<compile_context>
chip_gen: v6e
topology: v6e:2x2x1
jax: 0.10.0
libtpu: 0.0.40
codegen_flags: <defaults>
</compile_context>

<pallas_src>
import functools

import numpy as np
import jax
import jax.numpy as jnp
from jax import lax
from jax.experimental import pallas as pl
from jax.experimental.pallas import tpu as pltpu

# ConvTranspose2d hyper-params assumed for TransBlock (see TODO above).
STRIDE, KSIZE, PAD, OUT_PAD = 2, 5, 2, 1
BN_EPS = 1e-5

# Sub-pixel decomposition of ConvTranspose2d(k=5, s=2, p=2, op=1):
#   out[2t + parity] = sum_dy x[t + dy] * W[ky],  ky = _KMAP[parity][dy + 1]
# (independently along rows and columns; -1 = tap unused).
_KMAP = ((4, 2, 0), (-1, 3, 1))


# ----------------------------------------------------------------------------
# Pallas kernel: the whole decoder for one batch element
# ----------------------------------------------------------------------------
def _decoder_kernel(*refs, dims, out_dim, img_n):
    # refs = (x_ref, [wbd, scale, shift, pe, po] * n_layers, sel, bfin, o_ref)
    #   x_ref : (1, H0+2, (W0+2)*C0) zero-haloed, row-flattened NHWC input
    #   wbd   : (9*W*Cin, 2*Wout*Cout) block-diag sub-pixel conv weight
    #   scale/shift : (1, 2*Wout*Cout) fused bias+BN epilogue (0 on halo cols)
    #   pe/po : (2H(+2), H) 0/1 row-interleave (+ row halo) matrices
    #   sel   : (img_n*C_last, out_dim*img_n) final 1x1 conv as plane selectors
    #   bfin  : (1, out_dim*img_n) final conv bias
    #   o_ref : (1, out_dim, img_n, img_n) NCHW output
    x_ref = refs[0]
    sel_ref, bfin_ref, o_ref = refs[-3], refs[-2], refs[-1]

    x = x_ref[0]                                   # (H0+2, (W0+2)*C0) f32
    for li, (H, W, cin, cout) in enumerate(dims):
        base = 1 + 5 * li
        wbd = refs[base][...]
        scale = refs[base + 1][...]
        shift = refs[base + 2][...]
        pe = refs[base + 3][...]
        po = refs[base + 4][...]

        # 9 shifted views of the zero-haloed image -> one (H, 9*W*cin) slab;
        # the whole ConvTranspose layer is a single MXU matmul (K=1152).
        views = []
        for dy in (-1, 0, 1):
            for dx in (-1, 0, 1):
                views.append(x[1 + dy:1 + dy + H,
                               (1 + dx) * cin:(1 + dx) * cin + W * cin])
        xcat = jnp.concatenate(views, axis=1)

        y = jnp.dot(xcat, wbd, preferred_element_type=jnp.float32)
        y = jnp.maximum(y * scale + shift, 0.0)     # bias + BN + ReLU epilogue

        # Row interleave (pixel shuffle) + next layer's zero row halo, done as
        # two tiny 0/1 permutation matmuls (column interleave / column halo is
        # already folded into wbd's N ordering).
        half = y.shape[1] // 2                      # even / odd output rows
        x = (jnp.dot(pe, y[:, :half], preferred_element_type=jnp.float32) +
             jnp.dot(po, y[:, half:], preferred_element_type=jnp.float32))
        # x is now the next layer's zero-haloed padded image, or the bare
        # (2H, 2W*cout) image after the last TransBlock.

    # Final 1x1 Conv2d, emitted directly as NCHW channel planes.
    out_all = jnp.dot(x, sel_ref[...],
                      preferred_element_type=jnp.float32) + bfin_ref[...]
    for j in range(out_dim):
        o_ref[0, j, :, :] = out_all[:, j * img_n:(j + 1) * img_n]


def _zero2(b):
    return (0, 0)


def decoder_forward(h_nchw, layers, sel, bfin, *, dims, camera_num,
                    output_dim, image_size):
    """decoder.forward with the whole network fused into one pallas_call."""
    H0, W0, C0 = dims[0][0], dims[0][1], dims[0][2]
    B = h_nchw.shape[0]

    # NCHW -> zero-haloed, row-flattened NHWC input image (tiny, one time).
    x = jnp.transpose(h_nchw, (0, 2, 3, 1))
    x = jnp.pad(x, ((0, 0), (1, 1), (1, 1), (0, 0)))
    x0 = x.reshape(B, H0 + 2, (W0 + 2) * C0)

    in_specs = [pl.BlockSpec((1, H0 + 2, (W0 + 2) * C0), lambda b: (b, 0, 0))]
    args = [x0]
    for layer in layers:
        for a in layer:
            in_specs.append(pl.BlockSpec(a.shape, _zero2))
            args.append(a)
    for a in (sel, bfin):
        in_specs.append(pl.BlockSpec(a.shape, _zero2))
        args.append(a)

    kernel = functools.partial(_decoder_kernel, dims=dims,
                               out_dim=output_dim, img_n=image_size)
    out = pl.pallas_call(
        kernel,
        out_shape=jax.ShapeDtypeStruct(
            (B, output_dim, image_size, image_size), jnp.float32),
        grid=(B,),
        in_specs=in_specs,
        out_specs=pl.BlockSpec((1, output_dim, image_size, image_size),
                               lambda b: (b, 0, 0, 0)),
        compiler_params=pltpu.CompilerParams(
            dimension_semantics=("parallel",),
            vmem_limit_bytes=32 * 1024 * 1024),
    )(*args)
    return out.reshape(-1, camera_num, output_dim, image_size, image_size)


# ----------------------------------------------------------------------------
# One-time (outside jit) weight packing into the in-kernel matmul layout
# ----------------------------------------------------------------------------
def _pack_layer(wt, bt, gamma, beta, mean, var, H, W, pad_out):
    # wt: (Cin, Cout, 5, 5) PyTorch ConvTranspose2d layout.
    cin, cout = int(wt.shape[0]), int(wt.shape[1])
    wt = wt.astype(np.float32)

    # tap[dy+1, dx+1, py, px] = Wt[:, :, ky, kx] for the sub-pixel tap used by
    # output parity (py, px) and input shift (dy, dx); zeros when unused.
    tap = np.zeros((3, 3, 2, 2, cin, cout), np.float32)
    for py in range(2):
        for dyi in range(3):
            ky = _KMAP[py][dyi]
            if ky < 0:
                continue
            for px in range(2):
                for dxi in range(3):
                    kx = _KMAP[px][dxi]
                    if kx < 0:
                        continue
                    tap[dyi, dxi, py, px] = wt[:, :, ky, kx]

    off = 1 if pad_out else 0            # fold the next layer's column halo in
    wout = 2 * W + 2 * off               # output row width in pixels (+halo)
    colpos = np.zeros((W, 2, wout), np.float32)
    for n in range(W):
        for px in range(2):
            colpos[n, px, off + 2 * n + px] = 1.0

    # Block-diagonal weight: K = (shift d, input column n, ci),
    #                        N = (row parity py, output column Xp, co).
    wbd = np.einsum('yxpqio,nqX->yxnipXo', tap, colpos)
    wbd = np.ascontiguousarray(wbd).reshape(9 * W * cin, 2 * wout * cout)

    bn_scale = (gamma / np.sqrt(var + BN_EPS)).astype(np.float32)
    shift_c = (bt * bn_scale + beta - mean * bn_scale).astype(np.float32)
    used = colpos.sum(axis=(0, 1))                              # (wout,)
    scale_vec = np.broadcast_to(used[None, :, None] * bn_scale,
                                (2, wout, cout)).reshape(1, -1)
    shift_vec = np.broadcast_to(used[None, :, None] * shift_c,
                                (2, wout, cout)).reshape(1, -1)

    hout = 2 * H + 2 * off
    pe = np.zeros((hout, H), np.float32)
    po = np.zeros((hout, H), np.float32)
    r = np.arange(H)
    pe[off + 2 * r, r] = 1.0
    po[off + 2 * r + 1, r] = 1.0

    return tuple(jnp.asarray(np.ascontiguousarray(a))
                 for a in (wbd, scale_vec, shift_vec, pe, po))


def _pack_final(wf, bf, img_w, c_last):
    # wf: (out_dim, c_in, 1, 1) PyTorch Conv2d 1x1; image lanes are (X, c).
    wf2 = wf[:, :, 0, 0].astype(np.float32)
    out_dim = wf2.shape[0]
    eye = np.eye(img_w, dtype=np.float32)
    sel = np.einsum('jc,xy->xcjy', wf2, eye).reshape(img_w * c_last,
                                                     out_dim * img_w)
    bfin = np.repeat(bf.astype(np.float32), img_w).reshape(1, out_dim * img_w)
    return jnp.asarray(np.ascontiguousarray(sel)), jnp.asarray(bfin)


def prepare_decoder(params, H0, W0):
    """Pack PyTorch-layout params once, outside jit, into kernel constants."""
    layers, dims = [], []
    n = len(params["trans"])
    H, W = H0, W0
    for i, (wt, bt, gamma, beta, mean, var) in enumerate(params["trans"]):
        pad_out = i < n - 1
        layers.append(_pack_layer(np.asarray(wt), np.asarray(bt),
                                  np.asarray(gamma), np.asarray(beta),
                                  np.asarray(mean), np.asarray(var),
                                  H, W, pad_out))
        dims.append((H, W, int(wt.shape[0]), int(wt.shape[1])))
        H, W = 2 * H, 2 * W
    wf, bf = params["final"]
    c_last = int(params["trans"][-1][0].shape[1])
    sel, bfin = _pack_final(np.asarray(wf), np.asarray(bf), W, c_last)
    return {"layers": layers, "dims": tuple(dims), "sel": sel, "bfin": bfin}


# ----------------------------------------------------------------------------
# Parameters (deterministic, synthetic, PyTorch layouts)
# ----------------------------------------------------------------------------
def init_params(key, nfeature_image, output_dim):
    feats = [nfeature_image // (2 ** i) for i in range(6)]
    keys = jax.random.split(key, 32)
    ki = 0
    params = {"trans": [], "final": None}
    for i in range(5):
        cin, cout = feats[i], feats[i + 1]
        fan = cin * KSIZE * KSIZE
        wt = jax.random.normal(keys[ki], (cin, cout, KSIZE, KSIZE),
                               jnp.float32) / np.sqrt(fan); ki += 1
        bt = 0.01 * jax.random.normal(keys[ki], (cout,), jnp.float32); ki += 1
        gamma = 1.0 + 0.1 * jax.random.normal(keys[ki], (cout,), jnp.float32); ki += 1
        beta = 0.1 * jax.random.normal(keys[ki], (cout,), jnp.float32); ki += 1
        mean = 0.1 * jax.random.normal(keys[ki], (cout,), jnp.float32); ki += 1
        var = 1.0 + 0.1 * jax.random.uniform(keys[ki], (cout,), jnp.float32); ki += 1
        params["trans"].append((wt, bt, gamma, beta, mean, var))
    cin, cout = feats[5], output_dim
    wf = jax.random.normal(keys[ki], (cout, cin, 1, 1),
                           jnp.float32) / np.sqrt(cin); ki += 1
    bf = 0.01 * jax.random.normal(keys[ki], (cout,), jnp.float32); ki += 1
    params["final"] = (wf, bf)
    return params


# ----------------------------------------------------------------------------
# Pure-JAX reference
# ----------------------------------------------------------------------------
def _dilate_and_pad(x):
    B, H, W, C = x.shape
    Hd, Wd = (H - 1) * STRIDE + 1, (W - 1) * STRIDE + 1
    xd = jnp.zeros((B, Hd, Wd, C), x.dtype).at[:, ::STRIDE, ::STRIDE, :].set(x)
    lo = KSIZE - 1 - PAD
    hi = KSIZE - 1 - PAD + OUT_PAD
    return jnp.pad(xd, ((0, 0), (lo, hi), (lo, hi), (0, 0)))


def decoder_forward_ref(h_nchw, params, *, camera_num, output_dim, image_size):
    dn = ("NHWC", "HWIO", "NHWC")
    x = jnp.transpose(h_nchw, (0, 2, 3, 1))
    for (wt, b, gamma, beta, mean, var) in params["trans"]:
        w_hwio = jnp.transpose(wt, (2, 3, 0, 1))[::-1, ::-1]
        bn_scale = gamma / jnp.sqrt(var + BN_EPS)
        bn_shift = beta - mean * bn_scale
        xp = _dilate_and_pad(x)
        x = lax.conv_general_dilated(xp, w_hwio, (1, 1), "VALID",
                                     dimension_numbers=dn,
                                     precision=lax.Precision.HIGHEST)
        x = (x + b) * bn_scale + bn_shift
        x = jnp.maximum(x, 0.0)
    wf, bf = params["final"]
    wf_hwio = jnp.transpose(wf, (2, 3, 1, 0))
    x = lax.conv_general_dilated(x, wf_hwio, (1, 1), "VALID",
                                 dimension_numbers=dn,
                                 precision=lax.Precision.HIGHEST) + bf
    x_nchw = jnp.transpose(x, (0, 3, 1, 2))
    return x_nchw.reshape(-1, camera_num, output_dim, image_size, image_size)


if __name__ == "__main__":
    # opt: output_dim=3, camera_num=2, image_size=64, skip_level=False
    nfeature_image = 64
    output_dim = 3
    camera_num = 2
    H0 = W0 = 2
    image_size = H0 * (2 ** 5)   # five 2x-upsampling TransBlocks -> 64
    B = 2                        # must be a multiple of camera_num

    key = jax.random.PRNGKey(0)
    k_h, k_p = jax.random.split(key)
    h = jax.random.normal(k_h, (B, nfeature_image, H0, W0), jnp.float32)
    params = init_params(k_p, nfeature_image, output_dim)

    prep = prepare_decoder(params, H0, W0)       # one-time weight packing
    fwd = jax.jit(functools.partial(decoder_forward,
                                    dims=prep["dims"],
                                    camera_num=camera_num,
                                    output_dim=output_dim,
                                    image_size=image_size))
    out = jax.block_until_ready(
        fwd(h, prep["layers"], prep["sel"], prep["bfin"]))

    ref = jax.block_until_ready(
        decoder_forward_ref(h, params, camera_num=camera_num,
                            output_dim=output_dim, image_size=image_size))

    assert out.shape == (B // camera_num, camera_num, output_dim,
                         image_size, image_size), out.shape
    np.testing.assert_allclose(np.asarray(out), np.asarray(ref),
                               rtol=1e-2, atol=1e-2)
    print("KERNEL_OK")
</pallas_src>

<mosaic_0001>
module attributes {stable_mosaic.version = 11 : i64} {
  func.func @_decoder_kernel(%arg0: i32, %arg1: memref<1x4x256xf32, #tpu.memory_space<vmem>>, %arg2: memref<1152x384xf32, #tpu.memory_space<vmem>>, %arg3: memref<1x384xf32, #tpu.memory_space<vmem>>, %arg4: memref<1x384xf32, #tpu.memory_space<vmem>>, %arg5: memref<6x2xf32, #tpu.memory_space<vmem>>, %arg6: memref<6x2xf32, #tpu.memory_space<vmem>>, %arg7: memref<1152x320xf32, #tpu.memory_space<vmem>>, %arg8: memref<1x320xf32, #tpu.memory_space<vmem>>, %arg9: memref<1x320xf32, #tpu.memory_space<vmem>>, %arg10: memref<10x4xf32, #tpu.memory_space<vmem>>, %arg11: memref<10x4xf32, #tpu.memory_space<vmem>>, %arg12: memref<1152x288xf32, #tpu.memory_space<vmem>>, %arg13: memref<1x288xf32, #tpu.memory_space<vmem>>, %arg14: memref<1x288xf32, #tpu.memory_space<vmem>>, %arg15: memref<18x8xf32, #tpu.memory_space<vmem>>, %arg16: memref<18x8xf32, #tpu.memory_space<vmem>>, %arg17: memref<1152x272xf32, #tpu.memory_space<vmem>>, %arg18: memref<1x272xf32, #tpu.memory_space<vmem>>, %arg19: memref<1x272xf32, #tpu.memory_space<vmem>>, %arg20: memref<34x16xf32, #tpu.memory_space<vmem>>, %arg21: memref<34x16xf32, #tpu.memory_space<vmem>>, %arg22: memref<1152x256xf32, #tpu.memory_space<vmem>>, %arg23: memref<1x256xf32, #tpu.memory_space<vmem>>, %arg24: memref<1x256xf32, #tpu.memory_space<vmem>>, %arg25: memref<64x32xf32, #tpu.memory_space<vmem>>, %arg26: memref<64x32xf32, #tpu.memory_space<vmem>>, %arg27: memref<128x192xf32, #tpu.memory_space<vmem>>, %arg28: memref<1x192xf32, #tpu.memory_space<vmem>>, %arg29: memref<1x3x64x64xf32, #tpu.memory_space<vmem>>) attributes {dimension_semantics = [#tpu.dimension_semantics<parallel>], iteration_bounds = array<i64: 2>, scalar_prefetch = 0 : i64, scratch_operands = 0 : i64, tpu.core_type = #tpu.core_type<tc>, window_params = [{transform_indices = @transform_0, window_bounds = array<i64: 1, 4, 256>}, {pipeline_mode = #tpu.pipeline_mode<synchronous>, transform_indices = @transform_1, window_bounds = array<i64: 1152, 384>}, {pipeline_mode = #tpu.pipeline_mode<synchronous>, transform_indices = @transform_2, window_bounds = array<i64: 1, 384>}, {pipeline_mode = #tpu.pipeline_mode<synchronous>, transform_indices = @transform_3, window_bounds = array<i64: 1, 384>}, {pipeline_mode = #tpu.pipeline_mode<synchronous>, transform_indices = @transform_4, window_bounds = array<i64: 6, 2>}, {pipeline_mode = #tpu.pipeline_mode<synchronous>, transform_indices = @transform_5, window_bounds = array<i64: 6, 2>}, {pipeline_mode = #tpu.pipeline_mode<synchronous>, transform_indices = @transform_6, window_bounds = array<i64: 1152, 320>}, {pipeline_mode = #tpu.pipeline_mode<synchronous>, transform_indices = @transform_7, window_bounds = array<i64: 1, 320>}, {pipeline_mode = #tpu.pipeline_mode<synchronous>, transform_indices = @transform_8, window_bounds = array<i64: 1, 320>}, {pipeline_mode = #tpu.pipeline_mode<synchronous>, transform_indices = @transform_9, window_bounds = array<i64: 10, 4>}, {pipeline_mode = #tpu.pipeline_mode<synchronous>, transform_indices = @transform_10, window_bounds = array<i64: 10, 4>}, {pipeline_mode = #tpu.pipeline_mode<synchronous>, transform_indices = @transform_11, window_bounds = array<i64: 1152, 288>}, {pipeline_mode = #tpu.pipeline_mode<synchronous>, transform_indices = @transform_12, window_bounds = array<i64: 1, 288>}, {pipeline_mode = #tpu.pipeline_mode<synchronous>, transform_indices = @transform_13, window_bounds = array<i64: 1, 288>}, {pipeline_mode = #tpu.pipeline_mode<synchronous>, transform_indices = @transform_14, window_bounds = array<i64: 18, 8>}, {pipeline_mode = #tpu.pipeline_mode<synchronous>, transform_indices = @transform_15, window_bounds = array<i64: 18, 8>}, {pipeline_mode = #tpu.pipeline_mode<synchronous>, transform_indices = @transform_16, window_bounds = array<i64: 1152, 272>}, {pipeline_mode = #tpu.pipeline_mode<synchronous>, transform_indices = @transform_17, window_bounds = array<i64: 1, 272>}, {pipeline_mode = #tpu.pipeline_mode<synchronous>, transform_indices = @transform_18, window_bounds = array<i64: 1, 272>}, {pipeline_mode = #tpu.pipeline_mode<synchronous>, transform_indices = @transform_19, window_bounds = array<i64: 34, 16>}, {pipeline_mode = #tpu.pipeline_mode<synchronous>, transform_indices = @transform_20, window_bounds = array<i64: 34, 16>}, {pipeline_mode = #tpu.pipeline_mode<synchronous>, transform_indices = @transform_21, window_bounds = array<i64: 1152, 256>}, {pipeline_mode = #tpu.pipeline_mode<synchronous>, transform_indices = @transform_22, window_bounds = array<i64: 1, 256>}, {pipeline_mode = #tpu.pipeline_mode<synchronous>, transform_indices = @transform_23, window_bounds = array<i64: 1, 256>}, {pipeline_mode = #tpu.pipeline_mode<synchronous>, transform_indices = @transform_24, window_bounds = array<i64: 64, 32>}, {pipeline_mode = #tpu.pipeline_mode<synchronous>, transform_indices = @transform_25, window_bounds = array<i64: 64, 32>}, {pipeline_mode = #tpu.pipeline_mode<synchronous>, transform_indices = @transform_26, window_bounds = array<i64: 128, 192>}, {pipeline_mode = #tpu.pipeline_mode<synchronous>, transform_indices = @transform_27, window_bounds = array<i64: 1, 192>}, {transform_indices = @transform_28, window_bounds = array<i64: 1, 3, 64, 64>}]} {
    %c0 = arith.constant 0 : index
    %c0_0 = arith.constant 0 : index
    %c0_1 = arith.constant 0 : index
    %0 = vector.load %arg1[%c0, %c0_0, %c0_1] : memref<1x4x256xf32, #tpu.memory_space<vmem>>, vector<1x4x256xf32>
    %1 = vector.shape_cast %0 : vector<1x4x256xf32> to vector<4x256xf32>
    %c0_2 = arith.constant 0 : index
    %c0_3 = arith.constant 0 : index
    %2 = vector.load %arg2[%c0_2, %c0_3] : memref<1152x384xf32, #tpu.memory_space<vmem>>, vector<1152x384xf32>
    %c0_4 = arith.constant 0 : index
    %c0_5 = arith.constant 0 : index
    %3 = vector.load %arg3[%c0_4, %c0_5] : memref<1x384xf32, #tpu.memory_space<vmem>>, vector<1x384xf32>
    %c0_6 = arith.constant 0 : index
    %c0_7 = arith.constant 0 : index
    %4 = vector.load %arg4[%c0_6, %c0_7] : memref<1x384xf32, #tpu.memory_space<vmem>>, vector<1x384xf32>
    %c0_8 = arith.constant 0 : index
    %c0_9 = arith.constant 0 : index
    %5 = vector.load %arg5[%c0_8, %c0_9] : memref<6x2xf32, #tpu.memory_space<vmem>>, vector<6x2xf32>
    %c0_10 = arith.constant 0 : index
    %c0_11 = arith.constant 0 : index
    %6 = vector.load %arg6[%c0_10, %c0_11] : memref<6x2xf32, #tpu.memory_space<vmem>>, vector<6x2xf32>
    %7 = vector.extract_strided_slice %1 {offsets = [0, 0], sizes = [2, 128], strides = [1, 1]} : vector<4x256xf32> to vector<2x128xf32>
    %8 = vector.extract_strided_slice %1 {offsets = [0, 64], sizes = [2, 128], strides = [1, 1]} : vector<4x256xf32> to vector<2x128xf32>
    %9 = vector.extract_strided_slice %1 {offsets = [0, 128], sizes = [2, 128], strides = [1, 1]} : vector<4x256xf32> to vector<2x128xf32>
    %10 = vector.extract_strided_slice %1 {offsets = [1, 0], sizes = [2, 128], strides = [1, 1]} : vector<4x256xf32> to vector<2x128xf32>
    %11 = vector.extract_strided_slice %1 {offsets = [1, 64], sizes = [2, 128], strides = [1, 1]} : vector<4x256xf32> to vector<2x128xf32>
    %12 = vector.extract_strided_slice %1 {offsets = [1, 128], sizes = [2, 128], strides = [1, 1]} : vector<4x256xf32> to vector<2x128xf32>
    %13 = vector.extract_strided_slice %1 {offsets = [2, 0], sizes = [2, 128], strides = [1, 1]} : vector<4x256xf32> to vector<2x128xf32>
    %14 = vector.extract_strided_slice %1 {offsets = [2, 64], sizes = [2, 128], strides = [1, 1]} : vector<4x256xf32> to vector<2x128xf32>
    %15 = vector.extract_strided_slice %1 {offsets = [2, 128], sizes = [2, 128], strides = [1, 1]} : vector<4x256xf32> to vector<2x128xf32>
    %16 = tpu.concatenate %7, %8, %9, %10, %11, %12, %13, %14, %15 in 1 : vector<2x128xf32>, vector<2x128xf32>, vector<2x128xf32>, vector<2x128xf32>, vector<2x128xf32>, vector<2x128xf32>, vector<2x128xf32>, vector<2x128xf32>, vector<2x128xf32> -> vector<2x1152xf32>
    %cst = arith.constant dense<0.000000e+00> : vector<2x384xf32>
    %17 = tpu.matmul %16, %2, %cst {dimension_numbers = #tpu.dot_dimension_numbers<[1], [0], [0], [1], [0, 0, 1, 1], [], []>} : vector<2x1152xf32>, vector<1152x384xf32>, vector<2x384xf32> -> vector<2x384xf32>
    %18 = vector.broadcast %3 : vector<1x384xf32> to vector<2x384xf32>
    %19 = arith.mulf %17, %18 : vector<2x384xf32>
    %20 = vector.broadcast %4 : vector<1x384xf32> to vector<2x384xf32>
    %21 = arith.addf %19, %20 : vector<2x384xf32>
    %cst_12 = arith.constant 0.000000e+00 : f32
    %22 = vector.broadcast %cst_12 : f32 to vector<2x384xf32>
    %23 = arith.maximumf %21, %22 : vector<2x384xf32>
    %24 = vector.extract_strided_slice %23 {offsets = [0, 0], sizes = [2, 192], strides = [1, 1]} : vector<2x384xf32> to vector<2x192xf32>
    %cst_13 = arith.constant dense<0.000000e+00> : vector<6x192xf32>
    %25 = tpu.matmul %5, %24, %cst_13 {dimension_numbers = #tpu.dot_dimension_numbers<[1], [0], [0], [1], [0, 0, 1, 1], [], []>} : vector<6x2xf32>, vector<2x192xf32>, vector<6x192xf32> -> vector<6x192xf32>
    %26 = vector.extract_strided_slice %23 {offsets = [0, 192], sizes = [2, 192], strides = [1, 1]} : vector<2x384xf32> to vector<2x192xf32>
    %cst_14 = arith.constant dense<0.000000e+00> : vector<6x192xf32>
    %27 = tpu.matmul %6, %26, %cst_14 {dimension_numbers = #tpu.dot_dimension_numbers<[1], [0], [0], [1], [0, 0, 1, 1], [], []>} : vector<6x2xf32>, vector<2x192xf32>, vector<6x192xf32> -> vector<6x192xf32>
    %28 = arith.addf %25, %27 : vector<6x192xf32>
    %c0_15 = arith.constant 0 : index
    %c0_16 = arith.constant 0 : index
    %29 = vector.load %arg7[%c0_15, %c0_16] : memref<1152x320xf32, #tpu.memory_space<vmem>>, vector<1152x320xf32>
    %c0_17 = arith.constant 0 : index
    %c0_18 = arith.constant 0 : index
    %30 = vector.load %arg8[%c0_17, %c0_18] : memref<1x320xf32, #tpu.memory_space<vmem>>, vector<1x320xf32>
    %c0_19 = arith.constant 0 : index
    %c0_20 = arith.constant 0 : index
    %31 = vector.load %arg9[%c0_19, %c0_20] : memref<1x320xf32, #tpu.memory_space<vmem>>, vector<1x320xf32>
    %c0_21 = arith.constant 0 : index
    %c0_22 = arith.constant 0 : index
    %32 = vector.load %arg10[%c0_21, %c0_22] : memref<10x4xf32, #tpu.memory_space<vmem>>, vector<10x4xf32>
    %c0_23 = arith.constant 0 : index
    %c0_24 = arith.constant 0 : index
    %33 = vector.load %arg11[%c0_23, %c0_24] : memref<10x4xf32, #tpu.memory_space<vmem>>, vector<10x4xf32>
    %34 = vector.extract_strided_slice %28 {offsets = [0, 0], sizes = [4, 128], strides = [1, 1]} : vector<6x192xf32> to vector<4x128xf32>
    %35 = vector.extract_strided_slice %28 {offsets = [0, 32], sizes = [4, 128], strides = [1, 1]} : vector<6x192xf32> to vector<4x128xf32>
    %36 = vector.extract_strided_slice %28 {offsets = [0, 64], sizes = [4, 128], strides = [1, 1]} : vector<6x192xf32> to vector<4x128xf32>
    %37 = vector.extract_strided_slice %28 {offsets = [1, 0], sizes = [4, 128], strides = [1, 1]} : vector<6x192xf32> to vector<4x128xf32>
    %38 = vector.extract_strided_slice %28 {offsets = [1, 32], sizes = [4, 128], strides = [1, 1]} : vector<6x192xf32> to vector<4x128xf32>
    %39 = vector.extract_strided_slice %28 {offsets = [1, 64], sizes = [4, 128], strides = [1, 1]} : vector<6x192xf32> to vector<4x128xf32>
    %40 = vector.extract_strided_slice %28 {offsets = [2, 0], sizes = [4, 128], strides = [1, 1]} : vector<6x192xf32> to vector<4x128xf32>
    %41 = vector.extract_strided_slice %28 {offsets = [2, 32], sizes = [4, 128], strides = [1, 1]} : vector<6x192xf32> to vector<4x128xf32>
    %42 = vector.extract_strided_slice %28 {offsets = [2, 64], sizes = [4, 128], strides = [1, 1]} : vector<6x192xf32> to vector<4x128xf32>
    %43 = tpu.concatenate %34, %35, %36, %37, %38, %39, %40, %41, %42 in 1 : vector<4x128xf32>, vector<4x128xf32>, vector<4x128xf32>, vector<4x128xf32>, vector<4x128xf32>, vector<4x128xf32>, vector<4x128xf32>, vector<4x128xf32>, vector<4x128xf32> -> vector<4x1152xf32>
    %cst_25 = arith.constant dense<0.000000e+00> : vector<4x320xf32>
    %44 = tpu.matmul %43, %29, %cst_25 {dimension_numbers = #tpu.dot_dimension_numbers<[1], [0], [0], [1], [0, 0, 1, 1], [], []>} : vector<4x1152xf32>, vector<1152x320xf32>, vector<4x320xf32> -> vector<4x320xf32>
    %45 = vector.broadcast %30 : vector<1x320xf32> to vector<4x320xf32>
    %46 = arith.mulf %44, %45 : vector<4x320xf32>
    %47 = vector.broadcast %31 : vector<1x320xf32> to vector<4x320xf32>
    %48 = arith.addf %46, %47 : vector<4x320xf32>
    %cst_26 = arith.constant 0.000000e+00 : f32
    %49 = vector.broadcast %cst_26 : f32 to vector<4x320xf32>
    %50 = arith.maximumf %48, %49 : vector<4x320xf32>
    %51 = vector.extract_strided_slice %50 {offsets = [0, 0], sizes = [4, 160], strides = [1, 1]} : vector<4x320xf32> to vector<4x160xf32>
    %cst_27 = arith.constant dense<0.000000e+00> : vector<10x160xf32>
    %52 = tpu.matmul %32, %51, %cst_27 {dimension_numbers = #tpu.dot_dimension_numbers<[1], [0], [0], [1], [0, 0, 1, 1], [], []>} : vector<10x4xf32>, vector<4x160xf32>, vector<10x160xf32> -> vector<10x160xf32>
    %53 = vector.extract_strided_slice %50 {offsets = [0, 160], sizes = [4, 160], strides = [1, 1]} : vector<4x320xf32> to vector<4x160xf32>
    %cst_28 = arith.constant dense<0.000000e+00> : vector<10x160xf32>
    %54 = tpu.matmul %33, %53, %cst_28 {dimension_numbers = #tpu.dot_dimension_numbers<[1], [0], [0], [1], [0, 0, 1, 1], [], []>} : vector<10x4xf32>, vector<4x160xf32>, vector<10x160xf32> -> vector<10x160xf32>
    %55 = arith.addf %52, %54 : vector<10x160xf32>
    %c0_29 = arith.constant 0 : index
    %c0_30 = arith.constant 0 : index
    %56 = vector.load %arg12[%c0_29, %c0_30] : memref<1152x288xf32, #tpu.memory_space<vmem>>, vector<1152x288xf32>
    %c0_31 = arith.constant 0 : index
    %c0_32 = arith.constant 0 : index
    %57 = vector.load %arg13[%c0_31, %c0_32] : memref<1x288xf32, #tpu.memory_space<vmem>>, vector<1x288xf32>
    %c0_33 = arith.constant 0 : index
    %c0_34 = arith.constant 0 : index
    %58 = vector.load %arg14[%c0_33, %c0_34] : memref<1x288xf32, #tpu.memory_space<vmem>>, vector<1x288xf32>
    %c0_35 = arith.constant 0 : index
    %c0_36 = arith.constant 0 : index
    %59 = vector.load %arg15[%c0_35, %c0_36] : memref<18x8xf32, #tpu.memory_space<vmem>>, vector<18x8xf32>
    %c0_37 = arith.constant 0 : index
    %c0_38 = arith.constant 0 : index
    %60 = vector.load %arg16[%c0_37, %c0_38] : memref<18x8xf32, #tpu.memory_space<vmem>>, vector<18x8xf32>
    %61 = vector.extract_strided_slice %55 {offsets = [0, 0], sizes = [8, 128], strides = [1, 1]} : vector<10x160xf32> to vector<8x128xf32>
    %62 = vector.extract_strided_slice %55 {offsets = [0, 16], sizes = [8, 128], strides = [1, 1]} : vector<10x160xf32> to vector<8x128xf32>
    %63 = vector.extract_strided_slice %55 {offsets = [0, 32], sizes = [8, 128], strides = [1, 1]} : vector<10x160xf32> to vector<8x128xf32>
    %64 = vector.extract_strided_slice %55 {offsets = [1, 0], sizes = [8, 128], strides = [1, 1]} : vector<10x160xf32> to vector<8x128xf32>
    %65 = vector.extract_strided_slice %55 {offsets = [1, 16], sizes = [8, 128], strides = [1, 1]} : vector<10x160xf32> to vector<8x128xf32>
    %66 = vector.extract_strided_slice %55 {offsets = [1, 32], sizes = [8, 128], strides = [1, 1]} : vector<10x160xf32> to vector<8x128xf32>
    %67 = vector.extract_strided_slice %55 {offsets = [2, 0], sizes = [8, 128], strides = [1, 1]} : vector<10x160xf32> to vector<8x128xf32>
    %68 = vector.extract_strided_slice %55 {offsets = [2, 16], sizes = [8, 128], strides = [1, 1]} : vector<10x160xf32> to vector<8x128xf32>
    %69 = vector.extract_strided_slice %55 {offsets = [2, 32], sizes = [8, 128], strides = [1, 1]} : vector<10x160xf32> to vector<8x128xf32>
    %70 = tpu.concatenate %61, %62, %63, %64, %65, %66, %67, %68, %69 in 1 : vector<8x128xf32>, vector<8x128xf32>, vector<8x128xf32>, vector<8x128xf32>, vector<8x128xf32>, vector<8x128xf32>, vector<8x128xf32>, vector<8x128xf32>, vector<8x128xf32> -> vector<8x1152xf32>
    %cst_39 = arith.constant dense<0.000000e+00> : vector<8x288xf32>
    %71 = tpu.matmul %70, %56, %cst_39 {dimension_numbers = #tpu.dot_dimension_numbers<[1], [0], [0], [1], [0, 0, 1, 1], [], []>} : vector<8x1152xf32>, vector<1152x288xf32>, vector<8x288xf32> -> vector<8x288xf32>
    %72 = vector.broadcast %57 : vector<1x288xf32> to vector<8x288xf32>
    %73 = arith.mulf %71, %72 : vector<8x288xf32>
    %74 = vector.broadcast %58 : vector<1x288xf32> to vector<8x288xf32>
    %75 = arith.addf %73, %74 : vector<8x288xf32>
    %cst_40 = arith.constant 0.000000e+00 : f32
    %76 = vector.broadcast %cst_40 : f32 to vector<8x288xf32>
    %77 = arith.maximumf %75, %76 : vector<8x288xf32>
    %78 = vector.extract_strided_slice %77 {offsets = [0, 0], sizes = [8, 144], strides = [1, 1]} : vector<8x288xf32> to vector<8x144xf32>
    %cst_41 = arith.constant dense<0.000000e+00> : vector<18x144xf32>
    %79 = tpu.matmul %59, %78, %cst_41 {dimension_numbers = #tpu.dot_dimension_numbers<[1], [0], [0], [1], [0, 0, 1, 1], [], []>} : vector<18x8xf32>, vector<8x144xf32>, vector<18x144xf32> -> vector<18x144xf32>
    %80 = vector.extract_strided_slice %77 {offsets = [0, 144], sizes = [8, 144], strides = [1, 1]} : vector<8x288xf32> to vector<8x144xf32>
    %cst_42 = arith.constant dense<0.000000e+00> : vector<18x144xf32>
    %81 = tpu.matmul %60, %80, %cst_42 {dimension_numbers = #tpu.dot_dimension_numbers<[1], [0], [0], [1], [0, 0, 1, 1], [], []>} : vector<18x8xf32>, vector<8x144xf32>, vector<18x144xf32> -> vector<18x144xf32>
    %82 = arith.addf %79, %81 : vector<18x144xf32>
    %c0_43 = arith.constant 0 : index
    %c0_44 = arith.constant 0 : index
    %83 = vector.load %arg17[%c0_43, %c0_44] : memref<1152x272xf32, #tpu.memory_space<vmem>>, vector<1152x272xf32>
    %c0_45 = arith.constant 0 : index
    %c0_46 = arith.constant 0 : index
    %84 = vector.load %arg18[%c0_45, %c0_46] : memref<1x272xf32, #tpu.memory_space<vmem>>, vector<1x272xf32>
    %c0_47 = arith.constant 0 : index
    %c0_48 = arith.constant 0 : index
    %85 = vector.load %arg19[%c0_47, %c0_48] : memref<1x272xf32, #tpu.memory_space<vmem>>, vector<1x272xf32>
    %c0_49 = arith.constant 0 : index
    %c0_50 = arith.constant 0 : index
    %86 = vector.load %arg20[%c0_49, %c0_50] : memref<34x16xf32, #tpu.memory_space<vmem>>, vector<34x16xf32>
    %c0_51 = arith.constant 0 : index
    %c0_52 = arith.constant 0 : index
    %87 = vector.load %arg21[%c0_51, %c0_52] : memref<34x16xf32, #tpu.memory_space<vmem>>, vector<34x16xf32>
    %88 = vector.extract_strided_slice %82 {offsets = [0, 0], sizes = [16, 128], strides = [1, 1]} : vector<18x144xf32> to vector<16x128xf32>
    %89 = vector.extract_strided_slice %82 {offsets = [0, 8], sizes = [16, 128], strides = [1, 1]} : vector<18x144xf32> to vector<16x128xf32>
    %90 = vector.extract_strided_slice %82 {offsets = [0, 16], sizes = [16, 128], strides = [1, 1]} : vector<18x144xf32> to vector<16x128xf32>
    %91 = vector.extract_strided_slice %82 {offsets = [1, 0], sizes = [16, 128], strides = [1, 1]} : vector<18x144xf32> to vector<16x128xf32>
    %92 = vector.extract_strided_slice %82 {offsets = [1, 8], sizes = [16, 128], strides = [1, 1]} : vector<18x144xf32> to vector<16x128xf32>
    %93 = vector.extract_strided_slice %82 {offsets = [1, 16], sizes = [16, 128], strides = [1, 1]} : vector<18x144xf32> to vector<16x128xf32>
    %94 = vector.extract_strided_slice %82 {offsets = [2, 0], sizes = [16, 128], strides = [1, 1]} : vector<18x144xf32> to vector<16x128xf32>
    %95 = vector.extract_strided_slice %82 {offsets = [2, 8], sizes = [16, 128], strides = [1, 1]} : vector<18x144xf32> to vector<16x128xf32>
    %96 = vector.extract_strided_slice %82 {offsets = [2, 16], sizes = [16, 128], strides = [1, 1]} : vector<18x144xf32> to vector<16x128xf32>
    %97 = tpu.concatenate %88, %89, %90, %91, %92, %93, %94, %95, %96 in 1 : vector<16x128xf32>, vector<16x128xf32>, vector<16x128xf32>, vector<16x128xf32>, vector<16x128xf32>, vector<16x128xf32>, vector<16x128xf32>, vector<16x128xf32>, vector<16x128xf32> -> vector<16x1152xf32>
    %cst_53 = arith.constant dense<0.000000e+00> : vector<16x272xf32>
    %98 = tpu.matmul %97, %83, %cst_53 {dimension_numbers = #tpu.dot_dimension_numbers<[1], [0], [0], [1], [0, 0, 1, 1], [], []>} : vector<16x1152xf32>, vector<1152x272xf32>, vector<16x272xf32> -> vector<16x272xf32>
    %99 = vector.broadcast %84 : vector<1x272xf32> to vector<16x272xf32>
    %100 = arith.mulf %98, %99 : vector<16x272xf32>
    %101 = vector.broadcast %85 : vector<1x272xf32> to vector<16x272xf32>
    %102 = arith.addf %100, %101 : vector<16x272xf32>
    %cst_54 = arith.constant 0.000000e+00 : f32
    %103 = vector.broadcast %cst_54 : f32 to vector<16x272xf32>
    %104 = arith.maximumf %102, %103 : vector<16x272xf32>
    %105 = vector.extract_strided_slice %104 {offsets = [0, 0], sizes = [16, 136], strides = [1, 1]} : vector<16x272xf32> to vector<16x136xf32>
    %cst_55 = arith.constant dense<0.000000e+00> : vector<34x136xf32>
    %106 = tpu.matmul %86, %105, %cst_55 {dimension_numbers = #tpu.dot_dimension_numbers<[1], [0], [0], [1], [0, 0, 1, 1], [], []>} : vector<34x16xf32>, vector<16x136xf32>, vector<34x136xf32> -> vector<34x136xf32>
    %107 = vector.extract_strided_slice %104 {offsets = [0, 136], sizes = [16, 136], strides = [1, 1]} : vector<16x272xf32> to vector<16x136xf32>
    %cst_56 = arith.constant dense<0.000000e+00> : vector<34x136xf32>
    %108 = tpu.matmul %87, %107, %cst_56 {dimension_numbers = #tpu.dot_dimension_numbers<[1], [0], [0], [1], [0, 0, 1, 1], [], []>} : vector<34x16xf32>, vector<16x136xf32>, vector<34x136xf32> -> vector<34x136xf32>
    %109 = arith.addf %106, %108 : vector<34x136xf32>
    %c0_57 = arith.constant 0 : index
    %c0_58 = arith.constant 0 : index
    %110 = vector.load %arg22[%c0_57, %c0_58] : memref<1152x256xf32, #tpu.memory_space<vmem>>, vector<1152x256xf32>
    %c0_59 = arith.constant 0 : index
    %c0_60 = arith.constant 0 : index
    %111 = vector.load %arg23[%c0_59, %c0_60] : memref<1x256xf32, #tpu.memory_space<vmem>>, vector<1x256xf32>
    %c0_61 = arith.constant 0 : index
    %c0_62 = arith.constant 0 : index
    %112 = vector.load %arg24[%c0_61, %c0_62] : memref<1x256xf32, #tpu.memory_space<vmem>>, vector<1x256xf32>
    %c0_63 = arith.constant 0 : index
    %c0_64 = arith.constant 0 : index
    %113 = vector.load %arg25[%c0_63, %c0_64] : memref<64x32xf32, #tpu.memory_space<vmem>>, vector<64x32xf32>
    %c0_65 = arith.constant 0 : index
    %c0_66 = arith.constant 0 : index
    %114 = vector.load %arg26[%c0_65, %c0_66] : memref<64x32xf32, #tpu.memory_space<vmem>>, vector<64x32xf32>
    %115 = vector.extract_strided_slice %109 {offsets = [0, 0], sizes = [32, 128], strides = [1, 1]} : vector<34x136xf32> to vector<32x128xf32>
    %116 = vector.extract_strided_slice %109 {offsets = [0, 4], sizes = [32, 128], strides = [1, 1]} : vector<34x136xf32> to vector<32x128xf32>
    %117 = vector.extract_strided_slice %109 {offsets = [0, 8], sizes = [32, 128], strides = [1, 1]} : vector<34x136xf32> to vector<32x128xf32>
    %118 = vector.extract_strided_slice %109 {offsets = [1, 0], sizes = [32, 128], strides = [1, 1]} : vector<34x136xf32> to vector<32x128xf32>
    %119 = vector.extract_strided_slice %109 {offsets = [1, 4], sizes = [32, 128], strides = [1, 1]} : vector<34x136xf32> to vector<32x128xf32>
    %120 = vector.extract_strided_slice %109 {offsets = [1, 8], sizes = [32, 128], strides = [1, 1]} : vector<34x136xf32> to vector<32x128xf32>
    %121 = vector.extract_strided_slice %109 {offsets = [2, 0], sizes = [32, 128], strides = [1, 1]} : vector<34x136xf32> to vector<32x128xf32>
    %122 = vector.extract_strided_slice %109 {offsets = [2, 4], sizes = [32, 128], strides = [1, 1]} : vector<34x136xf32> to vector<32x128xf32>
    %123 = vector.extract_strided_slice %109 {offsets = [2, 8], sizes = [32, 128], strides = [1, 1]} : vector<34x136xf32> to vector<32x128xf32>
    %124 = tpu.concatenate %115, %116, %117, %118, %119, %120, %121, %122, %123 in 1 : vector<32x128xf32>, vector<32x128xf32>, vector<32x128xf32>, vector<32x128xf32>, vector<32x128xf32>, vector<32x128xf32>, vector<32x128xf32>, vector<32x128xf32>, vector<32x128xf32> -> vector<32x1152xf32>
    %cst_67 = arith.constant dense<0.000000e+00> : vector<32x256xf32>
    %125 = tpu.matmul %124, %110, %cst_67 {dimension_numbers = #tpu.dot_dimension_numbers<[1], [0], [0], [1], [0, 0, 1, 1], [], []>} : vector<32x1152xf32>, vector<1152x256xf32>, vector<32x256xf32> -> vector<32x256xf32>
    %126 = vector.broadcast %111 : vector<1x256xf32> to vector<32x256xf32>
    %127 = arith.mulf %125, %126 : vector<32x256xf32>
    %128 = vector.broadcast %112 : vector<1x256xf32> to vector<32x256xf32>
    %129 = arith.addf %127, %128 : vector<32x256xf32>
    %cst_68 = arith.constant 0.000000e+00 : f32
    %130 = vector.broadcast %cst_68 : f32 to vector<32x256xf32>
    %131 = arith.maximumf %129, %130 : vector<32x256xf32>
    %132 = vector.extract_strided_slice %131 {offsets = [0, 0], sizes = [32, 128], strides = [1, 1]} : vector<32x256xf32> to vector<32x128xf32>
    %cst_69 = arith.constant dense<0.000000e+00> : vector<64x128xf32>
    %133 = tpu.matmul %113, %132, %cst_69 {dimension_numbers = #tpu.dot_dimension_numbers<[1], [0], [0], [1], [0, 0, 1, 1], [], []>} : vector<64x32xf32>, vector<32x128xf32>, vector<64x128xf32> -> vector<64x128xf32>
    %134 = vector.extract_strided_slice %131 {offsets = [0, 128], sizes = [32, 128], strides = [1, 1]} : vector<32x256xf32> to vector<32x128xf32>
    %cst_70 = arith.constant dense<0.000000e+00> : vector<64x128xf32>
    %135 = tpu.matmul %114, %134, %cst_70 {dimension_numbers = #tpu.dot_dimension_numbers<[1], [0], [0], [1], [0, 0, 1, 1], [], []>} : vector<64x32xf32>, vector<32x128xf32>, vector<64x128xf32> -> vector<64x128xf32>
    %136 = arith.addf %133, %135 : vector<64x128xf32>
    %c0_71 = arith.constant 0 : index
    %c0_72 = arith.constant 0 : index
    %137 = vector.load %arg27[%c0_71, %c0_72] : memref<128x192xf32, #tpu.memory_space<vmem>>, vector<128x192xf32>
    %cst_73 = arith.constant dense<0.000000e+00> : vector<64x192xf32>
    %138 = tpu.matmul %136, %137, %cst_73 {dimension_numbers = #tpu.dot_dimension_numbers<[1], [0], [0], [1], [0, 0, 1, 1], [], []>} : vector<64x128xf32>, vector<128x192xf32>, vector<64x192xf32> -> vector<64x192xf32>
    %c0_74 = arith.constant 0 : index
    %c0_75 = arith.constant 0 : index
    %139 = vector.load %arg28[%c0_74, %c0_75] : memref<1x192xf32, #tpu.memory_space<vmem>>, vector<1x192xf32>
    %140 = vector.broadcast %139 : vector<1x192xf32> to vector<64x192xf32>
    %141 = arith.addf %138, %140 : vector<64x192xf32>
    %142 = vector.extract_strided_slice %141 {offsets = [0, 0], sizes = [64, 64], strides = [1, 1]} : vector<64x192xf32> to vector<64x64xf32>
    %c0_76 = arith.constant 0 : index
    %c0_77 = arith.constant 0 : index
    %c0_78 = arith.constant 0 : index
    %c0_79 = arith.constant 0 : index
    %143 = vector.load %arg29[%c0_76, %c0_77, %c0_78, %c0_79] : memref<1x3x64x64xf32, #tpu.memory_space<vmem>>, vector<1x1x64x64xf32>
    %144 = vector.shape_cast %143 : vector<1x1x64x64xf32> to vector<64x64xf32>
    %145 = vector.shape_cast %142 : vector<64x64xf32> to vector<1x1x64x64xf32>
    tpu.vector_store %arg29[%c0_76, %c0_77, %c0_78, %c0_79], %145 {strides = array<i32>} : memref<1x3x64x64xf32, #tpu.memory_space<vmem>>, vector<1x1x64x64xf32>,
    %146 = vector.extract_strided_slice %141 {offsets = [0, 64], sizes = [64, 64], strides = [1, 1]} : vector<64x192xf32> to vector<64x64xf32>
    %c0_80 = arith.constant 0 : index
    %c1 = arith.constant 1 : index
    %c0_81 = arith.constant 0 : index
    %c0_82 = arith.constant 0 : index
    %147 = vector.load %arg29[%c0_80, %c1, %c0_81, %c0_82] : memref<1x3x64x64xf32, #tpu.memory_space<vmem>>, vector<1x1x64x64xf32>
    %148 = vector.shape_cast %147 : vector<1x1x64x64xf32> to vector<64x64xf32>
    %149 = vector.shape_cast %146 : vector<64x64xf32> to vector<1x1x64x64xf32>
    tpu.vector_store %arg29[%c0_80, %c1, %c0_81, %c0_82], %149 {strides = array<i32>} : memref<1x3x64x64xf32, #tpu.memory_space<vmem>>, vector<1x1x64x64xf32>,
    %150 = vector.extract_strided_slice %141 {offsets = [0, 128], sizes = [64, 64], strides = [1, 1]} : vector<64x192xf32> to vector<64x64xf32>
    %c0_83 = arith.constant 0 : index
    %c2 = arith.constant 2 : index
    %c0_84 = arith.constant 0 : index
    %c0_85 = arith.constant 0 : index
    %151 = vector.load %arg29[%c0_83, %c2, %c0_84, %c0_85] : memref<1x3x64x64xf32, #tpu.memory_space<vmem>>, vector<1x1x64x64xf32>
    %152 = vector.shape_cast %151 : vector<1x1x64x64xf32> to vector<64x64xf32>
    %153 = vector.shape_cast %150 : vector<64x64xf32> to vector<1x1x64x64xf32>
    tpu.vector_store %arg29[%c0_83, %c2, %c0_84, %c0_85], %153 {strides = array<i32>} : memref<1x3x64x64xf32, #tpu.memory_space<vmem>>, vector<1x1x64x64xf32>,
    return
  }
  func.func @transform_0(%arg0: i32) -> (i32, i32, i32) {
    %c0_i32 = arith.constant 0 : i32
    %c0_i32_0 = arith.constant 0 : i32
    %c0_i32_1 = arith.constant 0 : i32
    return %arg0, %c0_i32, %c0_i32_0 : i32, i32, i32
  }
  func.func @transform_1(%arg0: i32) -> (i32, i32) {
    %c0_i32 = arith.constant 0 : i32
    %c0_i32_0 = arith.constant 0 : i32
    %c0_i32_1 = arith.constant 0 : i32
    return %c0_i32, %c0_i32_0 : i32, i32
  }
  func.func @transform_2(%arg0: i32) -> (i32, i32) {
    %c0_i32 = arith.constant 0 : i32
    %c0_i32_0 = arith.constant 0 : i32
    %c0_i32_1 = arith.constant 0 : i32
    return %c0_i32, %c0_i32_0 : i32, i32
  }
  func.func @transform_3(%arg0: i32) -> (i32, i32) {
    %c0_i32 = arith.constant 0 : i32
    %c0_i32_0 = arith.constant 0 : i32
    %c0_i32_1 = arith.constant 0 : i32
    return %c0_i32, %c0_i32_0 : i32, i32
  }
  func.func @transform_4(%arg0: i32) -> (i32, i32) {
    %c0_i32 = arith.constant 0 : i32
    %c0_i32_0 = arith.constant 0 : i32
    %c0_i32_1 = arith.constant 0 : i32
    return %c0_i32, %c0_i32_0 : i32, i32
  }
  func.func @transform_5(%arg0: i32) -> (i32, i32) {
    %c0_i32 = arith.constant 0 : i32
    %c0_i32_0 = arith.constant 0 : i32
    %c0_i32_1 = arith.constant 0 : i32
    return %c0_i32, %c0_i32_0 : i32, i32
  }
  func.func @transform_6(%arg0: i32) -> (i32, i32) {
    %c0_i32 = arith.constant 0 : i32
    %c0_i32_0 = arith.constant 0 : i32
    %c0_i32_1 = arith.constant 0 : i32
    return %c0_i32, %c0_i32_0 : i32, i32
  }
  func.func @transform_7(%arg0: i32) -> (i32, i32) {
    %c0_i32 = arith.constant 0 : i32
    %c0_i32_0 = arith.constant 0 : i32
    %c0_i32_1 = arith.constant 0 : i32
    return %c0_i32, %c0_i32_0 : i32, i32
  }
  func.func @transform_8(%arg0: i32) -> (i32, i32) {
    %c0_i32 = arith.constant 0 : i32
    %c0_i32_0 = arith.constant 0 : i32
    %c0_i32_1 = arith.constant 0 : i32
    return %c0_i32, %c0_i32_0 : i32, i32
  }
  func.func @transform_9(%arg0: i32) -> (i32, i32) {
    %c0_i32 = arith.constant 0 : i32
    %c0_i32_0 = arith.constant 0 : i32
    %c0_i32_1 = arith.constant 0 : i32
    return %c0_i32, %c0_i32_0 : i32, i32
  }
  func.func @transform_10(%arg0: i32) -> (i32, i32) {
    %c0_i32 = arith.constant 0 : i32
    %c0_i32_0 = arith.constant 0 : i32
    %c0_i32_1 = arith.constant 0 : i32
    return %c0_i32, %c0_i32_0 : i32, i32
  }
  func.func @transform_11(%arg0: i32) -> (i32, i32) {
    %c0_i32 = arith.constant 0 : i32
    %c0_i32_0 = arith.constant 0 : i32
    %c0_i32_1 = arith.constant 0 : i32
    return %c0_i32, %c0_i32_0 : i32, i32
  }
  func.func @transform_12(%arg0: i32) -> (i32, i32) {
    %c0_i32 = arith.constant 0 : i32
    %c0_i32_0 = arith.constant 0 : i32
    %c0_i32_1 = arith.constant 0 : i32
    return %c0_i32, %c0_i32_0 : i32, i32
  }
  func.func @transform_13(%arg0: i32) -> (i32, i32) {
    %c0_i32 = arith.constant 0 : i32
    %c0_i32_0 = arith.constant 0 : i32
    %c0_i32_1 = arith.constant 0 : i32
    return %c0_i32, %c0_i32_0 : i32, i32
  }
  func.func @transform_14(%arg0: i32) -> (i32, i32) {
    %c0_i32 = arith.constant 0 : i32
    %c0_i32_0 = arith.constant 0 : i32
    %c0_i32_1 = arith.constant 0 : i32
    return %c0_i32, %c0_i32_0 : i32, i32
  }
  func.func @transform_15(%arg0: i32) -> (i32, i32) {
    %c0_i32 = arith.constant 0 : i32
    %c0_i32_0 = arith.constant 0 : i32
    %c0_i32_1 = arith.constant 0 : i32
    return %c0_i32, %c0_i32_0 : i32, i32
  }
  func.func @transform_16(%arg0: i32) -> (i32, i32) {
    %c0_i32 = arith.constant 0 : i32
    %c0_i32_0 = arith.constant 0 : i32
    %c0_i32_1 = arith.constant 0 : i32
    return %c0_i32, %c0_i32_0 : i32, i32
  }
  func.func @transform_17(%arg0: i32) -> (i32, i32) {
    %c0_i32 = arith.constant 0 : i32
    %c0_i32_0 = arith.constant 0 : i32
    %c0_i32_1 = arith.constant 0 : i32
    return %c0_i32, %c0_i32_0 : i32, i32
  }
  func.func @transform_18(%arg0: i32) -> (i32, i32) {
    %c0_i32 = arith.constant 0 : i32
    %c0_i32_0 = arith.constant 0 : i32
    %c0_i32_1 = arith.constant 0 : i32
    return %c0_i32, %c0_i32_0 : i32, i32
  }
  func.func @transform_19(%arg0: i32) -> (i32, i32) {
    %c0_i32 = arith.constant 0 : i32
    %c0_i32_0 = arith.constant 0 : i32
    %c0_i32_1 = arith.constant 0 : i32
    return %c0_i32, %c0_i32_0 : i32, i32
  }
  func.func @transform_20(%arg0: i32) -> (i32, i32) {
    %c0_i32 = arith.constant 0 : i32
    %c0_i32_0 = arith.constant 0 : i32
    %c0_i32_1 = arith.constant 0 : i32
    return %c0_i32, %c0_i32_0 : i32, i32
  }
  func.func @transform_21(%arg0: i32) -> (i32, i32) {
    %c0_i32 = arith.constant 0 : i32
    %c0_i32_0 = arith.constant 0 : i32
    %c0_i32_1 = arith.constant 0 : i32
    return %c0_i32, %c0_i32_0 : i32, i32
  }
  func.func @transform_22(%arg0: i32) -> (i32, i32) {
    %c0_i32 = arith.constant 0 : i32
    %c0_i32_0 = arith.constant 0 : i32
    %c0_i32_1 = arith.constant 0 : i32
    return %c0_i32, %c0_i32_0 : i32, i32
  }
  func.func @transform_23(%arg0: i32) -> (i32, i32) {
    %c0_i32 = arith.constant 0 : i32
    %c0_i32_0 = arith.constant 0 : i32
    %c0_i32_1 = arith.constant 0 : i32
    return %c0_i32, %c0_i32_0 : i32, i32
  }
  func.func @transform_24(%arg0: i32) -> (i32, i32) {
    %c0_i32 = arith.constant 0 : i32
    %c0_i32_0 = arith.constant 0 : i32
    %c0_i32_1 = arith.constant 0 : i32
    return %c0_i32, %c0_i32_0 : i32, i32
  }
  func.func @transform_25(%arg0: i32) -> (i32, i32) {
    %c0_i32 = arith.constant 0 : i32
    %c0_i32_0 = arith.constant 0 : i32
    %c0_i32_1 = arith.constant 0 : i32
    return %c0_i32, %c0_i32_0 : i32, i32
  }
  func.func @transform_26(%arg0: i32) -> (i32, i32) {
    %c0_i32 = arith.constant 0 : i32
    %c0_i32_0 = arith.constant 0 : i32
    %c0_i32_1 = arith.constant 0 : i32
    return %c0_i32, %c0_i32_0 : i32, i32
  }
  func.func @transform_27(%arg0: i32) -> (i32, i32) {
    %c0_i32 = arith.constant 0 : i32
    %c0_i32_0 = arith.constant 0 : i32
    %c0_i32_1 = arith.constant 0 : i32
    return %c0_i32, %c0_i32_0 : i32, i32
  }
  func.func @transform_28(%arg0: i32) -> (i32, i32, i32, i32) {
    %c0_i32 = arith.constant 0 : i32
    %c0_i32_0 = arith.constant 0 : i32
    %c0_i32_1 = arith.constant 0 : i32
    %c0_i32_2 = arith.constant 0 : i32
    return %arg0, %c0_i32, %c0_i32_0, %c0_i32_1 : i32, i32, i32, i32
  }
}

</mosaic_0001>

<bundles_post_ra>
// kernel: decoder_forward.1
= control target key start
LH: loop header
LB: loop body
LE: loop exit
PB: predicated region body
PF: predicated region fallthrough
CT: control target
= control target key end

     0   :  { %s16753_s0 = inlined_call_operand.vmem [shape: f32[2,4,256], index: 0, kind: input, shape index: {}]   ;;  %s16754_s1 = inlined_call_operand.vmem [shape: f32[1152,384], index: 1, kind: input, shape index: {}]   ;;  %s16755_s2 = inlined_call_operand.vmem [shape: f32[1,384], index: 2, kind: input, shape index: {}]   ;;  %s16756_s3 = inlined_call_operand.vmem [shape: f32[1,384], index: 3, kind: input, shape index: {}]   ;;  %s16757_s4 = inlined_call_operand.vmem [shape: f32[6,2], index: 4, kind: input, shape index: {}]   ;;  %s16758_s5 = inlined_call_operand.vmem [shape: f32[6,2], index: 5, kind: input, shape index: {}]   ;;  %s16759_s6 = inlined_call_operand.vmem [shape: f32[1152,320], index: 6, kind: input, shape index: {}]   ;;  %s16760_s7 = inlined_call_operand.vmem [shape: f32[1,320], index: 7, kind: input, shape index: {}]   ;;  %s16761_s8 = inlined_call_operand.vmem [shape: f32[1,320], index: 8, kind: input, shape index: {}]   ;;  %s16762_s9 = inlined_call_operand.vmem [shape: f32[10,4], index: 9, kind: input, shape index: {}]   ;;  %s16763_s10 = inlined_call_operand.vmem [shape: f32[10,4], index: 10, kind: input, shape index: {}]   ;;  %s16764_s11 = inlined_call_operand.vmem [shape: f32[1152,288], index: 11, kind: input, shape index: {}]   ;;  %s16765_s12 = inlined_call_operand.vmem [shape: f32[1,288], index: 12, kind: input, shape index: {}]   ;;  %s16766_s13 = inlined_call_operand.vmem [shape: f32[1,288], index: 13, kind: input, shape index: {}]   ;;  %s16767_s14 = inlined_call_operand.vmem [shape: f32[18,8], index: 14, kind: input, shape index: {}]   ;;  %s16768_s15 = inlined_call_operand.vmem [shape: f32[18,8], index: 15, kind: input, shape index: {}]   ;;  %s16769_s16 = inlined_call_operand.vmem [shape: f32[1152,272], index: 16, kind: input, shape index: {}]   ;;  %s16770_s17 = inlined_call_operand.vmem [shape: f32[1,272], index: 17, kind: input, shape index: {}]   ;;  %s16771_s18 = inlined_call_operand.vmem [shape: f32[1,272], index: 18, kind: input, shape index: {}]   ;;  %s16772_s19 = inlined_call_operand.vmem [shape: f32[34,16], index: 19, kind: input, shape index: {}]   ;;  %s16773_s20 = inlined_call_operand.vmem [shape: f32[34,16], index: 20, kind: input, shape index: {}]   ;;  %s16774_s21 = inlined_call_operand.vmem [shape: f32[1152,256], index: 21, kind: input, shape index: {}]   ;;  %s16775_s22 = inlined_call_operand.vmem [shape: f32[1,256], index: 22, kind: input, shape index: {}]   ;;  %s16776_s23 = inlined_call_operand.vmem [shape: f32[1,256], index: 23, kind: input, shape index: {}]   ;;  %s16777_s24 = inlined_call_operand.vmem [shape: f32[64,32], index: 24, kind: input, shape index: {}]   ;;  %s16778_s25 = inlined_call_operand.vmem [shape: f32[64,32], index: 25, kind: input, shape index: {}]   ;;  %s16779_s26 = inlined_call_operand.vmem [shape: f32[128,192], index: 26, kind: input, shape index: {}]   ;;  %s16780_s27 = inlined_call_operand.vmem [shape: f32[1,192], index: 27, kind: input, shape index: {}]   ;;  %s16781_s28 = inlined_call_operand.hbm [shape: f32[2,3,64,64], index: 28, kind: output, shape index: {}]  }
   0x1   :  { %16805 = sst [smem:[#allocation12_spill]] %s16753_s0 }
   0x2   :  { %16806 = sst [smem:[#allocation13_spill]] %s16754_s1 }
   0x3   :  { %16807 = sst [smem:[#allocation14_spill]] %s16755_s2 }
   0x4   :  { %16808 = sst [smem:[#allocation15_spill]] %s16756_s3 }
   0x5   :  { %16809 = sst [smem:[#allocation16_spill]] %s16757_s4 }
   0x6   :  { %16810 = sst [smem:[#allocation17_spill]] %s16758_s5 }
   0x7   :  { %16811 = sst [smem:[#allocation18_spill]] %s16759_s6 }
   0x8   :  { %16812 = sst [smem:[#allocation19_spill]] %s16760_s7 }
   0x9   :  { %16813 = sst [smem:[#allocation20_spill]] %s16761_s8 }
   0xa   :  { %16814 = sst [smem:[#allocation21_spill]] %s16762_s9 }
   0xb   :  { %16815 = sst [smem:[#allocation22_spill]] %s16763_s10 }
   0xc   :  { %16816 = sst [smem:[#allocation23_spill]] %s16764_s11 }
   0xd   :  { %16817 = sst [smem:[#allocation24_spill]] %s16765_s12 }
   0xe   :  { %16818 = sst [smem:[#allocation25_spill]] %s16781_s28 }
   0xf   :  { %33 = vsyncpa [#allocation3], 0 }
  0x10   :  { %35 = vsyncpa [#allocation3 + $0x1], 0  ;;  %s9656_s8 = smov 0   ;;  %s9658_s5 = smov 0  }
  0x11   :  { %s9660_s9 = smov 0   ;;  %s9662_s30 = smov 0  }
  0x12 LB: > { %16819 = sst [smem:[#allocation5_spill]] %s9487_s8  ;;  %s9677_s3 = sadd.s32 4294967295, %s9499_s30   ;;  %s9499_s30 = sphi %s9662_s30, %s16848_s30   ;;  %s9495_s9 = sphi %s9660_s9, %s16850_s9   ;;  %s9491_s5 = sphi %s9658_s5, %s16852_s5   ;;  %s9487_s8 = sphi %s9656_s8, %s16851_s8  }
  0x13   : > { %16820 = sst [smem:[#allocation6_spill]] %s9495_s9  ;;  %s8215_s6 = sadd.s32 4294967294, %s9499_s30  }
  0x14   : > { %16821 = sst [smem:[#allocation7_spill]] %s9499_s30  ;;  %s9681_s10 = sadd.s32 1, %s9499_s30  }
  0x15   : > { %16822 = sst [smem:[#allocation8_spill]] %s9681_s10  ;;  %s641_s0 = sadd.s32 1, %s9495_s9 }
  0x16   : > { %s638_s11 = ssub.s32 %s9499_s30, %s9681_s10  ;;  %p651_p0 = scmp.ne.s32.totalorder %s9495_s9, %s9491_s5 }
  0x17   : > { %p639_p1 = scmp.eq.s32.totalorder %s638_s11, 0  ;;  %p652_p2 = scmp.eq.s32.totalorder %s9677_s3, 1 }
  0x18   : > { %p657_p3 = scmp.ne.s32.totalorder %s9491_s5, %s9487_s8  ;;  %p658_p4 = scmp.eq.s32.totalorder %s8215_s6, 1 }
  0x19   : > { %s9692_s29 = scalar_select %p639_p1, %s9495_s9, %s641_s0  }
  0x1a   : > { %p9694_p5 = por %p652_p2, %p651_p0  ;;  %p9698_p6 = por %p658_p4, %p657_p3 }
  0x1b   : > { %16823 = sst [smem:[#allocation9_spill]] %s9692_s29  ;;  %p8218_p7 = scmp.ge.s32.totalorder %s9499_s30, 1 }
  0x1c   : > { %s16824_s2 = scalar_select %p9694_p5, 1, 0 }
  0x1d   : > { %s16826_s7 = scalar_select %p9698_p6, 1, 0 }
  0x1e   : > { %16825 = sst [smem:[#allocation10_spill]] %s16824_s2  ;;  %p765_p8 = scmp.lt.s32.totalorder %s9499_s30, 3 }
  0x1f   : > { %16827 = sst [smem:[#allocation11_spill]] %s16826_s7 }
  0x20   : > { %p766_p9 = pnand %p8218_p7, %p765_p8 }
  0x21   : > { %s16828_s4 = sld [smem:[#allocation13_spill]] (!%p766_p9)  ;;  %p839_p10 = scmp.lt.s32.totalorder (!%p766_p9), %s9677_s3, 1 }
  0x22   : > { %769 = sbr.rel (%p766_p9) target bundleno = 4330 (0x10ea), region = 132  ;;  %s16829_s12 = sld [smem:[#allocation12_spill]] (!%p766_p9) }
  0x23   : > { %s16830_s8 = sld [smem:[#allocation14_spill]] (!%p766_p9) }
  0x24   : > { %s16831_s29 = sld [smem:[#allocation15_spill]] (!%p766_p9) }
  0x25   : > { %s16832_s0 = sld [smem:[#allocation17_spill]] (!%p766_p9) }
  0x26   : > { %s16833_s10 = sld [smem:[#allocation16_spill]] (!%p766_p9) }
  0x27   : > { %v987_v0 = vld [vmem:[%s16828_s4 + $0x470] sm:$0xff]  ;;  %v986_v1 = vld [vmem:[%s16828_s4 + $0x468] sm:$0xff]  ;;  %v984_v2 = vld [vmem:[%s16828_s4 + $0x458] sm:$0xff]  ;;  %s840_s1 = scalar_select %p839_p10, %s9677_s3, 1  ;;  %vm1287_vm0 = vcmask 523264   ;;  %vm9503_vm1 = vmmov 0  }
  0x28   : > { %1382 = vmatprep.subr.mxu1 %v987_v0  ;;  %v983_v3 = vld [vmem:[%s16828_s4 + $0x450] sm:$0xff]  ;;  %v981_v4 = vld [vmem:[%s16828_s4 + $0x440] sm:$0xff]  ;;  %v980_v5 = vld [vmem:[%s16828_s4 + $0x438] sm:$0xff]  ;;  %vm2068_vm2 = vcmask 1041408   ;;  %vm2064_vm3 = vcmask 15360   ;;  %s16834_s6 = sld [smem:[#allocation18_spill]] }
  0x29   : > { %1383 = vmatpush1.msra.mxu1 %v986_v1  ;;  %v978_v6 = vld [vmem:[%s16828_s4 + $0x428] sm:$0xff]  ;;  %s8286_s11 = sshll.u32 %s840_s1, 3  ;;  %v977_v7 = vld [vmem:[%s16828_s4 + $0x420] sm:$0xff]  ;;  %v975_v8 = vld [vmem:[%s16828_s4 + $0x410] sm:$0xff]  ;;  %vm2667_vm4 = vcmask 785408   ;;  %s16836_s30 = sld [smem:[#allocation19_spill]] }
  0x2a   : > { %1384 = vmatprep.subr.mxu1 %v984_v2  ;;  %s9733_s28 = scalar_lea.vmem %s16829_s12, %s8286_s11  ;;  %v974_v11 = vld [vmem:[%s16828_s4 + $0x408] sm:$0xff]  ;;  %v972_v14 = vld [vmem:[%s16828_s4 + $0x3f8] sm:$0xff]  ;;  %v971_v17 = vld [vmem:[%s16828_s4 + $0x3f0] sm:$0xff]  ;;  %s16794_s12 = smov 64   ;;  %vm3466_vm5 = vcmask 1043456   ;;  %vm3459_vm6 = vcmask 31744  }
  0x2b   : > { %1385 = vmatpush1.msra.mxu1 %v983_v3  ;;  %v9739_v9 = vld [vmem:[%s9733_s28] sm:$0xff]  ;;  %v968_v21 = vld [vmem:[%s16828_s4 + $0x3d8] sm:$0xff]  ;;  %v966_v23 = vld [vmem:[%s16828_s4 + $0x3c8] sm:$0xff]  ;;  %s16796_s11 = smov 96   ;;  %s16837_s7 = sld [smem:[#allocation20_spill]]  ;;  %vm4092_vm7 = vcmask 1046528  }
  0x2c   : > { %1386 = vmatprep.subr.mxu1 %v981_v4  ;;  %v9743_v10 = vcombine.high %v9739_v9, %v9739_v9  ;;  %v9749_v12 = vrot.slane %v9739_v9, 2  ;;  %v9752_v13 = vrot.slane %v9739_v9, 1  ;;  %v969_v19 = vld [vmem:[%s16828_s4 + $0x3e0] sm:$0xff]  ;;  %v963_v25 = vld [vmem:[%s16828_s4 + $0x3b0] sm:$0xff]  ;;  %v962_v26 = vld [vmem:[%s16828_s4 + $0x3a8] sm:$0xff]  ;;  %s9505_s1 = smov 112  }
  0x2d   : > { %1387 = vmatpush1.msra.mxu1 %v980_v5  ;;  %v965_v24 = vld [vmem:[%s16828_s4 + $0x3c0] sm:$0xff]  ;;  %v960_v27 = vld [vmem:[%s16828_s4 + $0x398] sm:$0xff]  ;;  %v959_v28 = vld [vmem:[%s16828_s4 + $0x390] sm:$0xff]  ;;  %vm4113_vm8 = vcmask 1045504   ;;  %vm4082_vm9 = vcmask 916480   ;;  %s16842_s2 = sld [smem:[#allocation24_spill]] }
  0x2e   : > { %1388 = vmatprep.subr.mxu1 %v978_v6  ;;  %v9182_v15 = vpack.i.bf16 %v9743_v10, %v9739_v9  ;;  %v9760_v16 = vrot.slane %v9743_v10, 2  ;;  %1446 = vmatprep.mubr.f32.mxu1 %v9752_v13  ;;  %v9767_v18 = vrot.slane %v9743_v10, 1  ;;  %v957_v29 = vld [vmem:[%s16828_s4 + $0x380] sm:$0xff]  ;;  %v956_v30 = vld [vmem:[%s16828_s4 + $0x378] sm:$0xff]  ;;  %v954_v31 = vld [vmem:[%s16828_s4 + $0x368] sm:$0xff]  ;;  %vm4888_vm10 = vcmask 64512  }
  0x2f   : > { %1389 = vmatpush1.msra.mxu1 %v977_v7  ;;  %v953_v32 = vld [vmem:[%s16828_s4 + $0x360] sm:$0xff]  ;;  %v891_v33 = vld [vmem:[%s16828_s4 + $0x170] sm:$0xff]  ;;  %v890_v34 = vld [vmem:[%s16828_s4 + $0x168] sm:$0xff]  ;;  %vm5529_vm11 = vcmask 982016   ;;  %vm6448_vm12 = vcmask 130048   ;;  %vm6999_vm13 = vcmask 1014784  }
  0x30   : > { %1390 = vmatprep.subr.mxu1 %v975_v8  ;;  %9183 = vrot.lane.b32.xlu0 %v9182_v15, %s16794_s12  ;;  %v9192_v20 = vpack.i.bf16 %v9760_v16, %v9749_v12  ;;  %v9187_v22 = vpack.i.bf16 %v9767_v18, %v9752_v13  ;;  %v951_v35 = vld [vmem:[%s16828_s4 + $0x350] sm:$0xff]  ;;  %v888_v36 = vld [vmem:[%s16828_s4 + $0x158] sm:$0xff]  ;;  %v950_v37 = vld [vmem:[%s16828_s4 + $0x348] sm:$0xff]  ;;  %vm7665_vm14 = vcmask 261120  }
  0x31   : > { %1391 = vmatpush1.msra.mxu1 %v974_v11  ;;  %1311 = vmatprep.subr.mxu0 %v891_v33  ;;  %v887_v38 = vld [vmem:[%s16828_s4 + $0x150] sm:$0xff]  ;;  %v885_v39 = vld [vmem:[%s16828_s4 + $0x140] sm:$0xff]  ;;  %v948_v40 = vld [vmem:[%s16828_s4 + $0x338] sm:$0xff] }
  0x32   : > { %1392 = vmatprep.subr.mxu1 %v972_v14  ;;  %9193 = vrot.lane.b32.xlu1 %v9192_v20, %s16794_s12  ;;  %v884_v41 = vld [vmem:[%s16828_s4 + $0x138] sm:$0xff]  ;;  %v947_v42 = vld [vmem:[%s16828_s4 + $0x330] sm:$0xff]  ;;  %v882_v43 = vld [vmem:[%s16828_s4 + $0x128] sm:$0xff] }
  0x33   : > { %1393 = vmatpush1.msra.mxu1 %v971_v17  ;;  %1312 = vmatpush1.msra.mxu0 %v890_v34  ;;  %v945_v44 = vld [vmem:[%s16828_s4 + $0x320] sm:$0xff]  ;;  %v944_v46 = vld [vmem:[%s16828_s4 + $0x318] sm:$0xff]  ;;  %v879_v47 = vld [vmem:[%s16828_s4 + $0x110] sm:$0xff] }
  0x34   : > { %1394 = vmatprep.subr.mxu1 %v969_v19  ;;  %9188 = vrot.lane.b32.xlu0 %v9187_v22, %s16794_s12  ;;  %v881_v45 = vld [vmem:[%s16828_s4 + $0x120] sm:$0xff]  ;;  %v942_v48 = vld [vmem:[%s16828_s4 + $0x308] sm:$0xff]  ;;  %v876_v51 = vld [vmem:[%s16828_s4 + $0xf8] sm:$0xff] }
  0x35   : > { %1395 = vmatpush1.msra.mxu1 %v968_v21  ;;  %1313 = vmatprep.subr.mxu0 %v888_v36  ;;  %v878_v49 = vld [vmem:[%s16828_s4 + $0x108] sm:$0xff]  ;;  %v941_v50 = vld [vmem:[%s16828_s4 + $0x300] sm:$0xff]  ;;  %v1035_v52 = vld [vmem:[%s16828_s4 + $0x5f0] sm:$0xff] }
  0x36   : > { %1396 = vmatprep.subr.mxu1 %v966_v23  ;;  %1314 = vmatpush1.msra.mxu0 %v887_v38  ;;  %v875_v53 = vld [vmem:[%s16828_s4 + $0xf0] sm:$0xff]  ;;  %v1034_v54 = vld [vmem:[%s16828_s4 + $0x5e8] sm:$0xff]  ;;  %v873_v55 = vld [vmem:[%s16828_s4 + $0xe0] sm:$0xff] }
  0x37   : > { %1397 = vmatpush1.msra.mxu1 %v965_v24  ;;  %1315 = vmatprep.subr.mxu0 %v885_v39  ;;  %v1032_v56 = vld [vmem:[%s16828_s4 + $0x5d8] sm:$0xff]  ;;  %v1031_v58 = vld [vmem:[%s16828_s4 + $0x5d0] sm:$0xff]  ;;  %v870_v59 = vld [vmem:[%s16828_s4 + $0xc8] sm:$0xff] }
  0x38   : > { %1398 = vmatprep.subr.mxu1 %v963_v25  ;;  %1316 = vmatpush1.msra.mxu0 %v884_v41  ;;  %v872_v57 = vld [vmem:[%s16828_s4 + $0xd8] sm:$0xff]  ;;  %v1029_v60 = vld [vmem:[%s16828_s4 + $0x5c0] sm:$0xff]  ;;  %v867_v63 = vld [vmem:[%s16828_s4 + $0xb0] sm:$0xff] }
  0x39   : > { %1399 = vmatpush1.msra.mxu1 %v962_v26  ;;  %1317 = vmatprep.subr.mxu0 %v882_v43  ;;  %v869_v61 = vld [vmem:[%s16828_s4 + $0xc0] sm:$0xff]  ;;  %v1028_v62 = vld [vmem:[%s16828_s4 + $0x5b8] sm:$0xff]  ;;  %v1026_v0 = vld [vmem:[%s16828_s4 + $0x5a8] sm:$0xff] }
  0x3a   : > { %1400 = vmatprep.subr.mxu1 %v960_v27  ;;  %1318 = vmatpush1.msra.mxu0 %v881_v45  ;;  %v866_v1 = vld [vmem:[%s16828_s4 + $0xa8] sm:$0xff]  ;;  %v1025_v2 = vld [vmem:[%s16828_s4 + $0x5a0] sm:$0xff]  ;;  %v864_v3 = vld [vmem:[%s16828_s4 + $0x98] sm:$0xff] }
  0x3b   : > { %1401 = vmatpush1.msra.mxu1 %v959_v28  ;;  %1319 = vmatprep.subr.mxu0 %v879_v47  ;;  %v1023_v4 = vld [vmem:[%s16828_s4 + $0x590] sm:$0xff]  ;;  %v1022_v6 = vld [vmem:[%s16828_s4 + $0x588] sm:$0xff]  ;;  %v861_v7 = vld [vmem:[%s16828_s4 + $0x80] sm:$0xff] }
  0x3c   : > { %1402 = vmatprep.subr.mxu1 %v957_v29  ;;  %1320 = vmatpush1.msra.mxu0 %v878_v49  ;;  %v863_v5 = vld [vmem:[%s16828_s4 + $0x90] sm:$0xff]  ;;  %v1020_v8 = vld [vmem:[%s16828_s4 + $0x578] sm:$0xff]  ;;  %v858_v15 = vld [vmem:[%s16828_s4 + $0x68] sm:$0xff] }
  0x3d   : > { %1403 = vmatpush1.msra.mxu1 %v956_v30  ;;  %1321 = vmatprep.subr.mxu0 %v876_v51  ;;  %v860_v11 = vld [vmem:[%s16828_s4 + $0x78] sm:$0xff]  ;;  %v1019_v14 = vld [vmem:[%s16828_s4 + $0x570] sm:$0xff]  ;;  %v1017_v17 = vld [vmem:[%s16828_s4 + $0x560] sm:$0xff] }
  0x3e   : > { %1404 = vmatprep.subr.mxu1 %v954_v31  ;;  %1322 = vmatpush1.msra.mxu0 %v875_v53  ;;  %v857_v19 = vld [vmem:[%s16828_s4 + $0x60] sm:$0xff]  ;;  %v1016_v20 = vld [vmem:[%s16828_s4 + $0x558] sm:$0xff]  ;;  %v855_v21 = vld [vmem:[%s16828_s4 + $0x50] sm:$0xff] }
  0x3f   : > { %1405 = vmatpush1.msra.mxu1 %v953_v32  ;;  %1323 = vmatprep.subr.mxu0 %v873_v55  ;;  %v1014_v22 = vld [vmem:[%s16828_s4 + $0x548] sm:$0xff]  ;;  %v1013_v24 = vld [vmem:[%s16828_s4 + $0x540] sm:$0xff]  ;;  %v852_v25 = vld [vmem:[%s16828_s4 + $0x38] sm:$0xff] }
  0x40   : > { %1406 = vmatprep.subr.mxu1 %v951_v35  ;;  %1324 = vmatpush1.msra.mxu0 %v872_v57  ;;  %v854_v23 = vld [vmem:[%s16828_s4 + $0x48] sm:$0xff]  ;;  %v1011_v26 = vld [vmem:[%s16828_s4 + $0x530] sm:$0xff]  ;;  %v849_v29 = vld [vmem:[%s16828_s4 + $0x20] sm:$0xff] }
  0x41   : > { %1407 = vmatpush1.msra.mxu1 %v950_v37  ;;  %1325 = vmatprep.subr.mxu0 %v870_v59  ;;  %v851_v27 = vld [vmem:[%s16828_s4 + $0x30] sm:$0xff]  ;;  %v1010_v28 = vld [vmem:[%s16828_s4 + $0x528] sm:$0xff]  ;;  %v1008_v30 = vld [vmem:[%s16828_s4 + $0x518] sm:$0xff] }
  0x42   : > { %1408 = vmatprep.subr.mxu1 %v948_v40  ;;  %1326 = vmatpush1.msra.mxu0 %v869_v61  ;;  %v848_v31 = vld [vmem:[%s16828_s4 + $0x18] sm:$0xff]  ;;  %v1007_v32 = vld [vmem:[%s16828_s4 + $0x510] sm:$0xff]  ;;  %v846_v33 = vld [vmem:[%s16828_s4 + $0x8] sm:$0xff] }
  0x43   : > { %1409 = vmatpush1.msra.mxu1 %v947_v42  ;;  %1327 = vmatprep.subr.mxu0 %v867_v63  ;;  %v1005_v34 = vld [vmem:[%s16828_s4 + $0x500] sm:$0xff]  ;;  %v1004_v36 = vld [vmem:[%s16828_s4 + $0x4f8] sm:$0xff]  ;;  %v939_v37 = vld [vmem:[%s16828_s4 + $0x2f0] sm:$0xff] }
  0x44   : > { %1410 = vmatprep.subr.mxu1 %v945_v44  ;;  %1328 = vmatpush1.msra.mxu0 %v866_v1  ;;  %v845_v35 = vld [vmem:[%s16828_s4] sm:$0xff]  ;;  %v1002_v38 = vld [vmem:[%s16828_s4 + $0x4e8] sm:$0xff]  ;;  %v936_v41 = vld [vmem:[%s16828_s4 + $0x2d8] sm:$0xff] }
  0x45   : > { %1411 = vmatpush1.msra.mxu1 %v944_v46  ;;  %1329 = vmatprep.subr.mxu0 %v864_v3  ;;  %v938_v39 = vld [vmem:[%s16828_s4 + $0x2e8] sm:$0xff]  ;;  %v1001_v40 = vld [vmem:[%s16828_s4 + $0x4e0] sm:$0xff]  ;;  %v999_v42 = vld [vmem:[%s16828_s4 + $0x4d0] sm:$0xff] }
  0x46   : > { %1412 = vmatprep.subr.mxu1 %v942_v48  ;;  %1330 = vmatpush1.msra.mxu0 %v863_v5  ;;  %v935_v43 = vld [vmem:[%s16828_s4 + $0x2d0] sm:$0xff]  ;;  %v998_v44 = vld [vmem:[%s16828_s4 + $0x4c8] sm:$0xff]  ;;  %v933_v45 = vld [vmem:[%s16828_s4 + $0x2c0] sm:$0xff] }
  0x47   : > { %1413 = vmatpush1.msra.mxu1 %v941_v50  ;;  %1331 = vmatprep.subr.mxu0 %v861_v7  ;;  %v996_v46 = vld [vmem:[%s16828_s4 + $0x4b8] sm:$0xff]  ;;  %v995_v48 = vld [vmem:[%s16828_s4 + $0x4b0] sm:$0xff]  ;;  %v930_v49 = vld [vmem:[%s16828_s4 + $0x2a8] sm:$0xff] }
  0x48   : > { %1414 = vmatprep.subr.mxu1 %v1035_v52  ;;  %1332 = vmatpush1.msra.mxu0 %v860_v11  ;;  %v932_v47 = vld [vmem:[%s16828_s4 + $0x2b8] sm:$0xff]  ;;  %v993_v50 = vld [vmem:[%s16828_s4 + $0x4a0] sm:$0xff]  ;;  %v927_v53 = vld [vmem:[%s16828_s4 + $0x290] sm:$0xff] }
  0x49   : > { %1415 = vmatpush2.msra.mxu1 %v1034_v54  ;;  %1333 = vmatprep.subr.mxu0 %v858_v15  ;;  %v929_v51 = vld [vmem:[%s16828_s4 + $0x2a0] sm:$0xff]  ;;  %v992_v52 = vld [vmem:[%s16828_s4 + $0x498] sm:$0xff]  ;;  %v990_v54 = vld [vmem:[%s16828_s4 + $0x488] sm:$0xff] }
  0x4a   : > { %1416 = vmatprep.subr.mxu1 %v1032_v56  ;;  %1334 = vmatpush1.msra.mxu0 %v857_v19  ;;  %v926_v55 = vld [vmem:[%s16828_s4 + $0x288] sm:$0xff]  ;;  %v989_v56 = vld [vmem:[%s16828_s4 + $0x480] sm:$0xff]  ;;  %v924_v57 = vld [vmem:[%s16828_s4 + $0x278] sm:$0xff] }
  0x4b   : > { %1417 = vmatpush2.msra.mxu1 %v1031_v58  ;;  %1335 = vmatprep.subr.mxu0 %v855_v21  ;;  %v1179_v58 = vld [vmem:[%s16828_s4 + $0xa70] sm:$0xff]  ;;  %v1178_v59 = vld [vmem:[%s16828_s4 + $0xa68] sm:$0xff]  ;;  %v1176_v61 = vld [vmem:[%s16828_s4 + $0xa58] sm:$0xff] }
  0x4c   : > { %1418 = vmatprep.subr.mxu1 %v1029_v60  ;;  %1336 = vmatpush1.msra.mxu0 %v854_v23  ;;  %v923_v60 = vld [vmem:[%s16828_s4 + $0x270] sm:$0xff]  ;;  %v1173_v1 = vld [vmem:[%s16828_s4 + $0xa40] sm:$0xff]  ;;  %v1172_v3 = vld [vmem:[%s16828_s4 + $0xa38] sm:$0xff] }
  0x4d   : > { %1419 = vmatpush2.msra.mxu1 %v1028_v62  ;;  %1337 = vmatprep.subr.mxu0 %v852_v25  ;;  %v921_v62 = vld [vmem:[%s16828_s4 + $0x260] sm:$0xff]  ;;  %v1175_v63 = vld [vmem:[%s16828_s4 + $0xa50] sm:$0xff]  ;;  %v1170_v5 = vld [vmem:[%s16828_s4 + $0xa28] sm:$0xff] }
  0x4e   : > { %1420 = vmatprep.subr.mxu1 %v1026_v0  ;;  %1338 = vmatpush1.msra.mxu0 %v851_v27  ;;  %v920_v0 = vld [vmem:[%s16828_s4 + $0x258] sm:$0xff]  ;;  %v1169_v7 = vld [vmem:[%s16828_s4 + $0xa20] sm:$0xff]  ;;  %v1167_v11 = vld [vmem:[%s16828_s4 + $0xa10] sm:$0xff] }
  0x4f   : > { %1421 = vmatpush2.msra.mxu1 %v1025_v2  ;;  %1339 = vmatprep.subr.mxu0 %v849_v29  ;;  %v918_v2 = vld [vmem:[%s16828_s4 + $0x248] sm:$0xff]  ;;  %v1164_v19 = vld [vmem:[%s16828_s4 + $0x9f8] sm:$0xff]  ;;  %v1163_v21 = vld [vmem:[%s16828_s4 + $0x9f0] sm:$0xff] }
  0x50   : > { %1422 = vmatprep.subr.mxu1 %v1023_v4  ;;  %1340 = vmatpush1.msra.mxu0 %v848_v31  ;;  %v917_v4 = vld [vmem:[%s16828_s4 + $0x240] sm:$0xff]  ;;  %v1166_v15 = vld [vmem:[%s16828_s4 + $0xa08] sm:$0xff]  ;;  %v1160_v25 = vld [vmem:[%s16828_s4 + $0x9d8] sm:$0xff] }
  0x51   : > { %1423 = vmatpush2.msra.mxu1 %v1022_v6  ;;  %1341 = vmatprep.subr.mxu0 %v846_v33  ;;  %v915_v6 = vld [vmem:[%s16828_s4 + $0x230] sm:$0xff]  ;;  %v1161_v23 = vld [vmem:[%s16828_s4 + $0x9e0] sm:$0xff]  ;;  %v1158_v27 = vld [vmem:[%s16828_s4 + $0x9c8] sm:$0xff] }
  0x52   : > { %1424 = vmatprep.subr.mxu1 %v1020_v8  ;;  %1342 = vmatpush1.msra.mxu0 %v845_v35  ;;  %v914_v8 = vld [vmem:[%s16828_s4 + $0x228] sm:$0xff]  ;;  %v1157_v29 = vld [vmem:[%s16828_s4 + $0x9c0] sm:$0xff]  ;;  %v1155_v31 = vld [vmem:[%s16828_s4 + $0x9b0] sm:$0xff] }
  0x53   : > { %1425 = vmatpush2.msra.mxu1 %v1019_v14  ;;  %1343 = vmatprep.subr.mxu0 %v939_v37  ;;  %v912_v14 = vld [vmem:[%s16828_s4 + $0x218] sm:$0xff]  ;;  %v1154_v33 = vld [vmem:[%s16828_s4 + $0x9a8] sm:$0xff]  ;;  %v1151_v37 = vld [vmem:[%s16828_s4 + $0x990] sm:$0xff] }
  0x54   : > { %1426 = vmatprep.subr.mxu1 %v1017_v17  ;;  %1344 = vmatpush2.msra.mxu0 %v938_v39  ;;  %v911_v17 = vld [vmem:[%s16828_s4 + $0x210] sm:$0xff]  ;;  %v1152_v35 = vld [vmem:[%s16828_s4 + $0x998] sm:$0xff]  ;;  %v1149_v39 = vld [vmem:[%s16828_s4 + $0x980] sm:$0xff] }
  0x55   : > { %1427 = vmatpush2.msra.mxu1 %v1016_v20  ;;  %1345 = vmatprep.subr.mxu0 %v936_v41  ;;  %v909_v20 = vld [vmem:[%s16828_s4 + $0x200] sm:$0xff]  ;;  %v1148_v41 = vld [vmem:[%s16828_s4 + $0x978] sm:$0xff] }
  0x56   : > { %1428 = vmatprep.subr.mxu1 %v1014_v22  ;;  %1346 = vmatpush2.msra.mxu0 %v935_v43  ;;  %v908_v22 = vld [vmem:[%s16828_s4 + $0x1f8] sm:$0xff]  ;;  %v1146_v43 = vld [vmem:[%s16828_s4 + $0x968] sm:$0xff] }
  0x57   : > { %1429 = vmatpush2.msra.mxu1 %v1013_v24  ;;  %1347 = vmatprep.subr.mxu0 %v933_v45  ;;  %v906_v24 = vld [vmem:[%s16828_s4 + $0x1e8] sm:$0xff]  ;;  %v1145_v45 = vld [vmem:[%s16828_s4 + $0x960] sm:$0xff] }
  0x58   : > { %1430 = vmatprep.subr.mxu1 %v1011_v26  ;;  %1348 = vmatpush2.msra.mxu0 %v932_v47  ;;  %v905_v26 = vld [vmem:[%s16828_s4 + $0x1e0] sm:$0xff]  ;;  %v1142_v47 = vld [vmem:[%s16828_s4 + $0x948] sm:$0xff] }
  0x59   : > { %1431 = vmatpush2.msra.mxu1 %v1010_v28  ;;  %1349 = vmatprep.subr.mxu0 %v930_v49  ;;  %v903_v28 = vld [vmem:[%s16828_s4 + $0x1d0] sm:$0xff] }
  0x5a   : > { %1432 = vmatprep.subr.mxu1 %v1008_v30  ;;  %1350 = vmatpush2.msra.mxu0 %v929_v51  ;;  %v902_v30 = vld [vmem:[%s16828_s4 + $0x1c8] sm:$0xff]  ;;  %v1139_v49 = vld [vmem:[%s16828_s4 + $0x930] sm:$0xff]  ;;  %v1136_v51 = vld [vmem:[%s16828_s4 + $0x918] sm:$0xff] }
  0x5b   : > { %1433 = vmatpush2.msra.mxu1 %v1007_v32  ;;  %1351 = vmatprep.subr.mxu0 %v927_v53  ;;  %v900_v32 = vld [vmem:[%s16828_s4 + $0x1b8] sm:$0xff]  ;;  %v1133_v53 = vld [vmem:[%s16828_s4 + $0x900] sm:$0xff] }
  0x5c   : > { %1434 = vmatprep.subr.mxu1 %v1005_v34  ;;  %1352 = vmatpush2.msra.mxu0 %v926_v55  ;;  %v899_v34 = vld [vmem:[%s16828_s4 + $0x1b0] sm:$0xff]  ;;  %v1226_v55 = vld [vmem:[%s16828_s4 + $0xbe8] sm:$0xff] }
  0x5d   : > { %1435 = vmatpush2.msra.mxu1 %v1004_v36  ;;  %1353 = vmatprep.subr.mxu0 %v924_v57  ;;  %v897_v36 = vld [vmem:[%s16828_s4 + $0x1a0] sm:$0xff]  ;;  %v1223_v57 = vld [vmem:[%s16828_s4 + $0xbd0] sm:$0xff] }
  0x5e   : > { %1436 = vmatprep.subr.mxu1 %v1002_v38  ;;  %1354 = vmatpush2.msra.mxu0 %v923_v60  ;;  %v896_v38 = vld [vmem:[%s16828_s4 + $0x198] sm:$0xff]  ;;  %v1218_v60 = vld [vmem:[%s16828_s4 + $0xba8] sm:$0xff] }
  0x5f   : > { %1437 = vmatpush2.msra.mxu1 %v1001_v40  ;;  %1355 = vmatprep.subr.mxu0 %v921_v62  ;;  %v894_v40 = vld [vmem:[%s16828_s4 + $0x188] sm:$0xff]  ;;  %v1215_v62 = vld [vmem:[%s16828_s4 + $0xb90] sm:$0xff] }
  0x60   : > { %1438 = vmatprep.subr.mxu1 %v999_v42  ;;  %1356 = vmatpush2.msra.mxu0 %v920_v0  ;;  %v893_v42 = vld [vmem:[%s16828_s4 + $0x180] sm:$0xff]  ;;  %v1212_v0 = vld [vmem:[%s16828_s4 + $0xb78] sm:$0xff] }
  0x61   : > { %1439 = vmatpush2.msra.mxu1 %v998_v44  ;;  %1357 = vmatprep.subr.mxu0 %v918_v2  ;;  %v1083_v44 = vld [vmem:[%s16828_s4 + $0x770] sm:$0xff]  ;;  %v1209_v2 = vld [vmem:[%s16828_s4 + $0xb60] sm:$0xff] }
  0x62   : > { %1440 = vmatprep.subr.mxu1 %v996_v46  ;;  %1358 = vmatpush2.msra.mxu0 %v917_v4  ;;  %v1143_v46 = vld [vmem:[%s16828_s4 + $0x950] sm:$0xff]  ;;  %v1206_v4 = vld [vmem:[%s16828_s4 + $0xb48] sm:$0xff] }
  0x63   : > { %1441 = vmatpush2.msra.mxu1 %v995_v48  ;;  %1359 = vmatprep.subr.mxu0 %v915_v6  ;;  %v1140_v48 = vld [vmem:[%s16828_s4 + $0x938] sm:$0xff]  ;;  %v1203_v6 = vld [vmem:[%s16828_s4 + $0xb30] sm:$0xff] }
  0x64   : > { %1442 = vmatprep.subr.mxu1 %v993_v50  ;;  %1360 = vmatpush2.msra.mxu0 %v914_v8  ;;  %v1137_v50 = vld [vmem:[%s16828_s4 + $0x920] sm:$0xff]  ;;  %v1200_v8 = vld [vmem:[%s16828_s4 + $0xb18] sm:$0xff] }
  0x65   : > { %1443 = vmatpush2.msra.mxu1 %v992_v52  ;;  %1361 = vmatprep.subr.mxu0 %v912_v14  ;;  %v1134_v52 = vld [vmem:[%s16828_s4 + $0x908] sm:$0xff]  ;;  %v1197_v14 = vld [vmem:[%s16828_s4 + $0xb00] sm:$0xff] }
  0x66   : > { %1444 = vmatprep.subr.mxu1 %v990_v54  ;;  %1362 = vmatpush2.msra.mxu0 %v911_v17  ;;  %v1227_v54 = vld [vmem:[%s16828_s4 + $0xbf0] sm:$0xff]  ;;  %v1194_v17 = vld [vmem:[%s16828_s4 + $0xae8] sm:$0xff] }
  0x67   : > { %1445 = vmatpush2.msra.mxu1 %v989_v56  ;;  %1363 = vmatprep.subr.mxu0 %v909_v20  ;;  %v1224_v56 = vld [vmem:[%s16828_s4 + $0xbd8] sm:$0xff]  ;;  %v1191_v20 = vld [vmem:[%s16828_s4 + $0xad0] sm:$0xff] }
  0x68   : > { %1524 = vmatprep.subr.mxu1 %v1179_v58  ;;  %1447 = vmatmul.mubr.f32.vlgmr.msra.gmra.mxu1 %v9743_v10  ;;  %v1221_v58 = vld [vmem:[%s16828_s4 + $0xbc0] sm:$0xff] }
  0x69   : > { %1525 = vmatpush1.msra.mxu1 %v1178_v59  ;;  %1364 = vmatpush2.msra.mxu0 %v908_v22  ;;  %v1220_v59 = vld [vmem:[%s16828_s4 + $0xbb8] sm:$0xff] }
  0x6a   : > { %1526 = vmatprep.subr.mxu1 %v1176_v61  ;;  %1365 = vmatprep.subr.mxu0 %v906_v24  ;;  %v1217_v61 = vld [vmem:[%s16828_s4 + $0xba0] sm:$0xff]  ;;  %v1188_v22 = vld [vmem:[%s16828_s4 + $0xab8] sm:$0xff] }
  0x6b   : > { %1527 = vmatpush1.msra.mxu1 %v1175_v63  ;;  %1366 = vmatpush2.msra.mxu0 %v905_v26  ;;  %v1214_v63 = vld [vmem:[%s16828_s4 + $0xb88] sm:$0xff]  ;;  %v1185_v24 = vld [vmem:[%s16828_s4 + $0xaa0] sm:$0xff] }
  0x6c   : > { %1528 = vmatprep.subr.mxu1 %v1173_v1  ;;  %1367 = vmatprep.subr.mxu0 %v903_v28  ;;  %v1211_v1 = vld [vmem:[%s16828_s4 + $0xb70] sm:$0xff]  ;;  %v1182_v26 = vld [vmem:[%s16828_s4 + $0xa88] sm:$0xff]  ;;  %v1181_v28 = vld [vmem:[%s16828_s4 + $0xa80] sm:$0xff] }
  0x6d   : > { %1529 = vmatpush1.msra.mxu1 %v1172_v3  ;;  %1368 = vmatpush2.msra.mxu0 %v902_v30  ;;  %v1208_v3 = vld [vmem:[%s16828_s4 + $0xb58] sm:$0xff] }
  0x6e   : > { %1530 = vmatprep.subr.mxu1 %v1170_v5  ;;  %1369 = vmatprep.subr.mxu0 %v900_v32  ;;  %v1205_v5 = vld [vmem:[%s16828_s4 + $0xb40] sm:$0xff] }
  0x6f   : > { %1531 = vmatpush1.msra.mxu1 %v1169_v7  ;;  %1370 = vmatpush2.msra.mxu0 %v899_v34  ;;  %v1202_v7 = vld [vmem:[%s16828_s4 + $0xb28] sm:$0xff] }
  0x70   : > { %1532 = vmatprep.subr.mxu1 %v1167_v11  ;;  %1371 = vmatprep.subr.mxu0 %v897_v36  ;;  %v1199_v11 = vld [vmem:[%s16828_s4 + $0xb10] sm:$0xff]  ;;  %v1082_v36 = vld [vmem:[%s16828_s4 + $0x768] sm:$0xff] }
  0x71   : > { %1533 = vmatpush1.msra.mxu1 %v1166_v15  ;;  %1372 = vmatpush2.msra.mxu0 %v896_v38  ;;  %v1196_v15 = vld [vmem:[%s16828_s4 + $0xaf8] sm:$0xff] }
  0x72   : > { %1534 = vmatprep.subr.mxu1 %v1164_v19  ;;  %1373 = vmatprep.subr.mxu0 %v894_v40  ;;  %v1193_v19 = vld [vmem:[%s16828_s4 + $0xae0] sm:$0xff]  ;;  %v892_v40 = vld [vmem:[%s16828_s4 + $0x178] sm:$0xff] }
  0x73   : > { %1535 = vmatpush1.msra.mxu1 %v1163_v21  ;;  %1374 = vmatpush2.msra.mxu0 %v893_v42  ;;  %v1190_v21 = vld [vmem:[%s16828_s4 + $0xac8] sm:$0xff]  ;;  %v1076_v42 = vld [vmem:[%s16828_s4 + $0x738] sm:$0xff] }
  0x74   : > { %1536 = vmatprep.subr.mxu1 %v1161_v23  ;;  %1453 = vmatprep.subr.mxu0 %v1083_v44  ;;  %v1187_v23 = vld [vmem:[%s16828_s4 + $0xab0] sm:$0xff]  ;;  %v1074_v44 = vld [vmem:[%s16828_s4 + $0x728] sm:$0xff] }
  0x75   : > { %1537 = vmatpush1.msra.mxu1 %v1160_v25  ;;  %v1184_v25 = vld [vmem:[%s16828_s4 + $0xa98] sm:$0xff] }
  0x76   : > { %1538 = vmatprep.subr.mxu1 %v1158_v27 }
  0x77   : > { %1539 = vmatpush1.msra.mxu1 %v1157_v29 }
  0x78   : > { %1540 = vmatprep.subr.mxu1 %v1155_v31  ;;  %v940_v31 = vld [vmem:[%s16828_s4 + $0x2f8] sm:$0xff] }
  0x79   : > { %1541 = vmatpush1.msra.mxu1 %v1154_v33 }
  0x7a   : > { %1542 = vmatprep.subr.mxu1 %v1152_v35 }
  0x7b   : > { %1543 = vmatpush1.msra.mxu1 %v1151_v37  ;;  %v1080_v37 = vld [vmem:[%s16828_s4 + $0x758] sm:$0xff] }
  0x7c   : > { %1544 = vmatprep.subr.mxu1 %v1149_v39  ;;  %v1079_v39 = vld [vmem:[%s16828_s4 + $0x750] sm:$0xff] }
  0x7d   : > { %1545 = vmatpush1.msra.mxu1 %v1148_v41  ;;  %v1077_v41 = vld [vmem:[%s16828_s4 + $0x740] sm:$0xff] }
  0x7e   : > { %1546 = vmatprep.subr.mxu1 %v1146_v43  ;;  %v889_v43 = vld [vmem:[%s16828_s4 + $0x160] sm:$0xff] }
  0x7f   : > { %1547 = vmatpush1.msra.mxu1 %v1145_v45  ;;  %v934_v45 = vld [vmem:[%s16828_s4 + $0x2c8] sm:$0xff] }
  0x80   : > { %1548 = vmatprep.subr.mxu1 %v1143_v46  ;;  %v1073_v46 = vld [vmem:[%s16828_s4 + $0x720] sm:$0xff] }
  0x81   : > { %1549 = vmatpush1.msra.mxu1 %v1142_v47  ;;  %v886_v47 = vld [vmem:[%s16828_s4 + $0x148] sm:$0xff] }
  0x82   : > { %1550 = vmatprep.subr.mxu1 %v1140_v48  ;;  %v1071_v48 = vld [vmem:[%s16828_s4 + $0x710] sm:$0xff] }
  0x83   : > { %1551 = vmatpush1.msra.mxu1 %v1139_v49  ;;  %v931_v49 = vld [vmem:[%s16828_s4 + $0x2b0] sm:$0xff] }
  0x84   : > { %1552 = vmatprep.subr.mxu1 %v1137_v50  ;;  %v1070_v50 = vld [vmem:[%s16828_s4 + $0x708] sm:$0xff] }
  0x85   : > { %1553 = vmatpush1.msra.mxu1 %v1136_v51  ;;  %v883_v51 = vld [vmem:[%s16828_s4 + $0x130] sm:$0xff] }
  0x86   : > { %1554 = vmatprep.subr.mxu1 %v1134_v52  ;;  %v1068_v52 = vld [vmem:[%s16828_s4 + $0x6f8] sm:$0xff] }
  0x87   : > { %1555 = vmatpush1.msra.mxu1 %v1133_v53  ;;  %v928_v53 = vld [vmem:[%s16828_s4 + $0x298] sm:$0xff] }
  0x88   : > { %1556 = vmatprep.subr.mxu1 %v1227_v54  ;;  %v1067_v54 = vld [vmem:[%s16828_s4 + $0x6f0] sm:$0xff] }
  0x89   : > { %1557 = vmatpush2.msra.mxu1 %v1226_v55  ;;  %v880_v55 = vld [vmem:[%s16828_s4 + $0x118] sm:$0xff] }
  0x8a   : > { %1558 = vmatprep.subr.mxu1 %v1224_v56  ;;  %v1065_v56 = vld [vmem:[%s16828_s4 + $0x6e0] sm:$0xff] }
  0x8b   : > { %1559 = vmatpush2.msra.mxu1 %v1223_v57  ;;  %v925_v57 = vld [vmem:[%s16828_s4 + $0x280] sm:$0xff] }
  0x8c   : > { %1560 = vmatprep.subr.mxu1 %v1221_v58  ;;  %v1064_v58 = vld [vmem:[%s16828_s4 + $0x6d8] sm:$0xff] }
  0x8d   : > { %1561 = vmatpush2.msra.mxu1 %v1220_v59  ;;  %v877_v59 = vld [vmem:[%s16828_s4 + $0x100] sm:$0xff] }
  0x8e   : > { %1562 = vmatprep.subr.mxu1 %v1218_v60  ;;  %v1062_v60 = vld [vmem:[%s16828_s4 + $0x6c8] sm:$0xff] }
  0x8f   : > { %1563 = vmatpush2.msra.mxu1 %v1217_v61  ;;  %v922_v61 = vld [vmem:[%s16828_s4 + $0x268] sm:$0xff] }
  0x90   : > { %1564 = vmatprep.subr.mxu1 %v1215_v62  ;;  %v1061_v62 = vld [vmem:[%s16828_s4 + $0x6c0] sm:$0xff] }
  0x91   : > { %1565 = vmatpush2.msra.mxu1 %v1214_v63  ;;  %v874_v63 = vld [vmem:[%s16828_s4 + $0xe8] sm:$0xff] }
  0x92   : > { %1566 = vmatprep.subr.mxu1 %v1212_v0  ;;  %v1059_v0 = vld [vmem:[%s16828_s4 + $0x6b0] sm:$0xff] }
  0x93   : > { %1567 = vmatpush2.msra.mxu1 %v1211_v1  ;;  %v919_v1 = vld [vmem:[%s16828_s4 + $0x250] sm:$0xff] }
  0x94   : > { %1568 = vmatprep.subr.mxu1 %v1209_v2  ;;  %v1058_v2 = vld [vmem:[%s16828_s4 + $0x6a8] sm:$0xff] }
  0x95   : > { %1569 = vmatpush2.msra.mxu1 %v1208_v3  ;;  %v871_v3 = vld [vmem:[%s16828_s4 + $0xd0] sm:$0xff] }
  0x96   : > { %1570 = vmatprep.subr.mxu1 %v1206_v4  ;;  %v1056_v4 = vld [vmem:[%s16828_s4 + $0x698] sm:$0xff] }
  0x97   : > { %1571 = vmatpush2.msra.mxu1 %v1205_v5  ;;  %v916_v5 = vld [vmem:[%s16828_s4 + $0x238] sm:$0xff] }
  0x98   : > { %1572 = vmatprep.subr.mxu1 %v1203_v6  ;;  %v1055_v6 = vld [vmem:[%s16828_s4 + $0x690] sm:$0xff] }
  0x99   : > { %1573 = vmatpush2.msra.mxu1 %v1202_v7  ;;  %v868_v7 = vld [vmem:[%s16828_s4 + $0xb8] sm:$0xff] }
  0x9a   : > { %1574 = vmatprep.subr.mxu1 %v1200_v8  ;;  %v1053_v8 = vld [vmem:[%s16828_s4 + $0x680] sm:$0xff] }
  0x9b   : > { %1575 = vmatpush2.msra.mxu1 %v1199_v11  ;;  %v913_v11 = vld [vmem:[%s16828_s4 + $0x220] sm:$0xff] }
  0x9c   : > { %1576 = vmatprep.subr.mxu1 %v1197_v14  ;;  %v1052_v14 = vld [vmem:[%s16828_s4 + $0x678] sm:$0xff] }
  0x9d   : > { %1577 = vmatpush2.msra.mxu1 %v1196_v15  ;;  %v865_v15 = vld [vmem:[%s16828_s4 + $0xa0] sm:$0xff] }
  0x9e   : > { %1578 = vmatprep.subr.mxu1 %v1194_v17  ;;  %v1050_v17 = vld [vmem:[%s16828_s4 + $0x668] sm:$0xff] }
  0x9f   : > { %1579 = vmatpush2.msra.mxu1 %v1193_v19  ;;  %v910_v19 = vld [vmem:[%s16828_s4 + $0x208] sm:$0xff] }
  0xa0   : > { %1580 = vmatprep.subr.mxu1 %v1191_v20  ;;  %v1049_v20 = vld [vmem:[%s16828_s4 + $0x660] sm:$0xff] }
  0xa1   : > { %1581 = vmatpush2.msra.mxu1 %v1190_v21  ;;  %v862_v21 = vld [vmem:[%s16828_s4 + $0x88] sm:$0xff] }
  0xa2   : > { %1582 = vmatprep.subr.mxu1 %v1188_v22  ;;  %v9184_v27 = vpop.permute.xlu0 %9183  ;;  %v1047_v22 = vld [vmem:[%s16828_s4 + $0x650] sm:$0xff] }
  0xa3   : > { %1583 = vmatpush2.msra.mxu1 %v1187_v23  ;;  %v9186_v29 = vunpack.i.h.bf16 %v9184_v27  ;;  %v9185_v30 = vunpack.i.l.bf16 %v9184_v27  ;;  %v907_v23 = vld [vmem:[%s16828_s4 + $0x1f0] sm:$0xff]  ;;  %v904_v27 = vld [vmem:[%s16828_s4 + $0x1d8] sm:$0xff] }
  0xa4   : > { %1584 = vmatprep.subr.mxu1 %v1185_v24  ;;  %v9194_v32 = vpop.permute.xlu1 %9193  ;;  %v1046_v24 = vld [vmem:[%s16828_s4 + $0x648] sm:$0xff] }
  0xa5   : > { %1585 = vmatpush2.msra.mxu1 %v1184_v25  ;;  %v9196_v33 = vunpack.i.h.bf16 %v9194_v32  ;;  %v9195_v34 = vunpack.i.l.bf16 %v9194_v32  ;;  %v1288_v35 = vsel %vm1287_vm0, %v9185_v30, %v9186_v29  ;;  %v859_v25 = vld [vmem:[%s16828_s4 + $0x70] sm:$0xff]  ;;  %v856_v29 = vld [vmem:[%s16828_s4 + $0x58] sm:$0xff]  ;;  %v1041_v30 = vld [vmem:[%s16828_s4 + $0x620] sm:$0xff] }
  0xa6   : > { %1586 = vmatprep.subr.mxu1 %v1182_v26  ;;  %1375 = vmatprep.mubr.f32.mxu0 %v1288_v35  ;;  %v1044_v26 = vld [vmem:[%s16828_s4 + $0x638] sm:$0xff] }
  0xa7   : > { %1587 = vmatpush2.msra.mxu1 %v1181_v28  ;;  %1376 = vmatmul.mubr.f32.vlgmr.msra.gmra.mxu0 %v9739_v9  ;;  %v10332_v38 = vsel %vm1287_vm0, %v9195_v34, %v9196_v33  ;;  %v937_v9 = vld [vmem:[%s16828_s4 + $0x2e0] sm:$0xff]  ;;  %v1043_v28 = vld [vmem:[%s16828_s4 + $0x630] sm:$0xff]  ;;  %v1040_v32 = vld [vmem:[%s16828_s4 + $0x618] sm:$0xff] }
  0xa8   : > { %8287 = vmatprep.subr.mxu1 %v940_v31  ;;  %1454 = vmatpush1.msra.mxu0 %v1082_v36  ;;  %v901_v31 = vld [vmem:[%s16828_s4 + $0x1c0] sm:$0xff]  ;;  %v1038_v34 = vld [vmem:[%s16828_s4 + $0x608] sm:$0xff] }
  0xa9   : > { %1588 = vmatprep.mubr.f32.mxu1 %v10332_v38  ;;  %1455 = vmatprep.subr.mxu0 %v1080_v37  ;;  %v853_v33 = vld [vmem:[%s16828_s4 + $0x40] sm:$0xff]  ;;  %v850_v37 = vld [vmem:[%s16828_s4 + $0x28] sm:$0xff] }
  0xaa   : > { %1589 = vmatmul.mubr.f32.vlgmr.msra.gmra.mxu1 %v9749_v12  ;;  %1456 = vmatpush1.msra.mxu0 %v1079_v39  ;;  %v1037_v36 = vld [vmem:[%s16828_s4 + $0x600] sm:$0xff]  ;;  %v1131_v39 = vld [vmem:[%s16828_s4 + $0x8f0] sm:$0xff] }
  0xab   : > { %8288 = vmatpush3.msra.mxu1 %v892_v40  ;;  %1457 = vmatprep.subr.mxu0 %v1077_v41  ;;  %v895_v40 = vld [vmem:[%s16828_s4 + $0x190] sm:$0xff]  ;;  %v1130_v41 = vld [vmem:[%s16828_s4 + $0x8e8] sm:$0xff] }
  0xac   : > { %8289 = vmatprep.subr.mxu1 %v937_v9  ;;  %1730 = vmatprep.mubr.f32.mxu1 %v1288_v35  ;;  %v898_v35 = vld [vmem:[%s16828_s4 + $0x1a8] sm:$0xff]  ;;  %v847_v9 = vld [vmem:[%s16828_s4 + $0x10] sm:$0xff] }
  0xad   : > { %1458 = vmatpush1.msra.mxu0 %v1076_v42  ;;  %8290 = vmatpush3.msra.mxu1 %v889_v43  ;;  %v1128_v42 = vld [vmem:[%s16828_s4 + $0x8d8] sm:$0xff] }
  0xae   : > { %1459 = vmatprep.subr.mxu0 %v1074_v44  ;;  %8291 = vmatprep.subr.mxu1 %v934_v45  ;;  %v1132_v43 = vld [vmem:[%s16828_s4 + $0x8f8] sm:$0xff]  ;;  %v1127_v44 = vld [vmem:[%s16828_s4 + $0x8d0] sm:$0xff]  ;;  %v1125_v45 = vld [vmem:[%s16828_s4 + $0x8c0] sm:$0xff] }
  0xaf   : > { %1460 = vmatpush1.msra.mxu0 %v1073_v46  ;;  %8292 = vmatpush3.msra.mxu1 %v886_v47  ;;  %v1084_v46 = vld [vmem:[%s16828_s4 + $0x778] sm:$0xff] }
  0xb0   : > { %1461 = vmatprep.subr.mxu0 %v1071_v48  ;;  %8293 = vmatprep.subr.mxu1 %v931_v49  ;;  %v1124_v47 = vld [vmem:[%s16828_s4 + $0x8b8] sm:$0xff]  ;;  %v1129_v48 = vld [vmem:[%s16828_s4 + $0x8e0] sm:$0xff]  ;;  %v1122_v49 = vld [vmem:[%s16828_s4 + $0x8a8] sm:$0xff] }
  0xb1   : > { %1462 = vmatpush1.msra.mxu0 %v1070_v50  ;;  %8294 = vmatpush3.msra.mxu1 %v883_v51  ;;  %v9438_v50 = vld [vmem:[%s9733_s28] sm:$0xff]  ;;  %s9508_s28 = smov [#allocation2]  }
  0xb2   : > { %1463 = vmatprep.subr.mxu0 %v1068_v52  ;;  %8295 = vmatprep.subr.mxu1 %v928_v53  ;;  %v1081_v51 = vld [vmem:[%s16828_s4 + $0x760] sm:$0xff]  ;;  %v1126_v53 = vld [vmem:[%s16828_s4 + $0x8c8] sm:$0xff] }
  0xb3   : > { %1464 = vmatpush1.msra.mxu0 %v1067_v54  ;;  %8296 = vmatpush3.msra.mxu1 %v880_v55  ;;  %v1121_v52 = vld [vmem:[%s16828_s4 + $0x8a0] sm:$0xff]  ;;  %v1119_v54 = vld [vmem:[%s16828_s4 + $0x890] sm:$0xff]  ;;  %v1078_v55 = vld [vmem:[%s16828_s4 + $0x748] sm:$0xff] }
  0xb4   : > { %1465 = vmatprep.subr.mxu0 %v1065_v56  ;;  %8297 = vmatprep.subr.mxu1 %v925_v57  ;;  %v1118_v56 = vld [vmem:[%s16828_s4 + $0x888] sm:$0xff]  ;;  %v1123_v57 = vld [vmem:[%s16828_s4 + $0x8b0] sm:$0xff] }
  0xb5   : > { %1466 = vmatpush1.msra.mxu0 %v1064_v58  ;;  %8298 = vmatpush3.msra.mxu1 %v877_v59  ;;  %v1116_v58 = vld [vmem:[%s16828_s4 + $0x878] sm:$0xff]  ;;  %v1075_v59 = vld [vmem:[%s16828_s4 + $0x730] sm:$0xff] }
  0xb6   : > { %1467 = vmatprep.subr.mxu0 %v1062_v60  ;;  %8299 = vmatprep.subr.mxu1 %v922_v61  ;;  %v1115_v60 = vld [vmem:[%s16828_s4 + $0x870] sm:$0xff]  ;;  %v1120_v61 = vld [vmem:[%s16828_s4 + $0x898] sm:$0xff] }
  0xb7   : > { %1468 = vmatpush1.msra.mxu0 %v1061_v62  ;;  %8300 = vmatpush3.msra.mxu1 %v874_v63  ;;  %v1113_v62 = vld [vmem:[%s16828_s4 + $0x860] sm:$0xff]  ;;  %v1072_v63 = vld [vmem:[%s16828_s4 + $0x718] sm:$0xff] }
  0xb8   : > { %1469 = vmatprep.subr.mxu0 %v1059_v0  ;;  %8301 = vmatprep.subr.mxu1 %v919_v1  ;;  %v1112_v0 = vld [vmem:[%s16828_s4 + $0x858] sm:$0xff]  ;;  %v1117_v1 = vld [vmem:[%s16828_s4 + $0x880] sm:$0xff] }
  0xb9   : > { %1470 = vmatpush1.msra.mxu0 %v1058_v2  ;;  %8302 = vmatpush3.msra.mxu1 %v871_v3  ;;  %v1110_v2 = vld [vmem:[%s16828_s4 + $0x848] sm:$0xff]  ;;  %v1069_v3 = vld [vmem:[%s16828_s4 + $0x700] sm:$0xff] }
  0xba   : > { %1471 = vmatprep.subr.mxu0 %v1056_v4  ;;  %8303 = vmatprep.subr.mxu1 %v916_v5  ;;  %v1109_v4 = vld [vmem:[%s16828_s4 + $0x840] sm:$0xff]  ;;  %v1114_v5 = vld [vmem:[%s16828_s4 + $0x868] sm:$0xff] }
  0xbb   : > { %1472 = vmatpush1.msra.mxu0 %v1055_v6  ;;  %8304 = vmatpush3.msra.mxu1 %v868_v7  ;;  %v1107_v6 = vld [vmem:[%s16828_s4 + $0x830] sm:$0xff]  ;;  %v1066_v7 = vld [vmem:[%s16828_s4 + $0x6e8] sm:$0xff] }
  0xbc   : > { %1473 = vmatprep.subr.mxu0 %v1053_v8  ;;  %8305 = vmatprep.subr.mxu1 %v913_v11  ;;  %v1106_v8 = vld [vmem:[%s16828_s4 + $0x828] sm:$0xff]  ;;  %v1111_v11 = vld [vmem:[%s16828_s4 + $0x850] sm:$0xff] }
  0xbd   : > { %1474 = vmatpush1.msra.mxu0 %v1052_v14  ;;  %8306 = vmatpush3.msra.mxu1 %v865_v15  ;;  %v1104_v14 = vld [vmem:[%s16828_s4 + $0x818] sm:$0xff]  ;;  %v1063_v15 = vld [vmem:[%s16828_s4 + $0x6d0] sm:$0xff] }
  0xbe   : > { %1475 = vmatprep.subr.mxu0 %v1050_v17  ;;  %8307 = vmatprep.subr.mxu1 %v910_v19  ;;  %v1103_v17 = vld [vmem:[%s16828_s4 + $0x810] sm:$0xff]  ;;  %v1108_v19 = vld [vmem:[%s16828_s4 + $0x838] sm:$0xff] }
  0xbf   : > { %1476 = vmatpush1.msra.mxu0 %v1049_v20  ;;  %8308 = vmatpush3.msra.mxu1 %v862_v21  ;;  %v1101_v20 = vld [vmem:[%s16828_s4 + $0x800] sm:$0xff]  ;;  %v1060_v21 = vld [vmem:[%s16828_s4 + $0x6b8] sm:$0xff] }
  0xc0   : > { %1477 = vmatprep.subr.mxu0 %v1047_v22  ;;  %8309 = vmatprep.subr.mxu1 %v907_v23  ;;  %v1100_v22 = vld [vmem:[%s16828_s4 + $0x7f8] sm:$0xff]  ;;  %v1105_v23 = vld [vmem:[%s16828_s4 + $0x820] sm:$0xff] }
  0xc1   : > { %1478 = vmatpush1.msra.mxu0 %v1046_v24  ;;  %8310 = vmatpush3.msra.mxu1 %v859_v25  ;;  %v1098_v24 = vld [vmem:[%s16828_s4 + $0x7e8] sm:$0xff]  ;;  %v1057_v25 = vld [vmem:[%s16828_s4 + $0x6a0] sm:$0xff] }
  0xc2   : > { %1479 = vmatprep.subr.mxu0 %v1044_v26  ;;  %8311 = vmatprep.subr.mxu1 %v904_v27  ;;  %v1097_v26 = vld [vmem:[%s16828_s4 + $0x7e0] sm:$0xff]  ;;  %v1102_v27 = vld [vmem:[%s16828_s4 + $0x808] sm:$0xff] }
  0xc3   : > { %1480 = vmatpush1.msra.mxu0 %v1043_v28  ;;  %8312 = vmatpush3.msra.mxu1 %v856_v29  ;;  %v1095_v28 = vld [vmem:[%s16828_s4 + $0x7d0] sm:$0xff]  ;;  %v1054_v29 = vld [vmem:[%s16828_s4 + $0x688] sm:$0xff] }
  0xc4   : > { %1481 = vmatprep.subr.mxu0 %v1041_v30  ;;  %8313 = vmatprep.subr.mxu1 %v901_v31  ;;  %v1094_v30 = vld [vmem:[%s16828_s4 + $0x7c8] sm:$0xff]  ;;  %v1099_v31 = vld [vmem:[%s16828_s4 + $0x7f0] sm:$0xff] }
  0xc5   : > { %1482 = vmatpush1.msra.mxu0 %v1040_v32  ;;  %8314 = vmatpush3.msra.mxu1 %v853_v33  ;;  %v1092_v32 = vld [vmem:[%s16828_s4 + $0x7b8] sm:$0xff]  ;;  %v9189_v33 = vpop.permute.xlu0 %9188 }
  0xc6   : > { %1483 = vmatprep.subr.mxu0 %v1038_v34  ;;  %8315 = vmatprep.subr.mxu1 %v898_v35  ;;  %v1051_v34 = vld [vmem:[%s16828_s4 + $0x670] sm:$0xff] }
  0xc7   : > { %1484 = vmatpush1.msra.mxu0 %v1037_v36  ;;  %8316 = vmatpush3.msra.mxu1 %v850_v37  ;;  %v1091_v35 = vld [vmem:[%s16828_s4 + $0x7b0] sm:$0xff]  ;;  %v1096_v36 = vld [vmem:[%s16828_s4 + $0x7d8] sm:$0xff]  ;;  %v1089_v37 = vld [vmem:[%s16828_s4 + $0x7a0] sm:$0xff] }
  0xc8   : > { %1485 = vmatprep.subr.mxu0 %v1131_v39  ;;  %8317 = vmatprep.subr.mxu1 %v895_v40  ;;  %v1048_v39 = vld [vmem:[%s16828_s4 + $0x658] sm:$0xff]  ;;  %v9191_v40 = vunpack.i.h.bf16 %v9189_v33 }
  0xc9   : > { %1486 = vmatpush2.msra.mxu0 %v1130_v41  ;;  %8318 = vmatpush3.msra.mxu1 %v847_v9  ;;  %v9190_v41 = vunpack.i.l.bf16 %v9189_v33  ;;  %v1088_v9 = vld [vmem:[%s16828_s4 + $0x798] sm:$0xff]  ;;  %v1243_v33 = vld [vmem:[%s16828_s4 + $0xc70] sm:$0xff] }
  0xca   : > { %1487 = vmatprep.subr.mxu0 %v1128_v42  ;;  %8357 = vmatprep.subr.mxu1 %v1132_v43  ;;  %v1093_v42 = vld [vmem:[%s16828_s4 + $0x7c0] sm:$0xff]  ;;  %v1086_v43 = vld [vmem:[%s16828_s4 + $0x788] sm:$0xff] }
  0xcb   : > { %1488 = vmatpush2.msra.mxu0 %v1127_v44  ;;  %1731 = vmatmul.mubr.f32.vlgmr.msra.gmra.mxu1 %v9438_v50  ;;  %v1045_v44 = vld [vmem:[%s16828_s4 + $0x640] sm:$0xff]  ;;  %v1087_v50 = vld [vmem:[%s16828_s4 + $0x790] sm:$0xff] }
  0xcc   : > { %1489 = vmatprep.subr.mxu0 %v1125_v45  ;;  %8358 = vmatpush3.msra.mxu1 %v1084_v46  ;;  %v1085_v45 = vld [vmem:[%s16828_s4 + $0x780] sm:$0xff]  ;;  %v1090_v46 = vld [vmem:[%s16828_s4 + $0x7a8] sm:$0xff] }
  0xcd   : > { %1490 = vmatpush2.msra.mxu0 %v1124_v47  ;;  %8359 = vmatprep.subr.mxu1 %v1129_v48  ;;  %v1042_v47 = vld [vmem:[%s16828_s4 + $0x628] sm:$0xff]  ;;  %v1298_v48 = vsel %vm1287_vm0, %v9190_v41, %v9191_v40  ;;  %v988_v40 = vld [vmem:[%s16828_s4 + $0x478] sm:$0xff]  ;;  %v1033_v41 = vld [vmem:[%s16828_s4 + $0x5e0] sm:$0xff] }
  0xce   : > { %1491 = vmatprep.subr.mxu0 %v1122_v49  ;;  %8360 = vmatpush3.msra.mxu1 %v1081_v51  ;;  %v1275_v49 = vld [vmem:[%s16828_s4 + $0xd70] sm:$0xff]  ;;  %v1274_v51 = vld [vmem:[%s16828_s4 + $0xd68] sm:$0xff] }
  0xcf   : > { %1492 = vmatpush2.msra.mxu0 %v1121_v52  ;;  %8361 = vmatprep.subr.mxu1 %v1126_v53  ;;  %v1039_v52 = vld [vmem:[%s16828_s4 + $0x610] sm:$0xff]  ;;  %v1272_v53 = vld [vmem:[%s16828_s4 + $0xd58] sm:$0xff] }
  0xd0   : > { %1493 = vmatprep.subr.mxu0 %v1119_v54  ;;  %8362 = vmatpush3.msra.mxu1 %v1078_v55  ;;  %v1271_v54 = vld [vmem:[%s16828_s4 + $0xd50] sm:$0xff]  ;;  %v1269_v55 = vld [vmem:[%s16828_s4 + $0xd40] sm:$0xff] }
  0xd1   : > { %1494 = vmatpush2.msra.mxu0 %v1118_v56  ;;  %8363 = vmatprep.subr.mxu1 %v1123_v57  ;;  %v1268_v56 = vld [vmem:[%s16828_s4 + $0xd38] sm:$0xff]  ;;  %v1266_v57 = vld [vmem:[%s16828_s4 + $0xd28] sm:$0xff] }
  0xd2   : > { %1495 = vmatprep.subr.mxu0 %v1116_v58  ;;  %8364 = vmatpush3.msra.mxu1 %v1075_v59  ;;  %v1276_v58 = vld [vmem:[%s16828_s4 + $0xd78] sm:$0xff]  ;;  %v9502_v59 = vmov 0.0  }
  0xd3   : > { %1496 = vmatpush2.msra.mxu0 %v1115_v60  ;;  %8365 = vmatprep.subr.mxu1 %v1120_v61  ;;  %v1263_v60 = vld [vmem:[%s16828_s4 + $0xd10] sm:$0xff]  ;;  %v1273_v61 = vld [vmem:[%s16828_s4 + $0xd60] sm:$0xff] }
  0xd4   : > { %1497 = vmatprep.subr.mxu0 %v1113_v62  ;;  %8366 = vmatpush3.msra.mxu1 %v1072_v63  ;;  %v1262_v62 = vld [vmem:[%s16828_s4 + $0xd08] sm:$0xff]  ;;  %v1260_v63 = vld [vmem:[%s16828_s4 + $0xcf8] sm:$0xff] }
  0xd5   : > { %1498 = vmatpush2.msra.mxu0 %v1112_v0  ;;  %8367 = vmatprep.subr.mxu1 %v1117_v1  ;;  %v1270_v0 = vld [vmem:[%s16828_s4 + $0xd48] sm:$0xff]  ;;  %v1259_v1 = vld [vmem:[%s16828_s4 + $0xcf0] sm:$0xff] }
  0xd6   : > { %1499 = vmatprep.subr.mxu0 %v1110_v2  ;;  %8368 = vmatpush3.msra.mxu1 %v1069_v3  ;;  %v1257_v2 = vld [vmem:[%s16828_s4 + $0xce0] sm:$0xff]  ;;  %v1267_v3 = vld [vmem:[%s16828_s4 + $0xd30] sm:$0xff] }
  0xd7   : > { %1500 = vmatpush2.msra.mxu0 %v1109_v4  ;;  %8369 = vmatprep.subr.mxu1 %v1114_v5  ;;  %v1256_v4 = vld [vmem:[%s16828_s4 + $0xcd8] sm:$0xff]  ;;  %v1254_v5 = vld [vmem:[%s16828_s4 + $0xcc8] sm:$0xff] }
  0xd8   : > { %1501 = vmatprep.subr.mxu0 %v1107_v6  ;;  %8370 = vmatpush3.msra.mxu1 %v1066_v7  ;;  %v1264_v6 = vld [vmem:[%s16828_s4 + $0xd18] sm:$0xff]  ;;  %v1253_v7 = vld [vmem:[%s16828_s4 + $0xcc0] sm:$0xff] }
  0xd9   : > { %1502 = vmatpush2.msra.mxu0 %v1106_v8  ;;  %8371 = vmatprep.subr.mxu1 %v1111_v11  ;;  %v1251_v8 = vld [vmem:[%s16828_s4 + $0xcb0] sm:$0xff]  ;;  %v1261_v11 = vld [vmem:[%s16828_s4 + $0xd00] sm:$0xff] }
  0xda   : > { %1503 = vmatprep.subr.mxu0 %v1104_v14  ;;  %8372 = vmatpush3.msra.mxu1 %v1063_v15  ;;  %v1250_v14 = vld [vmem:[%s16828_s4 + $0xca8] sm:$0xff]  ;;  %v1248_v15 = vld [vmem:[%s16828_s4 + $0xc98] sm:$0xff] }
  0xdb   : > { %1504 = vmatpush2.msra.mxu0 %v1103_v17  ;;  %8373 = vmatprep.subr.mxu1 %v1108_v19  ;;  %v1258_v17 = vld [vmem:[%s16828_s4 + $0xce8] sm:$0xff]  ;;  %v1247_v19 = vld [vmem:[%s16828_s4 + $0xc90] sm:$0xff] }
  0xdc   : > { %1505 = vmatprep.subr.mxu0 %v1101_v20  ;;  %8374 = vmatpush3.msra.mxu1 %v1060_v21  ;;  %v1245_v20 = vld [vmem:[%s16828_s4 + $0xc80] sm:$0xff]  ;;  %v1255_v21 = vld [vmem:[%s16828_s4 + $0xcd0] sm:$0xff] }
  0xdd   : > { %1506 = vmatpush2.msra.mxu0 %v1100_v22  ;;  %8375 = vmatprep.subr.mxu1 %v1105_v23  ;;  %v1244_v22 = vld [vmem:[%s16828_s4 + $0xc78] sm:$0xff]  ;;  %v1242_v23 = vld [vmem:[%s16828_s4 + $0xc68] sm:$0xff] }
  0xde   : > { %1507 = vmatprep.subr.mxu0 %v1098_v24  ;;  %8376 = vmatpush3.msra.mxu1 %v1057_v25  ;;  %v1252_v24 = vld [vmem:[%s16828_s4 + $0xcb8] sm:$0xff]  ;;  %v1241_v25 = vld [vmem:[%s16828_s4 + $0xc60] sm:$0xff] }
  0xdf   : > { %1508 = vmatpush2.msra.mxu0 %v1097_v26  ;;  %8377 = vmatprep.subr.mxu1 %v1102_v27  ;;  %v1239_v26 = vld [vmem:[%s16828_s4 + $0xc50] sm:$0xff]  ;;  %v1249_v27 = vld [vmem:[%s16828_s4 + $0xca0] sm:$0xff] }
  0xe0   : > { %1509 = vmatprep.subr.mxu0 %v1095_v28  ;;  %8378 = vmatpush3.msra.mxu1 %v1054_v29  ;;  %v1238_v28 = vld [vmem:[%s16828_s4 + $0xc48] sm:$0xff]  ;;  %v1236_v29 = vld [vmem:[%s16828_s4 + $0xc38] sm:$0xff] }
  0xe1   : > { %1510 = vmatpush2.msra.mxu0 %v1094_v30  ;;  %8379 = vmatprep.subr.mxu1 %v1099_v31  ;;  %v1246_v30 = vld [vmem:[%s16828_s4 + $0xc88] sm:$0xff]  ;;  %v1235_v31 = vld [vmem:[%s16828_s4 + $0xc30] sm:$0xff] }
  0xe2   : > { %1511 = vmatprep.subr.mxu0 %v1092_v32  ;;  %8380 = vmatpush3.msra.mxu1 %v1051_v34  ;;  %v1233_v32 = vld [vmem:[%s16828_s4 + $0xc20] sm:$0xff]  ;;  %v1232_v34 = vld [vmem:[%s16828_s4 + $0xc18] sm:$0xff] }
  0xe3   : > { %1512 = vmatpush2.msra.mxu0 %v1091_v35  ;;  %8381 = vmatprep.subr.mxu1 %v1096_v36  ;;  %v1230_v35 = vld [vmem:[%s16828_s4 + $0xc08] sm:$0xff]  ;;  %v1240_v36 = vld [vmem:[%s16828_s4 + $0xc58] sm:$0xff] }
  0xe4   : > { %1513 = vmatprep.subr.mxu0 %v1089_v37  ;;  %8382 = vmatpush3.msra.mxu1 %v1048_v39  ;;  %v1229_v37 = vld [vmem:[%s16828_s4 + $0xc00] sm:$0xff]  ;;  %v1036_v39 = vld [vmem:[%s16828_s4 + $0x5f8] sm:$0xff] }
  0xe5   : > { %1514 = vmatpush2.msra.mxu0 %v1088_v9  ;;  %8383 = vmatprep.subr.mxu1 %v1093_v42  ;;  %v1237_v9 = vld [vmem:[%s16828_s4 + $0xc40] sm:$0xff] }
  0xe6   : > { %1515 = vmatprep.subr.mxu0 %v1086_v43  ;;  %8384 = vmatpush3.msra.mxu1 %v1045_v44  ;;  %v985_v42 = vld [vmem:[%s16828_s4 + $0x460] sm:$0xff]  ;;  %v1030_v43 = vld [vmem:[%s16828_s4 + $0x5c8] sm:$0xff] }
  0xe7   : > { %1516 = vmatpush2.msra.mxu0 %v1085_v45  ;;  %8385 = vmatprep.subr.mxu1 %v1090_v46  ;;  %v1234_v44 = vld [vmem:[%s16828_s4 + $0xc28] sm:$0xff]  ;;  %v1027_v46 = vld [vmem:[%s16828_s4 + $0x5b0] sm:$0xff] }
  0xe8   : > { %1517 = vmatprep.mubr.f32.mxu0 %v9767_v18  ;;  %8386 = vmatpush3.msra.mxu1 %v1042_v47  ;;  %v982_v45 = vld [vmem:[%s16828_s4 + $0x448] sm:$0xff]  ;;  %v979_v47 = vld [vmem:[%s16828_s4 + $0x430] sm:$0xff] }
  0xe9   : > { %1518 = vmatmul.mubr.f32.vlgmr.msra.gmra.mxu0 %v1298_v48  ;;  %1595 = vmatprep.subr.mxu0 %v1275_v49  ;;  %v976_v49 = vld [vmem:[%s16828_s4 + $0x418] sm:$0xff] }
  0xea   : > { %8387 = vmatprep.subr.mxu1 %v1087_v50  ;;  %1596 = vmatpush1.msra.mxu0 %v1274_v51  ;;  %v1021_v50 = vld [vmem:[%s16828_s4 + $0x580] sm:$0xff] }
  0xeb   : > { %8388 = vmatpush3.msra.mxu1 %v1039_v52  ;;  %1870 = vmatprep.mubr.f32.mxu1 %v9767_v18  ;;  %v1265_v18 = vld [vmem:[%s16828_s4 + $0xd20] sm:$0xff]  ;;  %v1018_v52 = vld [vmem:[%s16828_s4 + $0x568] sm:$0xff] }
  0xec   : > { %1597 = vmatprep.subr.mxu0 %v1272_v53  ;;  %1871 = vmatmul.mubr.f32.vlgmr.msra.gmra.mxu1 %v1298_v48  ;;  %v1024_v48 = vld [vmem:[%s16828_s4 + $0x598] sm:$0xff]  ;;  %v973_v51 = vld [vmem:[%s16828_s4 + $0x400] sm:$0xff]  ;;  %v970_v53 = vld [vmem:[%s16828_s4 + $0x3e8] sm:$0xff] }
  0xed   : > { %1598 = vmatpush1.msra.mxu0 %v1271_v54  ;;  %1659 = vmatprep.mubr.f32.mxu0 %v9502_v59  ;;  %v1015_v54 = vld [vmem:[%s16828_s4 + $0x550] sm:$0xff] }
  0xee   : > { %1599 = vmatprep.subr.mxu0 %v1269_v55  ;;  %8952 = vmatprep.subr.mxu1 %v9502_v59  ;;  %v1012_v55 = vld [vmem:[%s16828_s4 + $0x538] sm:$0xff] }
  0xef   : > { %1600 = vmatpush1.msra.mxu0 %v1268_v56  ;;  %8953 = vmatpush3.msra.mxu1 %v1276_v58  ;;  %v964_v56 = vld [vmem:[%s16828_s4 + $0x3b8] sm:$0xff]  ;;  %v961_v58 = vld [vmem:[%s16828_s4 + $0x3a0] sm:$0xff] }
  0xf0   : > { %1601 = vmatprep.subr.mxu0 %v1266_v57  ;;  %8954 = vmatprep.subr.mxu1 %v9502_v59  ;;  %v1009_v57 = vld [vmem:[%s16828_s4 + $0x520] sm:$0xff] }
  0xf1   : > { %1602 = vmatpush1.msra.mxu0 %v1265_v18  ;;  %8955 = vmatpush3.msra.mxu1 %v1273_v61  ;;  %v1006_v18 = vld [vmem:[%s16828_s4 + $0x508] sm:$0xff]  ;;  %v1003_v61 = vld [vmem:[%s16828_s4 + $0x4f0] sm:$0xff] }
  0xf2   : > { %1603 = vmatprep.subr.mxu0 %v1263_v60  ;;  %8956 = vmatprep.subr.mxu1 %v9502_v59  ;;  %v958_v60 = vld [vmem:[%s16828_s4 + $0x388] sm:$0xff] }
  0xf3   : > { %1604 = vmatpush1.msra.mxu0 %v1262_v62  ;;  %8957 = vmatpush3.msra.mxu1 %v1270_v0  ;;  %v955_v62 = vld [vmem:[%s16828_s4 + $0x370] sm:$0xff]  ;;  %v952_v0 = vld [vmem:[%s16828_s4 + $0x358] sm:$0xff] }
  0xf4   : > { %1605 = vmatprep.subr.mxu0 %v1260_v63  ;;  %8958 = vmatprep.subr.mxu1 %v9502_v59  ;;  %v1000_v63 = vld [vmem:[%s16828_s4 + $0x4d8] sm:$0xff] }
  0xf5   : > { %1606 = vmatpush1.msra.mxu0 %v1259_v1  ;;  %8959 = vmatpush3.msra.mxu1 %v1267_v3  ;;  %v997_v1 = vld [vmem:[%s16828_s4 + $0x4c0] sm:$0xff]  ;;  %v994_v3 = vld [vmem:[%s16828_s4 + $0x4a8] sm:$0xff] }
  0xf6   : > { %1607 = vmatprep.subr.mxu0 %v1257_v2  ;;  %8960 = vmatprep.subr.mxu1 %v9502_v59  ;;  %v949_v2 = vld [vmem:[%s16828_s4 + $0x340] sm:$0xff] }
  0xf7   : > { %1608 = vmatpush1.msra.mxu0 %v1256_v4  ;;  %8961 = vmatpush3.msra.mxu1 %v1264_v6  ;;  %v946_v4 = vld [vmem:[%s16828_s4 + $0x328] sm:$0xff]  ;;  %v943_v6 = vld [vmem:[%s16828_s4 + $0x310] sm:$0xff] }
  0xf8   : > { %1609 = vmatprep.subr.mxu0 %v1254_v5  ;;  %8962 = vmatprep.subr.mxu1 %v9502_v59  ;;  %v991_v5 = vld [vmem:[%s16828_s4 + $0x490] sm:$0xff] }
  0xf9   : > { %1610 = vmatpush1.msra.mxu0 %v1253_v7  ;;  %8963 = vmatpush3.msra.mxu1 %v1261_v11  ;;  %v1228_v7 = vld [vmem:[%s16828_s4 + $0xbf8] sm:$0xff]  ;;  %v1225_v11 = vld [vmem:[%s16828_s4 + $0xbe0] sm:$0xff] }
  0xfa   : > { %1611 = vmatprep.subr.mxu0 %v1251_v8  ;;  %8964 = vmatprep.subr.mxu1 %v9502_v59  ;;  %v1180_v8 = vld [vmem:[%s16828_s4 + $0xa78] sm:$0xff] }
  0xfb   : > { %1612 = vmatpush1.msra.mxu0 %v1250_v14  ;;  %8965 = vmatpush3.msra.mxu1 %v1258_v17  ;;  %v1177_v14 = vld [vmem:[%s16828_s4 + $0xa60] sm:$0xff]  ;;  %v1174_v17 = vld [vmem:[%s16828_s4 + $0xa48] sm:$0xff] }
  0xfc   : > { %1613 = vmatprep.subr.mxu0 %v1248_v15  ;;  %8966 = vmatprep.subr.mxu1 %v9502_v59  ;;  %v1222_v15 = vld [vmem:[%s16828_s4 + $0xbc8] sm:$0xff] }
  0xfd   : > { %1614 = vmatpush1.msra.mxu0 %v1247_v19  ;;  %8967 = vmatpush3.msra.mxu1 %v1255_v21  ;;  %v1171_v19 = vld [vmem:[%s16828_s4 + $0xa30] sm:$0xff]  ;;  %v1213_v21 = vld [vmem:[%s16828_s4 + $0xb80] sm:$0xff] }
  0xfe   : > { %1615 = vmatprep.subr.mxu0 %v1245_v20  ;;  %8968 = vmatprep.subr.mxu1 %v9502_v59  ;;  %v1168_v20 = vld [vmem:[%s16828_s4 + $0xa18] sm:$0xff] }
  0xff   : > { %1616 = vmatpush1.msra.mxu0 %v1244_v22  ;;  %8969 = vmatpush3.msra.mxu1 %v1252_v24  ;;  %v1165_v22 = vld [vmem:[%s16828_s4 + $0xa00] sm:$0xff]  ;;  %v1162_v24 = vld [vmem:[%s16828_s4 + $0x9e8] sm:$0xff] }
 0x100   : > { %1617 = vmatprep.subr.mxu0 %v1242_v23  ;;  %8970 = vmatprep.subr.mxu1 %v9502_v59  ;;  %v1210_v23 = vld [vmem:[%s16828_s4 + $0xb68] sm:$0xff] }
 0x101   : > { %1618 = vmatpush1.msra.mxu0 %v1241_v25  ;;  %8971 = vmatpush3.msra.mxu1 %v1249_v27  ;;  %v1207_v25 = vld [vmem:[%s16828_s4 + $0xb50] sm:$0xff]  ;;  %v1204_v27 = vld [vmem:[%s16828_s4 + $0xb38] sm:$0xff] }
 0x102   : > { %1619 = vmatprep.subr.mxu0 %v1239_v26  ;;  %8972 = vmatprep.subr.mxu1 %v9502_v59  ;;  %v1159_v26 = vld [vmem:[%s16828_s4 + $0x9d0] sm:$0xff] }
 0x103   : > { %1620 = vmatpush1.msra.mxu0 %v1238_v28  ;;  %8973 = vmatpush3.msra.mxu1 %v1246_v30  ;;  %v1156_v28 = vld [vmem:[%s16828_s4 + $0x9b8] sm:$0xff]  ;;  %v1153_v30 = vld [vmem:[%s16828_s4 + $0x9a0] sm:$0xff] }
 0x104   : > { %1621 = vmatprep.subr.mxu0 %v1236_v29  ;;  %8974 = vmatprep.subr.mxu1 %v9502_v59  ;;  %v1201_v29 = vld [vmem:[%s16828_s4 + $0xb20] sm:$0xff] }
 0x105   : > { %1622 = vmatpush1.msra.mxu0 %v1235_v31  ;;  %8975 = vmatpush3.msra.mxu1 %v1243_v33  ;;  %v1198_v31 = vld [vmem:[%s16828_s4 + $0xb08] sm:$0xff]  ;;  %v1195_v33 = vld [vmem:[%s16828_s4 + $0xaf0] sm:$0xff] }
 0x106   : > { %1623 = vmatprep.subr.mxu0 %v1233_v32  ;;  %8976 = vmatprep.subr.mxu1 %v9502_v59  ;;  %v1150_v32 = vld [vmem:[%s16828_s4 + $0x988] sm:$0xff] }
 0x107   : > { %1624 = vmatpush1.msra.mxu0 %v1232_v34  ;;  %8977 = vmatpush3.msra.mxu1 %v1240_v36  ;;  %v1147_v34 = vld [vmem:[%s16828_s4 + $0x970] sm:$0xff]  ;;  %v1144_v36 = vld [vmem:[%s16828_s4 + $0x958] sm:$0xff] }
 0x108   : > { %1625 = vmatprep.subr.mxu0 %v1230_v35  ;;  %8978 = vmatprep.subr.mxu1 %v9502_v59  ;;  %v1192_v35 = vld [vmem:[%s16828_s4 + $0xad8] sm:$0xff] }
 0x109   : > { %1626 = vmatpush1.msra.mxu0 %v1229_v37  ;;  %8979 = vmatpush3.msra.mxu1 %v1237_v9  ;;  %v1189_v37 = vld [vmem:[%s16828_s4 + $0xac0] sm:$0xff]  ;;  %v1183_v9 = vld [vmem:[%s16828_s4 + $0xa90] sm:$0xff] }
 0x10a   : > { %1660 = vmatmul.mubr.f32.vlgmr.msra.gmra.mxu0 %v9760_v16  ;;  %8322 = vmatprep.subr.mxu0 %v1036_v39  ;;  %v1141_v39 = vld [vmem:[%s16828_s4 + $0x940] sm:$0xff] }
 0x10b   : > { %8323 = vmatpush3.msra.mxu0 %v988_v40  ;;  %1800 = vmatprep.mubr.f32.mxu0 %v9752_v13  ;;  %v1231_v13 = vld [vmem:[%s16828_s4 + $0xc10] sm:$0xff]  ;;  %v1186_v40 = vld [vmem:[%s16828_s4 + $0xaa8] sm:$0xff] }
 0x10c   : > { %8324 = vmatprep.subr.mxu0 %v1033_v41  ;;  %8980 = vmatprep.subr.mxu1 %v9502_v59  ;;  %v1138_v41 = vld [vmem:[%s16828_s4 + $0x928] sm:$0xff] }
 0x10d   : > { %8325 = vmatpush3.msra.mxu0 %v985_v42  ;;  %8981 = vmatpush3.msra.mxu1 %v1234_v44  ;;  %v1135_v42 = vld [vmem:[%s16828_s4 + $0x910] sm:$0xff] }
 0x10e   : > { %8326 = vmatprep.subr.mxu0 %v1030_v43  ;;  %8982 = vmatprep.subr.mxu1 %v9502_v59 }
 0x10f   : > { %8327 = vmatpush3.msra.mxu0 %v982_v45  ;;  %8983 = vmatpush3.msra.mxu1 %v1231_v13 }
 0x110   : > { %8328 = vmatprep.subr.mxu0 %v1027_v46  ;;  %8984 = vmatprep.mubr.msk.f32.mxu1 %vm9503_vm1, %v9502_v59 }
 0x111   : > { %8329 = vmatpush3.msra.mxu0 %v979_v47  ;;  %8985 = vmatmul.mubr.f32.vlgmr.msra.gmra.mxu1 %v9760_v16  ;;  %v967_v16 = vld [vmem:[%s16828_s4 + $0x3d0] sm:$0xff] }
 0x112   : > { %8330 = vmatprep.subr.mxu0 %v1024_v48  ;;  %2137 = vmatprep.mubr.f32.mxu1 %v9502_v59 }
 0x113   : > { %8331 = vmatpush3.msra.mxu0 %v976_v49 }
 0x114   : > { %8332 = vmatprep.subr.mxu0 %v1021_v50 }
 0x115   : > { %8333 = vmatpush3.msra.mxu0 %v973_v51 }
 0x116   : > { %8334 = vmatprep.subr.mxu0 %v1018_v52  ;;  %v2017_v52 = vlaneseq }
 0x117   : > { %8335 = vmatpush3.msra.mxu0 %v970_v53 }
 0x118   : > { %8336 = vmatprep.subr.mxu0 %v1015_v54 }
 0x119   : > { %8337 = vmatpush3.msra.mxu0 %v967_v16 }
 0x11a   : > { %8338 = vmatprep.subr.mxu0 %v1012_v55  ;;  %v2018_v55 = vshrl.u32 %v2017_v52, 7  ;;  %v2358_v52 = vld [vmem:[%s16834_s6 + $0x438] sm:$0xff] }
 0x11b   : > { %8339 = vmatpush3.msra.mxu0 %v964_v56 }
 0x11c   : > { %8340 = vmatprep.subr.mxu0 %v1009_v57  ;;  %v11074_v57 = vsub.s32 1, %v2018_v55 }
 0x11d   : > { %8341 = vmatpush3.msra.mxu0 %v961_v58 }
 0x11e   : > { %8342 = vmatprep.subr.mxu0 %v1006_v18 }
 0x11f   : > { %8343 = vmatpush3.msra.mxu0 %v958_v60 }
 0x120   : > { %8344 = vmatprep.subr.mxu0 %v1003_v61 }
 0x121   : > { %8345 = vmatpush3.msra.mxu0 %v955_v62 }
 0x122   : > { %8346 = vmatprep.subr.mxu0 %v1000_v63 }
 0x123   : > { %8347 = vmatpush3.msra.mxu0 %v952_v0  ;;  %v1278_v0 = vld [vmem:[%s16831_s29] sm:$0x7]  ;;  %s16839_s29 = sld [smem:[#allocation21_spill]] }
 0x124   : > { %8348 = vmatprep.subr.mxu0 %v997_v1 }
 0x125   : > { %8349 = vmatpush3.msra.mxu0 %v949_v2 }
 0x126   : > { %8350 = vmatprep.subr.mxu0 %v994_v3  ;;  %v2043_v3 = vrot.slane %v1278_v0, %v11074_v57 }
 0x127   : > { %8351 = vmatpush3.msra.mxu0 %v946_v4 }
 0x128   : > { %8352 = vmatprep.subr.mxu0 %v991_v5  ;;  %v1448_v43 = vpop.f32.mrf.mxu1 }
 0x129   : > { %8353 = vmatpush3.msra.mxu0 %v943_v6 }
 0x12a   : > { %1801 = vmatmul.mubr.f32.vlgmr.msra.gmra.mxu0 %v9743_v10  ;;  %8392 = vmatprep.subr.mxu0 %v1228_v7  ;;  %v1219_v10 = vld [vmem:[%s16828_s4 + $0xbb0] sm:$0xff]  ;;  %v1450_v13 = vpop.f32.mrf.mxu1 }
 0x12b   : > { %8393 = vmatpush3.msra.mxu0 %v1180_v8  ;;  %1940 = vmatprep.mubr.f32.mxu0 %v10332_v38  ;;  %v1216_v38 = vld [vmem:[%s16828_s4 + $0xb98] sm:$0xff] }
 0x12c   : > { %8394 = vmatprep.subr.mxu0 %v1225_v11 }
 0x12d   : > { %8395 = vmatpush3.msra.mxu0 %v1177_v14 }
 0x12e   : > { %8396 = vmatprep.subr.mxu0 %v1222_v15 }
 0x12f   : > { %8397 = vmatpush3.msra.mxu0 %v1174_v17 }
 0x130   : > { %8398 = vmatprep.subr.mxu0 %v1219_v10 }
 0x131   : > { %8399 = vmatpush3.msra.mxu0 %v1171_v19 }
 0x132   : > { %8400 = vmatprep.subr.mxu0 %v1216_v38 }
 0x133   : > { %8401 = vmatpush3.msra.mxu0 %v1168_v20 }
 0x134   : > { %8402 = vmatprep.subr.mxu0 %v1213_v21  ;;  %v11085_v21 = vsub.s32 2, %v2018_v55 }
 0x135   : > { %8403 = vmatpush3.msra.mxu0 %v1165_v22 }
 0x136   : > { %8404 = vmatprep.subr.mxu0 %v1210_v23 }
 0x137   : > { %8405 = vmatpush3.msra.mxu0 %v1162_v24 }
 0x138   : > { %8406 = vmatprep.subr.mxu0 %v1207_v25 }
 0x139   : > { %8407 = vmatpush3.msra.mxu0 %v1159_v26 }
 0x13a   : > { %8408 = vmatprep.subr.mxu0 %v1204_v27 }
 0x13b   : > { %8409 = vmatpush3.msra.mxu0 %v1156_v28  ;;  %v2047_v28 = vrot.slane %v1278_v0, %v11085_v21 }
 0x13c   : > { %8410 = vmatprep.subr.mxu0 %v1201_v29 }
 0x13d   : > { %8411 = vmatpush3.msra.mxu0 %v1153_v30 }
 0x13e   : > { %8412 = vmatprep.subr.mxu0 %v1198_v31 }
 0x13f   : > { %8413 = vmatpush3.msra.mxu0 %v1150_v32  ;;  %v11090_v32 = vsub.s32 0, %v2018_v55  ;;  %v2355_v55 = vld [vmem:[%s16834_s6 + $0x420] sm:$0xff] }
 0x140   : > { %8414 = vmatprep.subr.mxu0 %v1195_v33 }
 0x141   : > { %8415 = vmatpush3.msra.mxu0 %v1147_v34 }
 0x142   : > { %8416 = vmatprep.subr.mxu0 %v1192_v35  ;;  %v2039_v35 = vrot.slane %v1278_v0, %v11090_v32  ;;  %v2253_v0 = vld [vmem:[%s16834_s6 + $0xf0] sm:$0xff] }
 0x143   : > { %8417 = vmatpush3.msra.mxu0 %v1144_v36 }
 0x144   : > { %8418 = vmatprep.subr.mxu0 %v1189_v37 }
 0x145   : > { %8419 = vmatpush3.msra.mxu0 %v1141_v39 }
 0x146   : > { %8420 = vmatprep.subr.mxu0 %v1186_v40  ;;  %v1280_v40 = vld [vmem:[%s16832_s0] sm:$0x3f]  ;;  %s16835_s0 = smov 64  }
 0x147   : > { %8421 = vmatpush3.msra.mxu0 %v1138_v41 }
 0x148   : > { %8422 = vmatprep.subr.mxu0 %v1183_v9 }
 0x149   : > { %8423 = vmatpush3.msra.mxu0 %v1135_v42  ;;  %v1279_v42 = vld [vmem:[%s16833_s10] sm:$0x3f]  ;;  %s16840_s10 = sld [smem:[#allocation22_spill]] }
 0x14a   : > { %1941 = vmatmul.mubr.f32.vlgmr.msra.gmra.mxu0 %v9749_v12  ;;  %v1277_v12 = vld [vmem:[%s16830_s8] sm:$0x7]  ;;  %s9507_s8 = smov 124  }
 0x14b   : > { %v2024_v62 = vrot.slane %v1277_v12, %v11074_v57  ;;  %v2028_v26 = vrot.slane %v1277_v12, %v11085_v21  ;;  %v2020_v33 = vrot.slane %v1277_v12, %v11090_v32  ;;  %v2257_v12 = vld [vmem:[%s16834_s6 + $0x110] sm:$0xff] }
 0x167   : > { %v1377_v44 = vpop.f32.mrf.mxu0 }
 0x168   : > { %v1449_v45 = vadd.f32 %v1448_v43, %v1377_v44  ;;  %v2365_v43 = vld [vmem:[%s16834_s6 + $0x470] sm:$0xff] }
 0x169   : > { %v1379_v46 = vpop.f32.mrf.mxu0  ;;  %v2269_v44 = vld [vmem:[%s16834_s6 + $0x170] sm:$0xff] }
 0x16a   : > { %v1590_v49 = vpop.f32.mrf.mxu1  ;;  %v1451_v16 = vadd.f32 %v1450_v13, %v1379_v46  ;;  %2706 = vmatprep.subr.mxu0 %v2269_v44  ;;  %v2268_v46 = vld [vmem:[%s16834_s6 + $0x168] sm:$0xff]  ;;  %v2362_v13 = vld [vmem:[%s16834_s6 + $0x458] sm:$0xff] }
 0x16b   : > { %2707 = vmatpush1.msra.mxu0 %v2268_v46  ;;  %v2224_v44 = vld [vmem:[%s16834_s6 + $0x8] sm:$0xff]  ;;  %v2223_v46 = vld [vmem:[%s16834_s6] sm:$0xff] }
 0x16c   : > { %v1592_v51 = vpop.f32.mrf.mxu1 }
 0x18b   : > { %v8319_v53 = vpop.f32.mrf.mxu1 }
 0x18d   : > { %v8320_v58 = vpop.f32.mrf.mxu1 }
 0x18e   : > { %v8321_v10 = vadd.f32 %v8320_v58, %v8319_v53  ;;  %v2262_v53 = vld [vmem:[%s16834_s6 + $0x138] sm:$0xff]  ;;  %v2353_v58 = vld [vmem:[%s16834_s6 + $0x410] sm:$0xff] }
 0x1a9   : > { %v1519_v47 = vpop.f32.mrf.mxu0 }
 0x1aa   : > { %v1520_v48 = vadd.f32 %v1519_v47, %v1449_v45  ;;  %v2364_v45 = vld [vmem:[%s16834_s6 + $0x468] sm:$0xff]  ;;  %v2266_v47 = vld [vmem:[%s16834_s6 + $0x158] sm:$0xff] }
 0x1ab   : > { %v1521_v54 = vpop.f32.mrf.mxu0  ;;  %2708 = vmatprep.subr.mxu0 %v2266_v47  ;;  %v2317_v47 = vld [vmem:[%s16834_s6 + $0x2f0] sm:$0xff] }
 0x1ac   : > { %v1591_v50 = vadd.f32 %v1590_v49, %v1520_v48  ;;  %v1522_v56 = vadd.f32 %v1521_v54, %v1451_v16  ;;  %v8389_v63 = vpop.f32.mrf.mxu1  ;;  %v2361_v48 = vld [vmem:[%s16834_s6 + $0x450] sm:$0xff]  ;;  %v2356_v54 = vld [vmem:[%s16834_s6 + $0x428] sm:$0xff] }
 0x1ad   : > { %v2265_v49 = vld [vmem:[%s16834_s6 + $0x150] sm:$0xff]  ;;  %v2260_v16 = vld [vmem:[%s16834_s6 + $0x128] sm:$0xff] }
 0x1ae   : > { %v1593_v61 = vadd.f32 %v1592_v51, %v1522_v56  ;;  %v8390_v5 = vpop.f32.mrf.mxu1  ;;  %v2263_v51 = vld [vmem:[%s16834_s6 + $0x140] sm:$0xff]  ;;  %2709 = vmatpush1.msra.mxu0 %v2265_v49  ;;  %v2316_v49 = vld [vmem:[%s16834_s6 + $0x2e8] sm:$0xff] }
 0x1af   : > { %v8391_v20 = vadd.f32 %v8390_v5, %v8389_v63  ;;  %2710 = vmatprep.subr.mxu0 %v2263_v51  ;;  %v2259_v56 = vld [vmem:[%s16834_s6 + $0x120] sm:$0xff]  ;;  %v2349_v63 = vld [vmem:[%s16834_s6 + $0x3f0] sm:$0xff]  ;;  %v2344_v5 = vld [vmem:[%s16834_s6 + $0x3c8] sm:$0xff] }
 0x1b0   : > { %2711 = vmatpush1.msra.mxu0 %v2262_v53  ;;  %v2314_v51 = vld [vmem:[%s16834_s6 + $0x2d8] sm:$0xff]  ;;  %v2313_v53 = vld [vmem:[%s16834_s6 + $0x2d0] sm:$0xff] }
 0x1b1   : > { %2712 = vmatprep.subr.mxu0 %v2260_v16  ;;  %v2311_v16 = vld [vmem:[%s16834_s6 + $0x2c0] sm:$0xff] }
 0x1b2   : > { %2713 = vmatpush1.msra.mxu0 %v2259_v56  ;;  %v2310_v56 = vld [vmem:[%s16834_s6 + $0x2b8] sm:$0xff] }
 0x1b3   : > { %2714 = vmatprep.subr.mxu0 %v2257_v12  ;;  %v2308_v12 = vld [vmem:[%s16834_s6 + $0x2a8] sm:$0xff] }
 0x1ca   : > { %v1661_v18 = vpop.f32.mrf.mxu0 }
 0x1cb   : > { %v1662_v60 = vadd.f32 %v1661_v18, %v1591_v50  ;;  %v2359_v50 = vld [vmem:[%s16834_s6 + $0x440] sm:$0xff]  ;;  %v2352_v18 = vld [vmem:[%s16834_s6 + $0x408] sm:$0xff] }
 0x1cc   : > { %v1663_v1 = vpop.f32.mrf.mxu0 }
 0x1cd   : > { %v1664_v2 = vadd.f32 %v1663_v1, %v1593_v61  ;;  %v2032_v34 = vmul.f32 %v2020_v33, %v1662_v60  ;;  %v2256_v60 = vld [vmem:[%s16834_s6 + $0x108] sm:$0xff]  ;;  %v2350_v61 = vld [vmem:[%s16834_s6 + $0x3f8] sm:$0xff]  ;;  %v2347_v1 = vld [vmem:[%s16834_s6 + $0x3e0] sm:$0xff] }
 0x1ce   : > { %2715 = vmatpush1.msra.mxu0 %v2256_v60  ;;  %v2328_v33 = vld [vmem:[%s16834_s6 + $0x348] sm:$0xff]  ;;  %v2307_v60 = vld [vmem:[%s16834_s6 + $0x2a0] sm:$0xff] }
 0x1cf   : > { %v2033_v4 = vmul.f32 %v2024_v62, %v1664_v2  ;;  %v2051_v36 = vadd.f32 %v2039_v35, %v2032_v34  ;;  %v2254_v62 = vld [vmem:[%s16834_s6 + $0xf8] sm:$0xff]  ;;  %v2251_v2 = vld [vmem:[%s16834_s6 + $0xe0] sm:$0xff]  ;;  %v2232_v34 = vld [vmem:[%s16834_s6 + $0x48] sm:$0xff] }
 0x1d0   : > { %2716 = vmatprep.subr.mxu0 %v2254_v62  ;;  %v2326_v35 = vld [vmem:[%s16834_s6 + $0x338] sm:$0xff]  ;;  %v2305_v62 = vld [vmem:[%s16834_s6 + $0x290] sm:$0xff] }
 0x1d1   : > { %v2052_v6 = vadd.f32 %v2043_v3, %v2033_v4  ;;  %v2012_v7 = vpop.f32.mrf.mxu1  ;;  %v2054_v9 = vmax.f32 %v2051_v36, 0.0  ;;  %v2346_v3 = vld [vmem:[%s16834_s6 + $0x3d8] sm:$0xff]  ;;  %2717 = vmatpush1.msra.mxu0 %v2253_v0  ;;  %v2304_v0 = vld [vmem:[%s16834_s6 + $0x288] sm:$0xff] }
 0x1d2   : > { %v2250_v4 = vld [vmem:[%s16834_s6 + $0xd8] sm:$0xff]  ;;  %2718 = vmatprep.subr.mxu0 %v2251_v2 }
 0x1d3   : > { %v2055_v8 = vmax.f32 %v2052_v6, 0.0  ;;  %v8986_v11 = vpop.f32.mrf.mxu1  ;;  %v2248_v6 = vld [vmem:[%s16834_s6 + $0xc8] sm:$0xff]  ;;  %2719 = vmatpush1.msra.mxu0 %v2250_v4  ;;  %v2230_v36 = vld [vmem:[%s16834_s6 + $0x38] sm:$0xff]  ;;  %v2301_v4 = vld [vmem:[%s16834_s6 + $0x270] sm:$0xff] }
 0x1d4   : > { %v2341_v11 = vld [vmem:[%s16834_s6 + $0x3b0] sm:$0xff]  ;;  %2720 = vmatprep.subr.mxu0 %v2248_v6  ;;  %v2302_v2 = vld [vmem:[%s16834_s6 + $0x278] sm:$0xff]  ;;  %v2299_v6 = vld [vmem:[%s16834_s6 + $0x260] sm:$0xff] }
 0x1d5   : > { %2059 = vrot.lane.b32.xlu1 %v2055_v8, %s16794_s12 }
 0x1ea   : > { %v8354_v14 = vpop.f32.mrf.mxu0 }
 0x1ec   : > { %v8355_v15 = vpop.f32.mrf.mxu0 }
 0x1ed   : > { %v8356_v17 = vadd.f32 %v8355_v15, %v8354_v14  ;;  %v2245_v14 = vld [vmem:[%s16834_s6 + $0xb0] sm:$0xff]  ;;  %v2340_v15 = vld [vmem:[%s16834_s6 + $0x3a8] sm:$0xff] }
 0x1ef   : > { %v1803_v19 = vadd.f32 %v8356_v17, %v8321_v10  ;;  %v2244_v17 = vld [vmem:[%s16834_s6 + $0xa8] sm:$0xff]  ;;  %v2338_v10 = vld [vmem:[%s16834_s6 + $0x398] sm:$0xff] }
 0x1f1   : > { %v1873_v24 = vadd.f32 %v8391_v20, %v1803_v19  ;;  %v2242_v19 = vld [vmem:[%s16834_s6 + $0x98] sm:$0xff]  ;;  %v2241_v20 = vld [vmem:[%s16834_s6 + $0x90] sm:$0xff] }
 0x20a   : > { %v8424_v38 = vpop.f32.mrf.mxu0 }
 0x20c   : > { %v8425_v22 = vpop.f32.mrf.mxu0 }
 0x20d   : > { %v8426_v23 = vadd.f32 %v8425_v22, %v8424_v38  ;;  %v2337_v38 = vld [vmem:[%s16834_s6 + $0x390] sm:$0xff]  ;;  %v2335_v22 = vld [vmem:[%s16834_s6 + $0x380] sm:$0xff] }
 0x20f   : > { %v1943_v25 = vadd.f32 %v8426_v23, %v1873_v24  ;;  %v2239_v23 = vld [vmem:[%s16834_s6 + $0x80] sm:$0xff]  ;;  %v2334_v24 = vld [vmem:[%s16834_s6 + $0x378] sm:$0xff] }
 0x211   : > { %v2013_v27 = vadd.f32 %v2012_v7, %v1943_v25  ;;  %v2343_v7 = vld [vmem:[%s16834_s6 + $0x3c0] sm:$0xff]  ;;  %v2238_v25 = vld [vmem:[%s16834_s6 + $0x78] sm:$0xff] }
 0x213   : > { %v2034_v29 = vmul.f32 %v2028_v26, %v2013_v27  ;;  %v2332_v26 = vld [vmem:[%s16834_s6 + $0x368] sm:$0xff] }
 0x214   : > { %v2236_v27 = vld [vmem:[%s16834_s6 + $0x68] sm:$0xff] }
 0x215   : > { %v2053_v30 = vadd.f32 %v2047_v28, %v2034_v29  ;;  %v2331_v28 = vld [vmem:[%s16834_s6 + $0x360] sm:$0xff] }
 0x216   : > { %v2235_v29 = vld [vmem:[%s16834_s6 + $0x60] sm:$0xff] }
 0x217   : > { %v2056_v31 = vmax.f32 %v2053_v30, 0.0  ;;  %v2329_v30 = vld [vmem:[%s16834_s6 + $0x350] sm:$0xff] }
 0x219   : > { %2061 = vrot.lane.b32.xlu0 %v2056_v31, %s16794_s12  ;;  %v2233_v31 = vld [vmem:[%s16834_s6 + $0x50] sm:$0xff]  ;;  %s16841_s12 = sld [smem:[#allocation23_spill]] }
 0x247   : > { %v2060_v37 = vpop.permute.xlu1 %2059 }
 0x28b   : > { %v2062_v39 = vpop.permute.xlu0 %2061 }
 0x28c   : > { %v2063_v41 = vsel %vm1287_vm0, %v2060_v37, %v2062_v39  ;;  %8221 = vmatprep.subr.msk.mxu1 %vm2068_vm2, %v2062_v39  ;;  %v2325_v37 = vld [vmem:[%s16834_s6 + $0x330] sm:$0xff] }
 0x28d   : > { %8222 = vmatpush1.msk.msra.mxu1 %vm2068_vm2, %v2063_v41  ;;  %v2229_v39 = vld [vmem:[%s16834_s6 + $0x30] sm:$0xff]  ;;  %v2227_v41 = vld [vmem:[%s16834_s6 + $0x20] sm:$0xff] }
 0x28e   : > { %8223 = vmatmul.mubr.msk.f32.vlgmr.msra.gmra.mxu1 %vm2064_vm3, %v1280_v40  ;;  %8224 = vmatprep.subr.msk.mxu1 %vm2068_vm2, %v2055_v8  ;;  %v2247_v8 = vld [vmem:[%s16834_s6 + $0xc0] sm:$0xff] }
 0x28f   : > { %8225 = vmatpush1.msk.msra.mxu1 %vm2068_vm2, %v2054_v9  ;;  %2216 = vmatprep.mubr.f32.mxu1 %v9502_v59  ;;  %v2323_v40 = vld [vmem:[%s16834_s6 + $0x320] sm:$0xff]  ;;  %v2322_v9 = vld [vmem:[%s16834_s6 + $0x318] sm:$0xff] }
 0x290   : > { %2777 = vmatprep.subr.mxu1 %v2365_v43  ;;  %2721 = vmatpush1.msra.mxu0 %v2247_v8  ;;  %v2320_v43 = vld [vmem:[%s16834_s6 + $0x308] sm:$0xff]  ;;  %v2298_v8 = vld [vmem:[%s16834_s6 + $0x258] sm:$0xff] }
 0x291   : > { %2722 = vmatprep.subr.mxu0 %v2245_v14  ;;  %v2296_v14 = vld [vmem:[%s16834_s6 + $0x248] sm:$0xff] }
 0x292   : > { %8226 = vmatmul.mubr.msk.f32.vlgmr.msra.gmra.mxu1 %vm2064_vm3, %v1279_v42  ;;  %2723 = vmatpush1.msra.mxu0 %v2244_v17  ;;  %v2226_v42 = vld [vmem:[%s16834_s6 + $0x18] sm:$0xff]  ;;  %v2295_v17 = vld [vmem:[%s16834_s6 + $0x240] sm:$0xff] }
 0x293   : > { %2778 = vmatpush1.msra.mxu1 %v2364_v45  ;;  %2724 = vmatprep.subr.mxu0 %v2242_v19  ;;  %v2319_v45 = vld [vmem:[%s16834_s6 + $0x300] sm:$0xff]  ;;  %v2293_v19 = vld [vmem:[%s16834_s6 + $0x230] sm:$0xff] }
 0x294   : > { %2779 = vmatprep.subr.mxu1 %v2362_v13  ;;  %2725 = vmatpush1.msra.mxu0 %v2241_v20  ;;  %v2413_v13 = vld [vmem:[%s16834_s6 + $0x5f0] sm:$0xff]  ;;  %v2292_v20 = vld [vmem:[%s16834_s6 + $0x228] sm:$0xff] }
 0x295   : > { %2780 = vmatpush1.msra.mxu1 %v2361_v48  ;;  %2726 = vmatprep.subr.mxu0 %v2239_v23  ;;  %v2412_v48 = vld [vmem:[%s16834_s6 + $0x5e8] sm:$0xff]  ;;  %v2290_v23 = vld [vmem:[%s16834_s6 + $0x218] sm:$0xff] }
 0x296   : > { %2781 = vmatprep.subr.mxu1 %v2359_v50  ;;  %2727 = vmatpush1.msra.mxu0 %v2238_v25  ;;  %v2410_v50 = vld [vmem:[%s16834_s6 + $0x5d8] sm:$0xff]  ;;  %v2289_v25 = vld [vmem:[%s16834_s6 + $0x210] sm:$0xff] }
 0x297   : > { %2782 = vmatpush1.msra.mxu1 %v2358_v52  ;;  %2728 = vmatprep.subr.mxu0 %v2236_v27  ;;  %v2409_v52 = vld [vmem:[%s16834_s6 + $0x5d0] sm:$0xff]  ;;  %v2287_v27 = vld [vmem:[%s16834_s6 + $0x200] sm:$0xff] }
 0x298   : > { %2783 = vmatprep.subr.mxu1 %v2356_v54  ;;  %2729 = vmatpush1.msra.mxu0 %v2235_v29  ;;  %v2407_v54 = vld [vmem:[%s16834_s6 + $0x5c0] sm:$0xff]  ;;  %v2286_v29 = vld [vmem:[%s16834_s6 + $0x1f8] sm:$0xff] }
 0x299   : > { %2784 = vmatpush1.msra.mxu1 %v2355_v55  ;;  %2730 = vmatprep.subr.mxu0 %v2233_v31  ;;  %v2406_v55 = vld [vmem:[%s16834_s6 + $0x5b8] sm:$0xff]  ;;  %v2284_v31 = vld [vmem:[%s16834_s6 + $0x1e8] sm:$0xff] }
 0x29a   : > { %2785 = vmatprep.subr.mxu1 %v2353_v58  ;;  %2731 = vmatpush1.msra.mxu0 %v2232_v34  ;;  %v2404_v58 = vld [vmem:[%s16834_s6 + $0x5a8] sm:$0xff]  ;;  %v2283_v34 = vld [vmem:[%s16834_s6 + $0x1e0] sm:$0xff] }
 0x29b   : > { %2786 = vmatpush1.msra.mxu1 %v2352_v18  ;;  %2732 = vmatprep.subr.mxu0 %v2230_v36  ;;  %v2403_v18 = vld [vmem:[%s16834_s6 + $0x5a0] sm:$0xff]  ;;  %v2281_v36 = vld [vmem:[%s16834_s6 + $0x1d0] sm:$0xff] }
 0x29c   : > { %2787 = vmatprep.subr.mxu1 %v2350_v61  ;;  %2733 = vmatpush1.msra.mxu0 %v2229_v39  ;;  %v2401_v61 = vld [vmem:[%s16834_s6 + $0x590] sm:$0xff]  ;;  %v2280_v39 = vld [vmem:[%s16834_s6 + $0x1c8] sm:$0xff] }
 0x29d   : > { %2788 = vmatpush1.msra.mxu1 %v2349_v63  ;;  %2734 = vmatprep.subr.mxu0 %v2227_v41  ;;  %v2400_v63 = vld [vmem:[%s16834_s6 + $0x588] sm:$0xff]  ;;  %v2278_v41 = vld [vmem:[%s16834_s6 + $0x1b8] sm:$0xff] }
 0x29e   : > { %2789 = vmatprep.subr.mxu1 %v2347_v1  ;;  %2735 = vmatpush1.msra.mxu0 %v2226_v42  ;;  %v2398_v1 = vld [vmem:[%s16834_s6 + $0x578] sm:$0xff]  ;;  %v2277_v42 = vld [vmem:[%s16834_s6 + $0x1b0] sm:$0xff] }
 0x29f   : > { %2790 = vmatpush1.msra.mxu1 %v2346_v3  ;;  %2736 = vmatprep.subr.mxu0 %v2224_v44  ;;  %v2397_v3 = vld [vmem:[%s16834_s6 + $0x570] sm:$0xff]  ;;  %v2275_v44 = vld [vmem:[%s16834_s6 + $0x1a0] sm:$0xff] }
 0x2a0   : > { %2791 = vmatprep.subr.mxu1 %v2344_v5  ;;  %2737 = vmatpush1.msra.mxu0 %v2223_v46  ;;  %v2395_v5 = vld [vmem:[%s16834_s6 + $0x560] sm:$0xff]  ;;  %v2274_v46 = vld [vmem:[%s16834_s6 + $0x198] sm:$0xff] }
 0x2a1   : > { %2792 = vmatpush1.msra.mxu1 %v2343_v7  ;;  %2738 = vmatprep.subr.mxu0 %v2317_v47  ;;  %v2394_v7 = vld [vmem:[%s16834_s6 + $0x558] sm:$0xff]  ;;  %v2272_v47 = vld [vmem:[%s16834_s6 + $0x188] sm:$0xff] }
 0x2a2   : > { %2793 = vmatprep.subr.mxu1 %v2341_v11  ;;  %2739 = vmatpush2.msra.mxu0 %v2316_v49  ;;  %v2392_v11 = vld [vmem:[%s16834_s6 + $0x548] sm:$0xff]  ;;  %v2271_v49 = vld [vmem:[%s16834_s6 + $0x180] sm:$0xff] }
 0x2a3   : > { %2794 = vmatpush1.msra.mxu1 %v2340_v15  ;;  %2740 = vmatprep.subr.mxu0 %v2314_v51  ;;  %v2391_v15 = vld [vmem:[%s16834_s6 + $0x540] sm:$0xff] }
 0x2a4   : > { %2795 = vmatprep.subr.mxu1 %v2338_v10  ;;  %2741 = vmatpush2.msra.mxu0 %v2313_v53  ;;  %v2389_v10 = vld [vmem:[%s16834_s6 + $0x530] sm:$0xff] }
 0x2a5   : > { %2796 = vmatpush1.msra.mxu1 %v2337_v38  ;;  %2742 = vmatprep.subr.mxu0 %v2311_v16  ;;  %v2388_v38 = vld [vmem:[%s16834_s6 + $0x528] sm:$0xff] }
 0x2a6   : > { %2797 = vmatprep.subr.mxu1 %v2335_v22  ;;  %2743 = vmatpush2.msra.mxu0 %v2310_v56  ;;  %v2386_v22 = vld [vmem:[%s16834_s6 + $0x518] sm:$0xff] }
 0x2a7   : > { %2798 = vmatpush1.msra.mxu1 %v2334_v24  ;;  %2744 = vmatprep.subr.mxu0 %v2308_v12  ;;  %v2385_v24 = vld [vmem:[%s16834_s6 + $0x510] sm:$0xff] }
 0x2a8   : > { %2799 = vmatprep.subr.mxu1 %v2332_v26  ;;  %2745 = vmatpush2.msra.mxu0 %v2307_v60  ;;  %v2383_v26 = vld [vmem:[%s16834_s6 + $0x500] sm:$0xff] }
 0x2a9   : > { %2800 = vmatpush1.msra.mxu1 %v2331_v28  ;;  %2746 = vmatprep.subr.mxu0 %v2305_v62  ;;  %v2382_v28 = vld [vmem:[%s16834_s6 + $0x4f8] sm:$0xff] }
 0x2aa   : > { %2801 = vmatprep.subr.mxu1 %v2329_v30  ;;  %2747 = vmatpush2.msra.mxu0 %v2304_v0  ;;  %v2380_v30 = vld [vmem:[%s16834_s6 + $0x4e8] sm:$0xff] }
 0x2ab   : > { %2802 = vmatpush1.msra.mxu1 %v2328_v33  ;;  %2748 = vmatprep.subr.mxu0 %v2302_v2  ;;  %v2379_v33 = vld [vmem:[%s16834_s6 + $0x4e0] sm:$0xff] }
 0x2ac   : > { %2803 = vmatprep.subr.mxu1 %v2326_v35  ;;  %2749 = vmatpush2.msra.mxu0 %v2301_v4  ;;  %v2377_v35 = vld [vmem:[%s16834_s6 + $0x4d0] sm:$0xff] }
 0x2ad   : > { %2804 = vmatpush1.msra.mxu1 %v2325_v37  ;;  %2750 = vmatprep.subr.mxu0 %v2299_v6  ;;  %v2376_v37 = vld [vmem:[%s16834_s6 + $0x4c8] sm:$0xff] }
 0x2ae   : > { %2805 = vmatprep.subr.mxu1 %v2323_v40  ;;  %2751 = vmatpush2.msra.mxu0 %v2298_v8  ;;  %v2374_v40 = vld [vmem:[%s16834_s6 + $0x4b8] sm:$0xff]  ;;  %v2556_v6 = vld [vmem:[%s16834_s6 + $0xa68] sm:$0xff] }
 0x2af   : > { %2806 = vmatpush1.msra.mxu1 %v2322_v9  ;;  %2752 = vmatprep.subr.mxu0 %v2296_v14  ;;  %v2373_v9 = vld [vmem:[%s16834_s6 + $0x4b0] sm:$0xff]  ;;  %v2554_v14 = vld [vmem:[%s16834_s6 + $0xa58] sm:$0xff] }
 0x2b0   : > { %2807 = vmatprep.subr.mxu1 %v2320_v43  ;;  %2753 = vmatpush2.msra.mxu0 %v2295_v17  ;;  %v2371_v43 = vld [vmem:[%s16834_s6 + $0x4a0] sm:$0xff]  ;;  %v2458_v17 = vld [vmem:[%s16834_s6 + $0x758] sm:$0xff] }
 0x2b1   : > { %2808 = vmatpush1.msra.mxu1 %v2319_v45  ;;  %2754 = vmatprep.subr.mxu0 %v2293_v19  ;;  %v2370_v45 = vld [vmem:[%s16834_s6 + $0x498] sm:$0xff] }
 0x2b2   : > { %2809 = vmatprep.subr.mxu1 %v2413_v13  ;;  %2755 = vmatpush2.msra.mxu0 %v2292_v20  ;;  %v2368_v13 = vld [vmem:[%s16834_s6 + $0x488] sm:$0xff]  ;;  %v2457_v20 = vld [vmem:[%s16834_s6 + $0x750] sm:$0xff] }
 0x2b3   : > { %2810 = vmatpush2.msra.mxu1 %v2412_v48  ;;  %2756 = vmatprep.subr.mxu0 %v2290_v23  ;;  %v2367_v48 = vld [vmem:[%s16834_s6 + $0x480] sm:$0xff] }
 0x2b4   : > { %2811 = vmatprep.subr.mxu1 %v2410_v50  ;;  %2757 = vmatpush2.msra.mxu0 %v2289_v25  ;;  %v2557_v50 = vld [vmem:[%s16834_s6 + $0xa70] sm:$0xff]  ;;  %v2455_v23 = vld [vmem:[%s16834_s6 + $0x740] sm:$0xff]  ;;  %v2550_v25 = vld [vmem:[%s16834_s6 + $0xa38] sm:$0xff] }
 0x2b5   : > { %2812 = vmatpush2.msra.mxu1 %v2409_v52  ;;  %2758 = vmatprep.subr.mxu0 %v2287_v27  ;;  %v2461_v52 = vld [vmem:[%s16834_s6 + $0x770] sm:$0xff] }
 0x2b6   : > { %2813 = vmatprep.subr.mxu1 %v2407_v54  ;;  %2759 = vmatpush2.msra.mxu0 %v2286_v29  ;;  %v2452_v29 = vld [vmem:[%s16834_s6 + $0x728] sm:$0xff] }
 0x2b7   : > { %2814 = vmatpush2.msra.mxu1 %v2406_v55  ;;  %2760 = vmatprep.subr.mxu0 %v2284_v31 }
 0x2b8   : > { %2815 = vmatprep.subr.mxu1 %v2404_v58  ;;  %2761 = vmatpush2.msra.mxu0 %v2283_v34  ;;  %v2451_v34 = vld [vmem:[%s16834_s6 + $0x720] sm:$0xff] }
 0x2b9   : > { %2816 = vmatpush2.msra.mxu1 %v2403_v18  ;;  %2762 = vmatprep.subr.mxu0 %v2281_v36  ;;  %v2449_v36 = vld [vmem:[%s16834_s6 + $0x710] sm:$0xff] }
 0x2ba   : > { %2817 = vmatprep.subr.mxu1 %v2401_v61  ;;  %2763 = vmatpush2.msra.mxu0 %v2280_v39 }
 0x2bb   : > { %2818 = vmatpush2.msra.mxu1 %v2400_v63  ;;  %2764 = vmatprep.subr.mxu0 %v2278_v41  ;;  %v2542_v41 = vld [vmem:[%s16834_s6 + $0x9f8] sm:$0xff] }
 0x2bc   : > { %2819 = vmatprep.subr.mxu1 %v2398_v1  ;;  %2765 = vmatpush2.msra.mxu0 %v2277_v42  ;;  %v2541_v42 = vld [vmem:[%s16834_s6 + $0x9f0] sm:$0xff] }
 0x2bd   : > { %2820 = vmatpush2.msra.mxu1 %v2397_v3  ;;  %2766 = vmatprep.subr.mxu0 %v2275_v44  ;;  %v2539_v44 = vld [vmem:[%s16834_s6 + $0x9e0] sm:$0xff] }
 0x2be   : > { %2821 = vmatprep.subr.mxu1 %v2395_v5  ;;  %2767 = vmatpush2.msra.mxu0 %v2274_v46  ;;  %v2538_v46 = vld [vmem:[%s16834_s6 + $0x9d8] sm:$0xff] }
 0x2bf   : > { %2822 = vmatpush2.msra.mxu1 %v2394_v7  ;;  %2768 = vmatprep.subr.mxu0 %v2272_v47  ;;  %v2536_v47 = vld [vmem:[%s16834_s6 + $0x9c8] sm:$0xff] }
 0x2c0   : > { %2823 = vmatprep.subr.mxu1 %v2392_v11  ;;  %2769 = vmatpush2.msra.mxu0 %v2271_v49  ;;  %v2460_v11 = vld [vmem:[%s16834_s6 + $0x768] sm:$0xff]  ;;  %v2535_v49 = vld [vmem:[%s16834_s6 + $0x9c0] sm:$0xff] }
 0x2c1   : > { %2824 = vmatpush2.msra.mxu1 %v2391_v15  ;;  %2848 = vmatprep.subr.mxu0 %v2461_v52  ;;  %v2437_v52 = vld [vmem:[%s16834_s6 + $0x6b0] sm:$0xff] }
 0x2c2   : > { %2825 = vmatprep.subr.mxu1 %v2389_v10  ;;  %v2553_v10 = vld [vmem:[%s16834_s6 + $0xa50] sm:$0xff] }
 0x2c3   : > { %2826 = vmatpush2.msra.mxu1 %v2388_v38 }
 0x2c4   : > { %2827 = vmatprep.subr.mxu1 %v2386_v22  ;;  %v2551_v22 = vld [vmem:[%s16834_s6 + $0xa40] sm:$0xff] }
 0x2c5   : > { %2828 = vmatpush2.msra.mxu1 %v2385_v24 }
 0x2c6   : > { %2829 = vmatprep.subr.mxu1 %v2383_v26  ;;  %v2454_v26 = vld [vmem:[%s16834_s6 + $0x738] sm:$0xff] }
 0x2c7   : > { %2830 = vmatpush2.msra.mxu1 %v2382_v28  ;;  %v2548_v28 = vld [vmem:[%s16834_s6 + $0xa28] sm:$0xff] }
 0x2c8   : > { %2831 = vmatprep.subr.mxu1 %v2380_v30 }
 0x2c9   : > { %2832 = vmatpush2.msra.mxu1 %v2379_v33  ;;  %v2547_v33 = vld [vmem:[%s16834_s6 + $0xa20] sm:$0xff] }
 0x2ca   : > { %2833 = vmatprep.subr.mxu1 %v2377_v35  ;;  %v2545_v35 = vld [vmem:[%s16834_s6 + $0xa10] sm:$0xff] }
 0x2cb   : > { %2834 = vmatpush2.msra.mxu1 %v2376_v37  ;;  %v2544_v37 = vld [vmem:[%s16834_s6 + $0xa08] sm:$0xff] }
 0x2cc   : > { %2835 = vmatprep.subr.mxu1 %v2374_v40  ;;  %v2448_v40 = vld [vmem:[%s16834_s6 + $0x708] sm:$0xff] }
 0x2cd   : > { %2836 = vmatpush2.msra.mxu1 %v2373_v9  ;;  %v2446_v9 = vld [vmem:[%s16834_s6 + $0x6f8] sm:$0xff] }
 0x2ce   : > { %2837 = vmatprep.subr.mxu1 %v2371_v43  ;;  %v2445_v43 = vld [vmem:[%s16834_s6 + $0x6f0] sm:$0xff] }
 0x2cf   : > { %2838 = vmatpush2.msra.mxu1 %v2370_v45  ;;  %v2443_v45 = vld [vmem:[%s16834_s6 + $0x6e0] sm:$0xff] }
 0x2d0   : > { %2839 = vmatprep.subr.mxu1 %v2368_v13  ;;  %v2442_v13 = vld [vmem:[%s16834_s6 + $0x6d8] sm:$0xff] }
 0x2d1   : > { %2840 = vmatpush2.msra.mxu1 %v2367_v48  ;;  %v2440_v48 = vld [vmem:[%s16834_s6 + $0x6c8] sm:$0xff] }
 0x2d2   : > { %2919 = vmatprep.subr.mxu1 %v2557_v50  ;;  %v2439_v50 = vld [vmem:[%s16834_s6 + $0x6c0] sm:$0xff] }
 0x34e   : > { %v2139_v51 = vpop.f32.mrf.mxu1 }
 0x350   : > { %v2141_v53 = vpop.f32.mrf.mxu1 }
 0x352   : > { %v2218_v54 = vpop.f32.mrf.mxu1 }
 0x353   : > { %v11492_v16 = vadd.f32 %v2218_v54, %v2139_v51  ;;  %v2533_v51 = vld [vmem:[%s16834_s6 + $0x9b0] sm:$0xff]  ;;  %v2436_v54 = vld [vmem:[%s16834_s6 + $0x6a8] sm:$0xff] }
 0x354   : > { %v2220_v55 = vpop.f32.mrf.mxu1 }
 0x355   : > { %v2221_v56 = vadd.f32 %v2220_v55, %v2141_v53  ;;  %v11495_v58 = vrot.slane %v11492_v16, 1  ;;  %v11505_v62 = vrot.slane %v11492_v16, 2  ;;  %v2532_v53 = vld [vmem:[%s16834_s6 + $0x9a8] sm:$0xff]  ;;  %v2530_v55 = vld [vmem:[%s16834_s6 + $0x998] sm:$0xff] }
 0x357   : > { %2841 = vmatprep.mubr.f32.mxu1 %v11495_v58  ;;  %v9202_v12 = vpack.i.bf16 %v2221_v56, %v11492_v16  ;;  %v2678_v18 = vrot.slane %v2221_v56, 1  ;;  %v2693_v61 = vrot.slane %v2221_v56, 2  ;;  %v2434_v56 = vld [vmem:[%s16834_s6 + $0x698] sm:$0xff] }
 0x359   : > { %9203 = vrot.lane.b32.xlu0 %v9202_v12, %s16835_s0  ;;  %9198 = vrot.lane.b32.xlu1 %v9202_v12, %s16796_s11  ;;  %v9212_v60 = vpack.i.bf16 %v2678_v18, %v11495_v58  ;;  %v9222_v63 = vpack.i.bf16 %v2693_v61, %v11505_v62  ;;  %v2529_v12 = vld [vmem:[%s16834_s6 + $0x990] sm:$0xff]  ;;  %v2431_v61 = vld [vmem:[%s16834_s6 + $0x680] sm:$0xff] }
 0x35a   : > { %v2433_v18 = vld [vmem:[%s16834_s6 + $0x690] sm:$0xff] }
 0x35d   : > { %9213 = vrot.lane.b32.xlu0 %v9212_v60, %s16796_s11  ;;  %9208 = vrot.lane.b32.xlu1 %v9212_v60, %s16835_s0  ;;  %v2527_v60 = vld [vmem:[%s16834_s6 + $0x980] sm:$0xff] }
 0x361   : > { %9223 = vrot.lane.b32.xlu0 %v9222_v63, %s16835_s0  ;;  %9218 = vrot.lane.b32.xlu1 %v9222_v63, %s16796_s11  ;;  %v2526_v63 = vld [vmem:[%s16834_s6 + $0x978] sm:$0xff]  ;;  %s16838_s11 = smov 96  }
 0x3cb   : > { %v9204_v0 = vpop.permute.xlu0 %9203  ;;  %v9199_v1 = vpop.permute.xlu1 %9198 }
 0x3cc   : > { %v9206_v2 = vunpack.i.h.bf16 %v9204_v0  ;;  %v9205_v3 = vunpack.i.l.bf16 %v9204_v0  ;;  %v9201_v4 = vunpack.i.h.bf16 %v9199_v1  ;;  %v9200_v5 = vunpack.i.l.bf16 %v9199_v1  ;;  %v2430_v0 = vld [vmem:[%s16834_s6 + $0x678] sm:$0xff]  ;;  %v2524_v1 = vld [vmem:[%s16834_s6 + $0x968] sm:$0xff] }
 0x3ce   : > { %v11514_v7 = vsel %vm2667_vm4, %v9200_v5, %v9201_v4  ;;  %v11517_v8 = vsel %vm1287_vm0, %v9205_v3, %v9206_v2  ;;  %v2428_v2 = vld [vmem:[%s16834_s6 + $0x668] sm:$0xff]  ;;  %v2523_v3 = vld [vmem:[%s16834_s6 + $0x960] sm:$0xff]  ;;  %v2521_v5 = vld [vmem:[%s16834_s6 + $0x950] sm:$0xff] }
 0x3cf   : > { %2770 = vmatprep.mubr.f32.mxu0 %v11514_v7  ;;  %v9209_v15 = vpop.permute.xlu1 %9208  ;;  %2842 = vmatmul.mubr.f32.vlgmr.msra.gmra.mxu1 %v11517_v8  ;;  %v2427_v4 = vld [vmem:[%s16834_s6 + $0x660] sm:$0xff] }
 0x3d0   : > { %v9211_v19 = vunpack.i.h.bf16 %v9209_v15  ;;  %v9210_v38 = vunpack.i.l.bf16 %v9209_v15  ;;  %2920 = vmatpush1.msra.mxu1 %v2556_v6  ;;  %2771 = vmatmul.mubr.f32.vlgmr.msra.gmra.mxu0 %v11492_v16  ;;  %v2425_v6 = vld [vmem:[%s16834_s6 + $0x650] sm:$0xff]  ;;  %v2518_v15 = vld [vmem:[%s16834_s6 + $0x938] sm:$0xff] }
 0x3d1   : > { %2849 = vmatpush1.msra.mxu0 %v2460_v11  ;;  %2921 = vmatprep.subr.mxu1 %v2554_v14  ;;  %v2520_v11 = vld [vmem:[%s16834_s6 + $0x948] sm:$0xff] }
 0x3d2   : > { %2850 = vmatprep.subr.mxu0 %v2458_v17  ;;  %2922 = vmatpush1.msra.mxu1 %v2553_v10  ;;  %v11544_v24 = vsel %vm1287_vm0, %v9210_v38, %v9211_v19  ;;  %v2424_v14 = vld [vmem:[%s16834_s6 + $0x648] sm:$0xff]  ;;  %v2422_v17 = vld [vmem:[%s16834_s6 + $0x638] sm:$0xff]  ;;  %v2517_v10 = vld [vmem:[%s16834_s6 + $0x930] sm:$0xff] }
 0x3d3   : > { %2851 = vmatpush1.msra.mxu0 %v2457_v20  ;;  %2923 = vmatprep.subr.mxu1 %v2551_v22  ;;  %v9219_v27 = vpop.permute.xlu1 %9218  ;;  %v2421_v19 = vld [vmem:[%s16834_s6 + $0x630] sm:$0xff]  ;;  %v2515_v38 = vld [vmem:[%s16834_s6 + $0x920] sm:$0xff]  ;;  %v2514_v22 = vld [vmem:[%s16834_s6 + $0x918] sm:$0xff] }
 0x3d4   : > { %2852 = vmatprep.subr.mxu0 %v2455_v23  ;;  %v9221_v30 = vunpack.i.h.bf16 %v9219_v27  ;;  %v9220_v31 = vunpack.i.l.bf16 %v9219_v27  ;;  %2912 = vmatprep.mubr.f32.mxu0 %v11544_v24  ;;  %v2419_v20 = vld [vmem:[%s16834_s6 + $0x620] sm:$0xff]  ;;  %v2418_v23 = vld [vmem:[%s16834_s6 + $0x618] sm:$0xff] }
 0x3d5   : > { %2924 = vmatpush1.msra.mxu1 %v2550_v25  ;;  %2853 = vmatpush1.msra.mxu0 %v2454_v26  ;;  %v2512_v25 = vld [vmem:[%s16834_s6 + $0x908] sm:$0xff]  ;;  %v2511_v27 = vld [vmem:[%s16834_s6 + $0x900] sm:$0xff] }
 0x3d6   : > { %2925 = vmatprep.subr.mxu1 %v2548_v28  ;;  %2854 = vmatprep.subr.mxu0 %v2452_v29  ;;  %v11575_v39 = vsel %vm2667_vm4, %v9220_v31, %v9221_v30  ;;  %v2416_v26 = vld [vmem:[%s16834_s6 + $0x608] sm:$0xff]  ;;  %v2415_v28 = vld [vmem:[%s16834_s6 + $0x600] sm:$0xff]  ;;  %v2605_v29 = vld [vmem:[%s16834_s6 + $0xbf0] sm:$0xff] }
 0x3d7   : > { %2926 = vmatpush1.msra.mxu1 %v2547_v33  ;;  %2855 = vmatpush1.msra.mxu0 %v2451_v34  ;;  %v2509_v30 = vld [vmem:[%s16834_s6 + $0x8f0] sm:$0xff]  ;;  %v2604_v31 = vld [vmem:[%s16834_s6 + $0xbe8] sm:$0xff]  ;;  %v2602_v34 = vld [vmem:[%s16834_s6 + $0xbd8] sm:$0xff] }
 0x3d8   : > { %2927 = vmatprep.subr.mxu1 %v2545_v35  ;;  %2856 = vmatprep.subr.mxu0 %v2449_v36  ;;  %v2508_v33 = vld [vmem:[%s16834_s6 + $0x8e8] sm:$0xff]  ;;  %v2506_v35 = vld [vmem:[%s16834_s6 + $0x8d8] sm:$0xff]  ;;  %v2601_v36 = vld [vmem:[%s16834_s6 + $0xbd0] sm:$0xff] }
 0x3d9   : > { %2928 = vmatpush1.msra.mxu1 %v2544_v37  ;;  %2983 = vmatprep.mubr.f32.mxu1 %v11575_v39  ;;  %v2505_v37 = vld [vmem:[%s16834_s6 + $0x8d0] sm:$0xff] }
 0x3da   : > { %2857 = vmatpush1.msra.mxu0 %v2448_v40  ;;  %2929 = vmatprep.subr.mxu1 %v2542_v41  ;;  %v2599_v40 = vld [vmem:[%s16834_s6 + $0xbc0] sm:$0xff] }
 0x3db   : > { %2858 = vmatprep.subr.mxu0 %v2446_v9  ;;  %2930 = vmatpush1.msra.mxu1 %v2541_v42  ;;  %v2503_v41 = vld [vmem:[%s16834_s6 + $0x8c0] sm:$0xff]  ;;  %v2598_v9 = vld [vmem:[%s16834_s6 + $0xbb8] sm:$0xff] }
 0x3dc   : > { %2859 = vmatpush1.msra.mxu0 %v2445_v43  ;;  %2931 = vmatprep.subr.mxu1 %v2539_v44  ;;  %v2502_v42 = vld [vmem:[%s16834_s6 + $0x8b8] sm:$0xff]  ;;  %v2596_v43 = vld [vmem:[%s16834_s6 + $0xba8] sm:$0xff] }
 0x3dd   : > { %2860 = vmatprep.subr.mxu0 %v2443_v45  ;;  %2932 = vmatpush1.msra.mxu1 %v2538_v46  ;;  %v2500_v44 = vld [vmem:[%s16834_s6 + $0x8a8] sm:$0xff]  ;;  %v2595_v45 = vld [vmem:[%s16834_s6 + $0xba0] sm:$0xff] }
 0x3de   : > { %2861 = vmatpush1.msra.mxu0 %v2442_v13  ;;  %2933 = vmatprep.subr.mxu1 %v2536_v47  ;;  %v2499_v46 = vld [vmem:[%s16834_s6 + $0x8a0] sm:$0xff]  ;;  %v2593_v13 = vld [vmem:[%s16834_s6 + $0xb90] sm:$0xff] }
 0x3df   : > { %2862 = vmatprep.subr.mxu0 %v2440_v48  ;;  %2934 = vmatpush1.msra.mxu1 %v2535_v49  ;;  %v2497_v47 = vld [vmem:[%s16834_s6 + $0x890] sm:$0xff]  ;;  %v2592_v48 = vld [vmem:[%s16834_s6 + $0xb88] sm:$0xff] }
 0x3e0   : > { %2863 = vmatpush1.msra.mxu0 %v2439_v50  ;;  %2935 = vmatprep.subr.mxu1 %v2533_v51  ;;  %v2496_v49 = vld [vmem:[%s16834_s6 + $0x888] sm:$0xff]  ;;  %v2590_v50 = vld [vmem:[%s16834_s6 + $0xb78] sm:$0xff] }
 0x3e1   : > { %2864 = vmatprep.subr.mxu0 %v2437_v52  ;;  %2936 = vmatpush1.msra.mxu1 %v2532_v53  ;;  %v2494_v51 = vld [vmem:[%s16834_s6 + $0x878] sm:$0xff]  ;;  %v2589_v52 = vld [vmem:[%s16834_s6 + $0xb70] sm:$0xff] }
 0x3e2   : > { %2865 = vmatpush1.msra.mxu0 %v2436_v54  ;;  %2937 = vmatprep.subr.mxu1 %v2530_v55  ;;  %v2493_v53 = vld [vmem:[%s16834_s6 + $0x870] sm:$0xff]  ;;  %v2587_v54 = vld [vmem:[%s16834_s6 + $0xb60] sm:$0xff] }
 0x3e3   : > { %2866 = vmatprep.subr.mxu0 %v2434_v56  ;;  %2938 = vmatpush1.msra.mxu1 %v2529_v12  ;;  %v2491_v55 = vld [vmem:[%s16834_s6 + $0x860] sm:$0xff]  ;;  %v2586_v56 = vld [vmem:[%s16834_s6 + $0xb58] sm:$0xff] }
 0x3e4   : > { %2867 = vmatpush1.msra.mxu0 %v2433_v18  ;;  %2939 = vmatprep.subr.mxu1 %v2527_v60  ;;  %v2490_v12 = vld [vmem:[%s16834_s6 + $0x858] sm:$0xff]  ;;  %v2584_v18 = vld [vmem:[%s16834_s6 + $0xb48] sm:$0xff] }
 0x3e5   : > { %2868 = vmatprep.subr.mxu0 %v2431_v61  ;;  %2940 = vmatpush1.msra.mxu1 %v2526_v63  ;;  %v2488_v60 = vld [vmem:[%s16834_s6 + $0x848] sm:$0xff]  ;;  %v2583_v61 = vld [vmem:[%s16834_s6 + $0xb40] sm:$0xff] }
 0x3e6   : > { %2869 = vmatpush1.msra.mxu0 %v2430_v0  ;;  %2941 = vmatprep.subr.mxu1 %v2524_v1  ;;  %v2487_v63 = vld [vmem:[%s16834_s6 + $0x840] sm:$0xff]  ;;  %v2581_v0 = vld [vmem:[%s16834_s6 + $0xb30] sm:$0xff] }
 0x3e7   : > { %2870 = vmatprep.subr.mxu0 %v2428_v2  ;;  %2942 = vmatpush1.msra.mxu1 %v2523_v3  ;;  %v2485_v1 = vld [vmem:[%s16834_s6 + $0x830] sm:$0xff]  ;;  %v2580_v2 = vld [vmem:[%s16834_s6 + $0xb28] sm:$0xff] }
 0x3e8   : > { %2871 = vmatpush1.msra.mxu0 %v2427_v4  ;;  %2943 = vmatprep.subr.mxu1 %v2521_v5  ;;  %v2484_v3 = vld [vmem:[%s16834_s6 + $0x828] sm:$0xff]  ;;  %v2578_v4 = vld [vmem:[%s16834_s6 + $0xb18] sm:$0xff] }
 0x3e9   : > { %2872 = vmatprep.subr.mxu0 %v2425_v6  ;;  %2944 = vmatpush1.msra.mxu1 %v2520_v11  ;;  %v2482_v5 = vld [vmem:[%s16834_s6 + $0x818] sm:$0xff]  ;;  %v2577_v6 = vld [vmem:[%s16834_s6 + $0xb10] sm:$0xff] }
 0x3ea   : > { %2873 = vmatpush1.msra.mxu0 %v2424_v14  ;;  %2945 = vmatprep.subr.mxu1 %v2518_v15  ;;  %v2481_v11 = vld [vmem:[%s16834_s6 + $0x810] sm:$0xff]  ;;  %v2575_v14 = vld [vmem:[%s16834_s6 + $0xb00] sm:$0xff] }
 0x3eb   : > { %2874 = vmatprep.subr.mxu0 %v2422_v17  ;;  %2946 = vmatpush1.msra.mxu1 %v2517_v10  ;;  %v2479_v15 = vld [vmem:[%s16834_s6 + $0x800] sm:$0xff]  ;;  %v2574_v17 = vld [vmem:[%s16834_s6 + $0xaf8] sm:$0xff] }
 0x3ec   : > { %2875 = vmatpush1.msra.mxu0 %v2421_v19  ;;  %2947 = vmatprep.subr.mxu1 %v2515_v38  ;;  %v2478_v10 = vld [vmem:[%s16834_s6 + $0x7f8] sm:$0xff]  ;;  %v2572_v19 = vld [vmem:[%s16834_s6 + $0xae8] sm:$0xff] }
 0x3ed   : > { %2876 = vmatprep.subr.mxu0 %v2419_v20  ;;  %2948 = vmatpush1.msra.mxu1 %v2514_v22  ;;  %v2476_v38 = vld [vmem:[%s16834_s6 + $0x7e8] sm:$0xff]  ;;  %v2571_v20 = vld [vmem:[%s16834_s6 + $0xae0] sm:$0xff] }
 0x3ee   : > { %2877 = vmatpush1.msra.mxu0 %v2418_v23  ;;  %2949 = vmatprep.subr.mxu1 %v2512_v25  ;;  %v2475_v22 = vld [vmem:[%s16834_s6 + $0x7e0] sm:$0xff]  ;;  %v2569_v23 = vld [vmem:[%s16834_s6 + $0xad0] sm:$0xff] }
 0x3ef   : > { %2878 = vmatprep.subr.mxu0 %v2416_v26  ;;  %2950 = vmatpush1.msra.mxu1 %v2511_v27  ;;  %v2473_v25 = vld [vmem:[%s16834_s6 + $0x7d0] sm:$0xff]  ;;  %v2568_v26 = vld [vmem:[%s16834_s6 + $0xac8] sm:$0xff] }
 0x3f0   : > { %2879 = vmatpush1.msra.mxu0 %v2415_v28  ;;  %2951 = vmatprep.subr.mxu1 %v2605_v29  ;;  %v2472_v27 = vld [vmem:[%s16834_s6 + $0x7c8] sm:$0xff]  ;;  %v2566_v28 = vld [vmem:[%s16834_s6 + $0xab8] sm:$0xff] }
 0x3f1   : > { %2880 = vmatprep.subr.mxu0 %v2509_v30  ;;  %2952 = vmatpush2.msra.mxu1 %v2604_v31  ;;  %v2470_v29 = vld [vmem:[%s16834_s6 + $0x7b8] sm:$0xff]  ;;  %v2565_v30 = vld [vmem:[%s16834_s6 + $0xab0] sm:$0xff]  ;;  %v9214_v31 = vpop.permute.xlu0 %9213 }
 0x3f2   : > { %2881 = vmatpush2.msra.mxu0 %v2508_v33  ;;  %2953 = vmatprep.subr.mxu1 %v2602_v34  ;;  %v2469_v33 = vld [vmem:[%s16834_s6 + $0x7b0] sm:$0xff]  ;;  %v2563_v34 = vld [vmem:[%s16834_s6 + $0xaa0] sm:$0xff] }
 0x3f3   : > { %2882 = vmatprep.subr.mxu0 %v2506_v35  ;;  %2954 = vmatpush2.msra.mxu1 %v2601_v36  ;;  %v2467_v35 = vld [vmem:[%s16834_s6 + $0x7a0] sm:$0xff]  ;;  %v2562_v36 = vld [vmem:[%s16834_s6 + $0xa98] sm:$0xff] }
 0x3f4   : > { %2883 = vmatpush2.msra.mxu0 %v2505_v37  ;;  %2955 = vmatprep.subr.mxu1 %v2599_v40  ;;  %v2466_v37 = vld [vmem:[%s16834_s6 + $0x798] sm:$0xff]  ;;  %v2560_v40 = vld [vmem:[%s16834_s6 + $0xa88] sm:$0xff] }
 0x3f5   : > { %2884 = vmatprep.subr.mxu0 %v2503_v41  ;;  %2956 = vmatpush2.msra.mxu1 %v2598_v9  ;;  %v9216_v41 = vunpack.i.h.bf16 %v9214_v31  ;;  %v9215_v9 = vunpack.i.l.bf16 %v9214_v31  ;;  %v2623_v31 = vld [vmem:[%s16834_s6 + $0xc80] sm:$0xff] }
 0x3f6   : > { %2885 = vmatpush2.msra.mxu0 %v2502_v42  ;;  %2957 = vmatprep.subr.mxu1 %v2596_v43  ;;  %v2464_v42 = vld [vmem:[%s16834_s6 + $0x788] sm:$0xff]  ;;  %v2559_v43 = vld [vmem:[%s16834_s6 + $0xa80] sm:$0xff] }
 0x3f7   : > { %2886 = vmatprep.subr.mxu0 %v2500_v44  ;;  %2958 = vmatpush2.msra.mxu1 %v2595_v45  ;;  %v2463_v44 = vld [vmem:[%s16834_s6 + $0x780] sm:$0xff]  ;;  %v2318_v45 = vld [vmem:[%s16834_s6 + $0x2f8] sm:$0xff] }
 0x3f8   : > { %2887 = vmatpush2.msra.mxu0 %v2499_v46  ;;  %2959 = vmatprep.subr.mxu1 %v2593_v13  ;;  %v2653_v46 = vld [vmem:[%s16834_s6 + $0xd70] sm:$0xff]  ;;  %v2270_v13 = vld [vmem:[%s16834_s6 + $0x178] sm:$0xff] }
 0x3f9   : > { %2888 = vmatprep.subr.mxu0 %v2497_v47  ;;  %2960 = vmatpush2.msra.mxu1 %v2592_v48  ;;  %v11916_v47 = vsel %vm2667_vm4, %v9215_v9, %v9216_v41  ;;  %v2652_v48 = vld [vmem:[%s16834_s6 + $0xd68] sm:$0xff]  ;;  %v2282_v41 = vld [vmem:[%s16834_s6 + $0x1d8] sm:$0xff]  ;;  %v2617_v9 = vld [vmem:[%s16834_s6 + $0xc50] sm:$0xff] }
 0x3fa   : > { %2889 = vmatpush2.msra.mxu0 %v2496_v49  ;;  %2961 = vmatprep.subr.mxu1 %v2590_v50  ;;  %v2315_v49 = vld [vmem:[%s16834_s6 + $0x2e0] sm:$0xff]  ;;  %v2650_v50 = vld [vmem:[%s16834_s6 + $0xd58] sm:$0xff] }
 0x3fb   : > { %2890 = vmatprep.subr.mxu0 %v2494_v51  ;;  %2962 = vmatpush2.msra.mxu1 %v2589_v52  ;;  %v2267_v51 = vld [vmem:[%s16834_s6 + $0x160] sm:$0xff]  ;;  %v2649_v52 = vld [vmem:[%s16834_s6 + $0xd50] sm:$0xff] }
 0x3fc   : > { %2891 = vmatpush2.msra.mxu0 %v2493_v53  ;;  %2963 = vmatprep.subr.mxu1 %v2587_v54  ;;  %v2312_v53 = vld [vmem:[%s16834_s6 + $0x2c8] sm:$0xff]  ;;  %v2647_v54 = vld [vmem:[%s16834_s6 + $0xd40] sm:$0xff] }
 0x3fd   : > { %2892 = vmatprep.subr.mxu0 %v2491_v55  ;;  %2964 = vmatpush2.msra.mxu1 %v2586_v56  ;;  %v2264_v55 = vld [vmem:[%s16834_s6 + $0x148] sm:$0xff]  ;;  %v2646_v56 = vld [vmem:[%s16834_s6 + $0xd38] sm:$0xff] }
 0x3fe   : > { %2893 = vmatpush2.msra.mxu0 %v2490_v12  ;;  %2965 = vmatprep.subr.mxu1 %v2584_v18  ;;  %v2644_v12 = vld [vmem:[%s16834_s6 + $0xd28] sm:$0xff]  ;;  %v2261_v18 = vld [vmem:[%s16834_s6 + $0x130] sm:$0xff] }
 0x3ff   : > { %2894 = vmatprep.subr.mxu0 %v2488_v60  ;;  %2966 = vmatpush2.msra.mxu1 %v2583_v61  ;;  %v2643_v60 = vld [vmem:[%s16834_s6 + $0xd20] sm:$0xff]  ;;  %v2306_v61 = vld [vmem:[%s16834_s6 + $0x298] sm:$0xff] }
 0x400   : > { %2895 = vmatpush2.msra.mxu0 %v2487_v63  ;;  %2967 = vmatprep.subr.mxu1 %v2581_v0  ;;  %v2641_v63 = vld [vmem:[%s16834_s6 + $0xd10] sm:$0xff]  ;;  %v2258_v0 = vld [vmem:[%s16834_s6 + $0x118] sm:$0xff] }
 0x401   : > { %2896 = vmatprep.subr.mxu0 %v2485_v1  ;;  %2968 = vmatpush2.msra.mxu1 %v2580_v2  ;;  %v2640_v1 = vld [vmem:[%s16834_s6 + $0xd08] sm:$0xff]  ;;  %v2303_v2 = vld [vmem:[%s16834_s6 + $0x280] sm:$0xff] }
 0x402   : > { %2897 = vmatpush2.msra.mxu0 %v2484_v3  ;;  %2969 = vmatprep.subr.mxu1 %v2578_v4  ;;  %v2638_v3 = vld [vmem:[%s16834_s6 + $0xcf8] sm:$0xff]  ;;  %v2255_v4 = vld [vmem:[%s16834_s6 + $0x100] sm:$0xff] }
 0x403   : > { %2898 = vmatprep.subr.mxu0 %v2482_v5  ;;  %2970 = vmatpush2.msra.mxu1 %v2577_v6  ;;  %v2637_v5 = vld [vmem:[%s16834_s6 + $0xcf0] sm:$0xff]  ;;  %v2300_v6 = vld [vmem:[%s16834_s6 + $0x268] sm:$0xff] }
 0x404   : > { %2899 = vmatpush2.msra.mxu0 %v2481_v11  ;;  %2971 = vmatprep.subr.mxu1 %v2575_v14  ;;  %v2635_v11 = vld [vmem:[%s16834_s6 + $0xce0] sm:$0xff]  ;;  %v2252_v14 = vld [vmem:[%s16834_s6 + $0xe8] sm:$0xff] }
 0x405   : > { %2900 = vmatprep.subr.mxu0 %v2479_v15  ;;  %2972 = vmatpush2.msra.mxu1 %v2574_v17  ;;  %v2634_v15 = vld [vmem:[%s16834_s6 + $0xcd8] sm:$0xff]  ;;  %v2297_v17 = vld [vmem:[%s16834_s6 + $0x250] sm:$0xff] }
 0x406   : > { %2901 = vmatpush2.msra.mxu0 %v2478_v10  ;;  %2973 = vmatprep.subr.mxu1 %v2572_v19  ;;  %v2632_v10 = vld [vmem:[%s16834_s6 + $0xcc8] sm:$0xff]  ;;  %v2249_v19 = vld [vmem:[%s16834_s6 + $0xd0] sm:$0xff] }
 0x407   : > { %2902 = vmatprep.subr.mxu0 %v2476_v38  ;;  %2974 = vmatpush2.msra.mxu1 %v2571_v20  ;;  %v2631_v38 = vld [vmem:[%s16834_s6 + $0xcc0] sm:$0xff]  ;;  %v2294_v20 = vld [vmem:[%s16834_s6 + $0x238] sm:$0xff] }
 0x408   : > { %2903 = vmatpush2.msra.mxu0 %v2475_v22  ;;  %2975 = vmatprep.subr.mxu1 %v2569_v23  ;;  %v2629_v22 = vld [vmem:[%s16834_s6 + $0xcb0] sm:$0xff]  ;;  %v2246_v23 = vld [vmem:[%s16834_s6 + $0xb8] sm:$0xff] }
 0x409   : > { %2904 = vmatprep.subr.mxu0 %v2473_v25  ;;  %2976 = vmatpush2.msra.mxu1 %v2568_v26  ;;  %v2628_v25 = vld [vmem:[%s16834_s6 + $0xca8] sm:$0xff]  ;;  %v2291_v26 = vld [vmem:[%s16834_s6 + $0x220] sm:$0xff] }
 0x40a   : > { %2905 = vmatpush2.msra.mxu0 %v2472_v27  ;;  %2977 = vmatprep.subr.mxu1 %v2566_v28  ;;  %v2626_v27 = vld [vmem:[%s16834_s6 + $0xc98] sm:$0xff]  ;;  %v2243_v28 = vld [vmem:[%s16834_s6 + $0xa0] sm:$0xff] }
 0x40b   : > { %2906 = vmatprep.subr.mxu0 %v2470_v29  ;;  %2978 = vmatpush2.msra.mxu1 %v2565_v30  ;;  %v2625_v29 = vld [vmem:[%s16834_s6 + $0xc90] sm:$0xff]  ;;  %v2288_v30 = vld [vmem:[%s16834_s6 + $0x208] sm:$0xff] }
 0x40c   : > { %2907 = vmatpush2.msra.mxu0 %v2469_v33  ;;  %2979 = vmatprep.subr.mxu1 %v2563_v34  ;;  %v2240_v33 = vld [vmem:[%s16834_s6 + $0x88] sm:$0xff]  ;;  %v2622_v34 = vld [vmem:[%s16834_s6 + $0xc78] sm:$0xff] }
 0x40d   : > { %2908 = vmatprep.subr.mxu0 %v2467_v35  ;;  %2980 = vmatpush2.msra.mxu1 %v2562_v36  ;;  %v2285_v35 = vld [vmem:[%s16834_s6 + $0x1f0] sm:$0xff]  ;;  %v2620_v36 = vld [vmem:[%s16834_s6 + $0xc68] sm:$0xff] }
 0x40e   : > { %2909 = vmatpush2.msra.mxu0 %v2466_v37  ;;  %2981 = vmatprep.subr.mxu1 %v2560_v40  ;;  %v2237_v37 = vld [vmem:[%s16834_s6 + $0x70] sm:$0xff]  ;;  %v2619_v40 = vld [vmem:[%s16834_s6 + $0xc60] sm:$0xff] }
 0x40f   : > { %2910 = vmatprep.subr.mxu0 %v2464_v42  ;;  %2982 = vmatpush2.msra.mxu1 %v2559_v43  ;;  %v2234_v42 = vld [vmem:[%s16834_s6 + $0x58] sm:$0xff]  ;;  %v2616_v43 = vld [vmem:[%s16834_s6 + $0xc48] sm:$0xff] }
 0x410   : > { %2911 = vmatpush2.msra.mxu0 %v2463_v44  ;;  %2984 = vmatmul.mubr.f32.vlgmr.msra.gmra.mxu1 %v11505_v62  ;;  %v2279_v44 = vld [vmem:[%s16834_s6 + $0x1c0] sm:$0xff] }
 0x411   : > { %8444 = vmatprep.subr.mxu1 %v2318_v45  ;;  %2913 = vmatmul.mubr.f32.vlgmr.msra.gmra.mxu0 %v11916_v47  ;;  %v2614_v45 = vld [vmem:[%s16834_s6 + $0xc38] sm:$0xff] }
 0x412   : > { %2990 = vmatprep.subr.mxu0 %v2653_v46  ;;  %8445 = vmatpush3.msra.mxu1 %v2270_v13  ;;  %v2231_v46 = vld [vmem:[%s16834_s6 + $0x40] sm:$0xff]  ;;  %v2613_v13 = vld [vmem:[%s16834_s6 + $0xc30] sm:$0xff] }
 0x413   : > { %3125 = vmatprep.mubr.f32.mxu1 %v11514_v7  ;;  %2991 = vmatpush1.msra.mxu0 %v2652_v48  ;;  %v2309_v7 = vld [vmem:[%s16834_s6 + $0x2b0] sm:$0xff]  ;;  %v9224_v48 = vpop.permute.xlu0 %9223 }
 0x414   : > { %8446 = vmatprep.subr.mxu1 %v2315_v49  ;;  %2992 = vmatprep.subr.mxu0 %v2650_v50  ;;  %v2276_v49 = vld [vmem:[%s16834_s6 + $0x1a8] sm:$0xff]  ;;  %v2611_v50 = vld [vmem:[%s16834_s6 + $0xc20] sm:$0xff] }
 0x415   : > { %8447 = vmatpush3.msra.mxu1 %v2267_v51  ;;  %2993 = vmatpush1.msra.mxu0 %v2649_v52  ;;  %v2228_v51 = vld [vmem:[%s16834_s6 + $0x28] sm:$0xff]  ;;  %v2610_v52 = vld [vmem:[%s16834_s6 + $0xc18] sm:$0xff] }
 0x416   : > { %8448 = vmatprep.subr.mxu1 %v2312_v53  ;;  %2994 = vmatprep.subr.mxu0 %v2647_v54  ;;  %v2273_v53 = vld [vmem:[%s16834_s6 + $0x190] sm:$0xff]  ;;  %v2608_v54 = vld [vmem:[%s16834_s6 + $0xc08] sm:$0xff] }
 0x417   : > { %8449 = vmatpush3.msra.mxu1 %v2264_v55  ;;  %2995 = vmatpush1.msra.mxu0 %v2646_v56  ;;  %v9226_v55 = vunpack.i.h.bf16 %v9224_v48  ;;  %v9225_v56 = vunpack.i.l.bf16 %v9224_v48  ;;  %v2477_v48 = vld [vmem:[%s16834_s6 + $0x7f0] sm:$0xff] }
 0x418   : > { %8450 = vmatprep.subr.mxu1 %v2309_v7  ;;  %2996 = vmatprep.subr.mxu0 %v2644_v12  ;;  %v2225_v7 = vld [vmem:[%s16834_s6 + $0x10] sm:$0xff]  ;;  %v2607_v12 = vld [vmem:[%s16834_s6 + $0xc00] sm:$0xff] }
 0x419   : > { %8451 = vmatpush3.msra.mxu1 %v2261_v18  ;;  %2997 = vmatpush1.msra.mxu0 %v2643_v60  ;;  %v2510_v18 = vld [vmem:[%s16834_s6 + $0x8f8] sm:$0xff] }
 0x41a   : > { %8452 = vmatprep.subr.mxu1 %v2306_v61  ;;  %2998 = vmatprep.subr.mxu0 %v2641_v63  ;;  %v2414_v60 = vld [vmem:[%s16834_s6 + $0x5f8] sm:$0xff]  ;;  %v12115_v63 = vsel %vm1287_vm0, %v9225_v56, %v9226_v55  ;;  %v2471_v56 = vld [vmem:[%s16834_s6 + $0x7c0] sm:$0xff] }
 0x41b   : > { %8453 = vmatpush3.msra.mxu1 %v2258_v0  ;;  %2999 = vmatpush1.msra.mxu0 %v2640_v1  ;;  %v2462_v61 = vld [vmem:[%s16834_s6 + $0x778] sm:$0xff]  ;;  %v2507_v1 = vld [vmem:[%s16834_s6 + $0x8e0] sm:$0xff] }
 0x41c   : > { %8454 = vmatprep.subr.mxu1 %v2303_v2  ;;  %3000 = vmatprep.subr.mxu0 %v2638_v3  ;;  %v2366_v0 = vld [vmem:[%s16834_s6 + $0x478] sm:$0xff]  ;;  %v2459_v2 = vld [vmem:[%s16834_s6 + $0x760] sm:$0xff] }
 0x41d   : > { %8455 = vmatpush3.msra.mxu1 %v2255_v4  ;;  %3001 = vmatpush1.msra.mxu0 %v2637_v5  ;;  %v2363_v3 = vld [vmem:[%s16834_s6 + $0x460] sm:$0xff]  ;;  %v2504_v4 = vld [vmem:[%s16834_s6 + $0x8c8] sm:$0xff]  ;;  %v2330_v55 = vld [vmem:[%s16834_s6 + $0x358] sm:$0xff] }
 0x41e   : > { %8456 = vmatprep.subr.mxu1 %v2300_v6  ;;  %3002 = vmatprep.subr.mxu0 %v2635_v11  ;;  %v2408_v5 = vld [vmem:[%s16834_s6 + $0x5c8] sm:$0xff]  ;;  %v2501_v11 = vld [vmem:[%s16834_s6 + $0x8b0] sm:$0xff] }
 0x41f   : > { %8457 = vmatpush3.msra.mxu1 %v2252_v14  ;;  %3003 = vmatpush1.msra.mxu0 %v2634_v15  ;;  %v2360_v6 = vld [vmem:[%s16834_s6 + $0x448] sm:$0xff]  ;;  %v2453_v14 = vld [vmem:[%s16834_s6 + $0x730] sm:$0xff] }
 0x420   : > { %8458 = vmatprep.subr.mxu1 %v2297_v17  ;;  %3004 = vmatprep.subr.mxu0 %v2632_v10  ;;  %v2357_v15 = vld [vmem:[%s16834_s6 + $0x430] sm:$0xff]  ;;  %v2498_v17 = vld [vmem:[%s16834_s6 + $0x898] sm:$0xff] }
 0x421   : > { %8459 = vmatpush3.msra.mxu1 %v2249_v19  ;;  %3005 = vmatpush1.msra.mxu0 %v2631_v38  ;;  %v2402_v10 = vld [vmem:[%s16834_s6 + $0x598] sm:$0xff] }
 0x422   : > { %8460 = vmatprep.subr.mxu1 %v2294_v20  ;;  %3006 = vmatprep.subr.mxu0 %v2629_v22  ;;  %v2450_v19 = vld [vmem:[%s16834_s6 + $0x718] sm:$0xff]  ;;  %v2495_v20 = vld [vmem:[%s16834_s6 + $0x880] sm:$0xff] }
 0x423   : > { %8461 = vmatpush3.msra.mxu1 %v2246_v23  ;;  %3007 = vmatpush1.msra.mxu0 %v2628_v25  ;;  %v2354_v38 = vld [vmem:[%s16834_s6 + $0x418] sm:$0xff]  ;;  %v2399_v22 = vld [vmem:[%s16834_s6 + $0x580] sm:$0xff] }
 0x424   : > { %8462 = vmatprep.subr.mxu1 %v2291_v26  ;;  %3008 = vmatprep.subr.mxu0 %v2626_v27  ;;  %v2447_v23 = vld [vmem:[%s16834_s6 + $0x700] sm:$0xff]  ;;  %v2492_v26 = vld [vmem:[%s16834_s6 + $0x868] sm:$0xff] }
 0x425   : > { %8463 = vmatpush3.msra.mxu1 %v2243_v28  ;;  %3009 = vmatpush1.msra.mxu0 %v2625_v29  ;;  %v2351_v25 = vld [vmem:[%s16834_s6 + $0x400] sm:$0xff]  ;;  %v2396_v27 = vld [vmem:[%s16834_s6 + $0x568] sm:$0xff] }
 0x426   : > { %8464 = vmatprep.subr.mxu1 %v2288_v30  ;;  %3010 = vmatprep.subr.mxu0 %v2623_v31  ;;  %v2444_v28 = vld [vmem:[%s16834_s6 + $0x6e8] sm:$0xff]  ;;  %v2489_v30 = vld [vmem:[%s16834_s6 + $0x850] sm:$0xff] }
 0x427   : > { %8465 = vmatpush3.msra.mxu1 %v2240_v33  ;;  %3011 = vmatpush1.msra.mxu0 %v2622_v34  ;;  %v2348_v29 = vld [vmem:[%s16834_s6 + $0x3e8] sm:$0xff]  ;;  %v2393_v31 = vld [vmem:[%s16834_s6 + $0x550] sm:$0xff] }
 0x428   : > { %8466 = vmatprep.subr.mxu1 %v2285_v35  ;;  %3012 = vmatprep.subr.mxu0 %v2620_v36  ;;  %v2441_v33 = vld [vmem:[%s16834_s6 + $0x6d0] sm:$0xff]  ;;  %v2486_v35 = vld [vmem:[%s16834_s6 + $0x838] sm:$0xff] }
 0x429   : > { %8467 = vmatpush3.msra.mxu1 %v2237_v37  ;;  %3013 = vmatpush1.msra.mxu0 %v2619_v40  ;;  %v2345_v34 = vld [vmem:[%s16834_s6 + $0x3d0] sm:$0xff]  ;;  %v2390_v36 = vld [vmem:[%s16834_s6 + $0x538] sm:$0xff] }
 0x42a   : > { %8468 = vmatprep.subr.mxu1 %v2282_v41  ;;  %3014 = vmatprep.subr.mxu0 %v2617_v9  ;;  %v2438_v37 = vld [vmem:[%s16834_s6 + $0x6b8] sm:$0xff]  ;;  %v2483_v41 = vld [vmem:[%s16834_s6 + $0x820] sm:$0xff] }
 0x42b   : > { %8469 = vmatpush3.msra.mxu1 %v2234_v42  ;;  %3015 = vmatpush1.msra.mxu0 %v2616_v43  ;;  %v2342_v40 = vld [vmem:[%s16834_s6 + $0x3b8] sm:$0xff]  ;;  %v2387_v9 = vld [vmem:[%s16834_s6 + $0x520] sm:$0xff] }
 0x42c   : > { %8470 = vmatprep.subr.mxu1 %v2279_v44  ;;  %3016 = vmatprep.subr.mxu0 %v2614_v45  ;;  %v2435_v42 = vld [vmem:[%s16834_s6 + $0x6a0] sm:$0xff]  ;;  %v2480_v44 = vld [vmem:[%s16834_s6 + $0x808] sm:$0xff] }
 0x42d   : > { %8471 = vmatpush3.msra.mxu1 %v2231_v46  ;;  %3017 = vmatpush1.msra.mxu0 %v2613_v13  ;;  %v2339_v43 = vld [vmem:[%s16834_s6 + $0x3a0] sm:$0xff]  ;;  %v2384_v45 = vld [vmem:[%s16834_s6 + $0x508] sm:$0xff] }
 0x42e   : > { %8472 = vmatprep.subr.mxu1 %v2276_v49  ;;  %3018 = vmatprep.subr.mxu0 %v2611_v50  ;;  %v2432_v46 = vld [vmem:[%s16834_s6 + $0x688] sm:$0xff]  ;;  %v2381_v49 = vld [vmem:[%s16834_s6 + $0x4f0] sm:$0xff] }
 0x42f   : > { %8473 = vmatpush3.msra.mxu1 %v2228_v51  ;;  %3019 = vmatpush1.msra.mxu0 %v2610_v52  ;;  %v2336_v13 = vld [vmem:[%s16834_s6 + $0x388] sm:$0xff]  ;;  %v2429_v50 = vld [vmem:[%s16834_s6 + $0x670] sm:$0xff]  ;;  %v2474_v52 = vld [vmem:[%s16834_s6 + $0x7d8] sm:$0xff] }
 0x430   : > { %8474 = vmatprep.subr.mxu1 %v2273_v53  ;;  %3020 = vmatprep.subr.mxu0 %v2608_v54  ;;  %v2333_v51 = vld [vmem:[%s16834_s6 + $0x370] sm:$0xff]  ;;  %v2378_v53 = vld [vmem:[%s16834_s6 + $0x4d8] sm:$0xff] }
 0x431   : > { %8475 = vmatpush3.msra.mxu1 %v2225_v7  ;;  %3021 = vmatpush1.msra.mxu0 %v2607_v12  ;;  %v2426_v54 = vld [vmem:[%s16834_s6 + $0x658] sm:$0xff]  ;;  %v2375_v7 = vld [vmem:[%s16834_s6 + $0x4c0] sm:$0xff] }
 0x432   : > { %3054 = vmatprep.mubr.f32.mxu0 %v9502_v59  ;;  %3126 = vmatmul.mubr.f32.vlgmr.msra.gmra.mxu1 %v11492_v16  ;;  %v2411_v16 = vld [vmem:[%s16834_s6 + $0x5e0] sm:$0xff] }
 0x433   : > { %8514 = vmatprep.subr.mxu1 %v2510_v18  ;;  %3055 = vmatmul.mubr.f32.vlgmr.msra.gmra.mxu0 %v12115_v63  ;;  %v2423_v12 = vld [vmem:[%s16834_s6 + $0x640] sm:$0xff] }
 0x434   : > { %8479 = vmatprep.subr.mxu0 %v2414_v60  ;;  %8515 = vmatpush3.msra.mxu1 %v2462_v61  ;;  %v2327_v18 = vld [vmem:[%s16834_s6 + $0x340] sm:$0xff]  ;;  %v2468_v60 = vld [vmem:[%s16834_s6 + $0x7a8] sm:$0xff] }
 0x435   : > { %3265 = vmatprep.mubr.f32.mxu1 %v11544_v24  ;;  %8480 = vmatpush3.msra.mxu0 %v2366_v0  ;;  %v2456_v24 = vld [vmem:[%s16834_s6 + $0x748] sm:$0xff] }
 0x436   : > { %3195 = vmatprep.mubr.f32.mxu0 %v11495_v58  ;;  %8516 = vmatprep.subr.mxu1 %v2507_v1  ;;  %v2405_v58 = vld [vmem:[%s16834_s6 + $0x5b0] sm:$0xff]  ;;  %v2372_v61 = vld [vmem:[%s16834_s6 + $0x4a8] sm:$0xff] }
 0x437   : > { %8481 = vmatprep.subr.mxu0 %v2411_v16  ;;  %8517 = vmatpush3.msra.mxu1 %v2459_v2  ;;  %v2420_v0 = vld [vmem:[%s16834_s6 + $0x628] sm:$0xff]  ;;  %v2465_v16 = vld [vmem:[%s16834_s6 + $0x790] sm:$0xff] }
 0x438   : > { %8482 = vmatpush3.msra.mxu0 %v2363_v3  ;;  %8518 = vmatprep.subr.mxu1 %v2504_v4  ;;  %v2324_v1 = vld [vmem:[%s16834_s6 + $0x328] sm:$0xff]  ;;  %v2369_v2 = vld [vmem:[%s16834_s6 + $0x490] sm:$0xff] }
 0x439   : > { %8483 = vmatprep.subr.mxu0 %v2408_v5  ;;  %8519 = vmatpush3.msra.mxu1 %v2456_v24  ;;  %v2417_v3 = vld [vmem:[%s16834_s6 + $0x610] sm:$0xff]  ;;  %v2606_v5 = vld [vmem:[%s16834_s6 + $0xbf8] sm:$0xff] }
 0x43a   : > { %8484 = vmatpush3.msra.mxu0 %v2360_v6  ;;  %8520 = vmatprep.subr.mxu1 %v2501_v11  ;;  %v2321_v4 = vld [vmem:[%s16834_s6 + $0x310] sm:$0xff]  ;;  %v2654_v24 = vld [vmem:[%s16834_s6 + $0xd78] sm:$0xff]  ;;  %v2603_v11 = vld [vmem:[%s16834_s6 + $0xbe0] sm:$0xff] }
 0x43b   : > { %8485 = vmatprep.subr.mxu0 %v2405_v58  ;;  %8521 = vmatpush3.msra.mxu1 %v2453_v14  ;;  %v2558_v6 = vld [vmem:[%s16834_s6 + $0xa78] sm:$0xff]  ;;  %v2651_v58 = vld [vmem:[%s16834_s6 + $0xd60] sm:$0xff]  ;;  %v2648_v14 = vld [vmem:[%s16834_s6 + $0xd48] sm:$0xff] }
 0x43c   : > { %8486 = vmatpush3.msra.mxu0 %v2357_v15  ;;  %8522 = vmatprep.subr.mxu1 %v2498_v17  ;;  %v2552_v15 = vld [vmem:[%s16834_s6 + $0xa48] sm:$0xff]  ;;  %v2645_v17 = vld [vmem:[%s16834_s6 + $0xd30] sm:$0xff] }
 0x43d   : > { %8487 = vmatprep.subr.mxu0 %v2402_v10  ;;  %8523 = vmatpush3.msra.mxu1 %v2450_v19  ;;  %v2549_v10 = vld [vmem:[%s16834_s6 + $0xa30] sm:$0xff]  ;;  %v2594_v19 = vld [vmem:[%s16834_s6 + $0xb98] sm:$0xff] }
 0x43e   : > { %8488 = vmatpush3.msra.mxu0 %v2354_v38  ;;  %8524 = vmatprep.subr.mxu1 %v2495_v20  ;;  %v2642_v38 = vld [vmem:[%s16834_s6 + $0xd18] sm:$0xff] }
 0x43f   : > { %8489 = vmatprep.subr.mxu0 %v2399_v22  ;;  %8525 = vmatpush3.msra.mxu1 %v2447_v23  ;;  %v2546_v20 = vld [vmem:[%s16834_s6 + $0xa18] sm:$0xff]  ;;  %v2591_v22 = vld [vmem:[%s16834_s6 + $0xb80] sm:$0xff] }
 0x440   : > { %8490 = vmatpush3.msra.mxu0 %v2351_v25  ;;  %8526 = vmatprep.subr.mxu1 %v2492_v26  ;;  %v2639_v23 = vld [vmem:[%s16834_s6 + $0xd00] sm:$0xff]  ;;  %v2588_v26 = vld [vmem:[%s16834_s6 + $0xb68] sm:$0xff] }
 0x441   : > { %8491 = vmatprep.subr.mxu0 %v2396_v27  ;;  %8527 = vmatpush3.msra.mxu1 %v2444_v28  ;;  %v2543_v25 = vld [vmem:[%s16834_s6 + $0xa00] sm:$0xff]  ;;  %v2636_v27 = vld [vmem:[%s16834_s6 + $0xce8] sm:$0xff] }
 0x442   : > { %8492 = vmatpush3.msra.mxu0 %v2348_v29  ;;  %8528 = vmatprep.subr.mxu1 %v2489_v30  ;;  %v2540_v28 = vld [vmem:[%s16834_s6 + $0x9e8] sm:$0xff]  ;;  %v2585_v29 = vld [vmem:[%s16834_s6 + $0xb50] sm:$0xff] }
 0x443   : > { %8493 = vmatprep.subr.mxu0 %v2393_v31  ;;  %8529 = vmatpush3.msra.mxu1 %v2441_v33  ;;  %v2633_v30 = vld [vmem:[%s16834_s6 + $0xcd0] sm:$0xff]  ;;  %v2582_v33 = vld [vmem:[%s16834_s6 + $0xb38] sm:$0xff] }
 0x444   : > { %8494 = vmatpush3.msra.mxu0 %v2345_v34  ;;  %8530 = vmatprep.subr.mxu1 %v2486_v35  ;;  %v2537_v31 = vld [vmem:[%s16834_s6 + $0x9d0] sm:$0xff]  ;;  %v2630_v34 = vld [vmem:[%s16834_s6 + $0xcb8] sm:$0xff] }
 0x445   : > { %8495 = vmatprep.subr.mxu0 %v2390_v36  ;;  %8531 = vmatpush3.msra.mxu1 %v2438_v37  ;;  %v2534_v35 = vld [vmem:[%s16834_s6 + $0x9b8] sm:$0xff]  ;;  %v2579_v36 = vld [vmem:[%s16834_s6 + $0xb20] sm:$0xff] }
 0x446   : > { %8496 = vmatpush3.msra.mxu0 %v2342_v40  ;;  %8532 = vmatprep.subr.mxu1 %v2483_v41  ;;  %v2627_v37 = vld [vmem:[%s16834_s6 + $0xca0] sm:$0xff]  ;;  %v2576_v41 = vld [vmem:[%s16834_s6 + $0xb08] sm:$0xff] }
 0x447   : > { %8497 = vmatprep.subr.mxu0 %v2387_v9  ;;  %8533 = vmatpush3.msra.mxu1 %v2435_v42  ;;  %v2531_v40 = vld [vmem:[%s16834_s6 + $0x9a0] sm:$0xff]  ;;  %v2624_v9 = vld [vmem:[%s16834_s6 + $0xc88] sm:$0xff] }
 0x448   : > { %8498 = vmatpush3.msra.mxu0 %v2339_v43  ;;  %8534 = vmatprep.subr.mxu1 %v2480_v44  ;;  %v2528_v42 = vld [vmem:[%s16834_s6 + $0x988] sm:$0xff]  ;;  %v2573_v43 = vld [vmem:[%s16834_s6 + $0xaf0] sm:$0xff] }
 0x449   : > { %8499 = vmatprep.subr.mxu0 %v2384_v45  ;;  %8535 = vmatpush3.msra.mxu1 %v2432_v46  ;;  %v2621_v44 = vld [vmem:[%s16834_s6 + $0xc70] sm:$0xff]  ;;  %v2570_v46 = vld [vmem:[%s16834_s6 + $0xad8] sm:$0xff] }
 0x44a   : > { %8500 = vmatpush3.msra.mxu0 %v2336_v13  ;;  %8536 = vmatprep.subr.mxu1 %v2477_v48  ;;  %v2525_v45 = vld [vmem:[%s16834_s6 + $0x970] sm:$0xff]  ;;  %v2618_v13 = vld [vmem:[%s16834_s6 + $0xc58] sm:$0xff] }
 0x44b   : > { %8501 = vmatprep.subr.mxu0 %v2381_v49  ;;  %8537 = vmatpush3.msra.mxu1 %v2429_v50  ;;  %v2522_v48 = vld [vmem:[%s16834_s6 + $0x958] sm:$0xff]  ;;  %v2567_v49 = vld [vmem:[%s16834_s6 + $0xac0] sm:$0xff] }
 0x44c   : > { %8502 = vmatpush3.msra.mxu0 %v2333_v51  ;;  %8538 = vmatprep.subr.mxu1 %v2474_v52  ;;  %v2615_v50 = vld [vmem:[%s16834_s6 + $0xc40] sm:$0xff]  ;;  %v2564_v52 = vld [vmem:[%s16834_s6 + $0xaa8] sm:$0xff] }
 0x44d   : > { %8503 = vmatprep.subr.mxu0 %v2378_v53  ;;  %8539 = vmatpush3.msra.mxu1 %v2426_v54  ;;  %v2519_v51 = vld [vmem:[%s16834_s6 + $0x940] sm:$0xff]  ;;  %v2612_v53 = vld [vmem:[%s16834_s6 + $0xc28] sm:$0xff] }
 0x44e   : > { %8504 = vmatpush3.msra.mxu0 %v2330_v55  ;;  %8540 = vmatprep.subr.mxu1 %v2471_v56  ;;  %v2516_v54 = vld [vmem:[%s16834_s6 + $0x928] sm:$0xff]  ;;  %v2561_v55 = vld [vmem:[%s16834_s6 + $0xa90] sm:$0xff] }
 0x44f   : > { %8505 = vmatprep.subr.mxu0 %v2375_v7  ;;  %8541 = vmatpush3.msra.mxu1 %v2423_v12  ;;  %v2609_v56 = vld [vmem:[%s16834_s6 + $0xc10] sm:$0xff] }
 0x450   : > { %8506 = vmatpush3.msra.mxu0 %v2327_v18  ;;  %8542 = vmatprep.subr.mxu1 %v2468_v60  ;;  %v2513_v7 = vld [vmem:[%s16834_s6 + $0x910] sm:$0xff] }
 0x451   : > { %8507 = vmatprep.subr.mxu0 %v2372_v61  ;;  %8543 = vmatpush3.msra.mxu1 %v2420_v0 }
 0x452   : > { %8508 = vmatpush3.msra.mxu0 %v2324_v1  ;;  %8544 = vmatprep.subr.mxu1 %v2465_v16 }
 0x453   : > { %8509 = vmatprep.subr.mxu0 %v2369_v2  ;;  %8545 = vmatpush3.msra.mxu1 %v2417_v3 }
 0x454   : > { %8510 = vmatpush3.msra.mxu0 %v2321_v4  ;;  %3266 = vmatmul.mubr.f32.vlgmr.msra.gmra.mxu1 %v11916_v47  ;;  %v2555_v47 = vld [vmem:[%s16834_s6 + $0xa60] sm:$0xff] }
 0x455   : > { %8987 = vmatprep.subr.mxu1 %v9502_v59  ;;  %3196 = vmatmul.mubr.f32.vlgmr.msra.gmra.mxu0 %v11517_v8  ;;  %v2600_v8 = vld [vmem:[%s16834_s6 + $0xbc8] sm:$0xff] }
 0x456   : > { %8549 = vmatprep.subr.mxu0 %v2606_v5  ;;  %8988 = vmatpush3.msra.mxu1 %v2654_v24 }
 0x457   : > { %8550 = vmatpush3.msra.mxu0 %v2558_v6  ;;  %3335 = vmatprep.mubr.f32.mxu0 %v11575_v39  ;;  %v2597_v39 = vld [vmem:[%s16834_s6 + $0xbb0] sm:$0xff] }
 0x458   : > { %8989 = vmatprep.subr.mxu1 %v9502_v59  ;;  %8551 = vmatprep.subr.mxu0 %v2603_v11 }
 0x459   : > { %8990 = vmatpush3.msra.mxu1 %v2651_v58  ;;  %8552 = vmatpush3.msra.mxu0 %v2555_v47 }
 0x45a   : > { %8991 = vmatprep.subr.mxu1 %v9502_v59  ;;  %8553 = vmatprep.subr.mxu0 %v2600_v8 }
 0x45b   : > { %8992 = vmatpush3.msra.mxu1 %v2648_v14  ;;  %8554 = vmatpush3.msra.mxu0 %v2552_v15 }
 0x45c   : > { %8993 = vmatprep.subr.mxu1 %v9502_v59  ;;  %8555 = vmatprep.subr.mxu0 %v2597_v39 }
 0x45d   : > { %8994 = vmatpush3.msra.mxu1 %v2645_v17  ;;  %8556 = vmatpush3.msra.mxu0 %v2549_v10 }
 0x45e   : > { %8995 = vmatprep.subr.mxu1 %v9502_v59  ;;  %8557 = vmatprep.subr.mxu0 %v2594_v19 }
 0x45f   : > { %8996 = vmatpush3.msra.mxu1 %v2642_v38  ;;  %8558 = vmatpush3.msra.mxu0 %v2546_v20 }
 0x460   : > { %8997 = vmatprep.subr.mxu1 %v9502_v59  ;;  %8559 = vmatprep.subr.mxu0 %v2591_v22 }
 0x461   : > { %8998 = vmatpush3.msra.mxu1 %v2639_v23  ;;  %8560 = vmatpush3.msra.mxu0 %v2543_v25 }
 0x462   : > { %8999 = vmatprep.subr.mxu1 %v9502_v59  ;;  %8561 = vmatprep.subr.mxu0 %v2588_v26 }
 0x463   : > { %9000 = vmatpush3.msra.mxu1 %v2636_v27  ;;  %8562 = vmatpush3.msra.mxu0 %v2540_v28 }
 0x464   : > { %9001 = vmatprep.subr.mxu1 %v9502_v59  ;;  %8563 = vmatprep.subr.mxu0 %v2585_v29 }
 0x465   : > { %9002 = vmatpush3.msra.mxu1 %v2633_v30  ;;  %8564 = vmatpush3.msra.mxu0 %v2537_v31 }
 0x466   : > { %9003 = vmatprep.subr.mxu1 %v9502_v59  ;;  %8565 = vmatprep.subr.mxu0 %v2582_v33 }
 0x467   : > { %9004 = vmatpush3.msra.mxu1 %v2630_v34  ;;  %8566 = vmatpush3.msra.mxu0 %v2534_v35 }
 0x468   : > { %9005 = vmatprep.subr.mxu1 %v9502_v59  ;;  %8567 = vmatprep.subr.mxu0 %v2579_v36 }
 0x469   : > { %9006 = vmatpush3.msra.mxu1 %v2627_v37  ;;  %8568 = vmatpush3.msra.mxu0 %v2531_v40 }
 0x46a   : > { %9007 = vmatprep.subr.mxu1 %v9502_v59  ;;  %8569 = vmatprep.subr.mxu0 %v2576_v41 }
 0x46b   : > { %9008 = vmatpush3.msra.mxu1 %v2624_v9  ;;  %8570 = vmatpush3.msra.mxu0 %v2528_v42  ;;  %v2657_v9 = vld [vmem:[%s16839_s29] sm:$0xff] }
 0x46c   : > { %9009 = vmatprep.subr.mxu1 %v9502_v59  ;;  %8571 = vmatprep.subr.mxu0 %v2573_v43 }
 0x46d   : > { %9010 = vmatpush3.msra.mxu1 %v2621_v44  ;;  %8572 = vmatpush3.msra.mxu0 %v2525_v45 }
 0x46e   : > { %9011 = vmatprep.subr.mxu1 %v9502_v59  ;;  %8573 = vmatprep.subr.mxu0 %v2570_v46 }
 0x46f   : > { %9012 = vmatpush3.msra.mxu1 %v2618_v13  ;;  %8574 = vmatpush3.msra.mxu0 %v2522_v48 }
 0x470   : > { %9013 = vmatprep.subr.mxu1 %v9502_v59  ;;  %8575 = vmatprep.subr.mxu0 %v2567_v49  ;;  %v2658_v49 = vld [vmem:[%s16839_s29 + $0x8] sm:$0x3] }
 0x471   : > { %9014 = vmatpush3.msra.mxu1 %v2615_v50  ;;  %8576 = vmatpush3.msra.mxu0 %v2519_v51 }
 0x472   : > { %9015 = vmatprep.subr.mxu1 %v9502_v59  ;;  %8577 = vmatprep.subr.mxu0 %v2564_v52 }
 0x473   : > { %9016 = vmatpush3.msra.mxu1 %v2612_v53  ;;  %8578 = vmatpush3.msra.mxu0 %v2516_v54 }
 0x474   : > { %9017 = vmatprep.subr.mxu1 %v9502_v59  ;;  %8579 = vmatprep.subr.mxu0 %v2561_v55  ;;  %v2659_v55 = vld [vmem:[%s16840_s10] sm:$0xff] }
 0x475   : > { %9018 = vmatpush3.msra.mxu1 %v2609_v56  ;;  %9019 = vmatprep.mubr.msk.f32.mxu1 %vm9503_vm1, %v9502_v59 }
 0x476   : > { %8580 = vmatpush3.msra.mxu0 %v2513_v7  ;;  %9020 = vmatmul.mubr.f32.vlgmr.msra.gmra.mxu1 %v12115_v63  ;;  %v2655_v63 = vld [vmem:[%s16836_s30] sm:$0x7]  ;;  %v2660_v7 = vld [vmem:[%s16840_s10 + $0x8] sm:$0x3]  ;;  %s9506_s30 = smov 120  }
 0x477   : > { %3336 = vmatmul.mubr.f32.vlgmr.msra.gmra.mxu0 %v11505_v62  ;;  %3623 = vmatprep.mubr.f32.mxu1 %v9502_v59  ;;  %v2656_v62 = vld [vmem:[%s16837_s7] sm:$0x7]  ;;  %v3415_v6 = vrot.slane %v2655_v63, %v11090_v32  ;;  %v3419_v14 = vrot.slane %v2655_v63, %v11074_v57  ;;  %v3423_v46 = vrot.slane %v2655_v63, %v11085_v21  ;;  %v3771_v63 = vld [vmem:[%s16841_s12 + $0x438] sm:$0xff]  ;;  %s836_s7 = sand.u32 1, %s9491_s5  }
 0x478   : > { %3535 = vmatprep.mubr.f32.mxu0 %v9502_v59  ;;  %v3434_v15 = vrot.slane %v2656_v62, %v11090_v32  ;;  %v3438_v19 = vrot.slane %v2656_v62, %v11074_v57  ;;  %v3442_v48 = vrot.slane %v2656_v62, %v11085_v21  ;;  %v3769_v62 = vld [vmem:[%s16841_s12 + $0x428] sm:$0xff]  ;;  %s9132_s9 = smul.u32 192, %s836_s7 }
 0x47a   : > { %s16644_s4 = scalar_lea.vmem [#allocation2], %s9132_s9  ;;  %s9443_s9 = sshll.u32 %s9508_s28, 4  ;;  %s9444_s9 = int_to_ptr.vmem [resolvable:$false] %s9443_s9 }
 0x48f   : > { %v2843_v18 = vpop.f32.mrf.mxu1 }
 0x490   : > { %v2772_v12 = vpop.f32.mrf.mxu0 }
 0x491   : > { %v2845_v0 = vpop.f32.mrf.mxu1  ;;  %v2844_v1 = vadd.f32 %v2843_v18, %v2772_v12  ;;  %v3778_v12 = vld [vmem:[%s16841_s12 + $0x470] sm:$0xff] }
 0x492   : > { %v2774_v60 = vpop.f32.mrf.mxu0  ;;  %v3682_v18 = vld [vmem:[%s16841_s12 + $0x170] sm:$0xff] }
 0x493   : > { %v2846_v2 = vadd.f32 %v2845_v0, %v2774_v60  ;;  %v3777_v60 = vld [vmem:[%s16841_s12 + $0x468] sm:$0xff]  ;;  %v3775_v0 = vld [vmem:[%s16841_s12 + $0x458] sm:$0xff] }
 0x4d0   : > { %v2985_v4 = vpop.f32.mrf.mxu1 }
 0x4d1   : > { %v2914_v61 = vpop.f32.mrf.mxu0 }
 0x4d2   : > { %v2915_v3 = vadd.f32 %v2914_v61, %v2844_v1  ;;  %v2987_v11 = vpop.f32.mrf.mxu1  ;;  %v3681_v61 = vld [vmem:[%s16841_s12 + $0x168] sm:$0xff]  ;;  %v3679_v1 = vld [vmem:[%s16841_s12 + $0x158] sm:$0xff] }
 0x4d3   : > { %v2916_v16 = vpop.f32.mrf.mxu0 }
 0x4d4   : > { %v2917_v5 = vadd.f32 %v2916_v16, %v2846_v2  ;;  %v2986_v24 = vadd.f32 %v2985_v4, %v2915_v3  ;;  %v3774_v16 = vld [vmem:[%s16841_s12 + $0x450] sm:$0xff]  ;;  %v3772_v3 = vld [vmem:[%s16841_s12 + $0x440] sm:$0xff] }
 0x4d5   : > { %v3678_v2 = vld [vmem:[%s16841_s12 + $0x150] sm:$0xff]  ;;  %v3676_v4 = vld [vmem:[%s16841_s12 + $0x140] sm:$0xff] }
 0x4d6   : > { %v2988_v8 = vadd.f32 %v2987_v11, %v2917_v5  ;;  %v3675_v5 = vld [vmem:[%s16841_s12 + $0x138] sm:$0xff]  ;;  %v3672_v11 = vld [vmem:[%s16841_s12 + $0x120] sm:$0xff] }
 0x4f2   : > { %v8476_v26 = vpop.f32.mrf.mxu1 }
 0x4f3   : > { %v3056_v58 = vpop.f32.mrf.mxu0 }
 0x4f4   : > { %v3057_v47 = vadd.f32 %v3056_v58, %v2986_v24  ;;  %v8477_v28 = vpop.f32.mrf.mxu1  ;;  %v3673_v24 = vld [vmem:[%s16841_s12 + $0x128] sm:$0xff]  ;;  %v3766_v58 = vld [vmem:[%s16841_s12 + $0x410] sm:$0xff] }
 0x4f5   : > { %v3058_v39 = vpop.f32.mrf.mxu0  ;;  %v8478_v33 = vadd.f32 %v8477_v28, %v8476_v26  ;;  %v3756_v26 = vld [vmem:[%s16841_s12 + $0x3c0] sm:$0xff]  ;;  %v3754_v28 = vld [vmem:[%s16841_s12 + $0x3b0] sm:$0xff] }
 0x4f6   : > { %v3427_v17 = vmul.f32 %v3415_v6, %v3057_v47  ;;  %v3059_v10 = vadd.f32 %v3058_v39, %v2988_v8  ;;  %v3768_v6 = vld [vmem:[%s16841_s12 + $0x420] sm:$0xff]  ;;  %v3670_v47 = vld [vmem:[%s16841_s12 + $0x110] sm:$0xff]  ;;  %v3765_v8 = vld [vmem:[%s16841_s12 + $0x408] sm:$0xff] }
 0x4f7   : > { %v3667_v39 = vld [vmem:[%s16841_s12 + $0xf8] sm:$0xff] }
 0x4f8   : > { %v3428_v38 = vmul.f32 %v3419_v14, %v3059_v10  ;;  %v3446_v20 = vadd.f32 %v3434_v15, %v3427_v17  ;;  %v3669_v14 = vld [vmem:[%s16841_s12 + $0x108] sm:$0xff]  ;;  %v3763_v15 = vld [vmem:[%s16841_s12 + $0x3f8] sm:$0xff]  ;;  %v3762_v17 = vld [vmem:[%s16841_s12 + $0x3f0] sm:$0xff] }
 0x4f9   : > { %v3666_v10 = vld [vmem:[%s16841_s12 + $0xf0] sm:$0xff] }
 0x4fa   : > { %v3447_v22 = vadd.f32 %v3438_v19, %v3428_v38  ;;  %v3449_v25 = vmax.f32 %v3446_v20, 0.0  ;;  %v3760_v19 = vld [vmem:[%s16841_s12 + $0x3e0] sm:$0xff]  ;;  %v3759_v20 = vld [vmem:[%s16841_s12 + $0x3d8] sm:$0xff] }
 0x4fb   : > { %v3664_v38 = vld [vmem:[%s16841_s12 + $0xe0] sm:$0xff] }
 0x4fc   : > { %v3450_v23 = vmax.f32 %v3447_v22, 0.0  ;;  %v3663_v22 = vld [vmem:[%s16841_s12 + $0xd8] sm:$0xff] }
 0x4fe   : > { %3454 = vrot.lane.b32.xlu1 %v3450_v23, %s16838_s11  ;;  %8231 = vmatprep.subr.msk.mxu1 %vm3466_vm5, %v3450_v23  ;;  %v3757_v23 = vld [vmem:[%s16841_s12 + $0x3c8] sm:$0xff] }
 0x4ff   : > { %8232 = vmatpush1.msk.msra.mxu1 %vm3466_vm5, %v3449_v25  ;;  %v3661_v25 = vld [vmem:[%s16841_s12 + $0xc8] sm:$0xff] }
 0x500   : > { %8233 = vmatmul.mubr.msk.f32.vlgmr.msra.gmra.mxu1 %vm3459_vm6, %v2657_v9  ;;  %4204 = vmatprep.subr.mxu1 %v3778_v12  ;;  %v3651_v9 = vld [vmem:[%s16841_s12 + $0x78] sm:$0xff]  ;;  %v3733_v12 = vld [vmem:[%s16841_s12 + $0x308] sm:$0xff] }
 0x501   : > { %3629 = vmatprep.mubr.f32.mxu1 %v9502_v59  ;;  %4205 = vmatpush1.msra.mxu1 %v3777_v60  ;;  %v3732_v60 = vld [vmem:[%s16841_s12 + $0x300] sm:$0xff] }
 0x502   : > { %4206 = vmatprep.subr.mxu1 %v3775_v0  ;;  %v3826_v0 = vld [vmem:[%s16841_s12 + $0x5f0] sm:$0xff] }
 0x503   : > { %4207 = vmatpush1.msra.mxu1 %v3774_v16  ;;  %v3825_v16 = vld [vmem:[%s16841_s12 + $0x5e8] sm:$0xff] }
 0x504   : > { %8234 = vmatmul.mubr.msk.f32.gmra.mxu1 %vm3459_vm6, %v2658_v49  ;;  %4208 = vmatprep.subr.mxu1 %v3772_v3  ;;  %v3645_v49 = vld [vmem:[%s16841_s12 + $0x48] sm:$0xff]  ;;  %v3823_v3 = vld [vmem:[%s16841_s12 + $0x5d8] sm:$0xff] }
 0x505   : > { %4209 = vmatpush1.msra.mxu1 %v3771_v63  ;;  %v3822_v63 = vld [vmem:[%s16841_s12 + $0x5d0] sm:$0xff] }
 0x506   : > { %4210 = vmatprep.subr.mxu1 %v3769_v62  ;;  %v3820_v62 = vld [vmem:[%s16841_s12 + $0x5c0] sm:$0xff] }
 0x507   : > { %4211 = vmatpush1.msra.mxu1 %v3768_v6  ;;  %v3819_v6 = vld [vmem:[%s16841_s12 + $0x5b8] sm:$0xff] }
 0x508   : > { %4212 = vmatprep.subr.mxu1 %v3766_v58  ;;  %v3817_v58 = vld [vmem:[%s16841_s12 + $0x5a8] sm:$0xff] }
 0x509   : > { %4213 = vmatpush1.msra.mxu1 %v3765_v8  ;;  %v3816_v8 = vld [vmem:[%s16841_s12 + $0x5a0] sm:$0xff] }
 0x50a   : > { %4214 = vmatprep.subr.mxu1 %v3763_v15  ;;  %v3814_v15 = vld [vmem:[%s16841_s12 + $0x590] sm:$0xff] }
 0x50b   : > { %4215 = vmatpush1.msra.mxu1 %v3762_v17  ;;  %v3813_v17 = vld [vmem:[%s16841_s12 + $0x588] sm:$0xff] }
 0x50c   : > { %4216 = vmatprep.subr.mxu1 %v3760_v19  ;;  %v3811_v19 = vld [vmem:[%s16841_s12 + $0x578] sm:$0xff] }
 0x50d   : > { %4217 = vmatpush1.msra.mxu1 %v3759_v20  ;;  %v3810_v20 = vld [vmem:[%s16841_s12 + $0x570] sm:$0xff] }
 0x50e   : > { %4218 = vmatprep.subr.mxu1 %v3757_v23  ;;  %v3808_v23 = vld [vmem:[%s16841_s12 + $0x560] sm:$0xff] }
 0x50f   : > { %4219 = vmatpush1.msra.mxu1 %v3756_v26  ;;  %v3807_v26 = vld [vmem:[%s16841_s12 + $0x558] sm:$0xff] }
 0x510   : > { %4220 = vmatprep.subr.mxu1 %v3754_v28  ;;  %v3805_v28 = vld [vmem:[%s16841_s12 + $0x548] sm:$0xff] }
 0x514   : > { %v8546_v30 = vpop.f32.mrf.mxu1 }
 0x515   : > { %v8511_v27 = vpop.f32.mrf.mxu0 }
 0x516   : > { %v8547_v34 = vpop.f32.mrf.mxu1 }
 0x517   : > { %v8512_v29 = vpop.f32.mrf.mxu0  ;;  %v8548_v40 = vadd.f32 %v8547_v34, %v8546_v30  ;;  %v3753_v30 = vld [vmem:[%s16841_s12 + $0x3a8] sm:$0xff]  ;;  %v3655_v34 = vld [vmem:[%s16841_s12 + $0x98] sm:$0xff] }
 0x518   : > { %v8513_v31 = vadd.f32 %v8512_v29, %v8511_v27  ;;  %v3660_v27 = vld [vmem:[%s16841_s12 + $0xc0] sm:$0xff]  ;;  %v3658_v29 = vld [vmem:[%s16841_s12 + $0xb0] sm:$0xff]  ;;  %4221 = vmatpush1.msra.mxu1 %v3753_v30 }
 0x519   : > { %v3804_v30 = vld [vmem:[%s16841_s12 + $0x540] sm:$0xff] }
 0x51a   : > { %v3198_v35 = vadd.f32 %v8513_v31, %v8478_v33  ;;  %v3657_v31 = vld [vmem:[%s16841_s12 + $0xa8] sm:$0xff]  ;;  %v3751_v33 = vld [vmem:[%s16841_s12 + $0x398] sm:$0xff] }
 0x51b   : > { %4222 = vmatprep.subr.mxu1 %v3751_v33  ;;  %v3802_v33 = vld [vmem:[%s16841_s12 + $0x530] sm:$0xff] }
 0x51c   : > { %v3268_v43 = vadd.f32 %v8548_v40, %v3198_v35  ;;  %v3750_v35 = vld [vmem:[%s16841_s12 + $0x390] sm:$0xff]  ;;  %v3652_v40 = vld [vmem:[%s16841_s12 + $0x80] sm:$0xff] }
 0x51d   : > { %4223 = vmatpush1.msra.mxu1 %v3750_v35  ;;  %v3801_v35 = vld [vmem:[%s16841_s12 + $0x528] sm:$0xff] }
 0x536   : > { %v3407_v36 = vpop.f32.mrf.mxu1 }
 0x537   : > { %v8581_v37 = vpop.f32.mrf.mxu0 }
 0x538   : > { %v9021_v41 = vpop.f32.mrf.mxu1 }
 0x539   : > { %v8582_v42 = vpop.f32.mrf.mxu0  ;;  %v3747_v41 = vld [vmem:[%s16841_s12 + $0x378] sm:$0xff] }
 0x53a   : > { %v8583_v44 = vadd.f32 %v8582_v42, %v8581_v37  ;;  %v3748_v37 = vld [vmem:[%s16841_s12 + $0x380] sm:$0xff]  ;;  %v3745_v42 = vld [vmem:[%s16841_s12 + $0x368] sm:$0xff] }
 0x53b   : > { %4224 = vmatprep.subr.mxu1 %v3748_v37  ;;  %v3799_v37 = vld [vmem:[%s16841_s12 + $0x518] sm:$0xff] }
 0x53c   : > { %v3338_v45 = vadd.f32 %v8583_v44, %v3268_v43  ;;  %v3649_v43 = vld [vmem:[%s16841_s12 + $0x68] sm:$0xff]  ;;  %v3744_v44 = vld [vmem:[%s16841_s12 + $0x360] sm:$0xff]  ;;  %4225 = vmatpush1.msra.mxu1 %v3747_v41  ;;  %v3798_v41 = vld [vmem:[%s16841_s12 + $0x510] sm:$0xff] }
 0x53d   : > { %4226 = vmatprep.subr.mxu1 %v3745_v42  ;;  %v3796_v42 = vld [vmem:[%s16841_s12 + $0x500] sm:$0xff] }
 0x53e   : > { %v3408_v13 = vadd.f32 %v3407_v36, %v3338_v45  ;;  %v3654_v36 = vld [vmem:[%s16841_s12 + $0x90] sm:$0xff]  ;;  %v3648_v45 = vld [vmem:[%s16841_s12 + $0x60] sm:$0xff]  ;;  %4227 = vmatpush1.msra.mxu1 %v3744_v44  ;;  %v3795_v44 = vld [vmem:[%s16841_s12 + $0x4f8] sm:$0xff] }
 0x540   : > { %v3429_v50 = vmul.f32 %v3423_v46, %v3408_v13  ;;  %v3742_v46 = vld [vmem:[%s16841_s12 + $0x350] sm:$0xff] }
 0x541   : > { %v3646_v13 = vld [vmem:[%s16841_s12 + $0x50] sm:$0xff]  ;;  %4228 = vmatprep.subr.mxu1 %v3742_v46  ;;  %v3793_v46 = vld [vmem:[%s16841_s12 + $0x4e8] sm:$0xff] }
 0x542   : > { %v3448_v51 = vadd.f32 %v3442_v48, %v3429_v50  ;;  %v3741_v48 = vld [vmem:[%s16841_s12 + $0x348] sm:$0xff]  ;;  %v3739_v50 = vld [vmem:[%s16841_s12 + $0x338] sm:$0xff] }
 0x543   : > { %4229 = vmatpush1.msra.mxu1 %v3741_v48  ;;  %v3792_v48 = vld [vmem:[%s16841_s12 + $0x4e0] sm:$0xff] }
 0x544   : > { %v3451_v52 = vmax.f32 %v3448_v51, 0.0  ;;  %v3643_v51 = vld [vmem:[%s16841_s12 + $0x38] sm:$0xff]  ;;  %4230 = vmatprep.subr.mxu1 %v3739_v50  ;;  %v3790_v50 = vld [vmem:[%s16841_s12 + $0x4d0] sm:$0xff] }
 0x546   : > { %3456 = vrot.lane.b32.xlu0 %v3451_v52, %s16838_s11  ;;  %v3738_v52 = vld [vmem:[%s16841_s12 + $0x330] sm:$0xff] }
 0x547   : > { %4231 = vmatpush1.msra.mxu1 %v3738_v52  ;;  %v3789_v52 = vld [vmem:[%s16841_s12 + $0x4c8] sm:$0xff] }
 0x570   : > { %v3455_v53 = vpop.permute.xlu1 %3454 }
 0x5b8   : > { %v3457_v54 = vpop.permute.xlu0 %3456 }
 0x5b9   : > { %v3458_v56 = vsel %vm2667_vm4, %v3455_v53, %v3457_v54  ;;  %8227 = vmatprep.subr.msk.mxu0 %vm3466_vm5, %v3457_v54  ;;  %v3642_v53 = vld [vmem:[%s16841_s12 + $0x30] sm:$0xff]  ;;  %v3736_v54 = vld [vmem:[%s16841_s12 + $0x320] sm:$0xff] }
 0x5ba   : > { %8228 = vmatpush1.msk.msra.mxu0 %vm3466_vm5, %v3458_v56  ;;  %v3735_v56 = vld [vmem:[%s16841_s12 + $0x318] sm:$0xff]  ;;  %4232 = vmatprep.subr.mxu1 %v3736_v54 }
 0x5bb   : > { %8229 = vmatmul.mubr.msk.f32.vlgmr.msra.gmra.mxu0 %vm3459_vm6, %v2659_v55  ;;  %4133 = vmatprep.subr.mxu0 %v3682_v18  ;;  %v3640_v55 = vld [vmem:[%s16841_s12 + $0x20] sm:$0xff]  ;;  %v3637_v18 = vld [vmem:[%s16841_s12 + $0x8] sm:$0xff]  ;;  %v3787_v54 = vld [vmem:[%s16841_s12 + $0x4b8] sm:$0xff] }
 0x5bc   : > { %3541 = vmatprep.mubr.f32.mxu0 %v9502_v59  ;;  %4134 = vmatpush1.msra.mxu0 %v3681_v61  ;;  %v3636_v61 = vld [vmem:[%s16841_s12] sm:$0xff] }
 0x5bd   : > { %4135 = vmatprep.subr.mxu0 %v3679_v1  ;;  %4233 = vmatpush1.msra.mxu1 %v3735_v56  ;;  %v3730_v1 = vld [vmem:[%s16841_s12 + $0x2f0] sm:$0xff] }
 0x5be   : > { %4136 = vmatpush1.msra.mxu0 %v3678_v2  ;;  %4234 = vmatprep.subr.mxu1 %v3733_v12  ;;  %v3729_v2 = vld [vmem:[%s16841_s12 + $0x2e8] sm:$0xff]  ;;  %v3786_v56 = vld [vmem:[%s16841_s12 + $0x4b0] sm:$0xff]  ;;  %v3784_v12 = vld [vmem:[%s16841_s12 + $0x4a0] sm:$0xff] }
 0x5bf   : > { %8230 = vmatmul.mubr.msk.f32.gmra.mxu0 %vm3459_vm6, %v2660_v7  ;;  %4137 = vmatprep.subr.mxu0 %v3676_v4  ;;  %v3639_v7 = vld [vmem:[%s16841_s12 + $0x18] sm:$0xff] }
 0x5c0   : > { %4138 = vmatpush1.msra.mxu0 %v3675_v5  ;;  %4235 = vmatpush1.msra.mxu1 %v3732_v60  ;;  %v3727_v4 = vld [vmem:[%s16841_s12 + $0x2d8] sm:$0xff]  ;;  %v3726_v5 = vld [vmem:[%s16841_s12 + $0x2d0] sm:$0xff] }
 0x5c1   : > { %4139 = vmatprep.subr.mxu0 %v3673_v24  ;;  %4236 = vmatprep.subr.mxu1 %v3826_v0  ;;  %v3724_v24 = vld [vmem:[%s16841_s12 + $0x2c0] sm:$0xff]  ;;  %v3783_v60 = vld [vmem:[%s16841_s12 + $0x498] sm:$0xff] }
 0x5c2   : > { %4140 = vmatpush1.msra.mxu0 %v3672_v11  ;;  %4237 = vmatpush2.msra.mxu1 %v3825_v16  ;;  %v3723_v11 = vld [vmem:[%s16841_s12 + $0x2b8] sm:$0xff]  ;;  %v3685_v16 = vld [vmem:[%s16841_s12 + $0x188] sm:$0xff] }
 0x5c3   : > { %4141 = vmatprep.subr.mxu0 %v3670_v47  ;;  %4238 = vmatprep.subr.mxu1 %v3823_v3  ;;  %v3721_v47 = vld [vmem:[%s16841_s12 + $0x2a8] sm:$0xff]  ;;  %v3687_v0 = vld [vmem:[%s16841_s12 + $0x198] sm:$0xff]  ;;  %v3684_v3 = vld [vmem:[%s16841_s12 + $0x180] sm:$0xff] }
 0x5c4   : > { %4142 = vmatpush1.msra.mxu0 %v3669_v14  ;;  %4239 = vmatpush2.msra.mxu1 %v3822_v63  ;;  %v3720_v14 = vld [vmem:[%s16841_s12 + $0x2a0] sm:$0xff]  ;;  %v3874_v63 = vld [vmem:[%s16841_s12 + $0x770] sm:$0xff] }
 0x5c5   : > { %4143 = vmatprep.subr.mxu0 %v3667_v39  ;;  %4240 = vmatprep.subr.mxu1 %v3820_v62  ;;  %v3718_v39 = vld [vmem:[%s16841_s12 + $0x290] sm:$0xff] }
 0x5c6   : > { %4144 = vmatpush1.msra.mxu0 %v3666_v10  ;;  %4241 = vmatpush2.msra.mxu1 %v3819_v6  ;;  %v3717_v10 = vld [vmem:[%s16841_s12 + $0x288] sm:$0xff] }
 0x5c7   : > { %4145 = vmatprep.subr.mxu0 %v3664_v38  ;;  %4242 = vmatprep.subr.mxu1 %v3817_v58  ;;  %v3715_v38 = vld [vmem:[%s16841_s12 + $0x278] sm:$0xff] }
 0x5c8   : > { %4146 = vmatpush1.msra.mxu0 %v3663_v22  ;;  %4243 = vmatpush2.msra.mxu1 %v3816_v8  ;;  %v3714_v22 = vld [vmem:[%s16841_s12 + $0x270] sm:$0xff] }
 0x5c9   : > { %4147 = vmatprep.subr.mxu0 %v3661_v25  ;;  %4244 = vmatprep.subr.mxu1 %v3814_v15  ;;  %v3712_v25 = vld [vmem:[%s16841_s12 + $0x260] sm:$0xff] }
 0x5ca   : > { %4148 = vmatpush1.msra.mxu0 %v3660_v27  ;;  %4245 = vmatpush2.msra.mxu1 %v3813_v17  ;;  %v3711_v27 = vld [vmem:[%s16841_s12 + $0x258] sm:$0xff] }
 0x5cb   : > { %4149 = vmatprep.subr.mxu0 %v3658_v29  ;;  %4246 = vmatprep.subr.mxu1 %v3811_v19  ;;  %v3709_v29 = vld [vmem:[%s16841_s12 + $0x248] sm:$0xff] }
 0x5cc   : > { %4150 = vmatpush1.msra.mxu0 %v3657_v31  ;;  %4247 = vmatpush2.msra.mxu1 %v3810_v20  ;;  %v3708_v31 = vld [vmem:[%s16841_s12 + $0x240] sm:$0xff] }
 0x5cd   : > { %4151 = vmatprep.subr.mxu0 %v3655_v34  ;;  %4248 = vmatprep.subr.mxu1 %v3808_v23  ;;  %v3706_v34 = vld [vmem:[%s16841_s12 + $0x230] sm:$0xff] }
 0x5ce   : > { %4152 = vmatpush1.msra.mxu0 %v3654_v36  ;;  %4249 = vmatpush2.msra.mxu1 %v3807_v26  ;;  %v3705_v36 = vld [vmem:[%s16841_s12 + $0x228] sm:$0xff] }
 0x5cf   : > { %4153 = vmatprep.subr.mxu0 %v3652_v40  ;;  %4250 = vmatprep.subr.mxu1 %v3805_v28  ;;  %v3703_v40 = vld [vmem:[%s16841_s12 + $0x218] sm:$0xff] }
 0x5d0   : > { %4154 = vmatpush1.msra.mxu0 %v3651_v9  ;;  %4251 = vmatpush2.msra.mxu1 %v3804_v30  ;;  %v3702_v9 = vld [vmem:[%s16841_s12 + $0x210] sm:$0xff] }
 0x5d1   : > { %4155 = vmatprep.subr.mxu0 %v3649_v43  ;;  %4252 = vmatprep.subr.mxu1 %v3802_v33  ;;  %v3700_v43 = vld [vmem:[%s16841_s12 + $0x200] sm:$0xff] }
 0x5d2   : > { %4156 = vmatpush1.msra.mxu0 %v3648_v45  ;;  %4253 = vmatpush2.msra.mxu1 %v3801_v35  ;;  %v3699_v45 = vld [vmem:[%s16841_s12 + $0x1f8] sm:$0xff] }
 0x5d3   : > { %4157 = vmatprep.subr.mxu0 %v3646_v13  ;;  %4254 = vmatprep.subr.mxu1 %v3799_v37  ;;  %v3697_v13 = vld [vmem:[%s16841_s12 + $0x1e8] sm:$0xff] }
 0x5d4   : > { %4158 = vmatpush1.msra.mxu0 %v3645_v49  ;;  %4255 = vmatpush2.msra.mxu1 %v3798_v41  ;;  %v3696_v49 = vld [vmem:[%s16841_s12 + $0x1e0] sm:$0xff] }
 0x5d5   : > { %4159 = vmatprep.subr.mxu0 %v3643_v51  ;;  %4256 = vmatprep.subr.mxu1 %v3796_v42  ;;  %v3694_v51 = vld [vmem:[%s16841_s12 + $0x1d0] sm:$0xff] }
 0x5d6   : > { %4160 = vmatpush1.msra.mxu0 %v3642_v53  ;;  %4257 = vmatpush2.msra.mxu1 %v3795_v44  ;;  %v3693_v53 = vld [vmem:[%s16841_s12 + $0x1c8] sm:$0xff] }
 0x5d7   : > { %4161 = vmatprep.subr.mxu0 %v3640_v55  ;;  %4258 = vmatprep.subr.mxu1 %v3793_v46  ;;  %v3691_v55 = vld [vmem:[%s16841_s12 + $0x1b8] sm:$0xff]  ;;  %v3966_v46 = vld [vmem:[%s16841_s12 + $0xa50] sm:$0xff] }
 0x5d8   : > { %4162 = vmatpush1.msra.mxu0 %v3639_v7  ;;  %4259 = vmatpush2.msra.mxu1 %v3792_v48  ;;  %v3690_v7 = vld [vmem:[%s16841_s12 + $0x1b0] sm:$0xff]  ;;  %v3964_v48 = vld [vmem:[%s16841_s12 + $0xa40] sm:$0xff] }
 0x5d9   : > { %4163 = vmatprep.subr.mxu0 %v3637_v18  ;;  %4260 = vmatprep.subr.mxu1 %v3790_v50  ;;  %v3688_v18 = vld [vmem:[%s16841_s12 + $0x1a0] sm:$0xff]  ;;  %v3963_v50 = vld [vmem:[%s16841_s12 + $0xa38] sm:$0xff] }
 0x5da   : > { %4164 = vmatpush1.msra.mxu0 %v3636_v61  ;;  %4261 = vmatpush2.msra.mxu1 %v3789_v52  ;;  %v3625_v61 = vpop.f32.mrf.mxu1  ;;  %v3868_v52 = vld [vmem:[%s16841_s12 + $0x740] sm:$0xff] }
 0x5db   : > { %4165 = vmatprep.subr.mxu0 %v3730_v1  ;;  %4262 = vmatprep.subr.mxu1 %v3787_v54  ;;  %v3781_v1 = vld [vmem:[%s16841_s12 + $0x488] sm:$0xff] }
 0x5dc   : > { %4166 = vmatpush2.msra.mxu0 %v3729_v2  ;;  %4263 = vmatpush2.msra.mxu1 %v3786_v56  ;;  %v3780_v2 = vld [vmem:[%s16841_s12 + $0x480] sm:$0xff]  ;;  %v3867_v56 = vld [vmem:[%s16841_s12 + $0x738] sm:$0xff] }
 0x5dd   : > { %4167 = vmatprep.subr.mxu0 %v3727_v4  ;;  %4264 = vmatprep.subr.mxu1 %v3784_v12  ;;  %v3970_v4 = vld [vmem:[%s16841_s12 + $0xa70] sm:$0xff]  ;;  %v3865_v12 = vld [vmem:[%s16841_s12 + $0x728] sm:$0xff] }
 0x5de   : > { %4168 = vmatpush2.msra.mxu0 %v3726_v5  ;;  %4265 = vmatpush2.msra.mxu1 %v3783_v60  ;;  %v3627_v5 = vpop.f32.mrf.mxu1 }
 0x5df   : > { %4169 = vmatprep.subr.mxu0 %v3724_v24  ;;  %4266 = vmatprep.subr.mxu1 %v3781_v1  ;;  %v3862_v1 = vld [vmem:[%s16841_s12 + $0x710] sm:$0xff] }
 0x5e0   : > { %4170 = vmatpush2.msra.mxu0 %v3723_v11  ;;  %4267 = vmatpush2.msra.mxu1 %v3780_v2  ;;  %v3631_v24 = vpop.f32.mrf.mxu1 }
 0x5e1   : > { %4171 = vmatprep.subr.mxu0 %v3721_v47  ;;  %4346 = vmatprep.subr.mxu1 %v3970_v4  ;;  %v3861_v4 = vld [vmem:[%s16841_s12 + $0x708] sm:$0xff] }
 0x5e2   : > { %4172 = vmatpush2.msra.mxu0 %v3720_v14  ;;  %v3633_v8 = vpop.f32.mrf.mxu1 }
 0x5e3   : > { %4173 = vmatprep.subr.mxu0 %v3718_v39 }
 0x5e4   : > { %4174 = vmatpush2.msra.mxu0 %v3717_v10 }
 0x5e5   : > { %4175 = vmatprep.subr.mxu0 %v3715_v38 }
 0x5e6   : > { %4176 = vmatpush2.msra.mxu0 %v3714_v22 }
 0x5e7   : > { %4177 = vmatprep.subr.mxu0 %v3712_v25 }
 0x5e8   : > { %4178 = vmatpush2.msra.mxu0 %v3711_v27 }
 0x5e9   : > { %4179 = vmatprep.subr.mxu0 %v3709_v29 }
 0x5ea   : > { %4180 = vmatpush2.msra.mxu0 %v3708_v31 }
 0x5eb   : > { %4181 = vmatprep.subr.mxu0 %v3706_v34 }
 0x5ec   : > { %4182 = vmatpush2.msra.mxu0 %v3705_v36 }
 0x5ed   : > { %4183 = vmatprep.subr.mxu0 %v3703_v40 }
 0x5ee   : > { %4184 = vmatpush2.msra.mxu0 %v3702_v9  ;;  %v3969_v9 = vld [vmem:[%s16841_s12 + $0xa68] sm:$0xff] }
 0x5ef   : > { %4185 = vmatprep.subr.mxu0 %v3700_v43  ;;  %v3967_v43 = vld [vmem:[%s16841_s12 + $0xa58] sm:$0xff] }
 0x5f0   : > { %4186 = vmatpush2.msra.mxu0 %v3699_v45  ;;  %v3873_v45 = vld [vmem:[%s16841_s12 + $0x768] sm:$0xff] }
 0x5f1   : > { %4187 = vmatprep.subr.mxu0 %v3697_v13  ;;  %v3871_v13 = vld [vmem:[%s16841_s12 + $0x758] sm:$0xff] }
 0x5f2   : > { %4188 = vmatpush2.msra.mxu0 %v3696_v49  ;;  %v3870_v49 = vld [vmem:[%s16841_s12 + $0x750] sm:$0xff] }
 0x5f3   : > { %4189 = vmatprep.subr.mxu0 %v3694_v51 }
 0x5f4   : > { %4190 = vmatpush2.msra.mxu0 %v3693_v53  ;;  %v3961_v53 = vld [vmem:[%s16841_s12 + $0xa28] sm:$0xff] }
 0x5f5   : > { %4191 = vmatprep.subr.mxu0 %v3691_v55 }
 0x5f6   : > { %4192 = vmatpush2.msra.mxu0 %v3690_v7  ;;  %v3960_v7 = vld [vmem:[%s16841_s12 + $0xa20] sm:$0xff] }
 0x5f7   : > { %4193 = vmatprep.subr.mxu0 %v3688_v18  ;;  %v3864_v18 = vld [vmem:[%s16841_s12 + $0x720] sm:$0xff] }
 0x5f8   : > { %4194 = vmatpush2.msra.mxu0 %v3687_v0 }
 0x5f9   : > { %4195 = vmatprep.subr.mxu0 %v3685_v16  ;;  %v3957_v16 = vld [vmem:[%s16841_s12 + $0xa08] sm:$0xff] }
 0x5fa   : > { %4196 = vmatpush2.msra.mxu0 %v3684_v3 }
 0x5fb   : > { %4275 = vmatprep.subr.mxu0 %v3874_v63  ;;  %v3955_v63 = vld [vmem:[%s16841_s12 + $0x9f8] sm:$0xff] }
 0x67b   : > { %v3537_v62 = vpop.f32.mrf.mxu0 }
 0x67c   : > { %v12899_v11 = vadd.f32 %v3625_v61, %v3537_v62  ;;  %v3958_v61 = vld [vmem:[%s16841_s12 + $0xa10] sm:$0xff] }
 0x67d   : > { %v3539_v6 = vpop.f32.mrf.mxu0  ;;  %v3954_v62 = vld [vmem:[%s16841_s12 + $0x9f0] sm:$0xff] }
 0x67e   : > { %v3628_v58 = vadd.f32 %v3627_v5, %v3539_v6  ;;  %v4093_v19 = vrot.slane %v12899_v11, 1  ;;  %v4114_v29 = vrot.slane %v12899_v11, 2  ;;  %v3859_v5 = vld [vmem:[%s16841_s12 + $0x6f8] sm:$0xff]  ;;  %v3952_v6 = vld [vmem:[%s16841_s12 + $0x9e0] sm:$0xff] }
 0x67f   : > { %v3543_v47 = vpop.f32.mrf.mxu0 }
 0x680   : > { %v3632_v14 = vadd.f32 %v3631_v24, %v3543_v47  ;;  %v9232_v15 = vpack.i.bf16 %v3628_v58, %v12899_v11  ;;  %v4098_v38 = vrot.slane %v3628_v58, 1  ;;  %v4118_v25 = vrot.slane %v3628_v58, 2  ;;  %v3858_v24 = vld [vmem:[%s16841_s12 + $0x6f0] sm:$0xff]  ;;  %v3856_v47 = vld [vmem:[%s16841_s12 + $0x6e0] sm:$0xff] }
 0x681   : > { %v3545_v39 = vpop.f32.mrf.mxu0 }
 0x682   : > { %v4094_v17 = vrot.slane %v3632_v14, 1  ;;  %v3634_v10 = vadd.f32 %v3633_v8, %v3545_v39  ;;  %9233 = vrot.lane.b32.xlu0 %v9232_v15, %s16838_s11  ;;  %9228 = vrot.lane.b32.xlu1 %v9232_v15, %s9505_s1  ;;  %v4115_v26 = vrot.slane %v3632_v14, 2  ;;  %v3951_v8 = vld [vmem:[%s16841_s12 + $0x9d8] sm:$0xff]  ;;  %v3949_v15 = vld [vmem:[%s16841_s12 + $0x9c8] sm:$0xff] }
 0x683   : > { %v3855_v14 = vld [vmem:[%s16841_s12 + $0x6d8] sm:$0xff]  ;;  %v3853_v39 = vld [vmem:[%s16841_s12 + $0x6c8] sm:$0xff] }
 0x684   : > { %v4099_v20 = vrot.slane %v3634_v10, 1  ;;  %v4119_v22 = vrot.slane %v3634_v10, 2  ;;  %v12906_v23 = vsel %vm4092_vm7, %v4093_v19, %v4094_v17  ;;  %v12916_v31 = vsel %vm4113_vm8, %v4114_v29, %v4115_v26  ;;  %v3948_v17 = vld [vmem:[%s16841_s12 + $0x9c0] sm:$0xff]  ;;  %v3946_v19 = vld [vmem:[%s16841_s12 + $0x9b0] sm:$0xff]  ;;  %v3847_v26 = vld [vmem:[%s16841_s12 + $0x698] sm:$0xff] }
 0x685   : > { %4268 = vmatprep.mubr.f32.mxu1 %v12906_v23  ;;  %v3852_v10 = vld [vmem:[%s16841_s12 + $0x6c0] sm:$0xff] }
 0x686   : > { %v4100_v27 = vsel %vm4092_vm7, %v4098_v38, %v4099_v20  ;;  %v4120_v30 = vsel %vm4113_vm8, %v4118_v25, %v4119_v22  ;;  %v3850_v38 = vld [vmem:[%s16841_s12 + $0x6b0] sm:$0xff]  ;;  %v3945_v20 = vld [vmem:[%s16841_s12 + $0x9a8] sm:$0xff]  ;;  %v3943_v25 = vld [vmem:[%s16841_s12 + $0x998] sm:$0xff] }
 0x687   : > { %v9242_v28 = vpack.i.bf16 %v4100_v27, %v12906_v23  ;;  %v9252_v33 = vpack.i.bf16 %v4120_v30, %v12916_v31  ;;  %v3849_v22 = vld [vmem:[%s16841_s12 + $0x6a8] sm:$0xff]  ;;  %v3942_v27 = vld [vmem:[%s16841_s12 + $0x990] sm:$0xff]  ;;  %v3940_v29 = vld [vmem:[%s16841_s12 + $0x980] sm:$0xff] }
 0x688   : > { %v3844_v30 = vld [vmem:[%s16841_s12 + $0x680] sm:$0xff] }
 0x689   : > { %9243 = vrot.lane.b32.xlu0 %v9242_v28, %s9505_s1  ;;  %9238 = vrot.lane.b32.xlu1 %v9242_v28, %s16838_s11  ;;  %v3846_v28 = vld [vmem:[%s16841_s12 + $0x690] sm:$0xff] }
 0x68d   : > { %9253 = vrot.lane.b32.xlu0 %v9252_v33, %s16838_s11  ;;  %9248 = vrot.lane.b32.xlu1 %v9252_v33, %s9505_s1  ;;  %v3939_v33 = vld [vmem:[%s16841_s12 + $0x978] sm:$0xff] }
 0x6f4   : > { %v9234_v34 = vpop.permute.xlu0 %9233  ;;  %v9229_v37 = vpop.permute.xlu1 %9228 }
 0x6f5   : > { %v9236_v35 = vunpack.i.h.bf16 %v9234_v34  ;;  %v9235_v36 = vunpack.i.l.bf16 %v9234_v34  ;;  %v9231_v40 = vunpack.i.h.bf16 %v9229_v37  ;;  %v9230_v41 = vunpack.i.l.bf16 %v9229_v37  ;;  %v3843_v34 = vld [vmem:[%s16841_s12 + $0x678] sm:$0xff]  ;;  %v3936_v37 = vld [vmem:[%s16841_s12 + $0x960] sm:$0xff] }
 0x6f7   : > { %v12925_v42 = vsel %vm2667_vm4, %v9235_v36, %v9236_v35  ;;  %v12931_v44 = vsel %vm4082_vm9, %v9230_v41, %v9231_v40  ;;  %v3937_v35 = vld [vmem:[%s16841_s12 + $0x968] sm:$0xff]  ;;  %v3840_v40 = vld [vmem:[%s16841_s12 + $0x660] sm:$0xff]  ;;  %v3934_v41 = vld [vmem:[%s16841_s12 + $0x950] sm:$0xff] }
 0x6f8   : > { %4269 = vmatmul.mubr.f32.vlgmr.msra.gmra.mxu1 %v12925_v42  ;;  %4197 = vmatprep.mubr.f32.mxu0 %v12931_v44  ;;  %v3841_v36 = vld [vmem:[%s16841_s12 + $0x668] sm:$0xff] }
 0x6f9   : > { %4347 = vmatpush1.msra.mxu1 %v3969_v9  ;;  %4198 = vmatmul.mubr.f32.vlgmr.msra.gmra.mxu0 %v12899_v11  ;;  %v3838_v9 = vld [vmem:[%s16841_s12 + $0x650] sm:$0xff] }
 0x6fa   : > { %4348 = vmatprep.subr.mxu1 %v3967_v43  ;;  %4276 = vmatpush1.msra.mxu0 %v3873_v45  ;;  %v3933_v43 = vld [vmem:[%s16841_s12 + $0x948] sm:$0xff] }
 0x6fb   : > { %4349 = vmatpush1.msra.mxu1 %v3966_v46  ;;  %v9239_v51 = vpop.permute.xlu1 %9238  ;;  %4277 = vmatprep.subr.mxu0 %v3871_v13  ;;  %v3837_v45 = vld [vmem:[%s16841_s12 + $0x648] sm:$0xff]  ;;  %v3931_v46 = vld [vmem:[%s16841_s12 + $0x938] sm:$0xff] }
 0x6fc   : > { %v9241_v54 = vunpack.i.h.bf16 %v9239_v51  ;;  %v9240_v55 = vunpack.i.l.bf16 %v9239_v51  ;;  %4350 = vmatprep.subr.mxu1 %v3964_v48  ;;  %4278 = vmatpush1.msra.mxu0 %v3870_v49  ;;  %v3835_v13 = vld [vmem:[%s16841_s12 + $0x638] sm:$0xff]  ;;  %v3930_v48 = vld [vmem:[%s16841_s12 + $0x930] sm:$0xff]  ;;  %v3832_v51 = vld [vmem:[%s16841_s12 + $0x620] sm:$0xff] }
 0x6fd   : > { %4351 = vmatpush1.msra.mxu1 %v3963_v50  ;;  %4279 = vmatprep.subr.mxu0 %v3868_v52  ;;  %v3834_v49 = vld [vmem:[%s16841_s12 + $0x630] sm:$0xff]  ;;  %v3928_v50 = vld [vmem:[%s16841_s12 + $0x920] sm:$0xff]  ;;  %v3927_v52 = vld [vmem:[%s16841_s12 + $0x918] sm:$0xff] }
 0x6fe   : > { %4352 = vmatprep.subr.mxu1 %v3961_v53  ;;  %v12973_v60 = vsel %vm2667_vm4, %v9240_v55, %v9241_v54  ;;  %4280 = vmatpush1.msra.mxu0 %v3867_v56  ;;  %v3831_v53 = vld [vmem:[%s16841_s12 + $0x618] sm:$0xff]  ;;  %v3925_v54 = vld [vmem:[%s16841_s12 + $0x908] sm:$0xff]  ;;  %v3924_v56 = vld [vmem:[%s16841_s12 + $0x900] sm:$0xff] }
 0x6ff   : > { %4353 = vmatpush1.msra.mxu1 %v3960_v7  ;;  %v9249_v0 = vpop.permute.xlu1 %9248  ;;  %4281 = vmatprep.subr.mxu0 %v3865_v12  ;;  %v3829_v55 = vld [vmem:[%s16841_s12 + $0x608] sm:$0xff]  ;;  %v3828_v7 = vld [vmem:[%s16841_s12 + $0x600] sm:$0xff]  ;;  %v4018_v12 = vld [vmem:[%s16841_s12 + $0xbf0] sm:$0xff] }
 0x700   : > { %v9251_v2 = vunpack.i.h.bf16 %v9249_v0  ;;  %v9250_v3 = vunpack.i.l.bf16 %v9249_v0  ;;  %4339 = vmatprep.mubr.f32.mxu0 %v12973_v60  ;;  %4282 = vmatpush1.msra.mxu0 %v3864_v18  ;;  %v3922_v18 = vld [vmem:[%s16841_s12 + $0x8f0] sm:$0xff]  ;;  %v3921_v0 = vld [vmem:[%s16841_s12 + $0x8e8] sm:$0xff] }
 0x701   : > { %4354 = vmatprep.subr.mxu1 %v3958_v61  ;;  %4283 = vmatprep.subr.mxu0 %v3862_v1  ;;  %v4017_v61 = vld [vmem:[%s16841_s12 + $0xbe8] sm:$0xff]  ;;  %v4015_v1 = vld [vmem:[%s16841_s12 + $0xbd8] sm:$0xff] }
 0x702   : > { %4355 = vmatpush1.msra.mxu1 %v3957_v16  ;;  %4284 = vmatpush1.msra.mxu0 %v3861_v4  ;;  %v13004_v58 = vsel %vm4082_vm9, %v9250_v3, %v9251_v2  ;;  %v3919_v16 = vld [vmem:[%s16841_s12 + $0x8d8] sm:$0xff]  ;;  %v4014_v2 = vld [vmem:[%s16841_s12 + $0xbd0] sm:$0xff]  ;;  %v4012_v4 = vld [vmem:[%s16841_s12 + $0xbc0] sm:$0xff] }
 0x703   : > { %4356 = vmatprep.subr.mxu1 %v3955_v63  ;;  %4285 = vmatprep.subr.mxu0 %v3859_v5  ;;  %v3918_v3 = vld [vmem:[%s16841_s12 + $0x8d0] sm:$0xff]  ;;  %v3916_v63 = vld [vmem:[%s16841_s12 + $0x8c0] sm:$0xff]  ;;  %v4011_v5 = vld [vmem:[%s16841_s12 + $0xbb8] sm:$0xff] }
 0x704   : > { %4357 = vmatpush1.msra.mxu1 %v3954_v62  ;;  %4286 = vmatpush1.msra.mxu0 %v3858_v24  ;;  %v3915_v62 = vld [vmem:[%s16841_s12 + $0x8b8] sm:$0xff]  ;;  %v4009_v24 = vld [vmem:[%s16841_s12 + $0xba8] sm:$0xff] }
 0x705   : > { %4358 = vmatprep.subr.mxu1 %v3952_v6  ;;  %4410 = vmatprep.mubr.f32.mxu1 %v13004_v58  ;;  %v3913_v6 = vld [vmem:[%s16841_s12 + $0x8a8] sm:$0xff] }
 0x706   : > { %4287 = vmatprep.subr.mxu0 %v3856_v47  ;;  %4359 = vmatpush1.msra.mxu1 %v3951_v8  ;;  %v4008_v47 = vld [vmem:[%s16841_s12 + $0xba0] sm:$0xff] }
 0x707   : > { %4288 = vmatpush1.msra.mxu0 %v3855_v14  ;;  %4360 = vmatprep.subr.mxu1 %v3949_v15  ;;  %v3912_v8 = vld [vmem:[%s16841_s12 + $0x8a0] sm:$0xff]  ;;  %v4006_v14 = vld [vmem:[%s16841_s12 + $0xb90] sm:$0xff] }
 0x708   : > { %4289 = vmatprep.subr.mxu0 %v3853_v39  ;;  %4361 = vmatpush1.msra.mxu1 %v3948_v17  ;;  %v3910_v15 = vld [vmem:[%s16841_s12 + $0x890] sm:$0xff]  ;;  %v4005_v39 = vld [vmem:[%s16841_s12 + $0xb88] sm:$0xff] }
 0x709   : > { %4290 = vmatpush1.msra.mxu0 %v3852_v10  ;;  %4362 = vmatprep.subr.mxu1 %v3946_v19  ;;  %v3909_v17 = vld [vmem:[%s16841_s12 + $0x888] sm:$0xff]  ;;  %v4003_v10 = vld [vmem:[%s16841_s12 + $0xb78] sm:$0xff] }
 0x70a   : > { %4291 = vmatprep.subr.mxu0 %v3850_v38  ;;  %4363 = vmatpush1.msra.mxu1 %v3945_v20  ;;  %v3907_v19 = vld [vmem:[%s16841_s12 + $0x878] sm:$0xff]  ;;  %v4002_v38 = vld [vmem:[%s16841_s12 + $0xb70] sm:$0xff] }
 0x70b   : > { %4292 = vmatpush1.msra.mxu0 %v3849_v22  ;;  %4364 = vmatprep.subr.mxu1 %v3943_v25  ;;  %v3906_v20 = vld [vmem:[%s16841_s12 + $0x870] sm:$0xff]  ;;  %v4000_v22 = vld [vmem:[%s16841_s12 + $0xb60] sm:$0xff] }
 0x70c   : > { %4293 = vmatprep.subr.mxu0 %v3847_v26  ;;  %4365 = vmatpush1.msra.mxu1 %v3942_v27  ;;  %v3904_v25 = vld [vmem:[%s16841_s12 + $0x860] sm:$0xff]  ;;  %v3999_v26 = vld [vmem:[%s16841_s12 + $0xb58] sm:$0xff] }
 0x70d   : > { %4294 = vmatpush1.msra.mxu0 %v3846_v28  ;;  %4366 = vmatprep.subr.mxu1 %v3940_v29  ;;  %v3903_v27 = vld [vmem:[%s16841_s12 + $0x858] sm:$0xff]  ;;  %v3997_v28 = vld [vmem:[%s16841_s12 + $0xb48] sm:$0xff] }
 0x70e   : > { %4295 = vmatprep.subr.mxu0 %v3844_v30  ;;  %4367 = vmatpush1.msra.mxu1 %v3939_v33  ;;  %v3901_v29 = vld [vmem:[%s16841_s12 + $0x848] sm:$0xff]  ;;  %v3996_v30 = vld [vmem:[%s16841_s12 + $0xb40] sm:$0xff] }
 0x70f   : > { %4296 = vmatpush1.msra.mxu0 %v3843_v34  ;;  %4368 = vmatprep.subr.mxu1 %v3937_v35  ;;  %v3900_v33 = vld [vmem:[%s16841_s12 + $0x840] sm:$0xff]  ;;  %v3994_v34 = vld [vmem:[%s16841_s12 + $0xb30] sm:$0xff] }
 0x710   : > { %4297 = vmatprep.subr.mxu0 %v3841_v36  ;;  %4369 = vmatpush1.msra.mxu1 %v3936_v37  ;;  %v3898_v35 = vld [vmem:[%s16841_s12 + $0x830] sm:$0xff]  ;;  %v3993_v36 = vld [vmem:[%s16841_s12 + $0xb28] sm:$0xff] }
 0x711   : > { %4298 = vmatpush1.msra.mxu0 %v3840_v40  ;;  %4370 = vmatprep.subr.mxu1 %v3934_v41  ;;  %v3897_v37 = vld [vmem:[%s16841_s12 + $0x828] sm:$0xff]  ;;  %v3991_v40 = vld [vmem:[%s16841_s12 + $0xb18] sm:$0xff] }
 0x712   : > { %4299 = vmatprep.subr.mxu0 %v3838_v9  ;;  %4371 = vmatpush1.msra.mxu1 %v3933_v43  ;;  %v3895_v41 = vld [vmem:[%s16841_s12 + $0x818] sm:$0xff]  ;;  %v3990_v9 = vld [vmem:[%s16841_s12 + $0xb10] sm:$0xff] }
 0x713   : > { %4300 = vmatpush1.msra.mxu0 %v3837_v45  ;;  %4372 = vmatprep.subr.mxu1 %v3931_v46  ;;  %v3894_v43 = vld [vmem:[%s16841_s12 + $0x810] sm:$0xff]  ;;  %v3988_v45 = vld [vmem:[%s16841_s12 + $0xb00] sm:$0xff] }
 0x714   : > { %4301 = vmatprep.subr.mxu0 %v3835_v13  ;;  %4373 = vmatpush1.msra.mxu1 %v3930_v48  ;;  %v3892_v46 = vld [vmem:[%s16841_s12 + $0x800] sm:$0xff]  ;;  %v3987_v13 = vld [vmem:[%s16841_s12 + $0xaf8] sm:$0xff] }
 0x715   : > { %4302 = vmatpush1.msra.mxu0 %v3834_v49  ;;  %4374 = vmatprep.subr.mxu1 %v3928_v50  ;;  %v3891_v48 = vld [vmem:[%s16841_s12 + $0x7f8] sm:$0xff]  ;;  %v3985_v49 = vld [vmem:[%s16841_s12 + $0xae8] sm:$0xff] }
 0x716   : > { %4303 = vmatprep.subr.mxu0 %v3832_v51  ;;  %4375 = vmatpush1.msra.mxu1 %v3927_v52  ;;  %v3889_v50 = vld [vmem:[%s16841_s12 + $0x7e8] sm:$0xff]  ;;  %v3984_v51 = vld [vmem:[%s16841_s12 + $0xae0] sm:$0xff] }
 0x717   : > { %4304 = vmatpush1.msra.mxu0 %v3831_v53  ;;  %4376 = vmatprep.subr.mxu1 %v3925_v54  ;;  %v3888_v52 = vld [vmem:[%s16841_s12 + $0x7e0] sm:$0xff]  ;;  %v3982_v53 = vld [vmem:[%s16841_s12 + $0xad0] sm:$0xff] }
 0x718   : > { %4305 = vmatprep.subr.mxu0 %v3829_v55  ;;  %4377 = vmatpush1.msra.mxu1 %v3924_v56  ;;  %v3886_v54 = vld [vmem:[%s16841_s12 + $0x7d0] sm:$0xff]  ;;  %v3981_v55 = vld [vmem:[%s16841_s12 + $0xac8] sm:$0xff] }
 0x719   : > { %4306 = vmatpush1.msra.mxu0 %v3828_v7  ;;  %4378 = vmatprep.subr.mxu1 %v4018_v12  ;;  %v3885_v56 = vld [vmem:[%s16841_s12 + $0x7c8] sm:$0xff]  ;;  %v3979_v7 = vld [vmem:[%s16841_s12 + $0xab8] sm:$0xff] }
 0x71a   : > { %4307 = vmatprep.subr.mxu0 %v3922_v18  ;;  %4379 = vmatpush2.msra.mxu1 %v4017_v61  ;;  %v3883_v12 = vld [vmem:[%s16841_s12 + $0x7b8] sm:$0xff]  ;;  %v3978_v18 = vld [vmem:[%s16841_s12 + $0xab0] sm:$0xff] }
 0x71b   : > { %4308 = vmatpush2.msra.mxu0 %v3921_v0  ;;  %4380 = vmatprep.subr.mxu1 %v4015_v1  ;;  %v3882_v61 = vld [vmem:[%s16841_s12 + $0x7b0] sm:$0xff]  ;;  %v9244_v0 = vpop.permute.xlu0 %9243  ;;  %v3976_v1 = vld [vmem:[%s16841_s12 + $0xaa0] sm:$0xff] }
 0x71c   : > { %4309 = vmatprep.subr.mxu0 %v3919_v16  ;;  %4381 = vmatpush2.msra.mxu1 %v4014_v2  ;;  %v3880_v16 = vld [vmem:[%s16841_s12 + $0x7a0] sm:$0xff]  ;;  %v3975_v2 = vld [vmem:[%s16841_s12 + $0xa98] sm:$0xff] }
 0x71d   : > { %4310 = vmatpush2.msra.mxu0 %v3918_v3  ;;  %4382 = vmatprep.subr.mxu1 %v4012_v4  ;;  %v3879_v3 = vld [vmem:[%s16841_s12 + $0x798] sm:$0xff]  ;;  %v3973_v4 = vld [vmem:[%s16841_s12 + $0xa88] sm:$0xff] }
 0x71e   : > { %4311 = vmatprep.subr.mxu0 %v3916_v63  ;;  %4383 = vmatpush2.msra.mxu1 %v4011_v5  ;;  %v3877_v63 = vld [vmem:[%s16841_s12 + $0x788] sm:$0xff]  ;;  %v9246_v5 = vunpack.i.h.bf16 %v9244_v0 }
 0x71f   : > { %4312 = vmatpush2.msra.mxu0 %v3915_v62  ;;  %4384 = vmatprep.subr.mxu1 %v4009_v24  ;;  %v9245_v62 = vunpack.i.l.bf16 %v9244_v0  ;;  %v3972_v24 = vld [vmem:[%s16841_s12 + $0xa80] sm:$0xff]  ;;  %v3653_v0 = vld [vmem:[%s16841_s12 + $0x88] sm:$0xff] }
 0x720   : > { %4313 = vmatprep.subr.mxu0 %v3913_v6  ;;  %4385 = vmatpush2.msra.mxu1 %v4008_v47  ;;  %v3876_v6 = vld [vmem:[%s16841_s12 + $0x780] sm:$0xff]  ;;  %v3731_v47 = vld [vmem:[%s16841_s12 + $0x2f8] sm:$0xff] }
 0x721   : > { %4314 = vmatpush2.msra.mxu0 %v3912_v8  ;;  %4386 = vmatprep.subr.mxu1 %v4006_v14  ;;  %v4066_v8 = vld [vmem:[%s16841_s12 + $0xd70] sm:$0xff]  ;;  %v3683_v14 = vld [vmem:[%s16841_s12 + $0x178] sm:$0xff] }
 0x722   : > { %4315 = vmatprep.subr.mxu0 %v3910_v15  ;;  %4387 = vmatpush2.msra.mxu1 %v4005_v39  ;;  %v13327_v15 = vsel %vm4082_vm9, %v9245_v62, %v9246_v5  ;;  %v4065_v39 = vld [vmem:[%s16841_s12 + $0xd68] sm:$0xff]  ;;  %v4030_v5 = vld [vmem:[%s16841_s12 + $0xc50] sm:$0xff]  ;;  %v3647_v62 = vld [vmem:[%s16841_s12 + $0x58] sm:$0xff] }
 0x723   : > { %4316 = vmatpush2.msra.mxu0 %v3909_v17  ;;  %4388 = vmatprep.subr.mxu1 %v4003_v10  ;;  %v3728_v17 = vld [vmem:[%s16841_s12 + $0x2e0] sm:$0xff]  ;;  %v4063_v10 = vld [vmem:[%s16841_s12 + $0xd58] sm:$0xff] }
 0x724   : > { %4317 = vmatprep.subr.mxu0 %v3907_v19  ;;  %4389 = vmatpush2.msra.mxu1 %v4002_v38  ;;  %v3680_v19 = vld [vmem:[%s16841_s12 + $0x160] sm:$0xff]  ;;  %v4062_v38 = vld [vmem:[%s16841_s12 + $0xd50] sm:$0xff] }
 0x725   : > { %4318 = vmatpush2.msra.mxu0 %v3906_v20  ;;  %4390 = vmatprep.subr.mxu1 %v4000_v22  ;;  %v3725_v20 = vld [vmem:[%s16841_s12 + $0x2c8] sm:$0xff]  ;;  %v4060_v22 = vld [vmem:[%s16841_s12 + $0xd40] sm:$0xff] }
 0x726   : > { %4319 = vmatprep.subr.mxu0 %v3904_v25  ;;  %4391 = vmatpush2.msra.mxu1 %v3999_v26  ;;  %v3677_v25 = vld [vmem:[%s16841_s12 + $0x148] sm:$0xff]  ;;  %v3722_v26 = vld [vmem:[%s16841_s12 + $0x2b0] sm:$0xff] }
 0x727   : > { %4320 = vmatpush2.msra.mxu0 %v3903_v27  ;;  %4392 = vmatprep.subr.mxu1 %v3997_v28  ;;  %v4057_v27 = vld [vmem:[%s16841_s12 + $0xd28] sm:$0xff]  ;;  %v3674_v28 = vld [vmem:[%s16841_s12 + $0x130] sm:$0xff] }
 0x728   : > { %4321 = vmatprep.subr.mxu0 %v3901_v29  ;;  %4393 = vmatpush2.msra.mxu1 %v3996_v30  ;;  %v4056_v29 = vld [vmem:[%s16841_s12 + $0xd20] sm:$0xff]  ;;  %v3719_v30 = vld [vmem:[%s16841_s12 + $0x298] sm:$0xff] }
 0x729   : > { %4322 = vmatpush2.msra.mxu0 %v3900_v33  ;;  %4394 = vmatprep.subr.mxu1 %v3994_v34  ;;  %v4054_v33 = vld [vmem:[%s16841_s12 + $0xd10] sm:$0xff]  ;;  %v3671_v34 = vld [vmem:[%s16841_s12 + $0x118] sm:$0xff] }
 0x72a   : > { %4323 = vmatprep.subr.mxu0 %v3898_v35  ;;  %4395 = vmatpush2.msra.mxu1 %v3993_v36  ;;  %v4053_v35 = vld [vmem:[%s16841_s12 + $0xd08] sm:$0xff]  ;;  %v3716_v36 = vld [vmem:[%s16841_s12 + $0x280] sm:$0xff] }
 0x72b   : > { %4324 = vmatpush2.msra.mxu0 %v3897_v37  ;;  %4396 = vmatprep.subr.mxu1 %v3991_v40  ;;  %v4051_v37 = vld [vmem:[%s16841_s12 + $0xcf8] sm:$0xff]  ;;  %v3668_v40 = vld [vmem:[%s16841_s12 + $0x100] sm:$0xff] }
 0x72c   : > { %4325 = vmatprep.subr.mxu0 %v3895_v41  ;;  %4397 = vmatpush2.msra.mxu1 %v3990_v9  ;;  %v4050_v41 = vld [vmem:[%s16841_s12 + $0xcf0] sm:$0xff]  ;;  %v3713_v9 = vld [vmem:[%s16841_s12 + $0x268] sm:$0xff] }
 0x72d   : > { %4326 = vmatpush2.msra.mxu0 %v3894_v43  ;;  %4398 = vmatprep.subr.mxu1 %v3988_v45  ;;  %v4048_v43 = vld [vmem:[%s16841_s12 + $0xce0] sm:$0xff]  ;;  %v3665_v45 = vld [vmem:[%s16841_s12 + $0xe8] sm:$0xff] }
 0x72e   : > { %4327 = vmatprep.subr.mxu0 %v3892_v46  ;;  %4399 = vmatpush2.msra.mxu1 %v3987_v13  ;;  %v4047_v46 = vld [vmem:[%s16841_s12 + $0xcd8] sm:$0xff]  ;;  %v3710_v13 = vld [vmem:[%s16841_s12 + $0x250] sm:$0xff] }
 0x72f   : > { %4328 = vmatpush2.msra.mxu0 %v3891_v48  ;;  %4400 = vmatprep.subr.mxu1 %v3985_v49  ;;  %v4045_v48 = vld [vmem:[%s16841_s12 + $0xcc8] sm:$0xff]  ;;  %v3662_v49 = vld [vmem:[%s16841_s12 + $0xd0] sm:$0xff] }
 0x730   : > { %4329 = vmatprep.subr.mxu0 %v3889_v50  ;;  %4401 = vmatpush2.msra.mxu1 %v3984_v51  ;;  %v4044_v50 = vld [vmem:[%s16841_s12 + $0xcc0] sm:$0xff]  ;;  %v3707_v51 = vld [vmem:[%s16841_s12 + $0x238] sm:$0xff] }
 0x731   : > { %4330 = vmatpush2.msra.mxu0 %v3888_v52  ;;  %4402 = vmatprep.subr.mxu1 %v3982_v53  ;;  %v4042_v52 = vld [vmem:[%s16841_s12 + $0xcb0] sm:$0xff]  ;;  %v3659_v53 = vld [vmem:[%s16841_s12 + $0xb8] sm:$0xff] }
 0x732   : > { %4331 = vmatprep.subr.mxu0 %v3886_v54  ;;  %4403 = vmatpush2.msra.mxu1 %v3981_v55  ;;  %v4041_v54 = vld [vmem:[%s16841_s12 + $0xca8] sm:$0xff]  ;;  %v3704_v55 = vld [vmem:[%s16841_s12 + $0x220] sm:$0xff] }
 0x733   : > { %4332 = vmatpush2.msra.mxu0 %v3885_v56  ;;  %4404 = vmatprep.subr.mxu1 %v3979_v7  ;;  %v4039_v56 = vld [vmem:[%s16841_s12 + $0xc98] sm:$0xff]  ;;  %v3656_v7 = vld [vmem:[%s16841_s12 + $0xa0] sm:$0xff] }
 0x734   : > { %4333 = vmatprep.subr.mxu0 %v3883_v12  ;;  %4405 = vmatpush2.msra.mxu1 %v3978_v18  ;;  %v4038_v12 = vld [vmem:[%s16841_s12 + $0xc90] sm:$0xff]  ;;  %v3701_v18 = vld [vmem:[%s16841_s12 + $0x208] sm:$0xff] }
 0x735   : > { %4334 = vmatpush2.msra.mxu0 %v3882_v61  ;;  %4406 = vmatprep.subr.mxu1 %v3976_v1  ;;  %v4036_v61 = vld [vmem:[%s16841_s12 + $0xc80] sm:$0xff]  ;;  %v4035_v1 = vld [vmem:[%s16841_s12 + $0xc78] sm:$0xff] }
 0x736   : > { %4335 = vmatprep.subr.mxu0 %v3880_v16  ;;  %4407 = vmatpush2.msra.mxu1 %v3975_v2  ;;  %v3698_v16 = vld [vmem:[%s16841_s12 + $0x1f0] sm:$0xff]  ;;  %v4033_v2 = vld [vmem:[%s16841_s12 + $0xc68] sm:$0xff] }
 0x737   : > { %4336 = vmatpush2.msra.mxu0 %v3879_v3  ;;  %4408 = vmatprep.subr.mxu1 %v3973_v4  ;;  %v3650_v3 = vld [vmem:[%s16841_s12 + $0x70] sm:$0xff]  ;;  %v4032_v4 = vld [vmem:[%s16841_s12 + $0xc60] sm:$0xff] }
 0x738   : > { %4337 = vmatprep.subr.mxu0 %v3877_v63  ;;  %4409 = vmatpush2.msra.mxu1 %v3972_v24  ;;  %v3695_v63 = vld [vmem:[%s16841_s12 + $0x1d8] sm:$0xff]  ;;  %v4029_v24 = vld [vmem:[%s16841_s12 + $0xc48] sm:$0xff] }
 0x739   : > { %4338 = vmatpush2.msra.mxu0 %v3876_v6  ;;  %4411 = vmatmul.mubr.f32.vlgmr.msra.gmra.mxu1 %v12916_v31  ;;  %v3692_v6 = vld [vmem:[%s16841_s12 + $0x1c0] sm:$0xff] }
 0x73a   : > { %8601 = vmatprep.subr.mxu1 %v3731_v47  ;;  %4340 = vmatmul.mubr.f32.vlgmr.msra.gmra.mxu0 %v13327_v15  ;;  %v4027_v47 = vld [vmem:[%s16841_s12 + $0xc38] sm:$0xff] }
 0x73b   : > { %4417 = vmatprep.subr.mxu0 %v4066_v8  ;;  %8602 = vmatpush3.msra.mxu1 %v3683_v14  ;;  %v3644_v8 = vld [vmem:[%s16841_s12 + $0x40] sm:$0xff]  ;;  %v4026_v14 = vld [vmem:[%s16841_s12 + $0xc30] sm:$0xff] }
 0x73c   : > { %4552 = vmatprep.mubr.f32.mxu1 %v12931_v44  ;;  %4418 = vmatpush1.msra.mxu0 %v4065_v39  ;;  %v4059_v44 = vld [vmem:[%s16841_s12 + $0xd38] sm:$0xff]  ;;  %v3689_v39 = vld [vmem:[%s16841_s12 + $0x1a8] sm:$0xff] }
 0x73d   : > { %8603 = vmatprep.subr.mxu1 %v3728_v17  ;;  %4419 = vmatprep.subr.mxu0 %v4063_v10  ;;  %v9254_v17 = vpop.permute.xlu0 %9253  ;;  %v4024_v10 = vld [vmem:[%s16841_s12 + $0xc20] sm:$0xff] }
 0x73e   : > { %8604 = vmatpush3.msra.mxu1 %v3680_v19  ;;  %4420 = vmatpush1.msra.mxu0 %v4062_v38  ;;  %v3641_v19 = vld [vmem:[%s16841_s12 + $0x28] sm:$0xff]  ;;  %v4023_v38 = vld [vmem:[%s16841_s12 + $0xc18] sm:$0xff] }
 0x73f   : > { %8605 = vmatprep.subr.mxu1 %v3725_v20  ;;  %4421 = vmatprep.subr.mxu0 %v4060_v22  ;;  %v3686_v20 = vld [vmem:[%s16841_s12 + $0x190] sm:$0xff]  ;;  %v4021_v22 = vld [vmem:[%s16841_s12 + $0xc08] sm:$0xff] }
 0x740   : > { %8606 = vmatpush3.msra.mxu1 %v3677_v25  ;;  %4422 = vmatpush1.msra.mxu0 %v4059_v44  ;;  %v3638_v25 = vld [vmem:[%s16841_s12 + $0x10] sm:$0xff]  ;;  %v9256_v44 = vunpack.i.h.bf16 %v9254_v17 }
 0x741   : > { %8607 = vmatprep.subr.mxu1 %v3722_v26  ;;  %4423 = vmatprep.subr.mxu0 %v4057_v27  ;;  %v9255_v26 = vunpack.i.l.bf16 %v9254_v17  ;;  %v4020_v27 = vld [vmem:[%s16841_s12 + $0xc00] sm:$0xff]  ;;  %v3794_v17 = vld [vmem:[%s16841_s12 + $0x4f0] sm:$0xff] }
 0x742   : > { %8608 = vmatpush3.msra.mxu1 %v3674_v28  ;;  %4424 = vmatpush1.msra.mxu0 %v4056_v29  ;;  %v3923_v28 = vld [vmem:[%s16841_s12 + $0x8f8] sm:$0xff] }
 0x743   : > { %8609 = vmatprep.subr.mxu1 %v3719_v30  ;;  %4425 = vmatprep.subr.mxu0 %v4054_v33  ;;  %v3827_v29 = vld [vmem:[%s16841_s12 + $0x5f8] sm:$0xff]  ;;  %v13526_v33 = vsel %vm2667_vm4, %v9255_v26, %v9256_v44  ;;  %v3884_v44 = vld [vmem:[%s16841_s12 + $0x7c0] sm:$0xff] }
 0x744   : > { %8610 = vmatpush3.msra.mxu1 %v3671_v34  ;;  %4426 = vmatpush1.msra.mxu0 %v4053_v35  ;;  %v3875_v30 = vld [vmem:[%s16841_s12 + $0x778] sm:$0xff]  ;;  %v3920_v35 = vld [vmem:[%s16841_s12 + $0x8e0] sm:$0xff] }
 0x745   : > { %8611 = vmatprep.subr.mxu1 %v3716_v36  ;;  %4427 = vmatprep.subr.mxu0 %v4051_v37  ;;  %v3779_v34 = vld [vmem:[%s16841_s12 + $0x478] sm:$0xff]  ;;  %v3824_v36 = vld [vmem:[%s16841_s12 + $0x5e0] sm:$0xff] }
 0x746   : > { %8612 = vmatpush3.msra.mxu1 %v3668_v40  ;;  %4428 = vmatpush1.msra.mxu0 %v4050_v41  ;;  %v3776_v37 = vld [vmem:[%s16841_s12 + $0x460] sm:$0xff]  ;;  %v3917_v40 = vld [vmem:[%s16841_s12 + $0x8c8] sm:$0xff] }
 0x747   : > { %8613 = vmatprep.subr.mxu1 %v3713_v9  ;;  %4429 = vmatprep.subr.mxu0 %v4048_v43  ;;  %v3821_v41 = vld [vmem:[%s16841_s12 + $0x5c8] sm:$0xff]  ;;  %v3818_v43 = vld [vmem:[%s16841_s12 + $0x5b0] sm:$0xff]  ;;  %v3788_v26 = vld [vmem:[%s16841_s12 + $0x4c0] sm:$0xff] }
 0x748   : > { %8614 = vmatpush3.msra.mxu1 %v3665_v45  ;;  %4430 = vmatpush1.msra.mxu0 %v4047_v46  ;;  %v3773_v9 = vld [vmem:[%s16841_s12 + $0x448] sm:$0xff]  ;;  %v3866_v45 = vld [vmem:[%s16841_s12 + $0x730] sm:$0xff] }
 0x749   : > { %8615 = vmatprep.subr.mxu1 %v3710_v13  ;;  %4431 = vmatprep.subr.mxu0 %v4045_v48  ;;  %v3770_v46 = vld [vmem:[%s16841_s12 + $0x430] sm:$0xff]  ;;  %v3911_v13 = vld [vmem:[%s16841_s12 + $0x898] sm:$0xff] }
 0x74a   : > { %8616 = vmatpush3.msra.mxu1 %v3662_v49  ;;  %4432 = vmatpush1.msra.mxu0 %v4044_v50  ;;  %v3815_v48 = vld [vmem:[%s16841_s12 + $0x598] sm:$0xff] }
 0x74b   : > { %8617 = vmatprep.subr.mxu1 %v3707_v51  ;;  %4433 = vmatprep.subr.mxu0 %v4042_v52  ;;  %v3863_v49 = vld [vmem:[%s16841_s12 + $0x718] sm:$0xff]  ;;  %v3908_v51 = vld [vmem:[%s16841_s12 + $0x880] sm:$0xff] }
 0x74c   : > { %8618 = vmatpush3.msra.mxu1 %v3659_v53  ;;  %4434 = vmatpush1.msra.mxu0 %v4041_v54  ;;  %v3767_v50 = vld [vmem:[%s16841_s12 + $0x418] sm:$0xff]  ;;  %v3812_v52 = vld [vmem:[%s16841_s12 + $0x580] sm:$0xff] }
 0x74d   : > { %8619 = vmatprep.subr.mxu1 %v3704_v55  ;;  %4435 = vmatprep.subr.mxu0 %v4039_v56  ;;  %v3860_v53 = vld [vmem:[%s16841_s12 + $0x700] sm:$0xff]  ;;  %v3905_v55 = vld [vmem:[%s16841_s12 + $0x868] sm:$0xff] }
 0x74e   : > { %8620 = vmatpush3.msra.mxu1 %v3656_v7  ;;  %4436 = vmatpush1.msra.mxu0 %v4038_v12  ;;  %v3764_v54 = vld [vmem:[%s16841_s12 + $0x400] sm:$0xff]  ;;  %v3809_v56 = vld [vmem:[%s16841_s12 + $0x568] sm:$0xff] }
 0x74f   : > { %8621 = vmatprep.subr.mxu1 %v3701_v18  ;;  %4437 = vmatprep.subr.mxu0 %v4036_v61  ;;  %v3857_v7 = vld [vmem:[%s16841_s12 + $0x6e8] sm:$0xff]  ;;  %v3902_v18 = vld [vmem:[%s16841_s12 + $0x850] sm:$0xff] }
 0x750   : > { %8622 = vmatpush3.msra.mxu1 %v3653_v0  ;;  %4438 = vmatpush1.msra.mxu0 %v4035_v1  ;;  %v3761_v12 = vld [vmem:[%s16841_s12 + $0x3e8] sm:$0xff]  ;;  %v3806_v61 = vld [vmem:[%s16841_s12 + $0x550] sm:$0xff] }
 0x751   : > { %8623 = vmatprep.subr.mxu1 %v3698_v16  ;;  %4439 = vmatprep.subr.mxu0 %v4033_v2  ;;  %v3854_v0 = vld [vmem:[%s16841_s12 + $0x6d0] sm:$0xff]  ;;  %v3899_v16 = vld [vmem:[%s16841_s12 + $0x838] sm:$0xff] }
 0x752   : > { %8624 = vmatpush3.msra.mxu1 %v3650_v3  ;;  %4440 = vmatpush1.msra.mxu0 %v4032_v4  ;;  %v3758_v1 = vld [vmem:[%s16841_s12 + $0x3d0] sm:$0xff]  ;;  %v3803_v2 = vld [vmem:[%s16841_s12 + $0x538] sm:$0xff] }
 0x753   : > { %8625 = vmatprep.subr.mxu1 %v3695_v63  ;;  %4441 = vmatprep.subr.mxu0 %v4030_v5  ;;  %v3851_v3 = vld [vmem:[%s16841_s12 + $0x6b8] sm:$0xff]  ;;  %v3896_v63 = vld [vmem:[%s16841_s12 + $0x820] sm:$0xff] }
 0x754   : > { %8626 = vmatpush3.msra.mxu1 %v3647_v62  ;;  %4442 = vmatpush1.msra.mxu0 %v4029_v24  ;;  %v3755_v4 = vld [vmem:[%s16841_s12 + $0x3b8] sm:$0xff]  ;;  %v3800_v5 = vld [vmem:[%s16841_s12 + $0x520] sm:$0xff] }
 0x755   : > { %8627 = vmatprep.subr.mxu1 %v3692_v6  ;;  %4443 = vmatprep.subr.mxu0 %v4027_v47  ;;  %v3848_v62 = vld [vmem:[%s16841_s12 + $0x6a0] sm:$0xff]  ;;  %v3893_v6 = vld [vmem:[%s16841_s12 + $0x808] sm:$0xff] }
 0x756   : > { %8628 = vmatpush3.msra.mxu1 %v3644_v8  ;;  %4444 = vmatpush1.msra.mxu0 %v4026_v14  ;;  %v3752_v24 = vld [vmem:[%s16841_s12 + $0x3a0] sm:$0xff]  ;;  %v3797_v47 = vld [vmem:[%s16841_s12 + $0x508] sm:$0xff] }
 0x757   : > { %8629 = vmatprep.subr.mxu1 %v3689_v39  ;;  %4445 = vmatprep.subr.mxu0 %v4024_v10  ;;  %v3845_v8 = vld [vmem:[%s16841_s12 + $0x688] sm:$0xff]  ;;  %v3890_v39 = vld [vmem:[%s16841_s12 + $0x7f0] sm:$0xff] }
 0x758   : > { %8630 = vmatpush3.msra.mxu1 %v3641_v19  ;;  %4446 = vmatpush1.msra.mxu0 %v4023_v38  ;;  %v3749_v14 = vld [vmem:[%s16841_s12 + $0x388] sm:$0xff]  ;;  %v3842_v10 = vld [vmem:[%s16841_s12 + $0x670] sm:$0xff]  ;;  %v3887_v38 = vld [vmem:[%s16841_s12 + $0x7d8] sm:$0xff] }
 0x759   : > { %8631 = vmatprep.subr.mxu1 %v3686_v20  ;;  %4447 = vmatprep.subr.mxu0 %v4021_v22  ;;  %v3746_v19 = vld [vmem:[%s16841_s12 + $0x370] sm:$0xff]  ;;  %v3791_v20 = vld [vmem:[%s16841_s12 + $0x4d8] sm:$0xff] }
 0x75a   : > { %8632 = vmatpush3.msra.mxu1 %v3638_v25  ;;  %4448 = vmatpush1.msra.mxu0 %v4020_v27  ;;  %v3839_v22 = vld [vmem:[%s16841_s12 + $0x658] sm:$0xff]  ;;  %v3836_v27 = vld [vmem:[%s16841_s12 + $0x640] sm:$0xff] }
 0x75b   : > { %4481 = vmatprep.mubr.f32.mxu0 %v9502_v59  ;;  %4553 = vmatmul.mubr.f32.vlgmr.msra.gmra.mxu1 %v12899_v11  ;;  %v3872_v11 = vld [vmem:[%s16841_s12 + $0x760] sm:$0xff]  ;;  %v3743_v25 = vld [vmem:[%s16841_s12 + $0x358] sm:$0xff] }
 0x75c   : > { %8671 = vmatprep.subr.mxu1 %v3923_v28  ;;  %4482 = vmatmul.mubr.f32.vlgmr.msra.gmra.mxu0 %v13526_v33  ;;  %v3740_v28 = vld [vmem:[%s16841_s12 + $0x340] sm:$0xff] }
 0x75d   : > { %8636 = vmatprep.subr.mxu0 %v3827_v29  ;;  %8672 = vmatpush3.msra.mxu1 %v3875_v30  ;;  %v3881_v29 = vld [vmem:[%s16841_s12 + $0x7a8] sm:$0xff] }
 0x75e   : > { %4692 = vmatprep.mubr.f32.mxu1 %v12973_v60  ;;  %8637 = vmatpush3.msra.mxu0 %v3779_v34  ;;  %v3869_v60 = vld [vmem:[%s16841_s12 + $0x748] sm:$0xff] }
 0x75f   : > { %4622 = vmatprep.mubr.f32.mxu0 %v12906_v23  ;;  %8673 = vmatprep.subr.mxu1 %v3920_v35  ;;  %v3914_v23 = vld [vmem:[%s16841_s12 + $0x8b0] sm:$0xff]  ;;  %v3785_v30 = vld [vmem:[%s16841_s12 + $0x4a8] sm:$0xff] }
 0x760   : > { %8638 = vmatprep.subr.mxu0 %v3824_v36  ;;  %8674 = vmatpush3.msra.mxu1 %v3872_v11  ;;  %v3833_v34 = vld [vmem:[%s16841_s12 + $0x628] sm:$0xff]  ;;  %v3878_v36 = vld [vmem:[%s16841_s12 + $0x790] sm:$0xff] }
 0x761   : > { %8639 = vmatpush3.msra.mxu0 %v3776_v37  ;;  %8675 = vmatprep.subr.mxu1 %v3917_v40  ;;  %v3737_v35 = vld [vmem:[%s16841_s12 + $0x328] sm:$0xff]  ;;  %v3782_v11 = vld [vmem:[%s16841_s12 + $0x490] sm:$0xff] }
 0x762   : > { %8640 = vmatprep.subr.mxu0 %v3821_v41  ;;  %8676 = vmatpush3.msra.mxu1 %v3869_v60  ;;  %v3830_v37 = vld [vmem:[%s16841_s12 + $0x610] sm:$0xff]  ;;  %v4019_v41 = vld [vmem:[%s16841_s12 + $0xbf8] sm:$0xff] }
 0x763   : > { %8641 = vmatpush3.msra.mxu0 %v3773_v9  ;;  %8677 = vmatprep.subr.mxu1 %v3914_v23  ;;  %v3734_v40 = vld [vmem:[%s16841_s12 + $0x310] sm:$0xff]  ;;  %v4067_v60 = vld [vmem:[%s16841_s12 + $0xd78] sm:$0xff]  ;;  %v4016_v23 = vld [vmem:[%s16841_s12 + $0xbe0] sm:$0xff] }
 0x764   : > { %8642 = vmatprep.subr.mxu0 %v3818_v43  ;;  %8678 = vmatpush3.msra.mxu1 %v3866_v45  ;;  %v3971_v9 = vld [vmem:[%s16841_s12 + $0xa78] sm:$0xff]  ;;  %v4064_v43 = vld [vmem:[%s16841_s12 + $0xd60] sm:$0xff] }
 0x765   : > { %8643 = vmatpush3.msra.mxu0 %v3770_v46  ;;  %8679 = vmatprep.subr.mxu1 %v3911_v13  ;;  %v3968_v45 = vld [vmem:[%s16841_s12 + $0xa60] sm:$0xff]  ;;  %v3965_v46 = vld [vmem:[%s16841_s12 + $0xa48] sm:$0xff]  ;;  %v4058_v13 = vld [vmem:[%s16841_s12 + $0xd30] sm:$0xff] }
 0x766   : > { %8644 = vmatprep.subr.mxu0 %v3815_v48  ;;  %8680 = vmatpush3.msra.mxu1 %v3863_v49  ;;  %v3962_v48 = vld [vmem:[%s16841_s12 + $0xa30] sm:$0xff]  ;;  %v4007_v49 = vld [vmem:[%s16841_s12 + $0xb98] sm:$0xff] }
 0x767   : > { %8645 = vmatpush3.msra.mxu0 %v3767_v50  ;;  %8681 = vmatprep.subr.mxu1 %v3908_v51  ;;  %v4055_v50 = vld [vmem:[%s16841_s12 + $0xd18] sm:$0xff] }
 0x768   : > { %8646 = vmatprep.subr.mxu0 %v3812_v52  ;;  %8682 = vmatpush3.msra.mxu1 %v3860_v53  ;;  %v3959_v51 = vld [vmem:[%s16841_s12 + $0xa18] sm:$0xff]  ;;  %v4004_v52 = vld [vmem:[%s16841_s12 + $0xb80] sm:$0xff] }
 0x769   : > { %8647 = vmatpush3.msra.mxu0 %v3764_v54  ;;  %8683 = vmatprep.subr.mxu1 %v3905_v55  ;;  %v4052_v53 = vld [vmem:[%s16841_s12 + $0xd00] sm:$0xff]  ;;  %v4001_v55 = vld [vmem:[%s16841_s12 + $0xb68] sm:$0xff] }
 0x76a   : > { %8648 = vmatprep.subr.mxu0 %v3809_v56  ;;  %8684 = vmatpush3.msra.mxu1 %v3857_v7  ;;  %v3956_v54 = vld [vmem:[%s16841_s12 + $0xa00] sm:$0xff]  ;;  %v4049_v56 = vld [vmem:[%s16841_s12 + $0xce8] sm:$0xff] }
 0x76b   : > { %8649 = vmatpush3.msra.mxu0 %v3761_v12  ;;  %8685 = vmatprep.subr.mxu1 %v3902_v18  ;;  %v3953_v7 = vld [vmem:[%s16841_s12 + $0x9e8] sm:$0xff]  ;;  %v3998_v12 = vld [vmem:[%s16841_s12 + $0xb50] sm:$0xff] }
 0x76c   : > { %8650 = vmatprep.subr.mxu0 %v3806_v61  ;;  %8686 = vmatpush3.msra.mxu1 %v3854_v0  ;;  %v4046_v18 = vld [vmem:[%s16841_s12 + $0xcd0] sm:$0xff]  ;;  %v3995_v0 = vld [vmem:[%s16841_s12 + $0xb38] sm:$0xff] }
 0x76d   : > { %8651 = vmatpush3.msra.mxu0 %v3758_v1  ;;  %8687 = vmatprep.subr.mxu1 %v3899_v16  ;;  %v3950_v61 = vld [vmem:[%s16841_s12 + $0x9d0] sm:$0xff]  ;;  %v4043_v1 = vld [vmem:[%s16841_s12 + $0xcb8] sm:$0xff] }
 0x76e   : > { %8652 = vmatprep.subr.mxu0 %v3803_v2  ;;  %8688 = vmatpush3.msra.mxu1 %v3851_v3  ;;  %v3947_v16 = vld [vmem:[%s16841_s12 + $0x9b8] sm:$0xff]  ;;  %v3992_v2 = vld [vmem:[%s16841_s12 + $0xb20] sm:$0xff] }
 0x76f   : > { %8653 = vmatpush3.msra.mxu0 %v3755_v4  ;;  %8689 = vmatprep.subr.mxu1 %v3896_v63  ;;  %v4040_v3 = vld [vmem:[%s16841_s12 + $0xca0] sm:$0xff]  ;;  %v3989_v63 = vld [vmem:[%s16841_s12 + $0xb08] sm:$0xff] }
 0x770   : > { %8654 = vmatprep.subr.mxu0 %v3800_v5  ;;  %8690 = vmatpush3.msra.mxu1 %v3848_v62  ;;  %v3944_v4 = vld [vmem:[%s16841_s12 + $0x9a0] sm:$0xff]  ;;  %v4037_v5 = vld [vmem:[%s16841_s12 + $0xc88] sm:$0xff] }
 0x771   : > { %8655 = vmatpush3.msra.mxu0 %v3752_v24  ;;  %8691 = vmatprep.subr.mxu1 %v3893_v6  ;;  %v3941_v62 = vld [vmem:[%s16841_s12 + $0x988] sm:$0xff]  ;;  %v3986_v24 = vld [vmem:[%s16841_s12 + $0xaf0] sm:$0xff] }
 0x772   : > { %8656 = vmatprep.subr.mxu0 %v3797_v47  ;;  %8692 = vmatpush3.msra.mxu1 %v3845_v8  ;;  %v4034_v6 = vld [vmem:[%s16841_s12 + $0xc70] sm:$0xff]  ;;  %v3983_v8 = vld [vmem:[%s16841_s12 + $0xad8] sm:$0xff] }
 0x773   : > { %8657 = vmatpush3.msra.mxu0 %v3749_v14  ;;  %8693 = vmatprep.subr.mxu1 %v3890_v39  ;;  %v3938_v47 = vld [vmem:[%s16841_s12 + $0x970] sm:$0xff]  ;;  %v4031_v14 = vld [vmem:[%s16841_s12 + $0xc58] sm:$0xff] }
 0x774   : > { %8658 = vmatprep.subr.mxu0 %v3794_v17  ;;  %8694 = vmatpush3.msra.mxu1 %v3842_v10  ;;  %v3935_v39 = vld [vmem:[%s16841_s12 + $0x958] sm:$0xff]  ;;  %v3980_v17 = vld [vmem:[%s16841_s12 + $0xac0] sm:$0xff] }
 0x775   : > { %8659 = vmatpush3.msra.mxu0 %v3746_v19  ;;  %8695 = vmatprep.subr.mxu1 %v3887_v38  ;;  %v4028_v10 = vld [vmem:[%s16841_s12 + $0xc40] sm:$0xff]  ;;  %v3977_v38 = vld [vmem:[%s16841_s12 + $0xaa8] sm:$0xff] }
 0x776   : > { %8660 = vmatprep.subr.mxu0 %v3791_v20  ;;  %8696 = vmatpush3.msra.mxu1 %v3839_v22  ;;  %v3932_v19 = vld [vmem:[%s16841_s12 + $0x940] sm:$0xff]  ;;  %v4025_v20 = vld [vmem:[%s16841_s12 + $0xc28] sm:$0xff] }
 0x777   : > { %8661 = vmatpush3.msra.mxu0 %v3743_v25  ;;  %8697 = vmatprep.subr.mxu1 %v3884_v44  ;;  %v3929_v22 = vld [vmem:[%s16841_s12 + $0x928] sm:$0xff]  ;;  %v3974_v25 = vld [vmem:[%s16841_s12 + $0xa90] sm:$0xff] }
 0x778   : > { %8662 = vmatprep.subr.mxu0 %v3788_v26  ;;  %8698 = vmatpush3.msra.mxu1 %v3836_v27  ;;  %v4022_v44 = vld [vmem:[%s16841_s12 + $0xc10] sm:$0xff] }
 0x779   : > { %8663 = vmatpush3.msra.mxu0 %v3740_v28  ;;  %8699 = vmatprep.subr.mxu1 %v3881_v29  ;;  %v3926_v26 = vld [vmem:[%s16841_s12 + $0x910] sm:$0xff] }
 0x77a   : > { %8664 = vmatprep.subr.mxu0 %v3785_v30  ;;  %8700 = vmatpush3.msra.mxu1 %v3833_v34 }
 0x77b   : > { %8665 = vmatpush3.msra.mxu0 %v3737_v35  ;;  %8701 = vmatprep.subr.mxu1 %v3878_v36 }
 0x77c   : > { %8666 = vmatprep.subr.mxu0 %v3782_v11  ;;  %8702 = vmatpush3.msra.mxu1 %v3830_v37 }
 0x77d   : > { %8667 = vmatpush3.msra.mxu0 %v3734_v40  ;;  %4693 = vmatmul.mubr.f32.vlgmr.msra.gmra.mxu1 %v13327_v15  ;;  %v4061_v15 = vld [vmem:[%s16841_s12 + $0xd48] sm:$0xff] }
 0x77e   : > { %9022 = vmatprep.subr.mxu1 %v9502_v59  ;;  %4623 = vmatmul.mubr.f32.vlgmr.msra.gmra.mxu0 %v12925_v42  ;;  %v4013_v42 = vld [vmem:[%s16841_s12 + $0xbc8] sm:$0xff] }
 0x77f   : > { %8706 = vmatprep.subr.mxu0 %v4019_v41  ;;  %9023 = vmatpush3.msra.mxu1 %v4067_v60 }
 0x780   : > { %8707 = vmatpush3.msra.mxu0 %v3971_v9  ;;  %4762 = vmatprep.mubr.f32.mxu0 %v13004_v58  ;;  %v4010_v58 = vld [vmem:[%s16841_s12 + $0xbb0] sm:$0xff] }
 0x781   : > { %9024 = vmatprep.subr.mxu1 %v9502_v59  ;;  %8708 = vmatprep.subr.mxu0 %v4016_v23 }
 0x782   : > { %9025 = vmatpush3.msra.mxu1 %v4064_v43  ;;  %8709 = vmatpush3.msra.mxu0 %v3968_v45 }
 0x783   : > { %9026 = vmatprep.subr.mxu1 %v9502_v59  ;;  %8710 = vmatprep.subr.mxu0 %v4013_v42 }
 0x784   : > { %9027 = vmatpush3.msra.mxu1 %v4061_v15  ;;  %8711 = vmatpush3.msra.mxu0 %v3965_v46 }
 0x785   : > { %9028 = vmatprep.subr.mxu1 %v9502_v59  ;;  %8712 = vmatprep.subr.mxu0 %v4010_v58 }
 0x786   : > { %9029 = vmatpush3.msra.mxu1 %v4058_v13  ;;  %8713 = vmatpush3.msra.mxu0 %v3962_v48 }
 0x787   : > { %9030 = vmatprep.subr.mxu1 %v9502_v59  ;;  %8714 = vmatprep.subr.mxu0 %v4007_v49 }
 0x788   : > { %9031 = vmatpush3.msra.mxu1 %v4055_v50  ;;  %8715 = vmatpush3.msra.mxu0 %v3959_v51 }
 0x789   : > { %9032 = vmatprep.subr.mxu1 %v9502_v59  ;;  %8716 = vmatprep.subr.mxu0 %v4004_v52 }
 0x78a   : > { %9033 = vmatpush3.msra.mxu1 %v4052_v53  ;;  %8717 = vmatpush3.msra.mxu0 %v3956_v54 }
 0x78b   : > { %9034 = vmatprep.subr.mxu1 %v9502_v59  ;;  %8718 = vmatprep.subr.mxu0 %v4001_v55 }
 0x78c   : > { %9035 = vmatpush3.msra.mxu1 %v4049_v56  ;;  %8719 = vmatpush3.msra.mxu0 %v3953_v7 }
 0x78d   : > { %9036 = vmatprep.subr.mxu1 %v9502_v59  ;;  %8720 = vmatprep.subr.mxu0 %v3998_v12 }
 0x78e   : > { %9037 = vmatpush3.msra.mxu1 %v4046_v18  ;;  %8721 = vmatpush3.msra.mxu0 %v3950_v61 }
 0x78f   : > { %9038 = vmatprep.subr.mxu1 %v9502_v59  ;;  %8722 = vmatprep.subr.mxu0 %v3995_v0 }
 0x790   : > { %9039 = vmatpush3.msra.mxu1 %v4043_v1  ;;  %8723 = vmatpush3.msra.mxu0 %v3947_v16 }
 0x791   : > { %9040 = vmatprep.subr.mxu1 %v9502_v59  ;;  %8724 = vmatprep.subr.mxu0 %v3992_v2 }
 0x792   : > { %9041 = vmatpush3.msra.mxu1 %v4040_v3  ;;  %8725 = vmatpush3.msra.mxu0 %v3944_v4 }
 0x793   : > { %9042 = vmatprep.subr.mxu1 %v9502_v59  ;;  %8726 = vmatprep.subr.mxu0 %v3989_v63 }
 0x794   : > { %9043 = vmatpush3.msra.mxu1 %v4037_v5  ;;  %8727 = vmatpush3.msra.mxu0 %v3941_v62  ;;  %v4070_v62 = vld [vmem:[%s16767_s14] sm:$0xff] }
 0x795   : > { %9044 = vmatprep.subr.mxu1 %v9502_v59  ;;  %8728 = vmatprep.subr.mxu0 %v3986_v24 }
 0x796   : > { %9045 = vmatpush3.msra.mxu1 %v4034_v6  ;;  %8729 = vmatpush3.msra.mxu0 %v3938_v47 }
 0x797   : > { %9046 = vmatprep.subr.mxu1 %v9502_v59  ;;  %8730 = vmatprep.subr.mxu0 %v3983_v8 }
 0x798   : > { %9047 = vmatpush3.msra.mxu1 %v4031_v14  ;;  %8731 = vmatpush3.msra.mxu0 %v3935_v39 }
 0x799   : > { %9048 = vmatprep.subr.mxu1 %v9502_v59  ;;  %8732 = vmatprep.subr.mxu0 %v3980_v17  ;;  %v4071_v17 = vld [vmem:[%s16767_s14 + $0x8] sm:$0xff] }
 0x79a   : > { %9049 = vmatpush3.msra.mxu1 %v4028_v10  ;;  %8733 = vmatpush3.msra.mxu0 %v3932_v19 }
 0x79b   : > { %9050 = vmatprep.subr.mxu1 %v9502_v59  ;;  %8734 = vmatprep.subr.mxu0 %v3977_v38  ;;  %v4072_v38 = vld [vmem:[%s16767_s14 + $0x10] sm:$0x3] }
 0x79c   : > { %9051 = vmatpush3.msra.mxu1 %v4025_v20  ;;  %8735 = vmatpush3.msra.mxu0 %v3929_v22 }
 0x79d   : > { %9052 = vmatprep.subr.mxu1 %v9502_v59  ;;  %8736 = vmatprep.subr.mxu0 %v3974_v25 }
 0x79e   : > { %9053 = vmatpush3.msra.mxu1 %v4022_v44  ;;  %9054 = vmatprep.mubr.msk.f32.mxu1 %vm9503_vm1, %v9502_v59  ;;  %v4073_v44 = vld [vmem:[%s16768_s15] sm:$0xff] }
 0x79f   : > { %8737 = vmatpush3.msra.mxu0 %v3926_v26  ;;  %9055 = vmatmul.mubr.f32.vlgmr.msra.gmra.mxu1 %v13526_v33  ;;  %v4068_v33 = vld [vmem:[%s16842_s2] sm:$0x7]  ;;  %s16844_s2 = sld [smem:[#allocation25_spill]] }
 0x7a0   : > { %4763 = vmatmul.mubr.f32.vlgmr.msra.gmra.mxu0 %v12916_v31  ;;  %5054 = vmatprep.mubr.f32.mxu1 %v9502_v59  ;;  %v4069_v31 = vld [vmem:[%s16766_s13] sm:$0x7]  ;;  %v4842_v9 = vrot.slane %v4068_v33, %v11090_v32  ;;  %v4846_v15 = vrot.slane %v4068_v33, %v11074_v57  ;;  %v4850_v8 = vrot.slane %v4068_v33, %v11085_v21 }
 0x7a1   : > { %4962 = vmatprep.mubr.f32.mxu0 %v9502_v59  ;;  %v4861_v46 = vrot.slane %v4069_v31, %v11090_v32  ;;  %v4865_v49 = vrot.slane %v4069_v31, %v11074_v57  ;;  %v4869_v39 = vrot.slane %v4069_v31, %v11085_v21  ;;  %v5209_v33 = vld [vmem:[%s16769_s16 + $0x440] sm:$0xff]  ;;  %v5208_v31 = vld [vmem:[%s16769_s16 + $0x438] sm:$0xff] }
 0x7b8   : > { %v4270_v28 = vpop.f32.mrf.mxu1 }
 0x7b9   : > { %v4199_v27 = vpop.f32.mrf.mxu0 }
 0x7ba   : > { %v4272_v34 = vpop.f32.mrf.mxu1  ;;  %v4271_v35 = vadd.f32 %v4270_v28, %v4199_v27  ;;  %v4074_v27 = vld [vmem:[%s16768_s15 + $0x8] sm:$0xff]  ;;  %v4075_v28 = vld [vmem:[%s16768_s15 + $0x10] sm:$0x3] }
 0x7bb   : > { %v4201_v29 = vpop.f32.mrf.mxu0 }
 0x7bc   : > { %v4273_v11 = vadd.f32 %v4272_v34, %v4201_v29  ;;  %v5215_v29 = vld [vmem:[%s16769_s16 + $0x470] sm:$0xff]  ;;  %v5214_v34 = vld [vmem:[%s16769_s16 + $0x468] sm:$0xff] }
 0x7f9   : > { %v4412_v40 = vpop.f32.mrf.mxu1 }
 0x7fa   : > { %v4341_v30 = vpop.f32.mrf.mxu0 }
 0x7fb   : > { %v4342_v37 = vadd.f32 %v4341_v30, %v4271_v35  ;;  %v4414_v23 = vpop.f32.mrf.mxu1  ;;  %v5119_v30 = vld [vmem:[%s16769_s16 + $0x170] sm:$0xff]  ;;  %v5118_v35 = vld [vmem:[%s16769_s16 + $0x168] sm:$0xff] }
 0x7fc   : > { %v4343_v36 = vpop.f32.mrf.mxu0 }
 0x7fd   : > { %v4344_v41 = vadd.f32 %v4343_v36, %v4273_v11  ;;  %v4413_v60 = vadd.f32 %v4412_v40, %v4342_v37  ;;  %v5212_v36 = vld [vmem:[%s16769_s16 + $0x458] sm:$0xff]  ;;  %v5211_v37 = vld [vmem:[%s16769_s16 + $0x450] sm:$0xff] }
 0x7fe   : > { %v5116_v11 = vld [vmem:[%s16769_s16 + $0x158] sm:$0xff]  ;;  %v5115_v40 = vld [vmem:[%s16769_s16 + $0x150] sm:$0xff] }
 0x7ff   : > { %v4415_v42 = vadd.f32 %v4414_v23, %v4344_v41  ;;  %v5113_v41 = vld [vmem:[%s16769_s16 + $0x140] sm:$0xff]  ;;  %v5110_v23 = vld [vmem:[%s16769_s16 + $0x128] sm:$0xff] }
 0x81b   : > { %v8633_v55 = vpop.f32.mrf.mxu1 }
 0x81c   : > { %v4483_v43 = vpop.f32.mrf.mxu0 }
 0x81d   : > { %v4484_v45 = vadd.f32 %v4483_v43, %v4413_v60  ;;  %v8634_v7 = vpop.f32.mrf.mxu1  ;;  %v5112_v60 = vld [vmem:[%s16769_s16 + $0x138] sm:$0xff]  ;;  %v5205_v43 = vld [vmem:[%s16769_s16 + $0x420] sm:$0xff] }
 0x81e   : > { %v4485_v58 = vpop.f32.mrf.mxu0  ;;  %v8635_v0 = vadd.f32 %v8634_v7, %v8633_v55  ;;  %v5194_v55 = vld [vmem:[%s16769_s16 + $0x3c8] sm:$0xff]  ;;  %v5193_v7 = vld [vmem:[%s16769_s16 + $0x3c0] sm:$0xff] }
 0x81f   : > { %v4854_v13 = vmul.f32 %v4842_v9, %v4484_v45  ;;  %v4486_v48 = vadd.f32 %v4485_v58, %v4415_v42  ;;  %v5206_v9 = vld [vmem:[%s16769_s16 + $0x428] sm:$0xff]  ;;  %v5109_v45 = vld [vmem:[%s16769_s16 + $0x120] sm:$0xff]  ;;  %v5203_v42 = vld [vmem:[%s16769_s16 + $0x410] sm:$0xff] }
 0x820   : > { %v5106_v58 = vld [vmem:[%s16769_s16 + $0x108] sm:$0xff] }
 0x821   : > { %v4855_v50 = vmul.f32 %v4846_v15, %v4486_v48  ;;  %v4873_v51 = vadd.f32 %v4861_v46, %v4854_v13  ;;  %v5107_v15 = vld [vmem:[%s16769_s16 + $0x110] sm:$0xff]  ;;  %v5202_v46 = vld [vmem:[%s16769_s16 + $0x408] sm:$0xff]  ;;  %v5200_v13 = vld [vmem:[%s16769_s16 + $0x3f8] sm:$0xff] }
 0x822   : > { %v5104_v48 = vld [vmem:[%s16769_s16 + $0xf8] sm:$0xff] }
 0x823   : > { %v4874_v52 = vadd.f32 %v4865_v49, %v4855_v50  ;;  %v4876_v54 = vmax.f32 %v4873_v51, 0.0  ;;  %v5199_v49 = vld [vmem:[%s16769_s16 + $0x3f0] sm:$0xff]  ;;  %v5197_v51 = vld [vmem:[%s16769_s16 + $0x3e0] sm:$0xff] }
 0x824   : > { %v5103_v50 = vld [vmem:[%s16769_s16 + $0xf0] sm:$0xff] }
 0x825   : > { %v4877_v53 = vmax.f32 %v4874_v52, 0.0  ;;  %v5101_v52 = vld [vmem:[%s16769_s16 + $0xe0] sm:$0xff] }
 0x827   : > { %4881 = vrot.lane.b32.xlu1 %v4877_v53, %s9505_s1  ;;  %5020 = vmatprep.subr.mxu1 %v4877_v53  ;;  %v5196_v53 = vld [vmem:[%s16769_s16 + $0x3d8] sm:$0xff] }
 0x828   : > { %5021 = vmatpush1.msra.mxu1 %v4876_v54  ;;  %v5100_v54 = vld [vmem:[%s16769_s16 + $0xd8] sm:$0xff] }
 0x829   : > { %8238 = vmatmul.mubr.msk.f32.vlgmr.msra.gmra.mxu1 %vm4888_vm10, %v4070_v62  ;;  %5697 = vmatprep.subr.mxu1 %v5215_v29  ;;  %v5184_v62 = vld [vmem:[%s16769_s16 + $0x378] sm:$0xff]  ;;  %v5170_v29 = vld [vmem:[%s16769_s16 + $0x308] sm:$0xff] }
 0x82a   : > { %5060 = vmatprep.mubr.f32.mxu1 %v9502_v59  ;;  %5698 = vmatpush1.msra.mxu1 %v5214_v34  ;;  %v5169_v34 = vld [vmem:[%s16769_s16 + $0x300] sm:$0xff] }
 0x82b   : > { %5699 = vmatprep.subr.mxu1 %v5212_v36  ;;  %v5263_v36 = vld [vmem:[%s16769_s16 + $0x5f0] sm:$0xff] }
 0x82c   : > { %5700 = vmatpush1.msra.mxu1 %v5211_v37  ;;  %v5262_v37 = vld [vmem:[%s16769_s16 + $0x5e8] sm:$0xff] }
 0x82d   : > { %8239 = vmatmul.mubr.msk.f32.gmra.mxu1 %vm4888_vm10, %v4071_v17  ;;  %5701 = vmatprep.subr.mxu1 %v5209_v33  ;;  %v5083_v17 = vld [vmem:[%s16769_s16 + $0x50] sm:$0xff]  ;;  %v5260_v33 = vld [vmem:[%s16769_s16 + $0x5d8] sm:$0xff] }
 0x82e   : > { %5066 = vmatprep.mubr.f32.mxu1 %v9502_v59  ;;  %5702 = vmatpush1.msra.mxu1 %v5208_v31  ;;  %v5259_v31 = vld [vmem:[%s16769_s16 + $0x5d0] sm:$0xff] }
 0x82f   : > { %5703 = vmatprep.subr.mxu1 %v5206_v9  ;;  %v5257_v9 = vld [vmem:[%s16769_s16 + $0x5c0] sm:$0xff] }
 0x830   : > { %5704 = vmatpush1.msra.mxu1 %v5205_v43  ;;  %v5256_v43 = vld [vmem:[%s16769_s16 + $0x5b8] sm:$0xff] }
 0x831   : > { %8240 = vmatmul.mubr.msk.f32.gmra.mxu1 %vm4888_vm10, %v4072_v38  ;;  %5705 = vmatprep.subr.mxu1 %v5203_v42  ;;  %v5176_v38 = vld [vmem:[%s16769_s16 + $0x338] sm:$0xff]  ;;  %v5254_v42 = vld [vmem:[%s16769_s16 + $0x5a8] sm:$0xff] }
 0x832   : > { %5706 = vmatpush1.msra.mxu1 %v5202_v46  ;;  %v5253_v46 = vld [vmem:[%s16769_s16 + $0x5a0] sm:$0xff] }
 0x833   : > { %5707 = vmatprep.subr.mxu1 %v5200_v13  ;;  %v5251_v13 = vld [vmem:[%s16769_s16 + $0x590] sm:$0xff] }
 0x834   : > { %5708 = vmatpush1.msra.mxu1 %v5199_v49  ;;  %v5250_v49 = vld [vmem:[%s16769_s16 + $0x588] sm:$0xff] }
 0x835   : > { %5709 = vmatprep.subr.mxu1 %v5197_v51  ;;  %v5248_v51 = vld [vmem:[%s16769_s16 + $0x578] sm:$0xff] }
 0x836   : > { %5710 = vmatpush1.msra.mxu1 %v5196_v53  ;;  %v5247_v53 = vld [vmem:[%s16769_s16 + $0x570] sm:$0xff] }
 0x837   : > { %5711 = vmatprep.subr.mxu1 %v5194_v55  ;;  %v5245_v55 = vld [vmem:[%s16769_s16 + $0x560] sm:$0xff] }
 0x838   : > { %5712 = vmatpush1.msra.mxu1 %v5193_v7  ;;  %v5244_v7 = vld [vmem:[%s16769_s16 + $0x558] sm:$0xff] }
 0x83d   : > { %v8703_v18 = vpop.f32.mrf.mxu1 }
 0x83e   : > { %v8668_v56 = vpop.f32.mrf.mxu0 }
 0x83f   : > { %v8704_v1 = vpop.f32.mrf.mxu1 }
 0x840   : > { %v8669_v12 = vpop.f32.mrf.mxu0  ;;  %v8705_v4 = vadd.f32 %v8704_v1, %v8703_v18  ;;  %v5191_v18 = vld [vmem:[%s16769_s16 + $0x3b0] sm:$0xff]  ;;  %v5094_v1 = vld [vmem:[%s16769_s16 + $0xa8] sm:$0xff] }
 0x841   : > { %v8670_v61 = vadd.f32 %v8669_v12, %v8668_v56  ;;  %v5098_v56 = vld [vmem:[%s16769_s16 + $0xc8] sm:$0xff]  ;;  %v5097_v12 = vld [vmem:[%s16769_s16 + $0xc0] sm:$0xff]  ;;  %5713 = vmatprep.subr.mxu1 %v5191_v18 }
 0x842   : > { %v5242_v18 = vld [vmem:[%s16769_s16 + $0x548] sm:$0xff] }
 0x843   : > { %v4625_v16 = vadd.f32 %v8670_v61, %v8635_v0  ;;  %v5095_v61 = vld [vmem:[%s16769_s16 + $0xb0] sm:$0xff]  ;;  %v5190_v0 = vld [vmem:[%s16769_s16 + $0x3a8] sm:$0xff] }
 0x844   : > { %5714 = vmatpush1.msra.mxu1 %v5190_v0  ;;  %v5241_v0 = vld [vmem:[%s16769_s16 + $0x540] sm:$0xff] }
 0x845   : > { %v4695_v24 = vadd.f32 %v8705_v4, %v4625_v16  ;;  %v5188_v16 = vld [vmem:[%s16769_s16 + $0x398] sm:$0xff]  ;;  %v5091_v4 = vld [vmem:[%s16769_s16 + $0x90] sm:$0xff] }
 0x846   : > { %5715 = vmatprep.subr.mxu1 %v5188_v16  ;;  %v5239_v16 = vld [vmem:[%s16769_s16 + $0x530] sm:$0xff] }
 0x85f   : > { %v4834_v2 = vpop.f32.mrf.mxu1 }
 0x860   : > { %v8738_v3 = vpop.f32.mrf.mxu0 }
 0x861   : > { %v9056_v63 = vpop.f32.mrf.mxu1 }
 0x862   : > { %v8739_v5 = vpop.f32.mrf.mxu0  ;;  %v5185_v63 = vld [vmem:[%s16769_s16 + $0x380] sm:$0xff] }
 0x863   : > { %v8740_v6 = vadd.f32 %v8739_v5, %v8738_v3  ;;  %v5187_v3 = vld [vmem:[%s16769_s16 + $0x390] sm:$0xff]  ;;  %v5089_v5 = vld [vmem:[%s16769_s16 + $0x80] sm:$0xff] }
 0x864   : > { %5716 = vmatpush1.msra.mxu1 %v5187_v3  ;;  %v5238_v3 = vld [vmem:[%s16769_s16 + $0x528] sm:$0xff] }
 0x865   : > { %v4765_v47 = vadd.f32 %v8740_v6, %v4695_v24  ;;  %v5088_v24 = vld [vmem:[%s16769_s16 + $0x78] sm:$0xff]  ;;  %v5182_v6 = vld [vmem:[%s16769_s16 + $0x368] sm:$0xff]  ;;  %5717 = vmatprep.subr.mxu1 %v5185_v63 }
 0x866   : > { %5718 = vmatpush1.msra.mxu1 %v5184_v62  ;;  %v5236_v63 = vld [vmem:[%s16769_s16 + $0x518] sm:$0xff]  ;;  %v5235_v62 = vld [vmem:[%s16769_s16 + $0x510] sm:$0xff] }
 0x867   : > { %v4835_v14 = vadd.f32 %v4834_v2, %v4765_v47  ;;  %v5092_v2 = vld [vmem:[%s16769_s16 + $0x98] sm:$0xff]  ;;  %v5086_v47 = vld [vmem:[%s16769_s16 + $0x68] sm:$0xff]  ;;  %5719 = vmatprep.subr.mxu1 %v5182_v6  ;;  %v5233_v6 = vld [vmem:[%s16769_s16 + $0x500] sm:$0xff] }
 0x869   : > { %v4856_v10 = vmul.f32 %v4850_v8, %v4835_v14  ;;  %v5181_v8 = vld [vmem:[%s16769_s16 + $0x360] sm:$0xff] }
 0x86a   : > { %v5085_v14 = vld [vmem:[%s16769_s16 + $0x60] sm:$0xff]  ;;  %5720 = vmatpush1.msra.mxu1 %v5181_v8  ;;  %v5232_v8 = vld [vmem:[%s16769_s16 + $0x4f8] sm:$0xff] }
 0x86b   : > { %v4875_v19 = vadd.f32 %v4869_v39, %v4856_v10  ;;  %v5179_v39 = vld [vmem:[%s16769_s16 + $0x350] sm:$0xff]  ;;  %v5178_v10 = vld [vmem:[%s16769_s16 + $0x348] sm:$0xff] }
 0x86c   : > { %5721 = vmatprep.subr.mxu1 %v5179_v39  ;;  %v5230_v39 = vld [vmem:[%s16769_s16 + $0x4e8] sm:$0xff] }
 0x86d   : > { %v4878_v20 = vmax.f32 %v4875_v19, 0.0  ;;  %v5082_v19 = vld [vmem:[%s16769_s16 + $0x48] sm:$0xff]  ;;  %5722 = vmatpush1.msra.mxu1 %v5178_v10  ;;  %v5229_v10 = vld [vmem:[%s16769_s16 + $0x4e0] sm:$0xff] }
 0x86e   : > { %5723 = vmatprep.subr.mxu1 %v5176_v38  ;;  %v5227_v38 = vld [vmem:[%s16769_s16 + $0x4d0] sm:$0xff] }
 0x86f   : > { %4883 = vrot.lane.b32.xlu0 %v4878_v20, %s9505_s1  ;;  %v5080_v20 = vld [vmem:[%s16769_s16 + $0x38] sm:$0xff] }
 0x899   : > { %v4882_v22 = vpop.permute.xlu1 %4881 }
 0x8e1   : > { %v4884_v25 = vpop.permute.xlu0 %4883 }
 0x8e2   : > { %v4885_v26 = vsel %vm4082_vm9, %v4882_v22, %v4884_v25  ;;  %4928 = vmatprep.subr.mxu0 %v4884_v25  ;;  %v5175_v22 = vld [vmem:[%s16769_s16 + $0x330] sm:$0xff] }
 0x8e3   : > { %4929 = vmatpush1.msra.mxu0 %v4885_v26  ;;  %v5079_v25 = vld [vmem:[%s16769_s16 + $0x30] sm:$0xff]  ;;  %v5077_v26 = vld [vmem:[%s16769_s16 + $0x20] sm:$0xff]  ;;  %5724 = vmatpush1.msra.mxu1 %v5175_v22  ;;  %v5226_v22 = vld [vmem:[%s16769_s16 + $0x4c8] sm:$0xff] }
 0x8e4   : > { %8235 = vmatmul.mubr.msk.f32.vlgmr.msra.gmra.mxu0 %vm4888_vm10, %v4073_v44  ;;  %5620 = vmatprep.subr.mxu0 %v5119_v30  ;;  %v5173_v44 = vld [vmem:[%s16769_s16 + $0x320] sm:$0xff]  ;;  %v5074_v30 = vld [vmem:[%s16769_s16 + $0x8] sm:$0xff] }
 0x8e5   : > { %4968 = vmatprep.mubr.f32.mxu0 %v9502_v59  ;;  %5621 = vmatpush1.msra.mxu0 %v5118_v35  ;;  %v5073_v35 = vld [vmem:[%s16769_s16] sm:$0xff] }
 0x8e6   : > { %5622 = vmatprep.subr.mxu0 %v5116_v11  ;;  %5725 = vmatprep.subr.mxu1 %v5173_v44  ;;  %v5167_v11 = vld [vmem:[%s16769_s16 + $0x2f0] sm:$0xff]  ;;  %v5224_v44 = vld [vmem:[%s16769_s16 + $0x4b8] sm:$0xff] }
 0x8e7   : > { %5623 = vmatpush1.msra.mxu0 %v5115_v40  ;;  %v5166_v40 = vld [vmem:[%s16769_s16 + $0x2e8] sm:$0xff] }
 0x8e8   : > { %8236 = vmatmul.mubr.msk.f32.gmra.mxu0 %vm4888_vm10, %v4074_v27  ;;  %5624 = vmatprep.subr.mxu0 %v5113_v41  ;;  %v5172_v27 = vld [vmem:[%s16769_s16 + $0x318] sm:$0xff] }
 0x8e9   : > { %4974 = vmatprep.mubr.f32.mxu0 %v9502_v59  ;;  %5625 = vmatpush1.msra.mxu0 %v5112_v60  ;;  %v5164_v41 = vld [vmem:[%s16769_s16 + $0x2d8] sm:$0xff]  ;;  %v5163_v60 = vld [vmem:[%s16769_s16 + $0x2d0] sm:$0xff] }
 0x8ea   : > { %5626 = vmatprep.subr.mxu0 %v5110_v23  ;;  %5726 = vmatpush1.msra.mxu1 %v5172_v27  ;;  %v5161_v23 = vld [vmem:[%s16769_s16 + $0x2c0] sm:$0xff]  ;;  %v5223_v27 = vld [vmem:[%s16769_s16 + $0x4b0] sm:$0xff] }
 0x8eb   : > { %5627 = vmatpush1.msra.mxu0 %v5109_v45  ;;  %5727 = vmatprep.subr.mxu1 %v5170_v29  ;;  %v5160_v45 = vld [vmem:[%s16769_s16 + $0x2b8] sm:$0xff]  ;;  %v5221_v29 = vld [vmem:[%s16769_s16 + $0x4a0] sm:$0xff] }
 0x8ec   : > { %8237 = vmatmul.mubr.msk.f32.gmra.mxu0 %vm4888_vm10, %v4075_v28  ;;  %5628 = vmatprep.subr.mxu0 %v5107_v15  ;;  %v5076_v28 = vld [vmem:[%s16769_s16 + $0x18] sm:$0xff]  ;;  %v5158_v15 = vld [vmem:[%s16769_s16 + $0x2a8] sm:$0xff] }
 0x8ed   : > { %5629 = vmatpush1.msra.mxu0 %v5106_v58  ;;  %5728 = vmatpush1.msra.mxu1 %v5169_v34  ;;  %v5157_v58 = vld [vmem:[%s16769_s16 + $0x2a0] sm:$0xff]  ;;  %v5220_v34 = vld [vmem:[%s16769_s16 + $0x498] sm:$0xff] }
 0x8ee   : > { %5630 = vmatprep.subr.mxu0 %v5104_v48  ;;  %5729 = vmatprep.subr.mxu1 %v5263_v36  ;;  %v5155_v48 = vld [vmem:[%s16769_s16 + $0x290] sm:$0xff] }
 0x8ef   : > { %5631 = vmatpush1.msra.mxu0 %v5103_v50  ;;  %5730 = vmatpush2.msra.mxu1 %v5262_v37  ;;  %v5154_v50 = vld [vmem:[%s16769_s16 + $0x288] sm:$0xff] }
 0x8f0   : > { %5632 = vmatprep.subr.mxu0 %v5101_v52  ;;  %5731 = vmatprep.subr.mxu1 %v5260_v33  ;;  %v5152_v52 = vld [vmem:[%s16769_s16 + $0x278] sm:$0xff]  ;;  %v5218_v37 = vld [vmem:[%s16769_s16 + $0x488] sm:$0xff] }
 0x8f1   : > { %5633 = vmatpush1.msra.mxu0 %v5100_v54  ;;  %5732 = vmatpush2.msra.mxu1 %v5259_v31  ;;  %v5151_v54 = vld [vmem:[%s16769_s16 + $0x270] sm:$0xff]  ;;  %v5121_v31 = vld [vmem:[%s16769_s16 + $0x180] sm:$0xff] }
 0x8f2   : > { %5634 = vmatprep.subr.mxu0 %v5098_v56  ;;  %5733 = vmatprep.subr.mxu1 %v5257_v9  ;;  %v5149_v56 = vld [vmem:[%s16769_s16 + $0x260] sm:$0xff]  ;;  %v5311_v9 = vld [vmem:[%s16769_s16 + $0x770] sm:$0xff] }
 0x8f3   : > { %5635 = vmatpush1.msra.mxu0 %v5097_v12  ;;  %5734 = vmatpush2.msra.mxu1 %v5256_v43  ;;  %v5148_v12 = vld [vmem:[%s16769_s16 + $0x258] sm:$0xff] }
 0x8f4   : > { %5636 = vmatprep.subr.mxu0 %v5095_v61  ;;  %5735 = vmatprep.subr.mxu1 %v5254_v42  ;;  %v5146_v61 = vld [vmem:[%s16769_s16 + $0x248] sm:$0xff] }
 0x8f5   : > { %5637 = vmatpush1.msra.mxu0 %v5094_v1  ;;  %5736 = vmatpush2.msra.mxu1 %v5253_v46  ;;  %v5145_v1 = vld [vmem:[%s16769_s16 + $0x240] sm:$0xff] }
 0x8f6   : > { %5638 = vmatprep.subr.mxu0 %v5092_v2  ;;  %5737 = vmatprep.subr.mxu1 %v5251_v13  ;;  %v5143_v2 = vld [vmem:[%s16769_s16 + $0x230] sm:$0xff] }
 0x8f7   : > { %5639 = vmatpush1.msra.mxu0 %v5091_v4  ;;  %5738 = vmatpush2.msra.mxu1 %v5250_v49  ;;  %v5142_v4 = vld [vmem:[%s16769_s16 + $0x228] sm:$0xff] }
 0x8f8   : > { %5640 = vmatprep.subr.mxu0 %v5089_v5  ;;  %5739 = vmatprep.subr.mxu1 %v5248_v51  ;;  %v5140_v5 = vld [vmem:[%s16769_s16 + $0x218] sm:$0xff] }
 0x8f9   : > { %5641 = vmatpush1.msra.mxu0 %v5088_v24  ;;  %5740 = vmatpush2.msra.mxu1 %v5247_v53  ;;  %v5139_v24 = vld [vmem:[%s16769_s16 + $0x210] sm:$0xff] }
 0x8fa   : > { %5642 = vmatprep.subr.mxu0 %v5086_v47  ;;  %5741 = vmatprep.subr.mxu1 %v5245_v55  ;;  %v5137_v47 = vld [vmem:[%s16769_s16 + $0x200] sm:$0xff] }
 0x8fb   : > { %5643 = vmatpush1.msra.mxu0 %v5085_v14  ;;  %5742 = vmatpush2.msra.mxu1 %v5244_v7  ;;  %v5136_v14 = vld [vmem:[%s16769_s16 + $0x1f8] sm:$0xff] }
 0x8fc   : > { %5644 = vmatprep.subr.mxu0 %v5083_v17  ;;  %5743 = vmatprep.subr.mxu1 %v5242_v18  ;;  %v5134_v17 = vld [vmem:[%s16769_s16 + $0x1e8] sm:$0xff] }
 0x8fd   : > { %5645 = vmatpush1.msra.mxu0 %v5082_v19  ;;  %5744 = vmatpush2.msra.mxu1 %v5241_v0  ;;  %v5133_v19 = vld [vmem:[%s16769_s16 + $0x1e0] sm:$0xff] }
 0x8fe   : > { %5646 = vmatprep.subr.mxu0 %v5080_v20  ;;  %5745 = vmatprep.subr.mxu1 %v5239_v16  ;;  %v5131_v20 = vld [vmem:[%s16769_s16 + $0x1d0] sm:$0xff] }
 0x8ff   : > { %5647 = vmatpush1.msra.mxu0 %v5079_v25  ;;  %5746 = vmatpush2.msra.mxu1 %v5238_v3  ;;  %v5130_v25 = vld [vmem:[%s16769_s16 + $0x1c8] sm:$0xff] }
 0x900   : > { %5648 = vmatprep.subr.mxu0 %v5077_v26  ;;  %5747 = vmatprep.subr.mxu1 %v5236_v63  ;;  %v5128_v26 = vld [vmem:[%s16769_s16 + $0x1b8] sm:$0xff] }
 0x901   : > { %5649 = vmatpush1.msra.mxu0 %v5076_v28  ;;  %5748 = vmatpush2.msra.mxu1 %v5235_v62  ;;  %v5127_v28 = vld [vmem:[%s16769_s16 + $0x1b0] sm:$0xff] }
 0x902   : > { %5650 = vmatprep.subr.mxu0 %v5074_v30  ;;  %5749 = vmatprep.subr.mxu1 %v5233_v6  ;;  %v5125_v30 = vld [vmem:[%s16769_s16 + $0x1a0] sm:$0xff] }
 0x903   : > { %5651 = vmatpush1.msra.mxu0 %v5073_v35  ;;  %5750 = vmatpush2.msra.mxu1 %v5232_v8  ;;  %v5056_v35 = vpop.f32.mrf.mxu1 }
 0x904   : > { %5652 = vmatprep.subr.mxu0 %v5167_v11  ;;  %5751 = vmatprep.subr.mxu1 %v5230_v39  ;;  %v5124_v11 = vld [vmem:[%s16769_s16 + $0x198] sm:$0xff] }
 0x905   : > { %5653 = vmatpush2.msra.mxu0 %v5166_v40  ;;  %5752 = vmatpush2.msra.mxu1 %v5229_v10  ;;  %v5058_v36 = vpop.f32.mrf.mxu1  ;;  %v5122_v40 = vld [vmem:[%s16769_s16 + $0x188] sm:$0xff] }
 0x906   : > { %5654 = vmatprep.subr.mxu0 %v5164_v41  ;;  %5753 = vmatprep.subr.mxu1 %v5227_v38  ;;  %v5217_v41 = vld [vmem:[%s16769_s16 + $0x480] sm:$0xff] }
 0x907   : > { %5655 = vmatpush2.msra.mxu0 %v5163_v60  ;;  %5754 = vmatpush2.msra.mxu1 %v5226_v22  ;;  %v5062_v33 = vpop.f32.mrf.mxu1  ;;  %v5407_v60 = vld [vmem:[%s16769_s16 + $0xa70] sm:$0xff] }
 0x908   : > { %5656 = vmatprep.subr.mxu0 %v5161_v23  ;;  %5755 = vmatprep.subr.mxu1 %v5224_v44 }
 0x909   : > { %5657 = vmatpush2.msra.mxu0 %v5160_v45  ;;  %5756 = vmatpush2.msra.mxu1 %v5223_v27  ;;  %v5064_v43 = vpop.f32.mrf.mxu1 }
 0x90a   : > { %5658 = vmatprep.subr.mxu0 %v5158_v15  ;;  %5757 = vmatprep.subr.mxu1 %v5221_v29  ;;  %v5406_v29 = vld [vmem:[%s16769_s16 + $0xa68] sm:$0xff] }
 0x90b   : > { %5659 = vmatpush2.msra.mxu0 %v5157_v58  ;;  %5758 = vmatpush2.msra.mxu1 %v5220_v34  ;;  %v5068_v58 = vpop.f32.mrf.mxu1 }
 0x90c   : > { %5660 = vmatprep.subr.mxu0 %v5155_v48  ;;  %5759 = vmatprep.subr.mxu1 %v5218_v37  ;;  %v5308_v37 = vld [vmem:[%s16769_s16 + $0x758] sm:$0xff] }
 0x90d   : > { %5661 = vmatpush2.msra.mxu0 %v5154_v50  ;;  %5760 = vmatpush2.msra.mxu1 %v5217_v41 }
 0x90e   : > { %5662 = vmatprep.subr.mxu0 %v5152_v52  ;;  %5851 = vmatprep.subr.mxu1 %v5407_v60  ;;  %v5401_v60 = vld [vmem:[%s16769_s16 + $0xa40] sm:$0xff] }
 0x90f   : > { %5663 = vmatpush2.msra.mxu0 %v5151_v54  ;;  %v5070_v54 = vpop.f32.mrf.mxu1 }
 0x910   : > { %5664 = vmatprep.subr.mxu0 %v5149_v56 }
 0x911   : > { %5665 = vmatpush2.msra.mxu0 %v5148_v12 }
 0x912   : > { %5666 = vmatprep.subr.mxu0 %v5146_v61 }
 0x913   : > { %5667 = vmatpush2.msra.mxu0 %v5145_v1 }
 0x914   : > { %5668 = vmatprep.subr.mxu0 %v5143_v2 }
 0x915   : > { %5669 = vmatpush2.msra.mxu0 %v5142_v4 }
 0x916   : > { %5670 = vmatprep.subr.mxu0 %v5140_v5 }
 0x917   : > { %5671 = vmatpush2.msra.mxu0 %v5139_v24 }
 0x918   : > { %5672 = vmatprep.subr.mxu0 %v5137_v47 }
 0x919   : > { %5673 = vmatpush2.msra.mxu0 %v5136_v14 }
 0x91a   : > { %5674 = vmatprep.subr.mxu0 %v5134_v17 }
 0x91b   : > { %5675 = vmatpush2.msra.mxu0 %v5133_v19 }
 0x91c   : > { %5676 = vmatprep.subr.mxu0 %v5131_v20 }
 0x91d   : > { %5677 = vmatpush2.msra.mxu0 %v5130_v25 }
 0x91e   : > { %5678 = vmatprep.subr.mxu0 %v5128_v26 }
 0x91f   : > { %5679 = vmatpush2.msra.mxu0 %v5127_v28 }
 0x920   : > { %5680 = vmatprep.subr.mxu0 %v5125_v30 }
 0x921   : > { %5681 = vmatpush2.msra.mxu0 %v5124_v11 }
 0x922   : > { %5682 = vmatprep.subr.mxu0 %v5122_v40  ;;  %v5403_v40 = vld [vmem:[%s16769_s16 + $0xa50] sm:$0xff] }
 0x923   : > { %5683 = vmatpush2.msra.mxu0 %v5121_v31  ;;  %v5307_v31 = vld [vmem:[%s16769_s16 + $0x750] sm:$0xff] }
 0x924   : > { %5774 = vmatprep.subr.mxu0 %v5311_v9 }
 0x9a4   : > { %v4964_v23 = vpop.f32.mrf.mxu0 }
 0x9a5   : > { %v14316_v42 = vadd.f32 %v5056_v35, %v4964_v23  ;;  %v5310_v35 = vld [vmem:[%s16769_s16 + $0x768] sm:$0xff]  ;;  %v5305_v23 = vld [vmem:[%s16769_s16 + $0x740] sm:$0xff] }
 0x9a6   : > { %v4966_v45 = vpop.f32.mrf.mxu0 }
 0x9a7   : > { %v5059_v15 = vadd.f32 %v5058_v36, %v4966_v45  ;;  %v5547_v52 = vrot.slane %v14316_v42, 1  ;;  %v5584_v14 = vrot.slane %v14316_v42, 2  ;;  %v5404_v36 = vld [vmem:[%s16769_s16 + $0xa58] sm:$0xff] }
 0x9a8   : > { %v4970_v46 = vpop.f32.mrf.mxu0 }
 0x9a9   : > { %v14318_v13 = vadd.f32 %v5062_v33, %v4970_v46  ;;  %v9262_v48 = vpack.i.bf16 %v5059_v15, %v14316_v42  ;;  %v5555_v55 = vrot.slane %v5059_v15, 1  ;;  %v5591_v5 = vrot.slane %v5059_v15, 2  ;;  %v5400_v46 = vld [vmem:[%s16769_s16 + $0xa38] sm:$0xff] }
 0x9aa   : > { %v4972_v49 = vpop.f32.mrf.mxu0 }
 0x9ab   : > { %v5065_v50 = vadd.f32 %v5064_v43, %v4972_v49  ;;  %9263 = vrot.lane.b32.xlu0 %v9262_v48, %s9505_s1  ;;  %v5548_v51 = vrot.slane %v14318_v13, 1  ;;  %9258 = vrot.lane.b32.xlu1 %v9262_v48, %s9506_s30  ;;  %v5585_v62 = vrot.slane %v14318_v13, 2  ;;  %v5304_v48 = vld [vmem:[%s16769_s16 + $0x738] sm:$0xff]  ;;  %v5398_v49 = vld [vmem:[%s16769_s16 + $0xa28] sm:$0xff] }
 0x9ac   : > { %v4976_v53 = vpop.f32.mrf.mxu0 }
 0x9ad   : > { %v5556_v56 = vrot.slane %v5065_v50, 1  ;;  %v5069_v7 = vadd.f32 %v5068_v58, %v4976_v53  ;;  %v14326_v12 = vsel %vm4092_vm7, %v5547_v52, %v5548_v51  ;;  %v9267_v61 = vpack.i.bf16 %v5065_v50, %v14318_v13  ;;  %v5301_v52 = vld [vmem:[%s16769_s16 + $0x720] sm:$0xff] }
 0x9ae   : > { %v4978_v18 = vpop.f32.mrf.mxu0  ;;  %5761 = vmatprep.mubr.f32.mxu1 %v14326_v12  ;;  %v5592_v3 = vrot.slane %v5065_v50, 2  ;;  %v14345_v17 = vsel %vm4113_vm8, %v5584_v14, %v5585_v62  ;;  %v5302_v50 = vld [vmem:[%s16769_s16 + $0x728] sm:$0xff] }
 0x9af   : > { %v5550_v0 = vrot.slane %v5069_v7, 1  ;;  %v5071_v1 = vadd.f32 %v5070_v54, %v4978_v18  ;;  %v5557_v16 = vsel %vm4092_vm7, %v5555_v55, %v5556_v56  ;;  %9268 = vrot.lane.b32.xlu1 %v9267_v61, %s9506_s30  ;;  %v5587_v47 = vrot.slane %v5069_v7, 2  ;;  %v5395_v55 = vld [vmem:[%s16769_s16 + $0xa10] sm:$0xff]  ;;  %v5394_v18 = vld [vmem:[%s16769_s16 + $0xa08] sm:$0xff] }
 0x9b0   : > { %v9272_v2 = vpack.i.bf16 %v5557_v16, %v14326_v12  ;;  %v5593_v39 = vsel %vm4113_vm8, %v5591_v5, %v5592_v3  ;;  %v5391_v16 = vld [vmem:[%s16769_s16 + $0x9f0] sm:$0xff]  ;;  %v5293_v5 = vld [vmem:[%s16769_s16 + $0x6e0] sm:$0xff]  ;;  %v5386_v14 = vld [vmem:[%s16769_s16 + $0x9c8] sm:$0xff] }
 0x9b1   : > { %v14334_v4 = vsel %vm4092_vm7, %v5548_v51, %v5550_v0  ;;  %v5558_v63 = vrot.slane %v5071_v1, 1  ;;  %v5594_v8 = vrot.slane %v5071_v1, 2  ;;  %v9292_v10 = vpack.i.bf16 %v5593_v39, %v14345_v17  ;;  %v5397_v51 = vld [vmem:[%s16769_s16 + $0xa20] sm:$0xff]  ;;  %v5392_v0 = vld [vmem:[%s16769_s16 + $0x9f8] sm:$0xff]  ;;  %v5290_v39 = vld [vmem:[%s16769_s16 + $0x6c8] sm:$0xff] }
 0x9b2   : > { %9273 = vrot.lane.b32.xlu0 %v9272_v2, %s9505_s1  ;;  %v14350_v19 = vsel %vm4113_vm8, %v5585_v62, %v5587_v47  ;;  %v5296_v1 = vld [vmem:[%s16769_s16 + $0x6f8] sm:$0xff] }
 0x9b3   : > { %v5559_v24 = vsel %vm4092_vm7, %v5556_v56, %v5558_v63  ;;  %9278 = vrot.lane.b32.xlu1 %v9272_v2, %s9506_s30  ;;  %v5595_v38 = vsel %vm4113_vm8, %v5592_v3, %v5594_v8  ;;  %v5299_v56 = vld [vmem:[%s16769_s16 + $0x710] sm:$0xff]  ;;  %v5389_v63 = vld [vmem:[%s16769_s16 + $0x9e0] sm:$0xff] }
 0x9b4   : > { %v9282_v6 = vpack.i.bf16 %v5559_v24, %v14334_v4  ;;  %v9307_v20 = vpack.i.bf16 %v5595_v38, %v14350_v19  ;;  %v5295_v2 = vld [vmem:[%s16769_s16 + $0x6f0] sm:$0xff]  ;;  %v5388_v24 = vld [vmem:[%s16769_s16 + $0x9d8] sm:$0xff]  ;;  %v5289_v38 = vld [vmem:[%s16769_s16 + $0x6c0] sm:$0xff] }
 0x9b6   : > { %9283 = vrot.lane.b32.xlu0 %v9282_v6, %s9505_s1 }
 0x9b7   : > { %9288 = vrot.lane.b32.xlu1 %v9282_v6, %s9506_s30  ;;  %v5292_v6 = vld [vmem:[%s16769_s16 + $0x6d8] sm:$0xff] }
 0x9ba   : > { %9293 = vrot.lane.b32.xlu0 %v9292_v10, %s9505_s1 }
 0x9bb   : > { %9298 = vrot.lane.b32.xlu1 %v9267_v61, %s9505_s1  ;;  %v5298_v61 = vld [vmem:[%s16769_s16 + $0x708] sm:$0xff] }
 0x9be   : > { %9303 = vrot.lane.b32.xlu0 %v9292_v10, %s9506_s30  ;;  %v5385_v10 = vld [vmem:[%s16769_s16 + $0x9c0] sm:$0xff] }
 0x9bf   : > { %9308 = vrot.lane.b32.xlu1 %v9307_v20, %s9505_s1 }
 0x9c2   : > { %9313 = vrot.lane.b32.xlu0 %v9307_v20, %s9506_s30 }
 0xa1d   : > { %v9264_v22 = vpop.permute.xlu0 %9263  ;;  %v9259_v26 = vpop.permute.xlu1 %9258 }
 0xa1e   : > { %v9266_v25 = vunpack.i.h.bf16 %v9264_v22  ;;  %v9265_v44 = vunpack.i.l.bf16 %v9264_v22  ;;  %v9261_v27 = vunpack.i.h.bf16 %v9259_v26  ;;  %v9260_v28 = vunpack.i.l.bf16 %v9259_v26  ;;  %v5383_v22 = vld [vmem:[%s16769_s16 + $0x9b0] sm:$0xff] }
 0xa20   : > { %v14363_v30 = vsel %vm4082_vm9, %v9265_v44, %v9266_v25  ;;  %v14366_v34 = vsel %vm5529_vm11, %v9260_v28, %v9261_v27  ;;  %v5287_v27 = vld [vmem:[%s16769_s16 + $0x6b0] sm:$0xff]  ;;  %v5382_v28 = vld [vmem:[%s16769_s16 + $0x9a8] sm:$0xff] }
 0xa21   : > { %5762 = vmatmul.mubr.f32.vlgmr.msra.gmra.mxu1 %v14363_v30  ;;  %v9269_v11 = vpop.permute.xlu1 %9268  ;;  %5684 = vmatprep.mubr.f32.mxu0 %v14366_v34 }
 0xa22   : > { %5852 = vmatpush1.msra.mxu1 %v5406_v29  ;;  %v9271_v33 = vunpack.i.h.bf16 %v9269_v11  ;;  %v9270_v41 = vunpack.i.l.bf16 %v9269_v11  ;;  %5685 = vmatmul.mubr.f32.vlgmr.msra.gmra.mxu0 %v14316_v42  ;;  %v5286_v29 = vld [vmem:[%s16769_s16 + $0x6a8] sm:$0xff]  ;;  %v5379_v11 = vld [vmem:[%s16769_s16 + $0x990] sm:$0xff] }
 0xa23   : > { %5767 = vmatprep.mubr.f32.mxu1 %v14334_v4  ;;  %5775 = vmatpush1.msra.mxu0 %v5310_v35  ;;  %v5380_v35 = vld [vmem:[%s16769_s16 + $0x998] sm:$0xff] }
 0xa24   : > { %5853 = vmatprep.subr.mxu1 %v5404_v36  ;;  %v9274_v9 = vpop.permute.xlu0 %9273  ;;  %5776 = vmatprep.subr.mxu0 %v5308_v37  ;;  %v14394_v15 = vsel %vm5529_vm11, %v9270_v41, %v9271_v33  ;;  %v5284_v36 = vld [vmem:[%s16769_s16 + $0x698] sm:$0xff]  ;;  %v5283_v37 = vld [vmem:[%s16769_s16 + $0x690] sm:$0xff]  ;;  %v5281_v41 = vld [vmem:[%s16769_s16 + $0x680] sm:$0xff] }
 0xa25   : > { %5854 = vmatpush1.msra.mxu1 %v5403_v40  ;;  %v9276_v43 = vunpack.i.h.bf16 %v9274_v9  ;;  %v9275_v45 = vunpack.i.l.bf16 %v9274_v9  ;;  %5777 = vmatpush1.msra.mxu0 %v5307_v31  ;;  %v14399_v58 = vpop.permute.xlu1 %9278  ;;  %v5377_v40 = vld [vmem:[%s16769_s16 + $0x980] sm:$0xff]  ;;  %v5376_v31 = vld [vmem:[%s16769_s16 + $0x978] sm:$0xff]  ;;  %v5374_v9 = vld [vmem:[%s16769_s16 + $0x968] sm:$0xff] }
 0xa26   : > { %5855 = vmatprep.subr.mxu1 %v5401_v60  ;;  %5690 = vmatprep.mubr.f32.mxu0 %v14394_v15  ;;  %v5280_v60 = vld [vmem:[%s16769_s16 + $0x678] sm:$0xff] }
 0xa27   : > { %5778 = vmatprep.subr.mxu0 %v5305_v23  ;;  %5856 = vmatpush1.msra.mxu1 %v5400_v46  ;;  %v14421_v54 = vsel %vm4082_vm9, %v9275_v45, %v9276_v43  ;;  %v5278_v23 = vld [vmem:[%s16769_s16 + $0x668] sm:$0xff]  ;;  %v5373_v43 = vld [vmem:[%s16769_s16 + $0x960] sm:$0xff]  ;;  %v5371_v46 = vld [vmem:[%s16769_s16 + $0x950] sm:$0xff] }
 0xa28   : > { %5691 = vmatmul.mubr.f32.gmra.mxu0 %v14318_v13  ;;  %v14418_v53 = vpop.permute.xlu0 %9283  ;;  %5857 = vmatprep.subr.mxu1 %v5398_v49  ;;  %v5277_v45 = vld [vmem:[%s16769_s16 + $0x660] sm:$0xff]  ;;  %v5370_v49 = vld [vmem:[%s16769_s16 + $0x948] sm:$0xff] }
 0xa29   : > { %5779 = vmatpush1.msra.mxu0 %v5304_v48  ;;  %5858 = vmatpush1.msra.mxu1 %v5397_v51  ;;  %v14429_v7 = vpop.permute.xlu1 %9288  ;;  %v5275_v48 = vld [vmem:[%s16769_s16 + $0x650] sm:$0xff]  ;;  %v5368_v51 = vld [vmem:[%s16769_s16 + $0x938] sm:$0xff] }
 0xa2a   : > { %5780 = vmatprep.subr.mxu0 %v5302_v50  ;;  %5838 = vmatprep.mubr.f32.mxu0 %v14421_v54  ;;  %v5274_v50 = vld [vmem:[%s16769_s16 + $0x648] sm:$0xff] }
 0xa2b   : > { %5781 = vmatpush1.msra.mxu0 %v5301_v52  ;;  %5859 = vmatprep.subr.mxu1 %v5395_v55  ;;  %v5272_v52 = vld [vmem:[%s16769_s16 + $0x638] sm:$0xff]  ;;  %v5367_v55 = vld [vmem:[%s16769_s16 + $0x930] sm:$0xff] }
 0xa2c   : > { %5782 = vmatprep.subr.mxu0 %v5299_v56  ;;  %v14450_v3 = vpop.permute.xlu0 %9293  ;;  %5860 = vmatpush1.msra.mxu1 %v5394_v18  ;;  %v5271_v56 = vld [vmem:[%s16769_s16 + $0x630] sm:$0xff]  ;;  %v5365_v18 = vld [vmem:[%s16769_s16 + $0x920] sm:$0xff] }
 0xa2d   : > { %5783 = vmatpush1.msra.mxu0 %v5298_v61  ;;  %5861 = vmatprep.subr.mxu1 %v5392_v0  ;;  %v9299_v62 = vpop.permute.xlu1 %9298  ;;  %v5269_v61 = vld [vmem:[%s16769_s16 + $0x620] sm:$0xff]  ;;  %v5364_v0 = vld [vmem:[%s16769_s16 + $0x918] sm:$0xff] }
 0xa2e   : > { %5784 = vmatprep.subr.mxu0 %v5296_v1  ;;  %5862 = vmatpush1.msra.mxu1 %v5391_v16  ;;  %v9301_v47 = vunpack.i.h.bf16 %v9299_v62  ;;  %v9300_v8 = vunpack.i.l.bf16 %v9299_v62  ;;  %v5268_v1 = vld [vmem:[%s16769_s16 + $0x618] sm:$0xff]  ;;  %v5362_v16 = vld [vmem:[%s16769_s16 + $0x908] sm:$0xff]  ;;  %v5455_v62 = vld [vmem:[%s16769_s16 + $0xbf0] sm:$0xff] }
 0xa2f   : > { %5785 = vmatpush1.msra.mxu0 %v5295_v2  ;;  %5863 = vmatprep.subr.mxu1 %v5389_v63  ;;  %v5266_v2 = vld [vmem:[%s16769_s16 + $0x608] sm:$0xff]  ;;  %v5361_v63 = vld [vmem:[%s16769_s16 + $0x900] sm:$0xff] }
 0xa30   : > { %5786 = vmatprep.subr.mxu0 %v5293_v5  ;;  %v9304_v20 = vpop.permute.xlu0 %9303  ;;  %5864 = vmatpush1.msra.mxu1 %v5388_v24  ;;  %v14480_v25 = vsel %vm4082_vm9, %v9300_v8, %v9301_v47  ;;  %v5265_v5 = vld [vmem:[%s16769_s16 + $0x600] sm:$0xff]  ;;  %v5359_v24 = vld [vmem:[%s16769_s16 + $0x8f0] sm:$0xff]  ;;  %v5358_v47 = vld [vmem:[%s16769_s16 + $0x8e8] sm:$0xff] }
 0xa31   : > { %5787 = vmatpush1.msra.mxu0 %v5292_v6  ;;  %5865 = vmatprep.subr.mxu1 %v5386_v14  ;;  %v9306_v44 = vunpack.i.h.bf16 %v9304_v20  ;;  %v9305_v26 = vunpack.i.l.bf16 %v9304_v20  ;;  %v5454_v6 = vld [vmem:[%s16769_s16 + $0xbe8] sm:$0xff]  ;;  %v5452_v8 = vld [vmem:[%s16769_s16 + $0xbd8] sm:$0xff]  ;;  %v5353_v20 = vld [vmem:[%s16769_s16 + $0x8c0] sm:$0xff] }
 0xa32   : > { %5788 = vmatprep.subr.mxu0 %v5290_v39  ;;  %5866 = vmatpush1.msra.mxu1 %v5385_v10  ;;  %v5356_v14 = vld [vmem:[%s16769_s16 + $0x8d8] sm:$0xff]  ;;  %v5451_v39 = vld [vmem:[%s16769_s16 + $0xbd0] sm:$0xff] }
 0xa33   : > { %5789 = vmatpush1.msra.mxu0 %v5289_v38  ;;  %5867 = vmatprep.subr.mxu1 %v5383_v22  ;;  %v14508_v33 = vsel %vm5529_vm11, %v9305_v26, %v9306_v44  ;;  %v5355_v10 = vld [vmem:[%s16769_s16 + $0x8d0] sm:$0xff]  ;;  %v5449_v38 = vld [vmem:[%s16769_s16 + $0xbc0] sm:$0xff]  ;;  %v5448_v22 = vld [vmem:[%s16769_s16 + $0xbb8] sm:$0xff] }
 0xa34   : > { %5768 = vmatmul.mubr.f32.gmra.mxu1 %v14480_v25  ;;  %5790 = vmatprep.subr.mxu0 %v5287_v27  ;;  %v5352_v44 = vld [vmem:[%s16769_s16 + $0x8b8] sm:$0xff]  ;;  %v5446_v26 = vld [vmem:[%s16769_s16 + $0xba8] sm:$0xff] }
 0xa35   : > { %5868 = vmatpush1.msra.mxu1 %v5382_v28  ;;  %5791 = vmatpush1.msra.mxu0 %v5286_v29  ;;  %v5350_v27 = vld [vmem:[%s16769_s16 + $0x8a8] sm:$0xff]  ;;  %v5445_v28 = vld [vmem:[%s16769_s16 + $0xba0] sm:$0xff] }
 0xa36   : > { %5869 = vmatprep.subr.mxu1 %v5380_v35  ;;  %5792 = vmatprep.subr.mxu0 %v5284_v36  ;;  %v5349_v29 = vld [vmem:[%s16769_s16 + $0x8a0] sm:$0xff]  ;;  %v5443_v35 = vld [vmem:[%s16769_s16 + $0xb90] sm:$0xff] }
 0xa37   : > { %5870 = vmatpush1.msra.mxu1 %v5379_v11  ;;  %5793 = vmatpush1.msra.mxu0 %v5283_v37  ;;  %v5347_v36 = vld [vmem:[%s16769_s16 + $0x890] sm:$0xff]  ;;  %v5442_v11 = vld [vmem:[%s16769_s16 + $0xb88] sm:$0xff] }
 0xa38   : > { %5871 = vmatprep.subr.mxu1 %v5377_v40  ;;  %5915 = vmatprep.mubr.f32.mxu1 %v14508_v33  ;;  %v5346_v37 = vld [vmem:[%s16769_s16 + $0x888] sm:$0xff]  ;;  %v5440_v40 = vld [vmem:[%s16769_s16 + $0xb78] sm:$0xff] }
 0xa39   : > { %5794 = vmatprep.subr.mxu0 %v5281_v41  ;;  %5872 = vmatpush1.msra.mxu1 %v5376_v31  ;;  %v5344_v41 = vld [vmem:[%s16769_s16 + $0x878] sm:$0xff]  ;;  %v5439_v31 = vld [vmem:[%s16769_s16 + $0xb70] sm:$0xff] }
 0xa3a   : > { %5795 = vmatpush1.msra.mxu0 %v5280_v60  ;;  %5873 = vmatprep.subr.mxu1 %v5374_v9  ;;  %v5343_v60 = vld [vmem:[%s16769_s16 + $0x870] sm:$0xff]  ;;  %v5437_v9 = vld [vmem:[%s16769_s16 + $0xb60] sm:$0xff] }
 0xa3b   : > { %5796 = vmatprep.subr.mxu0 %v5278_v23  ;;  %5874 = vmatpush1.msra.mxu1 %v5373_v43  ;;  %v5341_v23 = vld [vmem:[%s16769_s16 + $0x860] sm:$0xff]  ;;  %v5436_v43 = vld [vmem:[%s16769_s16 + $0xb58] sm:$0xff] }
 0xa3c   : > { %5797 = vmatpush1.msra.mxu0 %v5277_v45  ;;  %5875 = vmatprep.subr.mxu1 %v5371_v46  ;;  %v5340_v45 = vld [vmem:[%s16769_s16 + $0x858] sm:$0xff]  ;;  %v5434_v46 = vld [vmem:[%s16769_s16 + $0xb48] sm:$0xff] }
 0xa3d   : > { %5798 = vmatprep.subr.mxu0 %v5275_v48  ;;  %5876 = vmatpush1.msra.mxu1 %v5370_v49  ;;  %v5338_v48 = vld [vmem:[%s16769_s16 + $0x848] sm:$0xff]  ;;  %v5433_v49 = vld [vmem:[%s16769_s16 + $0xb40] sm:$0xff] }
 0xa3e   : > { %5799 = vmatpush1.msra.mxu0 %v5274_v50  ;;  %5877 = vmatprep.subr.mxu1 %v5368_v51  ;;  %v5337_v50 = vld [vmem:[%s16769_s16 + $0x840] sm:$0xff]  ;;  %v5431_v51 = vld [vmem:[%s16769_s16 + $0xb30] sm:$0xff] }
 0xa3f   : > { %5800 = vmatprep.subr.mxu0 %v5272_v52  ;;  %5878 = vmatpush1.msra.mxu1 %v5367_v55  ;;  %v5335_v52 = vld [vmem:[%s16769_s16 + $0x830] sm:$0xff]  ;;  %v5430_v55 = vld [vmem:[%s16769_s16 + $0xb28] sm:$0xff] }
 0xa40   : > { %5801 = vmatpush1.msra.mxu0 %v5271_v56  ;;  %5879 = vmatprep.subr.mxu1 %v5365_v18  ;;  %v5334_v56 = vld [vmem:[%s16769_s16 + $0x828] sm:$0xff]  ;;  %v5428_v18 = vld [vmem:[%s16769_s16 + $0xb18] sm:$0xff] }
 0xa41   : > { %5802 = vmatprep.subr.mxu0 %v5269_v61  ;;  %5880 = vmatpush1.msra.mxu1 %v5364_v0  ;;  %v5332_v61 = vld [vmem:[%s16769_s16 + $0x818] sm:$0xff]  ;;  %v5427_v0 = vld [vmem:[%s16769_s16 + $0xb10] sm:$0xff] }
 0xa42   : > { %5803 = vmatpush1.msra.mxu0 %v5268_v1  ;;  %5881 = vmatprep.subr.mxu1 %v5362_v16  ;;  %v5331_v1 = vld [vmem:[%s16769_s16 + $0x810] sm:$0xff]  ;;  %v5425_v16 = vld [vmem:[%s16769_s16 + $0xb00] sm:$0xff] }
 0xa43   : > { %5804 = vmatprep.subr.mxu0 %v5266_v2  ;;  %5882 = vmatpush1.msra.mxu1 %v5361_v63  ;;  %v5329_v2 = vld [vmem:[%s16769_s16 + $0x800] sm:$0xff]  ;;  %v5424_v63 = vld [vmem:[%s16769_s16 + $0xaf8] sm:$0xff] }
 0xa44   : > { %5805 = vmatpush1.msra.mxu0 %v5265_v5  ;;  %5883 = vmatprep.subr.mxu1 %v5455_v62  ;;  %v5328_v5 = vld [vmem:[%s16769_s16 + $0x7f8] sm:$0xff]  ;;  %v5422_v62 = vld [vmem:[%s16769_s16 + $0xae8] sm:$0xff] }
 0xa45   : > { %5806 = vmatprep.subr.mxu0 %v5359_v24  ;;  %5884 = vmatpush2.msra.mxu1 %v5454_v6  ;;  %v5326_v24 = vld [vmem:[%s16769_s16 + $0x7e8] sm:$0xff]  ;;  %v5421_v6 = vld [vmem:[%s16769_s16 + $0xae0] sm:$0xff] }
 0xa46   : > { %5807 = vmatpush2.msra.mxu0 %v5358_v47  ;;  %5885 = vmatprep.subr.mxu1 %v5452_v8  ;;  %v5325_v47 = vld [vmem:[%s16769_s16 + $0x7e0] sm:$0xff]  ;;  %v5419_v8 = vld [vmem:[%s16769_s16 + $0xad0] sm:$0xff] }
 0xa47   : > { %5808 = vmatprep.subr.mxu0 %v5356_v14  ;;  %5886 = vmatpush2.msra.mxu1 %v5451_v39  ;;  %v5323_v14 = vld [vmem:[%s16769_s16 + $0x7d0] sm:$0xff]  ;;  %v5418_v39 = vld [vmem:[%s16769_s16 + $0xac8] sm:$0xff] }
 0xa48   : > { %5809 = vmatpush2.msra.mxu0 %v5355_v10  ;;  %5887 = vmatprep.subr.mxu1 %v5449_v38  ;;  %v5322_v10 = vld [vmem:[%s16769_s16 + $0x7c8] sm:$0xff]  ;;  %v5416_v38 = vld [vmem:[%s16769_s16 + $0xab8] sm:$0xff] }
 0xa49   : > { %5810 = vmatprep.subr.mxu0 %v5353_v20  ;;  %5888 = vmatpush2.msra.mxu1 %v5448_v22  ;;  %v5320_v20 = vld [vmem:[%s16769_s16 + $0x7b8] sm:$0xff]  ;;  %v5415_v22 = vld [vmem:[%s16769_s16 + $0xab0] sm:$0xff] }
 0xa4a   : > { %5811 = vmatpush2.msra.mxu0 %v5352_v44  ;;  %5889 = vmatprep.subr.mxu1 %v5446_v26  ;;  %v5319_v44 = vld [vmem:[%s16769_s16 + $0x7b0] sm:$0xff]  ;;  %v9314_v26 = vpop.permute.xlu0 %9313 }
 0xa4b   : > { %5812 = vmatprep.subr.mxu0 %v5350_v27  ;;  %5890 = vmatpush2.msra.mxu1 %v5445_v28  ;;  %v5413_v27 = vld [vmem:[%s16769_s16 + $0xaa0] sm:$0xff] }
 0xa4c   : > { %5813 = vmatpush2.msra.mxu0 %v5349_v29  ;;  %5891 = vmatprep.subr.mxu1 %v5443_v35  ;;  %v5317_v28 = vld [vmem:[%s16769_s16 + $0x7a0] sm:$0xff]  ;;  %v5412_v29 = vld [vmem:[%s16769_s16 + $0xa98] sm:$0xff] }
 0xa4d   : > { %5814 = vmatprep.subr.mxu0 %v5347_v36  ;;  %5892 = vmatpush2.msra.mxu1 %v5442_v11  ;;  %v5316_v35 = vld [vmem:[%s16769_s16 + $0x798] sm:$0xff]  ;;  %v5410_v36 = vld [vmem:[%s16769_s16 + $0xa88] sm:$0xff] }
 0xa4e   : > { %5815 = vmatpush2.msra.mxu0 %v5346_v37  ;;  %5893 = vmatprep.subr.mxu1 %v5440_v40  ;;  %v5314_v11 = vld [vmem:[%s16769_s16 + $0x788] sm:$0xff]  ;;  %v9281_v37 = vunpack.i.h.bf16 %v14399_v58  ;;  %v9280_v40 = vunpack.i.l.bf16 %v14399_v58  ;;  %v9286_v58 = vunpack.i.h.bf16 %v14418_v53 }
 0xa4f   : > { %5816 = vmatprep.subr.mxu0 %v5344_v41  ;;  %5894 = vmatpush2.msra.mxu1 %v5439_v31  ;;  %v9316_v41 = vunpack.i.h.bf16 %v9314_v26  ;;  %v9315_v31 = vunpack.i.l.bf16 %v9314_v26  ;;  %v5484_v26 = vld [vmem:[%s16769_s16 + $0xcd8] sm:$0xff] }
 0xa50   : > { %5817 = vmatpush2.msra.mxu0 %v5343_v60  ;;  %5895 = vmatprep.subr.mxu1 %v5437_v9  ;;  %v5409_v60 = vld [vmem:[%s16769_s16 + $0xa80] sm:$0xff] }
 0xa51   : > { %5818 = vmatprep.subr.mxu0 %v5341_v23  ;;  %5896 = vmatpush2.msra.mxu1 %v5436_v43  ;;  %v5313_v9 = vld [vmem:[%s16769_s16 + $0x780] sm:$0xff]  ;;  %v5168_v23 = vld [vmem:[%s16769_s16 + $0x2f8] sm:$0xff]  ;;  %v9285_v43 = vunpack.i.l.bf16 %v14418_v53  ;;  %v14790_v53 = vsel %vm5529_vm11, %v9315_v31, %v9316_v41 }
 0xa52   : > { %5819 = vmatpush2.msra.mxu0 %v5340_v45  ;;  %5897 = vmatprep.subr.mxu1 %v5434_v46  ;;  %v5503_v45 = vld [vmem:[%s16769_s16 + $0xd70] sm:$0xff]  ;;  %v5120_v46 = vld [vmem:[%s16769_s16 + $0x178] sm:$0xff]  ;;  %v5141_v41 = vld [vmem:[%s16769_s16 + $0x220] sm:$0xff] }
 0xa53   : > { %5820 = vmatprep.subr.mxu0 %v5338_v48  ;;  %5898 = vmatpush2.msra.mxu1 %v5433_v49  ;;  %v14787_v48 = vsel %vm5529_vm11, %v9280_v40, %v9281_v37  ;;  %v5502_v49 = vld [vmem:[%s16769_s16 + $0xd68] sm:$0xff]  ;;  %v5096_v37 = vld [vmem:[%s16769_s16 + $0xb8] sm:$0xff] }
 0xa54   : > { %5821 = vmatpush2.msra.mxu0 %v5337_v50  ;;  %5899 = vmatprep.subr.mxu1 %v5431_v51  ;;  %v5165_v50 = vld [vmem:[%s16769_s16 + $0x2e0] sm:$0xff]  ;;  %v5500_v51 = vld [vmem:[%s16769_s16 + $0xd58] sm:$0xff]  ;;  %v5478_v40 = vld [vmem:[%s16769_s16 + $0xca8] sm:$0xff] }
 0xa55   : > { %5822 = vmatprep.subr.mxu0 %v5335_v52  ;;  %5900 = vmatpush2.msra.mxu1 %v5430_v55  ;;  %v9291_v52 = vunpack.i.h.bf16 %v14429_v7  ;;  %v9290_v55 = vunpack.i.l.bf16 %v14429_v7  ;;  %v5162_v7 = vld [vmem:[%s16769_s16 + $0x2c8] sm:$0xff]  ;;  %v5476_v31 = vld [vmem:[%s16769_s16 + $0xc98] sm:$0xff] }
 0xa56   : > { %5823 = vmatpush2.msra.mxu0 %v5334_v56  ;;  %5901 = vmatprep.subr.mxu1 %v5428_v18  ;;  %v14806_v56 = vsel %vm4082_vm9, %v9285_v43, %v9286_v58  ;;  %v5117_v18 = vld [vmem:[%s16769_s16 + $0x160] sm:$0xff]  ;;  %v5090_v43 = vld [vmem:[%s16769_s16 + $0x88] sm:$0xff] }
 0xa57   : > { %5824 = vmatprep.subr.mxu0 %v5332_v61  ;;  %5902 = vmatpush2.msra.mxu1 %v5427_v0  ;;  %v5499_v61 = vld [vmem:[%s16769_s16 + $0xd50] sm:$0xff]  ;;  %v5497_v0 = vld [vmem:[%s16769_s16 + $0xd40] sm:$0xff] }
 0xa58   : > { %5825 = vmatpush2.msra.mxu0 %v5331_v1  ;;  %5903 = vmatprep.subr.mxu1 %v5425_v16  ;;  %v5114_v1 = vld [vmem:[%s16769_s16 + $0x148] sm:$0xff]  ;;  %v14826_v16 = vsel %vm5529_vm11, %v9290_v55, %v9291_v52  ;;  %v5473_v58 = vld [vmem:[%s16769_s16 + $0xc80] sm:$0xff]  ;;  %v5132_v52 = vld [vmem:[%s16769_s16 + $0x1d8] sm:$0xff] }
 0xa59   : > { %5826 = vmatprep.subr.mxu0 %v5329_v2  ;;  %5904 = vmatpush2.msra.mxu1 %v5424_v63  ;;  %v5496_v2 = vld [vmem:[%s16769_s16 + $0xd38] sm:$0xff]  ;;  %v5159_v63 = vld [vmem:[%s16769_s16 + $0x2b0] sm:$0xff] }
 0xa5a   : > { %5827 = vmatpush2.msra.mxu0 %v5328_v5  ;;  %5905 = vmatprep.subr.mxu1 %v5422_v62  ;;  %v5494_v5 = vld [vmem:[%s16769_s16 + $0xd28] sm:$0xff]  ;;  %v5111_v62 = vld [vmem:[%s16769_s16 + $0x130] sm:$0xff] }
 0xa5b   : > { %5828 = vmatprep.subr.mxu0 %v5326_v24  ;;  %5906 = vmatpush2.msra.mxu1 %v5421_v6  ;;  %v5493_v24 = vld [vmem:[%s16769_s16 + $0xd20] sm:$0xff]  ;;  %v5156_v6 = vld [vmem:[%s16769_s16 + $0x298] sm:$0xff]  ;;  %v5467_v55 = vld [vmem:[%s16769_s16 + $0xc50] sm:$0xff] }
 0xa5c   : > { %5829 = vmatpush2.msra.mxu0 %v5325_v47  ;;  %5907 = vmatprep.subr.mxu1 %v5419_v8  ;;  %v5491_v47 = vld [vmem:[%s16769_s16 + $0xd10] sm:$0xff]  ;;  %v5108_v8 = vld [vmem:[%s16769_s16 + $0x118] sm:$0xff] }
 0xa5d   : > { %5830 = vmatprep.subr.mxu0 %v5323_v14  ;;  %5908 = vmatpush2.msra.mxu1 %v5418_v39  ;;  %v5153_v14 = vld [vmem:[%s16769_s16 + $0x280] sm:$0xff]  ;;  %v5488_v39 = vld [vmem:[%s16769_s16 + $0xcf8] sm:$0xff] }
 0xa5e   : > { %5831 = vmatpush2.msra.mxu0 %v5322_v10  ;;  %5909 = vmatprep.subr.mxu1 %v5416_v38  ;;  %v5105_v10 = vld [vmem:[%s16769_s16 + $0x100] sm:$0xff]  ;;  %v5487_v38 = vld [vmem:[%s16769_s16 + $0xcf0] sm:$0xff] }
 0xa5f   : > { %5832 = vmatprep.subr.mxu0 %v5320_v20  ;;  %5910 = vmatpush2.msra.mxu1 %v5415_v22  ;;  %v5150_v20 = vld [vmem:[%s16769_s16 + $0x268] sm:$0xff]  ;;  %v5485_v22 = vld [vmem:[%s16769_s16 + $0xce0] sm:$0xff] }
 0xa60   : > { %5833 = vmatpush2.msra.mxu0 %v5319_v44  ;;  %5911 = vmatprep.subr.mxu1 %v5413_v27  ;;  %v5102_v44 = vld [vmem:[%s16769_s16 + $0xe8] sm:$0xff]  ;;  %v5147_v27 = vld [vmem:[%s16769_s16 + $0x250] sm:$0xff] }
 0xa61   : > { %5834 = vmatprep.subr.mxu0 %v5317_v28  ;;  %5912 = vmatpush2.msra.mxu1 %v5412_v29  ;;  %v5482_v28 = vld [vmem:[%s16769_s16 + $0xcc8] sm:$0xff]  ;;  %v5099_v29 = vld [vmem:[%s16769_s16 + $0xd0] sm:$0xff] }
 0xa62   : > { %5835 = vmatpush2.msra.mxu0 %v5316_v35  ;;  %5913 = vmatprep.subr.mxu1 %v5410_v36  ;;  %v5481_v35 = vld [vmem:[%s16769_s16 + $0xcc0] sm:$0xff]  ;;  %v5144_v36 = vld [vmem:[%s16769_s16 + $0x238] sm:$0xff] }
 0xa63   : > { %5836 = vmatprep.subr.mxu0 %v5314_v11  ;;  %5914 = vmatpush2.msra.mxu1 %v5409_v60  ;;  %v5479_v11 = vld [vmem:[%s16769_s16 + $0xcb0] sm:$0xff]  ;;  %v5093_v60 = vld [vmem:[%s16769_s16 + $0xa0] sm:$0xff] }
 0xa64   : > { %5837 = vmatpush2.msra.mxu0 %v5313_v9  ;;  %5916 = vmatmul.mubr.f32.vlgmr.msra.gmra.mxu1 %v14345_v17  ;;  %v5475_v9 = vld [vmem:[%s16769_s16 + $0xc90] sm:$0xff] }
 0xa65   : > { %8758 = vmatprep.subr.mxu1 %v5168_v23  ;;  %5839 = vmatmul.mubr.f32.vlgmr.msra.gmra.mxu0 %v14787_v48  ;;  %v5138_v23 = vld [vmem:[%s16769_s16 + $0x208] sm:$0xff] }
 0xa66   : > { %5921 = vmatprep.mubr.f32.mxu1 %v14790_v53  ;;  %5928 = vmatprep.subr.mxu0 %v5503_v45  ;;  %v5472_v45 = vld [vmem:[%s16769_s16 + $0xc78] sm:$0xff] }
 0xa67   : > { %8759 = vmatpush3.msra.mxu1 %v5120_v46  ;;  %5844 = vmatprep.mubr.f32.mxu0 %v14806_v56  ;;  %v5135_v46 = vld [vmem:[%s16769_s16 + $0x1f0] sm:$0xff] }
 0xa68   : > { %5929 = vmatpush1.msra.mxu0 %v5502_v49  ;;  %8760 = vmatprep.subr.mxu1 %v5165_v50  ;;  %v5470_v49 = vld [vmem:[%s16769_s16 + $0xc68] sm:$0xff]  ;;  %v5087_v50 = vld [vmem:[%s16769_s16 + $0x70] sm:$0xff] }
 0xa69   : > { %5930 = vmatprep.subr.mxu0 %v5500_v51  ;;  %8761 = vmatpush3.msra.mxu1 %v5117_v18  ;;  %v5469_v51 = vld [vmem:[%s16769_s16 + $0xc60] sm:$0xff]  ;;  %v5084_v18 = vld [vmem:[%s16769_s16 + $0x58] sm:$0xff] }
 0xa6a   : > { %5931 = vmatpush1.msra.mxu0 %v5499_v61  ;;  %5922 = vmatmul.mubr.f32.gmra.mxu1 %v14350_v19  ;;  %v5466_v61 = vld [vmem:[%s16769_s16 + $0xc48] sm:$0xff] }
 0xa6b   : > { %8762 = vmatprep.subr.mxu1 %v5162_v7  ;;  %5845 = vmatmul.mubr.f32.gmra.mxu0 %v14826_v16  ;;  %v5129_v7 = vld [vmem:[%s16769_s16 + $0x1c0] sm:$0xff] }
 0xa6c   : > { %5932 = vmatprep.subr.mxu0 %v5497_v0  ;;  %8763 = vmatpush3.msra.mxu1 %v5114_v1  ;;  %v5464_v0 = vld [vmem:[%s16769_s16 + $0xc38] sm:$0xff]  ;;  %v5081_v1 = vld [vmem:[%s16769_s16 + $0x40] sm:$0xff] }
 0xa6d   : > { %6069 = vmatprep.mubr.f32.mxu1 %v14366_v34  ;;  %5933 = vmatpush1.msra.mxu0 %v5496_v2  ;;  %v5490_v34 = vld [vmem:[%s16769_s16 + $0xd08] sm:$0xff]  ;;  %v5463_v2 = vld [vmem:[%s16769_s16 + $0xc30] sm:$0xff] }
 0xa6e   : > { %8764 = vmatprep.subr.mxu1 %v5159_v63  ;;  %5934 = vmatprep.subr.mxu0 %v5494_v5  ;;  %v5126_v63 = vld [vmem:[%s16769_s16 + $0x1a8] sm:$0xff]  ;;  %v5461_v5 = vld [vmem:[%s16769_s16 + $0xc20] sm:$0xff] }
 0xa6f   : > { %8765 = vmatpush3.msra.mxu1 %v5111_v62  ;;  %5935 = vmatpush1.msra.mxu0 %v5493_v24  ;;  %v5078_v62 = vld [vmem:[%s16769_s16 + $0x28] sm:$0xff]  ;;  %v5460_v24 = vld [vmem:[%s16769_s16 + $0xc18] sm:$0xff] }
 0xa70   : > { %8766 = vmatprep.subr.mxu1 %v5156_v6  ;;  %5936 = vmatprep.subr.mxu0 %v5491_v47  ;;  %v5123_v6 = vld [vmem:[%s16769_s16 + $0x190] sm:$0xff]  ;;  %v5458_v47 = vld [vmem:[%s16769_s16 + $0xc08] sm:$0xff] }
 0xa71   : > { %8767 = vmatpush3.msra.mxu1 %v5108_v8  ;;  %5937 = vmatpush1.msra.mxu0 %v5490_v34  ;;  %v5075_v8 = vld [vmem:[%s16769_s16 + $0x10] sm:$0xff]  ;;  %v9296_v34 = vunpack.i.h.bf16 %v14450_v3 }
 0xa72   : > { %8768 = vmatprep.subr.mxu1 %v5153_v14  ;;  %5938 = vmatprep.subr.mxu0 %v5488_v39  ;;  %v9295_v14 = vunpack.i.l.bf16 %v14450_v3  ;;  %v5457_v39 = vld [vmem:[%s16769_s16 + $0xc00] sm:$0xff]  ;;  %v5264_v3 = vld [vmem:[%s16769_s16 + $0x5f8] sm:$0xff] }
 0xa73   : > { %8769 = vmatpush3.msra.mxu1 %v5105_v10  ;;  %5939 = vmatpush1.msra.mxu0 %v5487_v38  ;;  %v5360_v10 = vld [vmem:[%s16769_s16 + $0x8f8] sm:$0xff]  ;;  %v9309_v38 = vpop.permute.xlu1 %9308 }
 0xa74   : > { %8770 = vmatprep.subr.mxu1 %v5150_v20  ;;  %5940 = vmatprep.subr.mxu0 %v5485_v22  ;;  %v5312_v20 = vld [vmem:[%s16769_s16 + $0x778] sm:$0xff]  ;;  %v15003_v22 = vsel %vm4082_vm9, %v9295_v14, %v9296_v34  ;;  %v5282_v34 = vld [vmem:[%s16769_s16 + $0x688] sm:$0xff] }
 0xa75   : > { %8771 = vmatpush3.msra.mxu1 %v5102_v44  ;;  %5941 = vmatpush1.msra.mxu0 %v5484_v26  ;;  %v5216_v44 = vld [vmem:[%s16769_s16 + $0x478] sm:$0xff]  ;;  %v5357_v26 = vld [vmem:[%s16769_s16 + $0x8e0] sm:$0xff]  ;;  %v5186_v14 = vld [vmem:[%s16769_s16 + $0x388] sm:$0xff] }
 0xa76   : > { %8772 = vmatprep.subr.mxu1 %v5147_v27  ;;  %5942 = vmatprep.subr.mxu0 %v5482_v28  ;;  %v5309_v27 = vld [vmem:[%s16769_s16 + $0x760] sm:$0xff]  ;;  %v9311_v28 = vunpack.i.h.bf16 %v9309_v38 }
 0xa77   : > { %8773 = vmatpush3.msra.mxu1 %v5099_v29  ;;  %5943 = vmatpush1.msra.mxu0 %v5481_v35  ;;  %v9310_v29 = vunpack.i.l.bf16 %v9309_v38  ;;  %v5213_v35 = vld [vmem:[%s16769_s16 + $0x460] sm:$0xff]  ;;  %v5279_v38 = vld [vmem:[%s16769_s16 + $0x670] sm:$0xff] }
 0xa78   : > { %8774 = vmatprep.subr.mxu1 %v5144_v36  ;;  %5944 = vmatprep.subr.mxu0 %v5479_v11  ;;  %v5258_v36 = vld [vmem:[%s16769_s16 + $0x5c8] sm:$0xff] }
 0xa79   : > { %8775 = vmatpush3.msra.mxu1 %v5096_v37  ;;  %5945 = vmatpush1.msra.mxu0 %v5478_v40  ;;  %v5306_v11 = vld [vmem:[%s16769_s16 + $0x748] sm:$0xff]  ;;  %v15034_v37 = vsel %vm4082_vm9, %v9310_v29, %v9311_v28  ;;  %v5225_v28 = vld [vmem:[%s16769_s16 + $0x4c0] sm:$0xff] }
 0xa7a   : > { %8776 = vmatprep.subr.mxu1 %v5141_v41  ;;  %5946 = vmatprep.subr.mxu0 %v5476_v31  ;;  %v5210_v40 = vld [vmem:[%s16769_s16 + $0x448] sm:$0xff]  ;;  %v5255_v41 = vld [vmem:[%s16769_s16 + $0x5b0] sm:$0xff]  ;;  %v5273_v29 = vld [vmem:[%s16769_s16 + $0x640] sm:$0xff] }
 0xa7b   : > { %8777 = vmatpush3.msra.mxu1 %v5093_v60  ;;  %5947 = vmatpush1.msra.mxu0 %v5475_v9  ;;  %v5303_v31 = vld [vmem:[%s16769_s16 + $0x730] sm:$0xff]  ;;  %v5348_v9 = vld [vmem:[%s16769_s16 + $0x898] sm:$0xff] }
 0xa7c   : > { %8778 = vmatprep.subr.mxu1 %v5138_v23  ;;  %5948 = vmatprep.subr.mxu0 %v5473_v58  ;;  %v5207_v60 = vld [vmem:[%s16769_s16 + $0x430] sm:$0xff]  ;;  %v5252_v23 = vld [vmem:[%s16769_s16 + $0x598] sm:$0xff] }
 0xa7d   : > { %8779 = vmatpush3.msra.mxu1 %v5090_v43  ;;  %5949 = vmatpush1.msra.mxu0 %v5472_v45  ;;  %v5204_v58 = vld [vmem:[%s16769_s16 + $0x418] sm:$0xff]  ;;  %v5249_v43 = vld [vmem:[%s16769_s16 + $0x580] sm:$0xff] }
 0xa7e   : > { %8780 = vmatprep.subr.mxu1 %v5135_v46  ;;  %5950 = vmatprep.subr.mxu0 %v5470_v49  ;;  %v5297_v45 = vld [vmem:[%s16769_s16 + $0x700] sm:$0xff]  ;;  %v5342_v49 = vld [vmem:[%s16769_s16 + $0x868] sm:$0xff] }
 0xa7f   : > { %8781 = vmatpush3.msra.mxu1 %v5087_v50  ;;  %5951 = vmatpush1.msra.mxu0 %v5469_v51  ;;  %v5201_v46 = vld [vmem:[%s16769_s16 + $0x400] sm:$0xff]  ;;  %v5246_v50 = vld [vmem:[%s16769_s16 + $0x568] sm:$0xff] }
 0xa80   : > { %8782 = vmatprep.subr.mxu1 %v5132_v52  ;;  %5952 = vmatprep.subr.mxu0 %v5467_v55  ;;  %v5294_v51 = vld [vmem:[%s16769_s16 + $0x6e8] sm:$0xff]  ;;  %v5339_v55 = vld [vmem:[%s16769_s16 + $0x850] sm:$0xff] }
 0xa81   : > { %8783 = vmatpush3.msra.mxu1 %v5084_v18  ;;  %5953 = vmatpush1.msra.mxu0 %v5466_v61  ;;  %v5198_v52 = vld [vmem:[%s16769_s16 + $0x3e8] sm:$0xff]  ;;  %v5243_v18 = vld [vmem:[%s16769_s16 + $0x550] sm:$0xff] }
 0xa82   : > { %8784 = vmatprep.subr.mxu1 %v5129_v7  ;;  %5954 = vmatprep.subr.mxu0 %v5464_v0  ;;  %v5291_v61 = vld [vmem:[%s16769_s16 + $0x6d0] sm:$0xff]  ;;  %v5336_v0 = vld [vmem:[%s16769_s16 + $0x838] sm:$0xff] }
 0xa83   : > { %8785 = vmatpush3.msra.mxu1 %v5081_v1  ;;  %5955 = vmatpush1.msra.mxu0 %v5463_v2  ;;  %v5195_v7 = vld [vmem:[%s16769_s16 + $0x3d0] sm:$0xff]  ;;  %v5240_v1 = vld [vmem:[%s16769_s16 + $0x538] sm:$0xff] }
 0xa84   : > { %8786 = vmatprep.subr.mxu1 %v5126_v63  ;;  %5956 = vmatprep.subr.mxu0 %v5461_v5  ;;  %v5288_v2 = vld [vmem:[%s16769_s16 + $0x6b8] sm:$0xff]  ;;  %v5333_v5 = vld [vmem:[%s16769_s16 + $0x820] sm:$0xff] }
 0xa85   : > { %8787 = vmatpush3.msra.mxu1 %v5078_v62  ;;  %5957 = vmatpush1.msra.mxu0 %v5460_v24  ;;  %v5192_v63 = vld [vmem:[%s16769_s16 + $0x3b8] sm:$0xff]  ;;  %v5237_v62 = vld [vmem:[%s16769_s16 + $0x520] sm:$0xff] }
 0xa86   : > { %8788 = vmatprep.subr.mxu1 %v5123_v6  ;;  %5958 = vmatprep.subr.mxu0 %v5458_v47  ;;  %v5285_v24 = vld [vmem:[%s16769_s16 + $0x6a0] sm:$0xff]  ;;  %v5330_v47 = vld [vmem:[%s16769_s16 + $0x808] sm:$0xff] }
 0xa87   : > { %8789 = vmatpush3.msra.mxu1 %v5075_v8  ;;  %5959 = vmatpush1.msra.mxu0 %v5457_v39  ;;  %v5189_v6 = vld [vmem:[%s16769_s16 + $0x3a0] sm:$0xff]  ;;  %v5234_v8 = vld [vmem:[%s16769_s16 + $0x508] sm:$0xff]  ;;  %v5327_v39 = vld [vmem:[%s16769_s16 + $0x7f0] sm:$0xff] }
 0xa88   : > { %5992 = vmatprep.mubr.f32.mxu0 %v9502_v59  ;;  %6070 = vmatmul.mubr.f32.vlgmr.msra.gmra.mxu1 %v14316_v42  ;;  %v5261_v42 = vld [vmem:[%s16769_s16 + $0x5e0] sm:$0xff] }
 0xa89   : > { %8834 = vmatprep.subr.mxu1 %v5360_v10  ;;  %5993 = vmatmul.mubr.f32.vlgmr.msra.gmra.mxu0 %v15003_v22  ;;  %v5231_v10 = vld [vmem:[%s16769_s16 + $0x4f0] sm:$0xff] }
 0xa8a   : > { %6074 = vmatprep.mubr.f32.mxu1 %v14394_v15  ;;  %8796 = vmatprep.subr.mxu0 %v5264_v3  ;;  %v5354_v15 = vld [vmem:[%s16769_s16 + $0x8c8] sm:$0xff]  ;;  %v5183_v3 = vld [vmem:[%s16769_s16 + $0x370] sm:$0xff] }
 0xa8b   : > { %8835 = vmatpush3.msra.mxu1 %v5312_v20  ;;  %8797 = vmatpush3.msra.mxu0 %v5216_v44  ;;  %v5324_v20 = vld [vmem:[%s16769_s16 + $0x7d8] sm:$0xff] }
 0xa8c   : > { %8836 = vmatprep.subr.mxu1 %v5357_v26  ;;  %8798 = vmatprep.subr.mxu0 %v5261_v42  ;;  %v5228_v44 = vld [vmem:[%s16769_s16 + $0x4d8] sm:$0xff] }
 0xa8d   : > { %8837 = vmatpush3.msra.mxu1 %v5309_v27  ;;  %5998 = vmatprep.mubr.f32.mxu0 %v9502_v59  ;;  %v5276_v26 = vld [vmem:[%s16769_s16 + $0x658] sm:$0xff]  ;;  %v5321_v27 = vld [vmem:[%s16769_s16 + $0x7c0] sm:$0xff] }
 0xa8e   : > { %6075 = vmatmul.mubr.f32.gmra.mxu1 %v14318_v13  ;;  %8799 = vmatpush3.msra.mxu0 %v5213_v35  ;;  %v5351_v13 = vld [vmem:[%s16769_s16 + $0x8b0] sm:$0xff]  ;;  %v5180_v42 = vld [vmem:[%s16769_s16 + $0x358] sm:$0xff]  ;;  %v5177_v35 = vld [vmem:[%s16769_s16 + $0x340] sm:$0xff] }
 0xa8f   : > { %8838 = vmatprep.subr.mxu1 %v5354_v15  ;;  %5999 = vmatmul.mubr.f32.gmra.mxu0 %v15034_v37  ;;  %v5318_v15 = vld [vmem:[%s16769_s16 + $0x7a8] sm:$0xff] }
 0xa90   : > { %8800 = vmatprep.subr.mxu0 %v5258_v36  ;;  %8839 = vmatpush3.msra.mxu1 %v5306_v11  ;;  %v5222_v36 = vld [vmem:[%s16769_s16 + $0x4a8] sm:$0xff] }
 0xa91   : > { %6219 = vmatprep.mubr.f32.mxu1 %v14421_v54  ;;  %8801 = vmatpush3.msra.mxu0 %v5210_v40  ;;  %v5300_v54 = vld [vmem:[%s16769_s16 + $0x718] sm:$0xff]  ;;  %v5270_v11 = vld [vmem:[%s16769_s16 + $0x628] sm:$0xff] }
 0xa92   : > { %6144 = vmatprep.mubr.f32.mxu0 %v14326_v12  ;;  %8840 = vmatprep.subr.mxu1 %v5351_v13  ;;  %v5345_v12 = vld [vmem:[%s16769_s16 + $0x880] sm:$0xff]  ;;  %v5174_v40 = vld [vmem:[%s16769_s16 + $0x328] sm:$0xff]  ;;  %v5315_v13 = vld [vmem:[%s16769_s16 + $0x790] sm:$0xff] }
 0xa93   : > { %8802 = vmatprep.subr.mxu0 %v5255_v41  ;;  %8841 = vmatpush3.msra.mxu1 %v5303_v31  ;;  %v5219_v41 = vld [vmem:[%s16769_s16 + $0x490] sm:$0xff] }
 0xa94   : > { %8803 = vmatpush3.msra.mxu0 %v5207_v60  ;;  %8842 = vmatprep.subr.mxu1 %v5348_v9  ;;  %v5267_v31 = vld [vmem:[%s16769_s16 + $0x610] sm:$0xff]  ;;  %v5456_v9 = vld [vmem:[%s16769_s16 + $0xbf8] sm:$0xff] }
 0xa95   : > { %8804 = vmatprep.subr.mxu0 %v5252_v23  ;;  %8843 = vmatpush3.msra.mxu1 %v5300_v54  ;;  %v5171_v60 = vld [vmem:[%s16769_s16 + $0x310] sm:$0xff]  ;;  %v5408_v23 = vld [vmem:[%s16769_s16 + $0xa78] sm:$0xff]  ;;  %v5453_v54 = vld [vmem:[%s16769_s16 + $0xbe0] sm:$0xff] }
 0xa96   : > { %8805 = vmatpush3.msra.mxu0 %v5204_v58  ;;  %8844 = vmatprep.subr.mxu1 %v5345_v12  ;;  %v5405_v58 = vld [vmem:[%s16769_s16 + $0xa60] sm:$0xff]  ;;  %v5444_v12 = vld [vmem:[%s16769_s16 + $0xb98] sm:$0xff] }
 0xa97   : > { %8806 = vmatprep.subr.mxu0 %v5249_v43  ;;  %8845 = vmatpush3.msra.mxu1 %v5297_v45  ;;  %v5438_v43 = vld [vmem:[%s16769_s16 + $0xb68] sm:$0xff] }
 0xa98   : > { %8807 = vmatpush3.msra.mxu0 %v5201_v46  ;;  %8846 = vmatprep.subr.mxu1 %v5342_v49  ;;  %v5390_v45 = vld [vmem:[%s16769_s16 + $0x9e8] sm:$0xff]  ;;  %v5435_v46 = vld [vmem:[%s16769_s16 + $0xb50] sm:$0xff] }
 0xa99   : > { %8808 = vmatprep.subr.mxu0 %v5246_v50  ;;  %8847 = vmatpush3.msra.mxu1 %v5294_v51  ;;  %v5387_v49 = vld [vmem:[%s16769_s16 + $0x9d0] sm:$0xff]  ;;  %v5432_v50 = vld [vmem:[%s16769_s16 + $0xb38] sm:$0xff] }
 0xa9a   : > { %8809 = vmatpush3.msra.mxu0 %v5198_v52  ;;  %8848 = vmatprep.subr.mxu1 %v5339_v55  ;;  %v5384_v51 = vld [vmem:[%s16769_s16 + $0x9b8] sm:$0xff]  ;;  %v5429_v52 = vld [vmem:[%s16769_s16 + $0xb20] sm:$0xff] }
 0xa9b   : > { %8810 = vmatprep.subr.mxu0 %v5243_v18  ;;  %8849 = vmatpush3.msra.mxu1 %v5291_v61  ;;  %v5381_v55 = vld [vmem:[%s16769_s16 + $0x9a0] sm:$0xff]  ;;  %v5426_v18 = vld [vmem:[%s16769_s16 + $0xb08] sm:$0xff] }
 0xa9c   : > { %8811 = vmatpush3.msra.mxu0 %v5195_v7  ;;  %8850 = vmatprep.subr.mxu1 %v5336_v0  ;;  %v5378_v61 = vld [vmem:[%s16769_s16 + $0x988] sm:$0xff]  ;;  %v5423_v7 = vld [vmem:[%s16769_s16 + $0xaf0] sm:$0xff] }
 0xa9d   : > { %8812 = vmatprep.subr.mxu0 %v5240_v1  ;;  %8851 = vmatpush3.msra.mxu1 %v5288_v2  ;;  %v5375_v0 = vld [vmem:[%s16769_s16 + $0x970] sm:$0xff]  ;;  %v5420_v1 = vld [vmem:[%s16769_s16 + $0xad8] sm:$0xff] }
 0xa9e   : > { %8813 = vmatpush3.msra.mxu0 %v5192_v63  ;;  %8852 = vmatprep.subr.mxu1 %v5333_v5  ;;  %v5372_v2 = vld [vmem:[%s16769_s16 + $0x958] sm:$0xff]  ;;  %v5417_v63 = vld [vmem:[%s16769_s16 + $0xac0] sm:$0xff] }
 0xa9f   : > { %8814 = vmatprep.subr.mxu0 %v5237_v62  ;;  %8853 = vmatpush3.msra.mxu1 %v5285_v24  ;;  %v5369_v5 = vld [vmem:[%s16769_s16 + $0x940] sm:$0xff]  ;;  %v5414_v62 = vld [vmem:[%s16769_s16 + $0xaa8] sm:$0xff] }
 0xaa0   : > { %8815 = vmatpush3.msra.mxu0 %v5189_v6  ;;  %8854 = vmatprep.subr.mxu1 %v5330_v47  ;;  %v5366_v24 = vld [vmem:[%s16769_s16 + $0x928] sm:$0xff]  ;;  %v5411_v6 = vld [vmem:[%s16769_s16 + $0xa90] sm:$0xff] }
 0xaa1   : > { %8816 = vmatprep.subr.mxu0 %v5234_v8  ;;  %8855 = vmatpush3.msra.mxu1 %v5282_v34  ;;  %v5363_v47 = vld [vmem:[%s16769_s16 + $0x910] sm:$0xff]  ;;  %v5504_v8 = vld [vmem:[%s16769_s16 + $0xd78] sm:$0xff]  ;;  %v5501_v34 = vld [vmem:[%s16769_s16 + $0xd60] sm:$0xff] }
 0xaa2   : > { %8817 = vmatpush3.msra.mxu0 %v5186_v14  ;;  %8856 = vmatprep.subr.mxu1 %v5327_v39  ;;  %v5498_v14 = vld [vmem:[%s16769_s16 + $0xd48] sm:$0xff]  ;;  %v5495_v39 = vld [vmem:[%s16769_s16 + $0xd30] sm:$0xff] }
 0xaa3   : > { %8818 = vmatprep.subr.mxu0 %v5231_v10  ;;  %8857 = vmatpush3.msra.mxu1 %v5279_v38  ;;  %v5480_v10 = vld [vmem:[%s16769_s16 + $0xcb8] sm:$0xff]  ;;  %v5477_v38 = vld [vmem:[%s16769_s16 + $0xca0] sm:$0xff] }
 0xaa4   : > { %8819 = vmatpush3.msra.mxu0 %v5183_v3  ;;  %8858 = vmatprep.subr.mxu1 %v5324_v20  ;;  %v5474_v3 = vld [vmem:[%s16769_s16 + $0xc88] sm:$0xff]  ;;  %v5471_v20 = vld [vmem:[%s16769_s16 + $0xc70] sm:$0xff] }
 0xaa5   : > { %8820 = vmatprep.subr.mxu0 %v5228_v44  ;;  %8859 = vmatpush3.msra.mxu1 %v5276_v26  ;;  %v5468_v44 = vld [vmem:[%s16769_s16 + $0xc58] sm:$0xff]  ;;  %v5465_v26 = vld [vmem:[%s16769_s16 + $0xc40] sm:$0xff] }
 0xaa6   : > { %8821 = vmatpush3.msra.mxu0 %v5180_v42  ;;  %8860 = vmatprep.subr.mxu1 %v5321_v27  ;;  %v5462_v42 = vld [vmem:[%s16769_s16 + $0xc28] sm:$0xff]  ;;  %v5459_v27 = vld [vmem:[%s16769_s16 + $0xc10] sm:$0xff] }
 0xaa7   : > { %8822 = vmatprep.subr.mxu0 %v5225_v28  ;;  %8861 = vmatpush3.msra.mxu1 %v5273_v29 }
 0xaa8   : > { %8823 = vmatpush3.msra.mxu0 %v5177_v35  ;;  %8862 = vmatprep.subr.mxu1 %v5318_v15 }
 0xaa9   : > { %8824 = vmatprep.subr.mxu0 %v5222_v36  ;;  %8863 = vmatpush3.msra.mxu1 %v5270_v11 }
 0xaaa   : > { %8825 = vmatpush3.msra.mxu0 %v5174_v40  ;;  %8864 = vmatprep.subr.mxu1 %v5315_v13 }
 0xaab   : > { %8826 = vmatprep.subr.mxu0 %v5219_v41  ;;  %8865 = vmatpush3.msra.mxu1 %v5267_v31 }
 0xaac   : > { %8827 = vmatpush3.msra.mxu0 %v5171_v60  ;;  %6220 = vmatmul.mubr.f32.vlgmr.msra.gmra.mxu1 %v14787_v48  ;;  %v5450_v48 = vld [vmem:[%s16769_s16 + $0xbc8] sm:$0xff] }
 0xaad   : > { %6145 = vmatmul.mubr.f32.vlgmr.msra.gmra.mxu0 %v14363_v30  ;;  %6224 = vmatprep.mubr.f32.mxu1 %v14806_v56  ;;  %v5402_v30 = vld [vmem:[%s16769_s16 + $0xa48] sm:$0xff]  ;;  %v5447_v56 = vld [vmem:[%s16769_s16 + $0xbb0] sm:$0xff] }
 0xaae   : > { %8872 = vmatprep.subr.mxu0 %v5456_v9  ;;  %6149 = vmatprep.mubr.f32.mxu0 %v14334_v4  ;;  %v5399_v4 = vld [vmem:[%s16769_s16 + $0xa30] sm:$0xff] }
 0xaaf   : > { %8873 = vmatpush3.msra.mxu0 %v5408_v23 }
 0xab0   : > { %8874 = vmatprep.subr.mxu0 %v5453_v54  ;;  %6225 = vmatmul.mubr.f32.gmra.mxu1 %v14826_v16  ;;  %v5396_v16 = vld [vmem:[%s16769_s16 + $0xa18] sm:$0xff] }
 0xab1   : > { %8875 = vmatpush3.msra.mxu0 %v5405_v58  ;;  %6528 = vmatprep.mubr.f32.mxu1 %v9502_v59 }
 0xab2   : > { %6150 = vmatmul.mubr.f32.gmra.mxu0 %v14480_v25  ;;  %8876 = vmatprep.subr.mxu0 %v5450_v48  ;;  %v5441_v25 = vld [vmem:[%s16769_s16 + $0xb80] sm:$0xff] }
 0xab3   : > { %8877 = vmatpush3.msra.mxu0 %v5402_v30  ;;  %6294 = vmatprep.mubr.f32.mxu0 %v14508_v33  ;;  %v5393_v33 = vld [vmem:[%s16769_s16 + $0xa00] sm:$0xff] }
 0xab4   : > { %8878 = vmatprep.subr.mxu0 %v5447_v56 }
 0xab5   : > { %8879 = vmatpush3.msra.mxu0 %v5399_v4 }
 0xab6   : > { %8880 = vmatprep.subr.mxu0 %v5444_v12 }
 0xab7   : > { %8881 = vmatpush3.msra.mxu0 %v5396_v16 }
 0xab8   : > { %8882 = vmatprep.subr.mxu0 %v5441_v25 }
 0xab9   : > { %8883 = vmatpush3.msra.mxu0 %v5393_v33 }
 0xaba   : > { %8884 = vmatprep.subr.mxu0 %v5438_v43 }
 0xabb   : > { %8885 = vmatpush3.msra.mxu0 %v5390_v45  ;;  %v15359_v45 = vld [vmem:[%s16770_s17] sm:$0x7] }
 0xabc   : > { %8886 = vmatprep.subr.mxu0 %v5435_v46 }
 0xabd   : > { %8887 = vmatpush3.msra.mxu0 %v5387_v49 }
 0xabe   : > { %8888 = vmatprep.subr.mxu0 %v5432_v50 }
 0xabf   : > { %8889 = vmatpush3.msra.mxu0 %v5384_v51  ;;  %v6388_v51 = vrot.slane %v15359_v45, %v11074_v57 }
 0xac0   : > { %8890 = vmatprep.subr.mxu0 %v5429_v52 }
 0xac1   : > { %8891 = vmatpush3.msra.mxu0 %v5381_v55 }
 0xac2   : > { %8892 = vmatprep.subr.mxu0 %v5426_v18 }
 0xac3   : > { %8893 = vmatpush3.msra.mxu0 %v5378_v61  ;;  %v6384_v61 = vrot.slane %v15359_v45, %v11090_v32 }
 0xac4   : > { %8894 = vmatprep.subr.mxu0 %v5423_v7 }
 0xac5   : > { %8895 = vmatpush3.msra.mxu0 %v5375_v0  ;;  %v5506_v0 = vld [vmem:[%s16771_s18] sm:$0x7] }
 0xac6   : > { %8896 = vmatprep.subr.mxu0 %v5420_v1 }
 0xac7   : > { %8897 = vmatpush3.msra.mxu0 %v5372_v2 }
 0xac8   : > { %8898 = vmatprep.subr.mxu0 %v5417_v63 }
 0xac9   : > { %8899 = vmatpush3.msra.mxu0 %v5369_v5 }
 0xaca   : > { %8900 = vmatprep.subr.mxu0 %v5414_v62 }
 0xacb   : > { %8901 = vmatpush3.msra.mxu0 %v5366_v24 }
 0xacc   : > { %8902 = vmatprep.subr.mxu0 %v5411_v6  ;;  %v6410_v6 = vrot.slane %v5506_v0, %v11074_v57 }
 0xacd   : > { %8903 = vmatpush3.msra.mxu0 %v5363_v47 }
 0xace   : > { %6295 = vmatmul.mubr.f32.vlgmr.msra.gmra.mxu0 %v14345_v17  ;;  %9057 = vmatprep.subr.mxu0 %v5504_v8  ;;  %v5492_v17 = vld [vmem:[%s16769_s16 + $0xd18] sm:$0xff] }
 0xacf   : > { %6299 = vmatprep.mubr.f32.mxu0 %v14790_v53  ;;  %9058 = vmatpush3.msra.mxu0 %v5504_v8  ;;  %v5489_v53 = vld [vmem:[%s16769_s16 + $0xd00] sm:$0xff]  ;;  %v6406_v8 = vrot.slane %v5506_v0, %v11090_v32 }
 0xad0   : > { %9059 = vmatprep.subr.mxu0 %v5501_v34 }
 0xad1   : > { %9060 = vmatpush3.msra.mxu0 %v5501_v34 }
 0xad2   : > { %6300 = vmatmul.mubr.f32.gmra.mxu0 %v14350_v19  ;;  %9061 = vmatprep.subr.mxu0 %v5498_v14  ;;  %v5486_v19 = vld [vmem:[%s16769_s16 + $0xce8] sm:$0xff] }
 0xad3   : > { %9062 = vmatpush3.msra.mxu0 %v5498_v14  ;;  %9089 = vmatprep.mubr.f32.mxu0 %v15003_v22  ;;  %v5483_v22 = vld [vmem:[%s16769_s16 + $0xcd0] sm:$0xff] }
 0xad4   : > { %9063 = vmatprep.subr.mxu0 %v5495_v39 }
 0xad5   : > { %9064 = vmatpush3.msra.mxu0 %v5495_v39 }
 0xad6   : > { %9065 = vmatprep.subr.mxu0 %v5492_v17 }
 0xad7   : > { %9066 = vmatpush3.msra.mxu0 %v5492_v17 }
 0xad8   : > { %9067 = vmatprep.subr.mxu0 %v5489_v53 }
 0xad9   : > { %9068 = vmatpush3.msra.mxu0 %v5489_v53 }
 0xada   : > { %9069 = vmatprep.subr.mxu0 %v5486_v19 }
 0xadb   : > { %9070 = vmatpush3.msra.mxu0 %v5486_v19 }
 0xadc   : > { %9071 = vmatprep.subr.mxu0 %v5483_v22 }
 0xadd   : > { %9072 = vmatpush3.msra.mxu0 %v5483_v22 }
 0xade   : > { %9073 = vmatprep.subr.mxu0 %v5480_v10 }
 0xadf   : > { %9074 = vmatpush3.msra.mxu0 %v5480_v10 }
 0xae0   : > { %9075 = vmatprep.subr.mxu0 %v5477_v38 }
 0xae1   : > { %9076 = vmatpush3.msra.mxu0 %v5477_v38  ;;  %v5763_v15 = vpop.f32.mrf.mxu1 }
 0xae2   : > { %9077 = vmatprep.subr.mxu0 %v5474_v3  ;;  %v5686_v28 = vpop.f32.mrf.mxu0 }
 0xae3   : > { %9078 = vmatpush3.msra.mxu0 %v5474_v3  ;;  %v5765_v11 = vpop.f32.mrf.mxu1  ;;  %v5764_v54 = vadd.f32 %v5763_v15, %v5686_v28 }
 0xae4   : > { %9079 = vmatprep.subr.mxu0 %v5471_v20  ;;  %v5688_v29 = vpop.f32.mrf.mxu0 }
 0xae5   : > { %9080 = vmatpush3.msra.mxu0 %v5471_v20  ;;  %v5766_v23 = vadd.f32 %v5765_v11, %v5688_v29 }
 0xae6   : > { %9081 = vmatprep.subr.mxu0 %v5468_v44 }
 0xae7   : > { %9082 = vmatpush3.msra.mxu0 %v5468_v44 }
 0xae8   : > { %9083 = vmatprep.subr.mxu0 %v5465_v26  ;;  %v5692_v35 = vpop.f32.mrf.mxu0 }
 0xae9   : > { %9084 = vmatpush3.msra.mxu0 %v5465_v26 }
 0xaea   : > { %9085 = vmatprep.subr.mxu0 %v5462_v42  ;;  %v5694_v36 = vpop.f32.mrf.mxu0 }
 0xaeb   : > { %9086 = vmatpush3.msra.mxu0 %v5462_v42 }
 0xaec   : > { %9087 = vmatprep.subr.mxu0 %v5459_v27 }
 0xaed   : > { %9088 = vmatpush3.msra.mxu0 %v5459_v27 }
 0xaee   : > { %9090 = vmatmul.mubr.f32.vlgmr.msra.gmra.mxu0 %v15034_v37 }
 0xaef   : > { %6638 = vmatprep.mubr.f32.mxu0 %v9502_v59 }
 0xaf4   : > { %v5769_v13 = vpop.f32.mrf.mxu1 }
 0xaf5   : > { %v5770_v30 = vadd.f32 %v5769_v13, %v5692_v35 }
 0xaf6   : > { %v5771_v31 = vpop.f32.mrf.mxu1 }
 0xaf7   : > { %v5772_v12 = vadd.f32 %v5771_v31, %v5694_v36 }
 0xb24   : > { %v5917_v60 = vpop.f32.mrf.mxu1 }
 0xb25   : > { %v5840_v40 = vpop.f32.mrf.mxu0 }
 0xb26   : > { %v5919_v58 = vpop.f32.mrf.mxu1  ;;  %v5841_v56 = vadd.f32 %v5840_v40, %v5764_v54 }
 0xb27   : > { %v5842_v41 = vpop.f32.mrf.mxu0 }
 0xb28   : > { %v5843_v37 = vadd.f32 %v5842_v41, %v5766_v23  ;;  %v5918_v49 = vadd.f32 %v5917_v60, %v5841_v56 }
 0xb2a   : > { %v5923_v25 = vpop.f32.mrf.mxu1  ;;  %v5920_v46 = vadd.f32 %v5919_v58, %v5843_v37 }
 0xb2b   : > { %v5846_v9 = vpop.f32.mrf.mxu0 }
 0xb2c   : > { %v5847_v16 = vadd.f32 %v5846_v9, %v5770_v30  ;;  %v5925_v55 = vpop.f32.mrf.mxu1 }
 0xb2d   : > { %v5848_v48 = vpop.f32.mrf.mxu0 }
 0xb2e   : > { %v5849_v43 = vadd.f32 %v5848_v48, %v5772_v12  ;;  %v5924_v52 = vadd.f32 %v5923_v25, %v5847_v16  ;;  %v6392_v25 = vrot.slane %v15359_v45, %v11085_v21 }
 0xb30   : > { %v5926_v2 = vadd.f32 %v5925_v55, %v5849_v43  ;;  %v5507_v43 = vld [vmem:[%s16772_s19] sm:$0xff] }
 0xb48   : > { %v8790_v3 = vpop.f32.mrf.mxu1 }
 0xb49   : > { %v5994_v4 = vpop.f32.mrf.mxu0 }
 0xb4a   : > { %v5995_v18 = vadd.f32 %v5994_v4, %v5918_v49  ;;  %v8791_v44 = vpop.f32.mrf.mxu1 }
 0xb4b   : > { %v5996_v33 = vpop.f32.mrf.mxu0  ;;  %v8792_v54 = vadd.f32 %v8791_v44, %v8790_v3  ;;  %v6699_v3 = vld [vmem:[%s16774_s21 + $0xf0] sm:$0xff]  ;;  %v6698_v44 = vld [vmem:[%s16774_s21 + $0xe8] sm:$0xff] }
 0xb4c   : > { %v5997_v50 = vadd.f32 %v5996_v33, %v5920_v46  ;;  %v6396_v47 = vmul.f32 %v6384_v61, %v5995_v18 }
 0xb4e   : > { %v6397_v5 = vmul.f32 %v6388_v51, %v5997_v50  ;;  %v6418_v53 = vadd.f32 %v6406_v8, %v6396_v47  ;;  %v8793_v42 = vpop.f32.mrf.mxu1 }
 0xb4f   : > { %v6000_v7 = vpop.f32.mrf.mxu0 }
 0xb50   : > { %v6001_v1 = vadd.f32 %v6000_v7, %v5924_v52  ;;  %v6419_v17 = vadd.f32 %v6410_v6, %v6397_v5  ;;  %v6424_v38 = vmax.f32 %v6418_v53, 0.0  ;;  %v8794_v28 = vpop.f32.mrf.mxu1  ;;  %v5508_v7 = vld [vmem:[%s16772_s19 + $0x8] sm:$0xff]  ;;  %v5511_v5 = vld [vmem:[%s16772_s19 + $0x20] sm:$0x3]  ;;  %v5515_v53 = vld [vmem:[%s16773_s20 + $0x18] sm:$0xff] }
 0xb51   : > { %v6002_v63 = vpop.f32.mrf.mxu0  ;;  %v8795_v31 = vadd.f32 %v8794_v28, %v8793_v42  ;;  %v6697_v42 = vld [vmem:[%s16774_s21 + $0xe0] sm:$0xff]  ;;  %v6696_v28 = vld [vmem:[%s16774_s21 + $0xd8] sm:$0xff] }
 0xb52   : > { %v6399_v62 = vmul.f32 %v6384_v61, %v6001_v1  ;;  %v6003_v24 = vadd.f32 %v6002_v63, %v5926_v2  ;;  %v6425_v10 = vmax.f32 %v6419_v17, 0.0  ;;  %v5510_v63 = vld [vmem:[%s16772_s19 + $0x18] sm:$0xff]  ;;  %v5514_v17 = vld [vmem:[%s16773_s20 + $0x10] sm:$0xff] }
 0xb54   : > { %v6400_v34 = vmul.f32 %v6388_v51, %v6003_v24  ;;  %v6421_v14 = vadd.f32 %v6406_v8, %v6399_v62  ;;  %v6414_v51 = vrot.slane %v5506_v0, %v11085_v21  ;;  %v5509_v21 = vld [vmem:[%s16772_s19 + $0x10] sm:$0xff] }
 0xb56   : > { %v6422_v39 = vadd.f32 %v6410_v6, %v6400_v34  ;;  %v6427_v22 = vmax.f32 %v6421_v14, 0.0  ;;  %v5512_v34 = vld [vmem:[%s16773_s20] sm:$0xff] }
 0xb58   : > { %v6428_v19 = vmax.f32 %v6422_v39, 0.0  ;;  %v5513_v39 = vld [vmem:[%s16773_s20 + $0x8] sm:$0xff] }
 0xb5a   : > { %6438 = vrot.lane.b32.xlu1 %v6428_v19, %s9506_s30  ;;  %6602 = vmatprep.subr.mxu0 %v6428_v19  ;;  %v5516_v19 = vld [vmem:[%s16773_s20 + $0x20] sm:$0x3] }
 0xb5b   : > { %6603 = vmatpush1.msra.mxu0 %v6427_v22  ;;  %v6764_v22 = vld [vmem:[%s16774_s21 + $0x2f8] sm:$0xff] }
 0xb5c   : > { %6604 = vmatprep.subr.mxu0 %v6425_v10 }
 0xb5d   : > { %6605 = vmatpush1.msra.mxu0 %v6424_v38  ;;  %v6763_v38 = vld [vmem:[%s16774_s21 + $0x2f0] sm:$0xff] }
 0xb5e   : > { %6434 = vrot.lane.b32.xlu1 %v6425_v10, %s9506_s30  ;;  %8246 = vmatmul.mubr.msk.f32.vlgmr.msra.gmra.mxu0 %vm6448_vm12, %v5507_v43  ;;  %v6700_v10 = vld [vmem:[%s16774_s21 + $0xf8] sm:$0xff] }
 0xb5f   : > { %6644 = vmatprep.mubr.f32.mxu0 %v9502_v59  ;;  %7263 = vmatprep.subr.mxu0 %v6764_v22  ;;  %v6684_v43 = vld [vmem:[%s16774_s21 + $0x78] sm:$0xff]  ;;  %v6670_v22 = vld [vmem:[%s16774_s21 + $0x8] sm:$0xff] }
 0xb60   : > { %7264 = vmatpush1.msra.mxu0 %v6763_v38  ;;  %v6669_v38 = vld [vmem:[%s16774_s21] sm:$0xff] }
 0xb62   : > { %8247 = vmatmul.mubr.msk.f32.gmra.mxu0 %vm6448_vm12, %v5508_v7  ;;  %v6679_v7 = vld [vmem:[%s16774_s21 + $0x50] sm:$0xff] }
 0xb63   : > { %6650 = vmatprep.mubr.f32.mxu0 %v9502_v59 }
 0xb66   : > { %8248 = vmatmul.mubr.msk.f32.gmra.mxu0 %vm6448_vm12, %v5509_v21  ;;  %v6741_v21 = vld [vmem:[%s16774_s21 + $0x240] sm:$0xff] }
 0xb67   : > { %6656 = vmatprep.mubr.f32.mxu0 %v9502_v59 }
 0xb6a   : > { %8249 = vmatmul.mubr.msk.f32.gmra.mxu0 %vm6448_vm12, %v5510_v63  ;;  %v6740_v63 = vld [vmem:[%s16774_s21 + $0x238] sm:$0xff] }
 0xb6b   : > { %6662 = vmatprep.mubr.f32.mxu0 %v9502_v59 }
 0xb6c   : > { %v8866_v35 = vpop.f32.mrf.mxu1 }
 0xb6d   : > { %v8828_v20 = vpop.f32.mrf.mxu0 }
 0xb6e   : > { %v8867_v36 = vpop.f32.mrf.mxu1  ;;  %8250 = vmatmul.mubr.msk.f32.gmra.mxu0 %vm6448_vm12, %v5511_v5  ;;  %v6676_v5 = vld [vmem:[%s16774_s21 + $0x38] sm:$0xff] }
 0xb6f   : > { %v8829_v26 = vpop.f32.mrf.mxu0  ;;  %v8868_v56 = vadd.f32 %v8867_v36, %v8866_v35  ;;  %v6695_v35 = vld [vmem:[%s16774_s21 + $0xd0] sm:$0xff]  ;;  %v6694_v36 = vld [vmem:[%s16774_s21 + $0xc8] sm:$0xff] }
 0xb70   : > { %v8869_v40 = vpop.f32.mrf.mxu1  ;;  %v8830_v60 = vadd.f32 %v8829_v26, %v8828_v20  ;;  %v6762_v20 = vld [vmem:[%s16774_s21 + $0x2e8] sm:$0xff]  ;;  %v6761_v26 = vld [vmem:[%s16774_s21 + $0x2e0] sm:$0xff] }
 0xb71   : > { %7265 = vmatprep.subr.mxu0 %v6762_v20  ;;  %v6732_v20 = vld [vmem:[%s16774_s21 + $0x1f8] sm:$0xff] }
 0xb72   : > { %v8831_v27 = vpop.f32.mrf.mxu0  ;;  %v8870_v9 = vpop.f32.mrf.mxu1  ;;  %v6147_v48 = vadd.f32 %v8830_v60, %v8792_v54  ;;  %7266 = vmatpush1.msra.mxu0 %v6761_v26  ;;  %v6691_v60 = vld [vmem:[%s16774_s21 + $0xb0] sm:$0xff]  ;;  %v6753_v54 = vld [vmem:[%s16774_s21 + $0x2a0] sm:$0xff] }
 0xb73   : > { %v8871_v30 = vadd.f32 %v8870_v9, %v8869_v40  ;;  %v6693_v40 = vld [vmem:[%s16774_s21 + $0xc0] sm:$0xff]  ;;  %v6754_v9 = vld [vmem:[%s16774_s21 + $0x2a8] sm:$0xff]  ;;  %v6731_v26 = vld [vmem:[%s16774_s21 + $0x1f0] sm:$0xff] }
 0xb74   : > { %v8832_v29 = vpop.f32.mrf.mxu0  ;;  %v6222_v33 = vadd.f32 %v8868_v56, %v6147_v48  ;;  %v6752_v48 = vld [vmem:[%s16774_s21 + $0x298] sm:$0xff]  ;;  %v6687_v56 = vld [vmem:[%s16774_s21 + $0x90] sm:$0xff] }
 0xb75   : > { %v8833_v41 = vadd.f32 %v8832_v29, %v8831_v27  ;;  %v6760_v27 = vld [vmem:[%s16774_s21 + $0x2d8] sm:$0xff]  ;;  %v6759_v29 = vld [vmem:[%s16774_s21 + $0x2d0] sm:$0xff] }
 0xb76   : > { %7267 = vmatprep.subr.mxu0 %v6760_v27  ;;  %v6730_v27 = vld [vmem:[%s16774_s21 + $0x1e8] sm:$0xff] }
 0xb77   : > { %v6152_v58 = vadd.f32 %v8833_v41, %v8795_v31  ;;  %7268 = vmatpush1.msra.mxu0 %v6759_v29  ;;  %v6692_v41 = vld [vmem:[%s16774_s21 + $0xb8] sm:$0xff]  ;;  %v6755_v31 = vld [vmem:[%s16774_s21 + $0x2b0] sm:$0xff]  ;;  %v6729_v29 = vld [vmem:[%s16774_s21 + $0x1e0] sm:$0xff] }
 0xb79   : > { %v6227_v12 = vadd.f32 %v8871_v30, %v6152_v58  ;;  %v6689_v58 = vld [vmem:[%s16774_s21 + $0xa0] sm:$0xff]  ;;  %v6688_v30 = vld [vmem:[%s16774_s21 + $0x98] sm:$0xff] }
 0xb8e   : > { %v8904_v15 = vpop.f32.mrf.mxu0 }
 0xb90   : > { %v8905_v11 = vpop.f32.mrf.mxu0 }
 0xb91   : > { %v8906_v4 = vadd.f32 %v8905_v11, %v8904_v15  ;;  %v6758_v15 = vld [vmem:[%s16774_s21 + $0x2c8] sm:$0xff]  ;;  %v6757_v11 = vld [vmem:[%s16774_s21 + $0x2c0] sm:$0xff] }
 0xb92   : > { %v8907_v13 = vpop.f32.mrf.mxu0  ;;  %7269 = vmatprep.subr.mxu0 %v6758_v15  ;;  %v6728_v15 = vld [vmem:[%s16774_s21 + $0x1d8] sm:$0xff] }
 0xb93   : > { %v6297_v50 = vadd.f32 %v8906_v4, %v6222_v33  ;;  %7270 = vmatpush1.msra.mxu0 %v6757_v11  ;;  %v6750_v4 = vld [vmem:[%s16774_s21 + $0x288] sm:$0xff]  ;;  %v6748_v33 = vld [vmem:[%s16774_s21 + $0x278] sm:$0xff]  ;;  %v6727_v11 = vld [vmem:[%s16774_s21 + $0x1d0] sm:$0xff] }
 0xb94   : > { %v8908_v23 = vpop.f32.mrf.mxu0 }
 0xb95   : > { %v8909_v37 = vadd.f32 %v8908_v23, %v8907_v13  ;;  %v6756_v13 = vld [vmem:[%s16774_s21 + $0x2b8] sm:$0xff]  ;;  %v6690_v23 = vld [vmem:[%s16774_s21 + $0xa8] sm:$0xff] }
 0xb96   : > { %7271 = vmatprep.subr.mxu0 %v6756_v13  ;;  %v6726_v13 = vld [vmem:[%s16774_s21 + $0x1c8] sm:$0xff] }
 0xb97   : > { %v6302_v16 = vadd.f32 %v8909_v37, %v6227_v12  ;;  %7272 = vmatpush1.msra.mxu0 %v6755_v31  ;;  %v6751_v37 = vld [vmem:[%s16774_s21 + $0x290] sm:$0xff]  ;;  %v6686_v12 = vld [vmem:[%s16774_s21 + $0x88] sm:$0xff]  ;;  %v6725_v31 = vld [vmem:[%s16774_s21 + $0x1c0] sm:$0xff] }
 0xb98   : > { %7273 = vmatprep.subr.mxu0 %v6754_v9  ;;  %v6724_v9 = vld [vmem:[%s16774_s21 + $0x1b8] sm:$0xff] }
 0xb99   : > { %7274 = vmatpush1.msra.mxu0 %v6753_v54  ;;  %v6723_v54 = vld [vmem:[%s16774_s21 + $0x1b0] sm:$0xff] }
 0xb9a   : > { %7275 = vmatprep.subr.mxu0 %v6752_v48  ;;  %v6722_v48 = vld [vmem:[%s16774_s21 + $0x1a8] sm:$0xff] }
 0xb9b   : > { %7276 = vmatpush1.msra.mxu0 %v6751_v37  ;;  %v6721_v37 = vld [vmem:[%s16774_s21 + $0x1a0] sm:$0xff] }
 0xb9c   : > { %7277 = vmatprep.subr.mxu0 %v6750_v4  ;;  %v6720_v4 = vld [vmem:[%s16774_s21 + $0x198] sm:$0xff] }
 0xbae   : > { %v9091_v46 = vpop.f32.mrf.mxu0 }
 0xbaf   : > { %v6377_v49 = vadd.f32 %v9091_v46, %v6302_v16  ;;  %v6749_v16 = vld [vmem:[%s16774_s21 + $0x280] sm:$0xff]  ;;  %v6747_v46 = vld [vmem:[%s16774_s21 + $0x270] sm:$0xff] }
 0xbb0   : > { %v6371_v52 = vpop.f32.mrf.mxu0  ;;  %7278 = vmatpush1.msra.mxu0 %v6749_v16  ;;  %v6719_v16 = vld [vmem:[%s16774_s21 + $0x190] sm:$0xff] }
 0xbb1   : > { %v6401_v55 = vmul.f32 %v6392_v25, %v6377_v49  ;;  %v6372_v18 = vadd.f32 %v6371_v52, %v6297_v50  ;;  %v6683_v49 = vld [vmem:[%s16774_s21 + $0x70] sm:$0xff]  ;;  %v6746_v50 = vld [vmem:[%s16774_s21 + $0x268] sm:$0xff]  ;;  %7279 = vmatprep.subr.mxu0 %v6748_v33  ;;  %v6745_v52 = vld [vmem:[%s16774_s21 + $0x260] sm:$0xff] }
 0xbb2   : > { %7280 = vmatpush1.msra.mxu0 %v6747_v46  ;;  %v6718_v33 = vld [vmem:[%s16774_s21 + $0x188] sm:$0xff]  ;;  %v6717_v46 = vld [vmem:[%s16774_s21 + $0x180] sm:$0xff] }
 0xbb3   : > { %v6398_v61 = vmul.f32 %v6392_v25, %v6372_v18  ;;  %v6423_v45 = vadd.f32 %v6414_v51, %v6401_v55  ;;  %v6685_v25 = vld [vmem:[%s16774_s21 + $0x80] sm:$0xff]  ;;  %v6744_v18 = vld [vmem:[%s16774_s21 + $0x258] sm:$0xff]  ;;  %7281 = vmatprep.subr.mxu0 %v6746_v50 }
 0xbb4   : > { %v6681_v55 = vld [vmem:[%s16774_s21 + $0x60] sm:$0xff]  ;;  %7282 = vmatpush1.msra.mxu0 %v6745_v52  ;;  %v6716_v50 = vld [vmem:[%s16774_s21 + $0x178] sm:$0xff]  ;;  %v6715_v52 = vld [vmem:[%s16774_s21 + $0x170] sm:$0xff] }
 0xbb5   : > { %v6429_v1 = vmax.f32 %v6423_v45, 0.0  ;;  %v6420_v2 = vadd.f32 %v6414_v51, %v6398_v61  ;;  %v6682_v51 = vld [vmem:[%s16774_s21 + $0x68] sm:$0xff]  ;;  %v6680_v61 = vld [vmem:[%s16774_s21 + $0x58] sm:$0xff]  ;;  %v6743_v45 = vld [vmem:[%s16774_s21 + $0x250] sm:$0xff]  ;;  %7283 = vmatprep.subr.mxu0 %v6744_v18 }
 0xbb6   : > { %7284 = vmatpush1.msra.mxu0 %v6743_v45  ;;  %v6714_v18 = vld [vmem:[%s16774_s21 + $0x168] sm:$0xff]  ;;  %v6713_v45 = vld [vmem:[%s16774_s21 + $0x160] sm:$0xff] }
 0xbb7   : > { %6440 = vrot.lane.b32.xlu0 %v6429_v1, %s9506_s30  ;;  %v6426_v0 = vmax.f32 %v6420_v2, 0.0  ;;  %v6742_v1 = vld [vmem:[%s16774_s21 + $0x248] sm:$0xff] }
 0xbb8   : > { %v6678_v2 = vld [vmem:[%s16774_s21 + $0x48] sm:$0xff]  ;;  %7285 = vmatprep.subr.mxu0 %v6742_v1  ;;  %v6712_v1 = vld [vmem:[%s16774_s21 + $0x158] sm:$0xff] }
 0xbb9   : > { %7286 = vmatpush1.msra.mxu0 %v6741_v21  ;;  %v6711_v21 = vld [vmem:[%s16774_s21 + $0x150] sm:$0xff] }
 0xbba   : > { %7287 = vmatprep.subr.mxu0 %v6740_v63  ;;  %v6710_v63 = vld [vmem:[%s16774_s21 + $0x148] sm:$0xff] }
 0xbbb   : > { %6436 = vrot.lane.b32.xlu0 %v6426_v0, %s9506_s30  ;;  %v6677_v0 = vld [vmem:[%s16774_s21 + $0x40] sm:$0xff] }
 0xbcc   : > { %v6439_v62 = vpop.permute.xlu1 %6438 }
 0xbd0   : > { %v6435_v47 = vpop.permute.xlu1 %6434 }
 0xc29   : > { %v6441_v24 = vpop.permute.xlu0 %6440 }
 0xc2a   : > { %v6443_v6 = vsel %vm5529_vm11, %v6439_v62, %v6441_v24  ;;  %6492 = vmatprep.subr.mxu1 %v6441_v24  ;;  %v6739_v62 = vld [vmem:[%s16774_s21 + $0x230] sm:$0xff] }
 0xc2b   : > { %6493 = vmatpush1.msra.mxu1 %v6443_v6  ;;  %v6675_v24 = vld [vmem:[%s16774_s21 + $0x30] sm:$0xff]  ;;  %v6738_v6 = vld [vmem:[%s16774_s21 + $0x228] sm:$0xff]  ;;  %7288 = vmatpush1.msra.mxu0 %v6739_v62  ;;  %v6709_v62 = vld [vmem:[%s16774_s21 + $0x140] sm:$0xff] }
 0xc2c   : > { %7289 = vmatprep.subr.mxu0 %v6738_v6  ;;  %v6708_v6 = vld [vmem:[%s16774_s21 + $0x138] sm:$0xff] }
 0xc2d   : > { %v6437_v8 = vpop.permute.xlu0 %6436 }
 0xc2e   : > { %v6442_v14 = vsel %vm5529_vm11, %v6435_v47, %v6437_v8  ;;  %6494 = vmatprep.subr.mxu1 %v6437_v8  ;;  %v6674_v47 = vld [vmem:[%s16774_s21 + $0x28] sm:$0xff]  ;;  %v6737_v8 = vld [vmem:[%s16774_s21 + $0x220] sm:$0xff] }
 0xc2f   : > { %6495 = vmatpush1.msra.mxu1 %v6442_v14  ;;  %v6736_v14 = vld [vmem:[%s16774_s21 + $0x218] sm:$0xff]  ;;  %7290 = vmatpush1.msra.mxu0 %v6737_v8  ;;  %v6707_v8 = vld [vmem:[%s16774_s21 + $0x130] sm:$0xff] }
 0xc30   : > { %8241 = vmatmul.mubr.msk.f32.vlgmr.msra.gmra.mxu1 %vm6448_vm12, %v5512_v34  ;;  %7174 = vmatprep.subr.mxu1 %v6700_v10  ;;  %v6673_v34 = vld [vmem:[%s16774_s21 + $0x20] sm:$0xff] }
 0xc31   : > { %6534 = vmatprep.mubr.f32.mxu1 %v9502_v59  ;;  %7175 = vmatpush1.msra.mxu1 %v6699_v3  ;;  %v6733_v10 = vld [vmem:[%s16774_s21 + $0x200] sm:$0xff]  ;;  %v6796_v3 = vld [vmem:[%s16774_s21 + $0x3f8] sm:$0xff] }
 0xc32   : > { %7176 = vmatprep.subr.mxu1 %v6698_v44  ;;  %7291 = vmatprep.subr.mxu0 %v6736_v14  ;;  %v6795_v44 = vld [vmem:[%s16774_s21 + $0x3f0] sm:$0xff]  ;;  %v6706_v14 = vld [vmem:[%s16774_s21 + $0x128] sm:$0xff] }
 0xc33   : > { %7177 = vmatpush1.msra.mxu1 %v6697_v42  ;;  %v6794_v42 = vld [vmem:[%s16774_s21 + $0x3e8] sm:$0xff] }
 0xc34   : > { %8242 = vmatmul.mubr.msk.f32.gmra.mxu1 %vm6448_vm12, %v5513_v39  ;;  %7178 = vmatprep.subr.mxu1 %v6696_v28  ;;  %v6672_v39 = vld [vmem:[%s16774_s21 + $0x18] sm:$0xff]  ;;  %v6793_v28 = vld [vmem:[%s16774_s21 + $0x3e0] sm:$0xff] }
 0xc35   : > { %6540 = vmatprep.mubr.f32.mxu1 %v9502_v59  ;;  %7179 = vmatpush1.msra.mxu1 %v6695_v35  ;;  %v6792_v35 = vld [vmem:[%s16774_s21 + $0x3d8] sm:$0xff] }
 0xc36   : > { %7180 = vmatprep.subr.mxu1 %v6694_v36  ;;  %v6791_v36 = vld [vmem:[%s16774_s21 + $0x3d0] sm:$0xff] }
 0xc37   : > { %7181 = vmatpush1.msra.mxu1 %v6693_v40  ;;  %v6790_v40 = vld [vmem:[%s16774_s21 + $0x3c8] sm:$0xff] }
 0xc38   : > { %8243 = vmatmul.mubr.msk.f32.gmra.mxu1 %vm6448_vm12, %v5514_v17  ;;  %7182 = vmatprep.subr.mxu1 %v6692_v41  ;;  %v6735_v17 = vld [vmem:[%s16774_s21 + $0x210] sm:$0xff]  ;;  %v6789_v41 = vld [vmem:[%s16774_s21 + $0x3c0] sm:$0xff] }
 0xc39   : > { %6546 = vmatprep.mubr.f32.mxu1 %v9502_v59  ;;  %7183 = vmatpush1.msra.mxu1 %v6691_v60  ;;  %v6788_v60 = vld [vmem:[%s16774_s21 + $0x3b8] sm:$0xff] }
 0xc3a   : > { %7184 = vmatprep.subr.mxu1 %v6690_v23  ;;  %7292 = vmatpush1.msra.mxu0 %v6735_v17  ;;  %v6787_v23 = vld [vmem:[%s16774_s21 + $0x3b0] sm:$0xff]  ;;  %v6705_v17 = vld [vmem:[%s16774_s21 + $0x120] sm:$0xff] }
 0xc3b   : > { %7185 = vmatpush1.msra.mxu1 %v6689_v58  ;;  %v6786_v58 = vld [vmem:[%s16774_s21 + $0x3a8] sm:$0xff] }
 0xc3c   : > { %8244 = vmatmul.mubr.msk.f32.gmra.mxu1 %vm6448_vm12, %v5515_v53  ;;  %7186 = vmatprep.subr.mxu1 %v6688_v30  ;;  %v6671_v53 = vld [vmem:[%s16774_s21 + $0x10] sm:$0xff]  ;;  %v6785_v30 = vld [vmem:[%s16774_s21 + $0x3a0] sm:$0xff] }
 0xc3d   : > { %6552 = vmatprep.mubr.f32.mxu1 %v9502_v59  ;;  %7187 = vmatpush1.msra.mxu1 %v6687_v56  ;;  %v6784_v56 = vld [vmem:[%s16774_s21 + $0x398] sm:$0xff] }
 0xc3e   : > { %7188 = vmatprep.subr.mxu1 %v6686_v12  ;;  %v6783_v12 = vld [vmem:[%s16774_s21 + $0x390] sm:$0xff] }
 0xc3f   : > { %7189 = vmatpush1.msra.mxu1 %v6685_v25  ;;  %v6782_v25 = vld [vmem:[%s16774_s21 + $0x388] sm:$0xff] }
 0xc40   : > { %8245 = vmatmul.mubr.msk.f32.gmra.mxu1 %vm6448_vm12, %v5516_v19  ;;  %7190 = vmatprep.subr.mxu1 %v6684_v43  ;;  %v6734_v19 = vld [vmem:[%s16774_s21 + $0x208] sm:$0xff]  ;;  %v6781_v43 = vld [vmem:[%s16774_s21 + $0x380] sm:$0xff] }
 0xc41   : > { %7191 = vmatpush1.msra.mxu1 %v6683_v49  ;;  %7293 = vmatprep.subr.mxu0 %v6734_v19  ;;  %v6780_v49 = vld [vmem:[%s16774_s21 + $0x378] sm:$0xff] }
 0xc42   : > { %7192 = vmatprep.subr.mxu1 %v6682_v51  ;;  %7294 = vmatpush1.msra.mxu0 %v6733_v10  ;;  %v6779_v51 = vld [vmem:[%s16774_s21 + $0x370] sm:$0xff]  ;;  %v6704_v19 = vld [vmem:[%s16774_s21 + $0x118] sm:$0xff]  ;;  %v6640_v10 = vpop.f32.mrf.mxu0 }
 0xc43   : > { %7193 = vmatpush1.msra.mxu1 %v6681_v55  ;;  %7295 = vmatprep.subr.mxu0 %v6796_v3  ;;  %v6778_v55 = vld [vmem:[%s16774_s21 + $0x368] sm:$0xff] }
 0xc44   : > { %7194 = vmatprep.subr.mxu1 %v6680_v61  ;;  %7296 = vmatpush2.msra.mxu0 %v6795_v44  ;;  %v6777_v61 = vld [vmem:[%s16774_s21 + $0x360] sm:$0xff]  ;;  %v6766_v44 = vld [vmem:[%s16774_s21 + $0x308] sm:$0xff] }
 0xc45   : > { %7195 = vmatpush1.msra.mxu1 %v6679_v7  ;;  %7297 = vmatprep.subr.mxu0 %v6794_v42  ;;  %v6776_v7 = vld [vmem:[%s16774_s21 + $0x358] sm:$0xff]  ;;  %v6765_v42 = vld [vmem:[%s16774_s21 + $0x300] sm:$0xff] }
 0xc46   : > { %7196 = vmatprep.subr.mxu1 %v6678_v2  ;;  %7298 = vmatpush2.msra.mxu0 %v6793_v28  ;;  %v6775_v2 = vld [vmem:[%s16774_s21 + $0x350] sm:$0xff] }
 0xc47   : > { %7197 = vmatpush1.msra.mxu1 %v6677_v0  ;;  %7299 = vmatprep.subr.mxu0 %v6792_v35  ;;  %v6774_v0 = vld [vmem:[%s16774_s21 + $0x348] sm:$0xff]  ;;  %v6828_v35 = vld [vmem:[%s16774_s21 + $0x4f8] sm:$0xff] }
 0xc48   : > { %7198 = vmatprep.subr.mxu1 %v6676_v5  ;;  %7300 = vmatpush2.msra.mxu0 %v6791_v36  ;;  %v6773_v5 = vld [vmem:[%s16774_s21 + $0x340] sm:$0xff] }
 0xc49   : > { %7199 = vmatpush1.msra.mxu1 %v6675_v24  ;;  %7301 = vmatprep.subr.mxu0 %v6790_v40  ;;  %v6772_v24 = vld [vmem:[%s16774_s21 + $0x338] sm:$0xff] }
 0xc4a   : > { %7200 = vmatprep.subr.mxu1 %v6674_v47  ;;  %7302 = vmatpush2.msra.mxu0 %v6789_v41  ;;  %v6771_v47 = vld [vmem:[%s16774_s21 + $0x330] sm:$0xff] }
 0xc4b   : > { %7201 = vmatpush1.msra.mxu1 %v6673_v34  ;;  %7303 = vmatprep.subr.mxu0 %v6788_v60  ;;  %v6770_v34 = vld [vmem:[%s16774_s21 + $0x328] sm:$0xff] }
 0xc4c   : > { %7202 = vmatprep.subr.mxu1 %v6672_v39  ;;  %7304 = vmatpush2.msra.mxu0 %v6787_v23  ;;  %v6769_v39 = vld [vmem:[%s16774_s21 + $0x320] sm:$0xff] }
 0xc4d   : > { %7203 = vmatpush1.msra.mxu1 %v6671_v53  ;;  %7305 = vmatprep.subr.mxu0 %v6786_v58  ;;  %v6768_v53 = vld [vmem:[%s16774_s21 + $0x318] sm:$0xff] }
 0xc4e   : > { %7204 = vmatprep.subr.mxu1 %v6670_v22  ;;  %7306 = vmatpush2.msra.mxu0 %v6785_v30  ;;  %v6767_v22 = vld [vmem:[%s16774_s21 + $0x310] sm:$0xff] }
 0xc4f   : > { %7205 = vmatpush1.msra.mxu1 %v6669_v38  ;;  %7307 = vmatprep.subr.mxu0 %v6784_v56  ;;  %v6642_v38 = vpop.f32.mrf.mxu0 }
 0xc50   : > { %7206 = vmatprep.subr.mxu1 %v6732_v20  ;;  %7308 = vmatpush2.msra.mxu0 %v6783_v12  ;;  %v6703_v20 = vld [vmem:[%s16774_s21 + $0x110] sm:$0xff] }
 0xc51   : > { %7207 = vmatpush2.msra.mxu1 %v6731_v26  ;;  %7309 = vmatprep.subr.mxu0 %v6782_v25  ;;  %v6646_v3 = vpop.f32.mrf.mxu0  ;;  %v6702_v26 = vld [vmem:[%s16774_s21 + $0x108] sm:$0xff] }
 0xc52   : > { %7208 = vmatprep.subr.mxu1 %v6730_v27  ;;  %7310 = vmatpush2.msra.mxu0 %v6781_v43  ;;  %v6701_v27 = vld [vmem:[%s16774_s21 + $0x100] sm:$0xff] }
 0xc53   : > { %7209 = vmatpush2.msra.mxu1 %v6729_v29  ;;  %7311 = vmatprep.subr.mxu0 %v6780_v49  ;;  %v6648_v28 = vpop.f32.mrf.mxu0  ;;  %v6892_v29 = vld [vmem:[%s16774_s21 + $0x6f8] sm:$0xff] }
 0xc54   : > { %7210 = vmatprep.subr.mxu1 %v6728_v15  ;;  %7312 = vmatpush2.msra.mxu0 %v6779_v51 }
 0xc55   : > { %7211 = vmatpush2.msra.mxu1 %v6727_v11  ;;  %7313 = vmatprep.subr.mxu0 %v6778_v55  ;;  %v6652_v36 = vpop.f32.mrf.mxu0 }
 0xc56   : > { %7212 = vmatprep.subr.mxu1 %v6726_v13  ;;  %7314 = vmatpush2.msra.mxu0 %v6777_v61 }
 0xc57   : > { %7213 = vmatpush2.msra.mxu1 %v6725_v31  ;;  %7315 = vmatprep.subr.mxu0 %v6776_v7  ;;  %v6654_v31 = vpop.f32.mrf.mxu0 }
 0xc58   : > { %7214 = vmatprep.subr.mxu1 %v6724_v9  ;;  %7316 = vmatpush2.msra.mxu0 %v6775_v2 }
 0xc59   : > { %7215 = vmatpush2.msra.mxu1 %v6723_v54  ;;  %7317 = vmatprep.subr.mxu0 %v6774_v0 }
 0xc5a   : > { %7216 = vmatprep.subr.mxu1 %v6722_v48  ;;  %7318 = vmatpush2.msra.mxu0 %v6773_v5 }
 0xc5b   : > { %7217 = vmatpush2.msra.mxu1 %v6721_v37  ;;  %7319 = vmatprep.subr.mxu0 %v6772_v24  ;;  %v6658_v37 = vpop.f32.mrf.mxu0 }
 0xc5c   : > { %7218 = vmatprep.subr.mxu1 %v6720_v4  ;;  %7320 = vmatpush2.msra.mxu0 %v6771_v47 }
 0xc5d   : > { %7219 = vmatpush2.msra.mxu1 %v6719_v16  ;;  %7321 = vmatprep.subr.mxu0 %v6770_v34  ;;  %v6660_v49 = vpop.f32.mrf.mxu0 }
 0xc5e   : > { %7220 = vmatprep.subr.mxu1 %v6718_v33  ;;  %7322 = vmatpush2.msra.mxu0 %v6769_v39 }
 0xc5f   : > { %7221 = vmatpush2.msra.mxu1 %v6717_v46  ;;  %7323 = vmatprep.subr.mxu0 %v6768_v53 }
 0xc60   : > { %7222 = vmatprep.subr.mxu1 %v6716_v50  ;;  %7324 = vmatpush2.msra.mxu0 %v6767_v22 }
 0xc61   : > { %7223 = vmatpush2.msra.mxu1 %v6715_v52  ;;  %7325 = vmatprep.subr.mxu0 %v6766_v44 }
 0xc62   : > { %7224 = vmatprep.subr.mxu1 %v6714_v18  ;;  %7326 = vmatpush2.msra.mxu0 %v6765_v42 }
 0xc63   : > { %7225 = vmatpush2.msra.mxu1 %v6713_v45  ;;  %7441 = vmatprep.subr.mxu0 %v6892_v29 }
 0xc64   : > { %7226 = vmatprep.subr.mxu1 %v6712_v1 }
 0xc65   : > { %7227 = vmatpush2.msra.mxu1 %v6711_v21  ;;  %v6664_v21 = vpop.f32.mrf.mxu0 }
 0xc66   : > { %7228 = vmatprep.subr.mxu1 %v6710_v63 }
 0xc67   : > { %7229 = vmatpush2.msra.mxu1 %v6709_v62 }
 0xc68   : > { %7230 = vmatprep.subr.mxu1 %v6708_v6  ;;  %v6666_v6 = vpop.f32.mrf.mxu0 }
 0xc69   : > { %7231 = vmatpush2.msra.mxu1 %v6707_v8 }
 0xc6a   : > { %7232 = vmatprep.subr.mxu1 %v6706_v14 }
 0xc6b   : > { %7233 = vmatpush2.msra.mxu1 %v6705_v17 }
 0xc6c   : > { %7234 = vmatprep.subr.mxu1 %v6704_v19 }
 0xc6d   : > { %7235 = vmatpush2.msra.mxu1 %v6703_v20 }
 0xc6e   : > { %7236 = vmatprep.subr.mxu1 %v6702_v26 }
 0xc6f   : > { %7237 = vmatpush2.msra.mxu1 %v6701_v27 }
 0xc70   : > { %7352 = vmatprep.subr.mxu1 %v6828_v35 }
 0xcf0   : > { %v6530_v15 = vpop.f32.mrf.mxu1 }
 0xcf1   : > { %v15817_v40 = vadd.f32 %v6640_v10, %v6530_v15 }
 0xcf2   : > { %v6532_v11 = vpop.f32.mrf.mxu1 }
 0xcf3   : > { %v15819_v13 = vadd.f32 %v6642_v38, %v6532_v11  ;;  %v7033_v58 = vrot.slane %v15817_v40, 1  ;;  %v7104_v27 = vrot.slane %v15817_v40, 2 }
 0xcf4   : > { %v6536_v41 = vpop.f32.mrf.mxu1 }
 0xcf5   : > { %v15821_v60 = vadd.f32 %v6646_v3, %v6536_v41  ;;  %v9322_v9 = vpack.i.bf16 %v15819_v13, %v15817_v40  ;;  %v7047_v43 = vrot.slane %v15819_v13, 1  ;;  %v7117_v44 = vrot.slane %v15819_v13, 2 }
 0xcf6   : > { %v6538_v23 = vpop.f32.mrf.mxu1 }
 0xcf7   : > { %v15825_v54 = vadd.f32 %v6648_v28, %v6538_v23  ;;  %9323 = vrot.lane.b32.xlu0 %v9322_v9, %s9506_s30  ;;  %v7034_v48 = vrot.slane %v15821_v60, 1  ;;  %9318 = vrot.lane.b32.xlu1 %v9322_v9, %s9507_s8  ;;  %v7105_v20 = vrot.slane %v15821_v60, 2 }
 0xcf8   : > { %v6542_v30 = vpop.f32.mrf.mxu1 }
 0xcf9   : > { %v15831_v56 = vadd.f32 %v6652_v36, %v6542_v30  ;;  %v7035_v4 = vsel %vm4092_vm7, %v7033_v58, %v7034_v48  ;;  %v7048_v12 = vrot.slane %v15825_v54, 1  ;;  %v9327_v25 = vpack.i.bf16 %v15825_v54, %v15821_v60 }
 0xcfa   : > { %v6544_v16 = vpop.f32.mrf.mxu1  ;;  %7327 = vmatprep.mubr.f32.mxu0 %v7035_v4  ;;  %v7118_v38 = vrot.slane %v15825_v54, 2  ;;  %v15890_v29 = vsel %vm4113_vm8, %v7104_v27, %v7105_v20  ;;  %v6881_v27 = vld [vmem:[%s16774_s21 + $0x6a0] sm:$0xff] }
 0xcfb   : > { %v15837_v33 = vadd.f32 %v6654_v31, %v6544_v16  ;;  %9328 = vrot.lane.b32.xlu1 %v9327_v25, %s9507_s8  ;;  %v7049_v55 = vsel %vm4092_vm7, %v7047_v43, %v7048_v12  ;;  %v7036_v45 = vrot.slane %v15831_v56, 1  ;;  %v7107_v42 = vrot.slane %v15831_v56, 2 }
 0xcfc   : > { %v6548_v46 = vpop.f32.mrf.mxu1  ;;  %v9342_v1 = vpack.i.bf16 %v7049_v55, %v7035_v4  ;;  %v7119_v28 = vsel %vm4113_vm8, %v7117_v44, %v7118_v38  ;;  %v6890_v55 = vld [vmem:[%s16774_s21 + $0x6e8] sm:$0xff]  ;;  %v6819_v44 = vld [vmem:[%s16774_s21 + $0x4b0] sm:$0xff] }
 0xcfd   : > { %v15841_v50 = vadd.f32 %v6658_v37, %v6548_v46  ;;  %v9332_v51 = vpack.i.bf16 %v15837_v33, %v15831_v56  ;;  %v7050_v61 = vrot.slane %v15837_v33, 1  ;;  %v15857_v63 = vsel %vm4092_vm7, %v7034_v48, %v7036_v45  ;;  %v6891_v46 = vld [vmem:[%s16774_s21 + $0x6f0] sm:$0xff] }
 0xcfe   : > { %v6550_v52 = vpop.f32.mrf.mxu1  ;;  %v7120_v26 = vrot.slane %v15837_v33, 2  ;;  %v15894_v15 = vsel %vm4113_vm8, %v7105_v20, %v7107_v42  ;;  %v9392_v13 = vpack.i.bf16 %v7119_v28, %v15890_v29  ;;  %v6883_v20 = vld [vmem:[%s16774_s21 + $0x6b0] sm:$0xff]  ;;  %v6817_v28 = vld [vmem:[%s16774_s21 + $0x4a0] sm:$0xff] }
 0xcff   : > { %v15846_v18 = vadd.f32 %v6660_v49, %v6550_v52  ;;  %9333 = vrot.lane.b32.xlu0 %v9332_v51, %s9507_s8  ;;  %v7051_v5 = vsel %vm4092_vm7, %v7048_v12, %v7050_v61  ;;  %v7038_v62 = vrot.slane %v15841_v50, 1  ;;  %v7109_v11 = vrot.slane %v15841_v50, 2  ;;  %v6827_v52 = vld [vmem:[%s16774_s21 + $0x4f0] sm:$0xff] }
 0xd00   : > { %v6554_v2 = vpop.f32.mrf.mxu1  ;;  %v9357_v47 = vpack.i.bf16 %v7051_v5, %v15857_v63  ;;  %v7121_v36 = vsel %vm4113_vm8, %v7118_v38, %v7120_v26 }
 0xd01   : > { %v9337_v7 = vpack.i.bf16 %v15846_v18, %v15841_v50  ;;  %v7052_v0 = vrot.slane %v15846_v18, 1  ;;  %v6665_v8 = vadd.f32 %v6664_v21, %v6554_v2  ;;  %v15865_v14 = vsel %vm4092_vm7, %v7036_v45, %v7038_v62  ;;  %v6889_v45 = vld [vmem:[%s16774_s21 + $0x6e0] sm:$0xff]  ;;  %v6888_v21 = vld [vmem:[%s16774_s21 + $0x6d8] sm:$0xff] }
 0xd02   : > { %v6556_v24 = vpop.f32.mrf.mxu1  ;;  %v7122_v35 = vrot.slane %v15846_v18, 2  ;;  %v9407_v41 = vpack.i.bf16 %v7121_v36, %v15894_v15  ;;  %v15903_v23 = vsel %vm4113_vm8, %v7107_v42, %v7109_v11  ;;  %v6825_v2 = vld [vmem:[%s16774_s21 + $0x4e0] sm:$0xff]  ;;  %v6818_v42 = vld [vmem:[%s16774_s21 + $0x4a8] sm:$0xff] }
 0xd03   : > { %9338 = vrot.lane.b32.xlu1 %v9337_v7, %s9507_s8  ;;  %9343 = vrot.lane.b32.xlu0 %v9342_v1, %s9506_s30  ;;  %v6667_v34 = vadd.f32 %v6666_v6, %v6556_v24  ;;  %v7053_v39 = vsel %vm4092_vm7, %v7050_v61, %v7052_v0  ;;  %v7040_v53 = vrot.slane %v6665_v8, 1  ;;  %v7111_v31 = vrot.slane %v6665_v8, 2  ;;  %v6826_v61 = vld [vmem:[%s16774_s21 + $0x4e8] sm:$0xff]  ;;  %v6823_v6 = vld [vmem:[%s16774_s21 + $0x4d0] sm:$0xff] }
 0xd04   : > { %v9372_v17 = vpack.i.bf16 %v7053_v39, %v15865_v14  ;;  %v7123_v54 = vsel %vm4113_vm8, %v7120_v26, %v7122_v35  ;;  %v6822_v8 = vld [vmem:[%s16774_s21 + $0x4c8] sm:$0xff]  ;;  %v6821_v39 = vld [vmem:[%s16774_s21 + $0x4c0] sm:$0xff] }
 0xd05   : > { %v7054_v19 = vrot.slane %v6667_v34, 1  ;;  %v15874_v22 = vsel %vm4092_vm7, %v7038_v62, %v7040_v53  ;;  %v7124_v9 = vrot.slane %v6667_v34, 2  ;;  %v9417_v58 = vpack.i.bf16 %v7123_v54, %v15903_v23  ;;  %v6885_v34 = vld [vmem:[%s16774_s21 + $0x6c0] sm:$0xff]  ;;  %v6882_v26 = vld [vmem:[%s16774_s21 + $0x6a8] sm:$0xff] }
 0xd06   : > { %v15910_v48 = vsel %vm4113_vm8, %v7109_v11, %v7111_v31 }
 0xd07   : > { %9348 = vrot.lane.b32.xlu1 %v9342_v1, %s9507_s8  ;;  %9353 = vrot.lane.b32.xlu0 %v9327_v25, %s9506_s30  ;;  %v7055_v10 = vsel %vm4092_vm7, %v7052_v0, %v7054_v19  ;;  %v7125_v30 = vsel %vm4113_vm8, %v7122_v35, %v7124_v9  ;;  %v6824_v0 = vld [vmem:[%s16774_s21 + $0x4d8] sm:$0xff]  ;;  %v6879_v9 = vld [vmem:[%s16774_s21 + $0x690] sm:$0xff] }
 0xd08   : > { %v9387_v3 = vpack.i.bf16 %v7055_v10, %v15874_v22  ;;  %v9427_v37 = vpack.i.bf16 %v7125_v30, %v15910_v48  ;;  %v6820_v10 = vld [vmem:[%s16774_s21 + $0x4b8] sm:$0xff]  ;;  %v6815_v30 = vld [vmem:[%s16774_s21 + $0x490] sm:$0xff] }
 0xd09   : > { %v6880_v35 = vld [vmem:[%s16774_s21 + $0x698] sm:$0xff] }
 0xd0b   : > { %9358 = vrot.lane.b32.xlu1 %v9357_v47, %s9506_s30  ;;  %9363 = vrot.lane.b32.xlu0 %v9357_v47, %s9507_s8  ;;  %v6886_v47 = vld [vmem:[%s16774_s21 + $0x6c8] sm:$0xff] }
 0xd0f   : > { %9368 = vrot.lane.b32.xlu1 %v9332_v51, %s9506_s30  ;;  %9373 = vrot.lane.b32.xlu0 %v9372_v17, %s9506_s30 }
 0xd13   : > { %9383 = vrot.lane.b32.xlu1 %v9372_v17, %s9507_s8  ;;  %9378 = vrot.lane.b32.xlu0 %v9337_v7, %s9506_s30  ;;  %v6884_v17 = vld [vmem:[%s16774_s21 + $0x6b8] sm:$0xff] }
 0xd17   : > { %9388 = vrot.lane.b32.xlu1 %v9387_v3, %s9506_s30  ;;  %9398 = vrot.lane.b32.xlu0 %v9387_v3, %s9507_s8 }
 0xd1b   : > { %9393 = vrot.lane.b32.xlu1 %v9392_v13, %s9507_s8  ;;  %9403 = vrot.lane.b32.xlu0 %v9392_v13, %s9506_s30 }
 0xd1f   : > { %9408 = vrot.lane.b32.xlu1 %v9407_v41, %s9507_s8  ;;  %9413 = vrot.lane.b32.xlu0 %v9407_v41, %s9506_s30  ;;  %v6816_v41 = vld [vmem:[%s16774_s21 + $0x498] sm:$0xff] }
 0xd23   : > { %9418 = vrot.lane.b32.xlu1 %v9417_v58, %s9507_s8  ;;  %9423 = vrot.lane.b32.xlu0 %v9417_v58, %s9506_s30 }
 0xd27   : > { %9428 = vrot.lane.b32.xlu1 %v9427_v37, %s9507_s8  ;;  %9433 = vrot.lane.b32.xlu0 %v9427_v37, %s9506_s30  ;;  %v6878_v37 = vld [vmem:[%s16774_s21 + $0x688] sm:$0xff]  ;;  %s8153_s30 = sshll.u32 %s16644_s4, 4  ;;  %s16713_s8 = scalar_lea.sflag [#allocation3], %s836_s7  ;;  %s16707_s30 = int_to_ptr.vmem [resolvable:$true] %s8153_s30 }
 0xd28   : > { %p9446_p0 = scmp.lt.s32.totalorder %s16707_s30, %s9444_s9 }
 0xd69   : > { %v9324_v4 = vpop.permute.xlu0 %9323  ;;  %v9319_v25 = vpop.permute.xlu1 %9318 }
 0xd6a   : > { %v9326_v12 = vunpack.i.h.bf16 %v9324_v4  ;;  %v9325_v16 = vunpack.i.l.bf16 %v9324_v4  ;;  %v9321_v33 = vunpack.i.h.bf16 %v9319_v25  ;;  %v9320_v43 = vunpack.i.l.bf16 %v9319_v25  ;;  %v6814_v4 = vld [vmem:[%s16774_s21 + $0x488] sm:$0xff]  ;;  %v6877_v25 = vld [vmem:[%s16774_s21 + $0x680] sm:$0xff] }
 0xd6c   : > { %v7024_v49 = vsel %vm5529_vm11, %v9325_v16, %v9326_v12  ;;  %v7000_v51 = vsel %vm6999_vm13, %v9320_v43, %v9321_v33  ;;  %v6813_v33 = vld [vmem:[%s16774_s21 + $0x480] sm:$0xff] }
 0xd6d   : > { %7328 = vmatmul.mubr.f32.vlgmr.msra.gmra.mxu0 %v7024_v49  ;;  %v9329_v18 = vpop.permute.xlu1 %9328  ;;  %7238 = vmatprep.mubr.f32.mxu1 %v7000_v51  ;;  %v6811_v51 = vld [vmem:[%s16774_s21 + $0x470] sm:$0xff] }
 0xd6e   : > { %7442 = vmatpush1.msra.mxu0 %v6891_v46  ;;  %v9331_v7 = vunpack.i.h.bf16 %v9329_v18  ;;  %v9330_v1 = vunpack.i.l.bf16 %v9329_v18  ;;  %7239 = vmatmul.mubr.f32.vlgmr.msra.gmra.mxu1 %v15817_v40  ;;  %v6876_v46 = vld [vmem:[%s16774_s21 + $0x678] sm:$0xff] }
 0xd6f   : > { %7333 = vmatprep.mubr.f32.mxu0 %v15857_v63  ;;  %7353 = vmatpush1.msra.mxu1 %v6827_v52  ;;  %v6887_v63 = vld [vmem:[%s16774_s21 + $0x6d0] sm:$0xff] }
 0xd70   : > { %7443 = vmatprep.subr.mxu0 %v6890_v55  ;;  %7354 = vmatprep.subr.mxu1 %v6826_v61  ;;  %v7001_v40 = vsel %vm6999_vm13, %v9330_v1, %v9331_v7  ;;  %v6875_v52 = vld [vmem:[%s16774_s21 + $0x670] sm:$0xff]  ;;  %v6874_v61 = vld [vmem:[%s16774_s21 + $0x668] sm:$0xff]  ;;  %v6873_v7 = vld [vmem:[%s16774_s21 + $0x660] sm:$0xff] }
 0xd71   : > { %7444 = vmatpush1.msra.mxu0 %v6889_v45  ;;  %v9334_v5 = vpop.permute.xlu0 %9333  ;;  %7355 = vmatpush1.msra.mxu1 %v6825_v2  ;;  %v6810_v45 = vld [vmem:[%s16774_s21 + $0x468] sm:$0xff]  ;;  %v6809_v1 = vld [vmem:[%s16774_s21 + $0x460] sm:$0xff]  ;;  %v6872_v2 = vld [vmem:[%s16774_s21 + $0x658] sm:$0xff] }
 0xd72   : > { %7445 = vmatprep.subr.mxu0 %v6888_v21  ;;  %v9336_v62 = vunpack.i.h.bf16 %v9334_v5  ;;  %v9335_v24 = vunpack.i.l.bf16 %v9334_v5  ;;  %7244 = vmatprep.mubr.f32.mxu1 %v7001_v40  ;;  %v6808_v21 = vld [vmem:[%s16774_s21 + $0x458] sm:$0xff]  ;;  %v6871_v40 = vld [vmem:[%s16774_s21 + $0x650] sm:$0xff] }
 0xd73   : > { %7356 = vmatprep.subr.mxu1 %v6824_v0  ;;  %7446 = vmatpush1.msra.mxu0 %v6887_v63 }
 0xd74   : > { %7245 = vmatmul.mubr.f32.gmra.mxu1 %v15821_v60  ;;  %7447 = vmatprep.subr.mxu0 %v6886_v47  ;;  %v7002_v19 = vsel %vm6999_vm13, %v9335_v24, %v9336_v62  ;;  %v6870_v62 = vld [vmem:[%s16774_s21 + $0x648] sm:$0xff]  ;;  %v6805_v47 = vld [vmem:[%s16774_s21 + $0x440] sm:$0xff] }
 0xd75   : > { %7357 = vmatpush1.msra.mxu1 %v6823_v6  ;;  %v9339_v53 = vpop.permute.xlu1 %9338  ;;  %v9344_v38 = vpop.permute.xlu0 %9343  ;;  %7448 = vmatpush1.msra.mxu0 %v6885_v34  ;;  %v6806_v24 = vld [vmem:[%s16774_s21 + $0x448] sm:$0xff]  ;;  %v6869_v6 = vld [vmem:[%s16774_s21 + $0x640] sm:$0xff]  ;;  %v6868_v34 = vld [vmem:[%s16774_s21 + $0x638] sm:$0xff] }
 0xd76   : > { %7358 = vmatprep.subr.mxu1 %v6822_v8  ;;  %v9341_v60 = vunpack.i.h.bf16 %v9339_v53  ;;  %v9340_v3 = vunpack.i.l.bf16 %v9339_v53  ;;  %7449 = vmatprep.subr.mxu0 %v6884_v17  ;;  %v9345_v31 = vunpack.i.l.bf16 %v9344_v38  ;;  %v6803_v53 = vld [vmem:[%s16774_s21 + $0x430] sm:$0xff] }
 0xd77   : > { %7359 = vmatpush1.msra.mxu1 %v6821_v39  ;;  %7250 = vmatprep.mubr.f32.mxu1 %v7002_v19  ;;  %v6804_v39 = vld [vmem:[%s16774_s21 + $0x438] sm:$0xff] }
 0xd78   : > { %7360 = vmatprep.subr.mxu1 %v6820_v10  ;;  %7450 = vmatpush1.msra.mxu0 %v6883_v20  ;;  %v7003_v13 = vsel %vm6999_vm13, %v9340_v3, %v9341_v60  ;;  %v6867_v60 = vld [vmem:[%s16774_s21 + $0x630] sm:$0xff]  ;;  %v6866_v3 = vld [vmem:[%s16774_s21 + $0x628] sm:$0xff] }
 0xd79   : > { %7251 = vmatmul.mubr.f32.gmra.mxu1 %v15831_v56  ;;  %v15995_v36 = vpop.permute.xlu1 %9348  ;;  %v9354_v11 = vpop.permute.xlu0 %9353  ;;  %7451 = vmatprep.subr.mxu0 %v6882_v26  ;;  %v9346_v56 = vunpack.i.h.bf16 %v9344_v38  ;;  %v6802_v20 = vld [vmem:[%s16774_s21 + $0x428] sm:$0xff]  ;;  %v6801_v26 = vld [vmem:[%s16774_s21 + $0x420] sm:$0xff] }
 0xd7a   : > { %7361 = vmatpush1.msra.mxu1 %v6819_v44  ;;  %7452 = vmatpush1.msra.mxu0 %v6881_v27  ;;  %v9356_v54 = vunpack.i.h.bf16 %v9354_v11  ;;  %v9355_v58 = vunpack.i.l.bf16 %v9354_v11  ;;  %v6865_v44 = vld [vmem:[%s16774_s21 + $0x620] sm:$0xff]  ;;  %v6800_v27 = vld [vmem:[%s16774_s21 + $0x418] sm:$0xff]  ;;  %v6798_v11 = vld [vmem:[%s16774_s21 + $0x408] sm:$0xff] }
 0xd7b   : > { %7362 = vmatprep.subr.mxu1 %v6818_v42  ;;  %7453 = vmatprep.subr.mxu0 %v6880_v35  ;;  %v7096_v43 = vsel %vm5529_vm11, %v9345_v31, %v9346_v56  ;;  %v6864_v42 = vld [vmem:[%s16774_s21 + $0x618] sm:$0xff]  ;;  %v6799_v35 = vld [vmem:[%s16774_s21 + $0x410] sm:$0xff]  ;;  %v6797_v56 = vld [vmem:[%s16774_s21 + $0x400] sm:$0xff] }
 0xd7c   : > { %7363 = vmatpush1.msra.mxu1 %v6817_v28  ;;  %7256 = vmatprep.mubr.f32.mxu1 %v7003_v13  ;;  %v7025_v49 = vsel %vm5529_vm11, %v9355_v58, %v9356_v54  ;;  %v6861_v31 = vld [vmem:[%s16774_s21 + $0x600] sm:$0xff]  ;;  %v6924_v54 = vld [vmem:[%s16774_s21 + $0x7f8] sm:$0xff] }
 0xd7d   : > { %7364 = vmatprep.subr.mxu1 %v6816_v41  ;;  %v16013_v12 = vpop.permute.xlu1 %9358  ;;  %v16015_v16 = vpop.permute.xlu0 %9363  ;;  %7454 = vmatpush1.msra.mxu0 %v6879_v9  ;;  %v6862_v41 = vld [vmem:[%s16774_s21 + $0x608] sm:$0xff]  ;;  %v6860_v9 = vld [vmem:[%s16774_s21 + $0x5f8] sm:$0xff] }
 0xd7e   : > { %7257 = vmatmul.mubr.f32.gmra.mxu1 %v15841_v50  ;;  %7455 = vmatprep.subr.mxu0 %v6878_v37  ;;  %v6812_v50 = vld [vmem:[%s16774_s21 + $0x478] sm:$0xff]  ;;  %v6859_v37 = vld [vmem:[%s16774_s21 + $0x5f0] sm:$0xff] }
 0xd7f   : > { %7365 = vmatpush1.msra.mxu1 %v6815_v30  ;;  %7416 = vmatprep.mubr.f32.mxu1 %v7096_v43  ;;  %v6857_v43 = vld [vmem:[%s16774_s21 + $0x5e0] sm:$0xff] }
 0xd80   : > { %7366 = vmatprep.subr.mxu1 %v6814_v4  ;;  %7456 = vmatpush1.msra.mxu0 %v6877_v25  ;;  %v6923_v4 = vld [vmem:[%s16774_s21 + $0x7f0] sm:$0xff]  ;;  %v6858_v25 = vld [vmem:[%s16774_s21 + $0x5e8] sm:$0xff] }
 0xd81   : > { %7367 = vmatpush1.msra.mxu1 %v6813_v33  ;;  %v9369_v55 = vpop.permute.xlu1 %9368  ;;  %v16038_v18 = vpop.permute.xlu0 %9373  ;;  %7457 = vmatprep.subr.mxu0 %v6876_v46  ;;  %v6922_v33 = vld [vmem:[%s16774_s21 + $0x7e8] sm:$0xff]  ;;  %v6921_v46 = vld [vmem:[%s16774_s21 + $0x7e0] sm:$0xff] }
 0xd82   : > { %7368 = vmatprep.subr.mxu1 %v6812_v50  ;;  %7334 = vmatmul.mubr.f32.gmra.mxu0 %v7025_v49  ;;  %v9371_v0 = vunpack.i.h.bf16 %v9369_v55  ;;  %v9370_v5 = vunpack.i.l.bf16 %v9369_v55  ;;  %v6856_v50 = vld [vmem:[%s16774_s21 + $0x5d8] sm:$0xff]  ;;  %v6855_v55 = vld [vmem:[%s16774_s21 + $0x5d0] sm:$0xff] }
 0xd83   : > { %7369 = vmatpush1.msra.mxu1 %v6811_v51  ;;  %7458 = vmatpush1.msra.mxu0 %v6875_v52  ;;  %v6920_v49 = vld [vmem:[%s16774_s21 + $0x7d8] sm:$0xff]  ;;  %v6919_v52 = vld [vmem:[%s16774_s21 + $0x7d0] sm:$0xff] }
 0xd84   : > { %7339 = vmatprep.mubr.f32.mxu0 %v15865_v14  ;;  %7459 = vmatprep.subr.mxu0 %v6874_v61  ;;  %v6807_v14 = vld [vmem:[%s16774_s21 + $0x450] sm:$0xff]  ;;  %v7026_v17 = vsel %vm5529_vm11, %v9370_v5, %v9371_v0  ;;  %v6918_v61 = vld [vmem:[%s16774_s21 + $0x7c8] sm:$0xff] }
 0xd85   : > { %7370 = vmatprep.subr.mxu1 %v6810_v45  ;;  %v16065_v63 = vpop.permute.xlu1 %9383  ;;  %7460 = vmatpush1.msra.mxu0 %v6873_v7  ;;  %v9379_v8 = vpop.permute.xlu0 %9378  ;;  %v6854_v45 = vld [vmem:[%s16774_s21 + $0x5c8] sm:$0xff]  ;;  %v6917_v7 = vld [vmem:[%s16774_s21 + $0x7c0] sm:$0xff]  ;;  %v6915_v0 = vld [vmem:[%s16774_s21 + $0x7b0] sm:$0xff] }
 0xd86   : > { %7371 = vmatpush1.msra.mxu1 %v6809_v1  ;;  %7461 = vmatprep.subr.mxu0 %v6872_v2  ;;  %v9381_v10 = vunpack.i.h.bf16 %v9379_v8  ;;  %v9380_v38 = vunpack.i.l.bf16 %v9379_v8  ;;  %v6853_v1 = vld [vmem:[%s16774_s21 + $0x5c0] sm:$0xff]  ;;  %v6916_v2 = vld [vmem:[%s16774_s21 + $0x7b8] sm:$0xff]  ;;  %v6851_v5 = vld [vmem:[%s16774_s21 + $0x5b0] sm:$0xff] }
 0xd87   : > { %7372 = vmatprep.subr.mxu1 %v6808_v21  ;;  %7462 = vmatpush1.msra.mxu0 %v6871_v40  ;;  %v6852_v21 = vld [vmem:[%s16774_s21 + $0x5b8] sm:$0xff]  ;;  %v6914_v40 = vld [vmem:[%s16774_s21 + $0x7a8] sm:$0xff]  ;;  %v6911_v8 = vld [vmem:[%s16774_s21 + $0x790] sm:$0xff] }
 0xd88   : > { %7373 = vmatpush1.msra.mxu1 %v6807_v14  ;;  %7463 = vmatprep.subr.mxu0 %v6870_v62  ;;  %v7027_v28 = vsel %vm5529_vm11, %v9380_v38, %v9381_v10  ;;  %v6850_v14 = vld [vmem:[%s16774_s21 + $0x5a8] sm:$0xff]  ;;  %v6913_v62 = vld [vmem:[%s16774_s21 + $0x7a0] sm:$0xff]  ;;  %v6908_v38 = vld [vmem:[%s16774_s21 + $0x778] sm:$0xff] }
 0xd89   : > { %7374 = vmatprep.subr.mxu1 %v6806_v24  ;;  %v16089_v19 = vpop.permute.xlu1 %9388  ;;  %7464 = vmatpush1.msra.mxu0 %v6869_v6  ;;  %v6849_v24 = vld [vmem:[%s16774_s21 + $0x5a0] sm:$0xff]  ;;  %v6912_v6 = vld [vmem:[%s16774_s21 + $0x798] sm:$0xff] }
 0xd8a   : > { %7375 = vmatpush1.msra.mxu1 %v6805_v47  ;;  %7465 = vmatprep.subr.mxu0 %v6868_v34  ;;  %v6848_v47 = vld [vmem:[%s16774_s21 + $0x598] sm:$0xff]  ;;  %v6847_v34 = vld [vmem:[%s16774_s21 + $0x590] sm:$0xff]  ;;  %v6845_v10 = vld [vmem:[%s16774_s21 + $0x580] sm:$0xff] }
 0xd8b   : > { %7376 = vmatprep.subr.mxu1 %v6804_v39  ;;  %7340 = vmatmul.mubr.f32.gmra.mxu0 %v7026_v17  ;;  %v6910_v39 = vld [vmem:[%s16774_s21 + $0x788] sm:$0xff] }
 0xd8c   : > { %7377 = vmatpush1.msra.mxu1 %v6803_v53  ;;  %7466 = vmatpush1.msra.mxu0 %v6867_v60  ;;  %v6846_v17 = vld [vmem:[%s16774_s21 + $0x588] sm:$0xff]  ;;  %v6909_v53 = vld [vmem:[%s16774_s21 + $0x780] sm:$0xff]  ;;  %v6844_v60 = vld [vmem:[%s16774_s21 + $0x578] sm:$0xff] }
 0xd8d   : > { %7345 = vmatprep.mubr.f32.mxu0 %v15874_v22  ;;  %7467 = vmatprep.subr.mxu0 %v6866_v3  ;;  %v6863_v22 = vld [vmem:[%s16774_s21 + $0x610] sm:$0xff]  ;;  %v9394_v13 = vpop.permute.xlu1 %9393 }
 0xd8e   : > { %7378 = vmatprep.subr.mxu1 %v6802_v20  ;;  %7468 = vmatpush1.msra.mxu0 %v6865_v44  ;;  %v9396_v58 = vunpack.i.h.bf16 %v9394_v13  ;;  %v9395_v30 = vunpack.i.l.bf16 %v9394_v13  ;;  %v6907_v3 = vld [vmem:[%s16774_s21 + $0x770] sm:$0xff]  ;;  %v6906_v44 = vld [vmem:[%s16774_s21 + $0x768] sm:$0xff] }
 0xd8f   : > { %7379 = vmatpush1.msra.mxu1 %v6801_v26  ;;  %7469 = vmatprep.subr.mxu0 %v6864_v42  ;;  %v6843_v20 = vld [vmem:[%s16774_s21 + $0x570] sm:$0xff]  ;;  %v6842_v26 = vld [vmem:[%s16774_s21 + $0x568] sm:$0xff]  ;;  %v6905_v42 = vld [vmem:[%s16774_s21 + $0x760] sm:$0xff] }
 0xd90   : > { %7380 = vmatprep.subr.mxu1 %v6800_v27  ;;  %7346 = vmatmul.mubr.f32.gmra.mxu0 %v7027_v28  ;;  %v7142_v51 = vsel %vm6999_vm13, %v9395_v30, %v9396_v58  ;;  %v6841_v27 = vld [vmem:[%s16774_s21 + $0x560] sm:$0xff]  ;;  %v6904_v28 = vld [vmem:[%s16774_s21 + $0x758] sm:$0xff]  ;;  %v6902_v13 = vld [vmem:[%s16774_s21 + $0x748] sm:$0xff] }
 0xd91   : > { %7381 = vmatpush1.msra.mxu1 %v6799_v35  ;;  %7470 = vmatpush1.msra.mxu0 %v6863_v22  ;;  %v6840_v35 = vld [vmem:[%s16774_s21 + $0x558] sm:$0xff]  ;;  %v6903_v22 = vld [vmem:[%s16774_s21 + $0x750] sm:$0xff] }
 0xd92   : > { %7382 = vmatprep.subr.mxu1 %v6798_v11  ;;  %7471 = vmatprep.subr.mxu0 %v6862_v41  ;;  %v6839_v11 = vld [vmem:[%s16774_s21 + $0x550] sm:$0xff]  ;;  %v6838_v41 = vld [vmem:[%s16774_s21 + $0x548] sm:$0xff]  ;;  %v6836_v58 = vld [vmem:[%s16774_s21 + $0x538] sm:$0xff] }
 0xd93   : > { %7383 = vmatpush1.msra.mxu1 %v6797_v56  ;;  %7472 = vmatpush1.msra.mxu0 %v6861_v31  ;;  %v6901_v56 = vld [vmem:[%s16774_s21 + $0x740] sm:$0xff]  ;;  %v6899_v30 = vld [vmem:[%s16774_s21 + $0x730] sm:$0xff] }
 0xd94   : > { %7384 = vmatprep.subr.mxu1 %v6860_v9  ;;  %7473 = vmatprep.subr.mxu0 %v6924_v54  ;;  %v6837_v31 = vld [vmem:[%s16774_s21 + $0x540] sm:$0xff]  ;;  %v9409_v9 = vpop.permute.xlu1 %9408  ;;  %v6900_v54 = vld [vmem:[%s16774_s21 + $0x738] sm:$0xff] }
 0xd95   : > { %7385 = vmatpush2.msra.mxu1 %v6859_v37  ;;  %7474 = vmatpush2.msra.mxu0 %v6923_v4  ;;  %v6835_v37 = vld [vmem:[%s16774_s21 + $0x530] sm:$0xff]  ;;  %v6898_v4 = vld [vmem:[%s16774_s21 + $0x728] sm:$0xff] }
 0xd96   : > { %7386 = vmatprep.subr.mxu1 %v6858_v25  ;;  %7475 = vmatprep.subr.mxu0 %v6922_v33  ;;  %v6834_v25 = vld [vmem:[%s16774_s21 + $0x528] sm:$0xff]  ;;  %v6897_v33 = vld [vmem:[%s16774_s21 + $0x720] sm:$0xff] }
 0xd97   : > { %7387 = vmatpush2.msra.mxu1 %v6857_v43  ;;  %7476 = vmatpush2.msra.mxu0 %v6921_v46  ;;  %v6833_v43 = vld [vmem:[%s16774_s21 + $0x520] sm:$0xff]  ;;  %v6896_v46 = vld [vmem:[%s16774_s21 + $0x718] sm:$0xff] }
 0xd98   : > { %7388 = vmatprep.subr.mxu1 %v6856_v50  ;;  %7477 = vmatprep.subr.mxu0 %v6920_v49  ;;  %v6832_v50 = vld [vmem:[%s16774_s21 + $0x518] sm:$0xff]  ;;  %v6895_v49 = vld [vmem:[%s16774_s21 + $0x710] sm:$0xff] }
 0xd99   : > { %7505 = vmatprep.mubr.f32.mxu0 %v7142_v51  ;;  %7478 = vmatpush2.msra.mxu0 %v6919_v52  ;;  %v6831_v51 = vld [vmem:[%s16774_s21 + $0x510] sm:$0xff]  ;;  %v9351_v52 = vunpack.i.h.bf16 %v15995_v36 }
 0xd9a   : > { %7389 = vmatpush2.msra.mxu1 %v6855_v55  ;;  %7479 = vmatprep.subr.mxu0 %v6918_v61  ;;  %v9350_v55 = vunpack.i.l.bf16 %v15995_v36  ;;  %v9419_v61 = vpop.permute.xlu1 %9418  ;;  %v6829_v36 = vld [vmem:[%s16774_s21 + $0x500] sm:$0xff] }
 0xd9b   : > { %7390 = vmatprep.subr.mxu1 %v6854_v45  ;;  %7480 = vmatpush2.msra.mxu0 %v6917_v7  ;;  %v6894_v45 = vld [vmem:[%s16774_s21 + $0x708] sm:$0xff] }
 0xd9c   : > { %7391 = vmatpush2.msra.mxu1 %v6853_v1  ;;  %7481 = vmatprep.subr.mxu0 %v6916_v2  ;;  %v6830_v7 = vld [vmem:[%s16774_s21 + $0x508] sm:$0xff]  ;;  %v9411_v1 = vunpack.i.h.bf16 %v9409_v9  ;;  %v9410_v2 = vunpack.i.l.bf16 %v9409_v9  ;;  %v6945_v9 = vld [vmem:[%s16774_s21 + $0x8a0] sm:$0xff] }
 0xd9d   : > { %7392 = vmatprep.subr.mxu1 %v6852_v21  ;;  %7482 = vmatpush2.msra.mxu0 %v6915_v0  ;;  %v6893_v21 = vld [vmem:[%s16774_s21 + $0x700] sm:$0xff]  ;;  %v9361_v0 = vunpack.i.h.bf16 %v16013_v12 }
 0xd9e   : > { %7393 = vmatpush2.msra.mxu1 %v6851_v5  ;;  %7483 = vmatprep.subr.mxu0 %v6914_v40  ;;  %v9360_v5 = vunpack.i.l.bf16 %v16013_v12  ;;  %v6956_v40 = vld [vmem:[%s16774_s21 + $0x8f8] sm:$0xff]  ;;  %v9365_v12 = vunpack.i.l.bf16 %v16015_v16 }
 0xd9f   : > { %7394 = vmatprep.subr.mxu1 %v6850_v14  ;;  %7484 = vmatpush2.msra.mxu0 %v6913_v62  ;;  %v9366_v14 = vunpack.i.h.bf16 %v16015_v16  ;;  %v7072_v62 = vsel %vm6999_vm13, %v9350_v55, %v9351_v52  ;;  %v6933_v52 = vld [vmem:[%s16774_s21 + $0x840] sm:$0xff]  ;;  %v6932_v55 = vld [vmem:[%s16774_s21 + $0x838] sm:$0xff] }
 0xda0   : > { %7395 = vmatpush2.msra.mxu1 %v6849_v24  ;;  %7485 = vmatprep.subr.mxu0 %v6912_v6  ;;  %v6955_v24 = vld [vmem:[%s16774_s21 + $0x8f0] sm:$0xff]  ;;  %v9421_v6 = vunpack.i.h.bf16 %v9419_v61  ;;  %v7097_v16 = vsel %vm5529_vm11, %v9360_v5, %v9361_v0  ;;  %v6926_v5 = vld [vmem:[%s16774_s21 + $0x808] sm:$0xff] }
 0xda1   : > { %7396 = vmatprep.subr.mxu1 %v6848_v47  ;;  %7486 = vmatpush2.msra.mxu0 %v6911_v8  ;;  %v9420_v47 = vunpack.i.l.bf16 %v9419_v61  ;;  %v7143_v8 = vsel %vm6999_vm13, %v9410_v2, %v9411_v1  ;;  %v6931_v61 = vld [vmem:[%s16774_s21 + $0x830] sm:$0xff]  ;;  %v6929_v1 = vld [vmem:[%s16774_s21 + $0x820] sm:$0xff]  ;;  %v6928_v2 = vld [vmem:[%s16774_s21 + $0x818] sm:$0xff] }
 0xda2   : > { %7397 = vmatpush2.msra.mxu1 %v6847_v34  ;;  %7487 = vmatprep.subr.mxu0 %v6910_v39  ;;  %v6954_v34 = vld [vmem:[%s16774_s21 + $0x8e8] sm:$0xff]  ;;  %v9376_v39 = vunpack.i.h.bf16 %v16038_v18 }
 0xda3   : > { %7398 = vmatprep.subr.mxu1 %v6846_v17  ;;  %7488 = vmatpush2.msra.mxu0 %v6909_v53  ;;  %v9375_v17 = vunpack.i.l.bf16 %v16038_v18  ;;  %v9429_v53 = vpop.permute.xlu1 %9428  ;;  %v7073_v18 = vsel %vm6999_vm13, %v9365_v12, %v9366_v14 }
 0xda4   : > { %7399 = vmatpush2.msra.mxu1 %v6845_v10  ;;  %7489 = vmatprep.subr.mxu0 %v6908_v38  ;;  %v6952_v10 = vld [vmem:[%s16774_s21 + $0x8d8] sm:$0xff]  ;;  %v9431_v38 = vunpack.i.h.bf16 %v9429_v53 }
 0xda5   : > { %7400 = vmatprep.subr.mxu1 %v6844_v60  ;;  %7490 = vmatpush2.msra.mxu0 %v6907_v3  ;;  %v9430_v60 = vunpack.i.l.bf16 %v9429_v53  ;;  %v7144_v3 = vsel %vm6999_vm13, %v9420_v47, %v9421_v6 }
 0xda6   : > { %7401 = vmatpush2.msra.mxu1 %v6843_v20  ;;  %7491 = vmatprep.subr.mxu0 %v6906_v44  ;;  %v6951_v20 = vld [vmem:[%s16774_s21 + $0x8d0] sm:$0xff]  ;;  %v9386_v44 = vunpack.i.h.bf16 %v16065_v63 }
 0xda7   : > { %7402 = vmatprep.subr.mxu1 %v6842_v26  ;;  %7492 = vmatpush2.msra.mxu0 %v6905_v42  ;;  %v9385_v26 = vunpack.i.l.bf16 %v16065_v63  ;;  %v7098_v42 = vsel %vm5529_vm11, %v9375_v17, %v9376_v39  ;;  %v6948_v63 = vld [vmem:[%s16774_s21 + $0x8b8] sm:$0xff] }
 0xda8   : > { %7403 = vmatpush2.msra.mxu1 %v6841_v27  ;;  %7493 = vmatprep.subr.mxu0 %v6904_v28  ;;  %v9391_v27 = vunpack.i.h.bf16 %v16089_v19  ;;  %v9390_v28 = vunpack.i.l.bf16 %v16089_v19  ;;  %v6947_v19 = vld [vmem:[%s16774_s21 + $0x8b0] sm:$0xff] }
 0xda9   : > { %7404 = vmatprep.subr.mxu1 %v6840_v35  ;;  %7494 = vmatpush2.msra.mxu0 %v6903_v22  ;;  %v6949_v35 = vld [vmem:[%s16774_s21 + $0x8c0] sm:$0xff]  ;;  %v9399_v22 = vpop.permute.xlu0 %9398 }
 0xdaa   : > { %7405 = vmatpush2.msra.mxu1 %v6839_v11  ;;  %7495 = vmatprep.subr.mxu0 %v6902_v13  ;;  %v7145_v11 = vsel %vm6999_vm13, %v9430_v60, %v9431_v38  ;;  %v9401_v13 = vunpack.i.h.bf16 %v9399_v22  ;;  %v7954_v38 = vld [vmem:[%s16779_s26 + $0xf0] sm:$0xff]  ;;  %v7953_v60 = vld [vmem:[%s16779_s26 + $0xe8] sm:$0xff] }
 0xdab   : > { %7406 = vmatprep.subr.mxu1 %v6838_v41  ;;  %7496 = vmatpush2.msra.mxu0 %v6901_v56  ;;  %v9400_v41 = vunpack.i.l.bf16 %v9399_v22  ;;  %v7074_v56 = vsel %vm6999_vm13, %v9385_v26, %v9386_v44  ;;  %v7949_v44 = vld [vmem:[%s16779_s26 + $0xc8] sm:$0xff]  ;;  %v7948_v26 = vld [vmem:[%s16779_s26 + $0xc0] sm:$0xff] }
 0xdac   : > { %7407 = vmatpush2.msra.mxu1 %v6837_v31  ;;  %7497 = vmatprep.subr.mxu0 %v6900_v54  ;;  %v6946_v31 = vld [vmem:[%s16774_s21 + $0x8a8] sm:$0xff]  ;;  %v6944_v54 = vld [vmem:[%s16774_s21 + $0x898] sm:$0xff] }
 0xdad   : > { %7408 = vmatprep.subr.mxu1 %v6836_v58  ;;  %7498 = vmatpush2.msra.mxu0 %v6899_v30  ;;  %v6943_v58 = vld [vmem:[%s16774_s21 + $0x890] sm:$0xff]  ;;  %v7075_v30 = vsel %vm6999_vm13, %v9400_v41, %v9401_v13 }
 0xdae   : > { %7409 = vmatpush2.msra.mxu1 %v6835_v37  ;;  %7499 = vmatprep.subr.mxu0 %v6898_v4  ;;  %v6942_v37 = vld [vmem:[%s16774_s21 + $0x888] sm:$0xff]  ;;  %v6941_v4 = vld [vmem:[%s16774_s21 + $0x880] sm:$0xff] }
 0xdaf   : > { %7410 = vmatprep.subr.mxu1 %v6834_v25  ;;  %7500 = vmatpush2.msra.mxu0 %v6897_v33  ;;  %v6939_v25 = vld [vmem:[%s16774_s21 + $0x870] sm:$0xff]  ;;  %v6938_v33 = vld [vmem:[%s16774_s21 + $0x868] sm:$0xff] }
 0xdb0   : > { %7411 = vmatpush2.msra.mxu1 %v6833_v43  ;;  %7501 = vmatprep.subr.mxu0 %v6896_v46  ;;  %v6937_v43 = vld [vmem:[%s16774_s21 + $0x860] sm:$0xff]  ;;  %v6936_v46 = vld [vmem:[%s16774_s21 + $0x858] sm:$0xff] }
 0xdb1   : > { %7412 = vmatprep.subr.mxu1 %v6832_v50  ;;  %7502 = vmatpush2.msra.mxu0 %v6895_v49  ;;  %v6935_v50 = vld [vmem:[%s16774_s21 + $0x850] sm:$0xff]  ;;  %v6934_v49 = vld [vmem:[%s16774_s21 + $0x848] sm:$0xff] }
 0xdb2   : > { %7413 = vmatpush2.msra.mxu1 %v6831_v51  ;;  %7503 = vmatprep.subr.mxu0 %v6894_v45  ;;  %v9404_v51 = vpop.permute.xlu0 %9403  ;;  %v6930_v45 = vld [vmem:[%s16774_s21 + $0x828] sm:$0xff] }
 0xdb3   : > { %7414 = vmatprep.subr.mxu1 %v6830_v7  ;;  %7504 = vmatpush2.msra.mxu0 %v6893_v21  ;;  %v6927_v21 = vld [vmem:[%s16774_s21 + $0x810] sm:$0xff]  ;;  %v9405_v0 = vunpack.i.l.bf16 %v9404_v51 }
 0xdb4   : > { %7415 = vmatpush2.msra.mxu1 %v6829_v36  ;;  %7506 = vmatmul.mubr.f32.vlgmr.msra.gmra.mxu0 %v15890_v29  ;;  %v6953_v29 = vld [vmem:[%s16774_s21 + $0x8e0] sm:$0xff]  ;;  %v9406_v36 = vunpack.i.h.bf16 %v9404_v51 }
 0xdb5   : > { %7417 = vmatmul.mubr.f32.vlgmr.msra.gmra.mxu1 %v7072_v62  ;;  %7511 = vmatprep.mubr.f32.mxu0 %v7143_v8 }
 0xdb6   : > { %7530 = vmatprep.subr.mxu1 %v6956_v40  ;;  %7422 = vmatprep.mubr.f32.mxu1 %v7097_v16  ;;  %v9414_v7 = vpop.permute.xlu0 %9413  ;;  %v6925_v40 = vld [vmem:[%s16774_s21 + $0x800] sm:$0xff]  ;;  %v7166_v12 = vsel %vm5529_vm11, %v9405_v0, %v9406_v36 }
 0xdb7   : > { %7531 = vmatpush1.msra.mxu1 %v6955_v24  ;;  %v9416_v62 = vunpack.i.h.bf16 %v9414_v7  ;;  %v9415_v24 = vunpack.i.l.bf16 %v9414_v7 }
 0xdb8   : > { %7532 = vmatprep.subr.mxu1 %v6954_v34  ;;  %7512 = vmatmul.mubr.f32.gmra.mxu0 %v15894_v15  ;;  %v6950_v15 = vld [vmem:[%s16774_s21 + $0x8c8] sm:$0xff] }
 0xdb9   : > { %7533 = vmatpush1.msra.mxu1 %v6953_v29  ;;  %7517 = vmatprep.mubr.f32.mxu0 %v7144_v3  ;;  %v7167_v8 = vsel %vm5529_vm11, %v9415_v24, %v9416_v62  ;;  %v6967_v29 = vld [vmem:[%s16778_s25] sm:$0xff]  ;;  %v7951_v3 = vld [vmem:[%s16779_s26 + $0xd8] sm:$0xff] }
 0xdba   : > { %7423 = vmatmul.mubr.f32.gmra.mxu1 %v7073_v18  ;;  %7534 = vmatprep.subr.mxu1 %v6952_v10  ;;  %v9424_v14 = vpop.permute.xlu0 %9423  ;;  %v7955_v10 = vld [vmem:[%s16779_s26 + $0xf8] sm:$0xff]  ;;  %v7952_v18 = vld [vmem:[%s16779_s26 + $0xe0] sm:$0xff] }
 0xdbb   : > { %7428 = vmatprep.mubr.f32.mxu1 %v7098_v42  ;;  %7535 = vmatpush1.msra.mxu1 %v6951_v20  ;;  %v9426_v6 = vunpack.i.h.bf16 %v9424_v14  ;;  %v9425_v47 = vunpack.i.l.bf16 %v9424_v14  ;;  %v7950_v20 = vld [vmem:[%s16779_s26 + $0xd0] sm:$0xff]  ;;  %v7947_v42 = vld [vmem:[%s16779_s26 + $0xb8] sm:$0xff] }
 0xdbc   : > { %7536 = vmatprep.subr.mxu1 %v6950_v15  ;;  %7518 = vmatmul.mubr.f32.gmra.mxu0 %v15903_v23  ;;  %v7099_v23 = vsel %vm5529_vm11, %v9390_v28, %v9391_v27  ;;  %v7946_v15 = vld [vmem:[%s16779_s26 + $0xb0] sm:$0xff]  ;;  %v7945_v27 = vld [vmem:[%s16779_s26 + $0xa8] sm:$0xff] }
 0xdbd   : > { %7537 = vmatpush1.msra.mxu1 %v6949_v35  ;;  %7523 = vmatprep.mubr.f32.mxu0 %v7145_v11  ;;  %v7168_v53 = vsel %vm5529_vm11, %v9425_v47, %v9426_v6 }
 0xdbe   : > { %7429 = vmatmul.mubr.f32.gmra.mxu1 %v7074_v56  ;;  %7538 = vmatprep.subr.mxu1 %v6948_v63  ;;  %v9434_v34 = vpop.permute.xlu0 %9433 }
 0xdbf   : > { %7434 = vmatprep.mubr.f32.mxu1 %v7099_v23  ;;  %7539 = vmatpush1.msra.mxu1 %v6947_v19  ;;  %v9436_v39 = vunpack.i.h.bf16 %v9434_v34  ;;  %v9435_v17 = vunpack.i.l.bf16 %v9434_v34 }
 0xdc0   : > { %7540 = vmatprep.subr.mxu1 %v6946_v31  ;;  %7524 = vmatmul.mubr.f32.gmra.mxu0 %v15910_v48  ;;  %v6940_v48 = vld [vmem:[%s16774_s21 + $0x878] sm:$0xff] }
 0xdc1   : > { %7541 = vmatpush1.msra.mxu1 %v6945_v9  ;;  %v7169_v16 = vsel %vm5529_vm11, %v9435_v17, %v9436_v39  ;;  %9100 = vmatprep.mubr.msk.f32.mxu0 %vm7665_vm14, %v6967_v29  ;;  %v6957_v29 = vld [vmem:[%s16775_s22] sm:$0x3] }
 0xdc2   : > { %7435 = vmatmul.mubr.f32.gmra.mxu1 %v7075_v30  ;;  %7542 = vmatprep.subr.mxu1 %v6944_v54 }
 0xdc3   : > { %7543 = vmatpush1.msra.mxu1 %v6943_v58  ;;  %7594 = vmatprep.mubr.f32.mxu1 %v9502_v59 }
 0xdc4   : > { %7544 = vmatprep.subr.mxu1 %v6942_v37 }
 0xdc5   : > { %7545 = vmatpush1.msra.mxu1 %v6941_v4 }
 0xdc6   : > { %7546 = vmatprep.subr.mxu1 %v6940_v48 }
 0xdc7   : > { %7547 = vmatpush1.msra.mxu1 %v6939_v25 }
 0xdc8   : > { %7548 = vmatprep.subr.mxu1 %v6938_v33 }
 0xdc9   : > { %7549 = vmatpush1.msra.mxu1 %v6937_v43 }
 0xdca   : > { %7550 = vmatprep.subr.mxu1 %v6936_v46 }
 0xdcb   : > { %7551 = vmatpush1.msra.mxu1 %v6935_v50 }
 0xdcc   : > { %7552 = vmatprep.subr.mxu1 %v6934_v49 }
 0xdcd   : > { %7553 = vmatpush1.msra.mxu1 %v6933_v52 }
 0xdce   : > { %7554 = vmatprep.subr.mxu1 %v6932_v55 }
 0xdcf   : > { %7555 = vmatpush1.msra.mxu1 %v6931_v61 }
 0xdd0   : > { %7556 = vmatprep.subr.mxu1 %v6930_v45 }
 0xdd1   : > { %7557 = vmatpush1.msra.mxu1 %v6929_v1 }
 0xdd2   : > { %7558 = vmatprep.subr.mxu1 %v6928_v2 }
 0xdd3   : > { %7559 = vmatpush1.msra.mxu1 %v6927_v21 }
 0xdd4   : > { %7560 = vmatprep.subr.mxu1 %v6926_v5 }
 0xdd5   : > { %7561 = vmatpush1.msra.mxu1 %v6925_v40 }
 0xdd6   : > { %7595 = vmatmul.mubr.f32.vlgmr.msra.gmra.mxu1 %v7166_v12  ;;  %7968 = vmatprep.subr.mxu1 %v7955_v10 }
 0xdd7   : > { %7600 = vmatprep.mubr.f32.mxu1 %v9502_v59  ;;  %7969 = vmatpush1.msra.mxu1 %v7954_v38 }
 0xdd8   : > { %7970 = vmatprep.subr.mxu1 %v7953_v60 }
 0xdd9   : > { %7971 = vmatpush1.msra.mxu1 %v7952_v18 }
 0xdda   : > { %7601 = vmatmul.mubr.f32.gmra.mxu1 %v7167_v8  ;;  %7972 = vmatprep.subr.mxu1 %v7951_v3  ;;  %v7627_v3 = vrot.slane %v6957_v29, %v11074_v57 }
 0xddb   : > { %7606 = vmatprep.mubr.f32.mxu1 %v9502_v59  ;;  %7973 = vmatpush1.msra.mxu1 %v7950_v20 }
 0xddc   : > { %7974 = vmatprep.subr.mxu1 %v7949_v44 }
 0xddd   : > { %7975 = vmatpush1.msra.mxu1 %v7948_v26 }
 0xdde   : > { %7607 = vmatmul.mubr.f32.gmra.mxu1 %v7168_v53  ;;  %7976 = vmatprep.subr.mxu1 %v7947_v42 }
 0xddf   : > { %7612 = vmatprep.mubr.f32.mxu1 %v9502_v59  ;;  %7977 = vmatpush1.msra.mxu1 %v7946_v15 }
 0xde0   : > { %7978 = vmatprep.subr.mxu1 %v7945_v27 }
 0xde2   : > { %7613 = vmatmul.mubr.f32.gmra.mxu1 %v7169_v16 }
 0xde3   : > { %8032 = vmatprep.mubr.f32.mxu1 %v9502_v59 }
 0xe2d   : > { %v7329_v19 = vpop.f32.mrf.mxu0 }
 0xe2e   : > { %v16493_v28 = vpop.f32.mrf.mxu1 }
 0xe2f   : > { %v7331_v41 = vpop.f32.mrf.mxu0  ;;  %v7330_v27 = vadd.f32 %v7329_v19, %v16493_v28 }
 0xe30   : > { %v7242_v35 = vpop.f32.mrf.mxu1 }
 0xe31   : > { %v7332_v14 = vadd.f32 %v7331_v41, %v7242_v35 }
 0xe34   : > { %v7246_v63 = vpop.f32.mrf.mxu1 }
 0xe36   : > { %v7248_v22 = vpop.f32.mrf.mxu1 }
 0xe39   : > { %v7252_v11 = vpop.f32.mrf.mxu1 }
 0xe3b   : > { %v7254_v13 = vpop.f32.mrf.mxu1 }
 0xe3e   : > { %v7258_v56 = vpop.f32.mrf.mxu1 }
 0xe40   : > { %v7260_v23 = vpop.f32.mrf.mxu1 }
 0xe42   : > { %v7335_v31 = vpop.f32.mrf.mxu0 }
 0xe43   : > { %v7336_v60 = vadd.f32 %v7335_v31, %v7246_v63  ;;  %v6958_v63 = vld [vmem:[%s16776_s23] sm:$0x3] }
 0xe44   : > { %v7337_v9 = vpop.f32.mrf.mxu0 }
 0xe45   : > { %v7338_v0 = vadd.f32 %v7337_v9, %v7248_v22 }
 0xe4b   : > { %v7341_v54 = vpop.f32.mrf.mxu0 }
 0xe4c   : > { %v7342_v53 = vadd.f32 %v7341_v54, %v7252_v11 }
 0xe4d   : > { %v7343_v30 = vpop.f32.mrf.mxu0 }
 0xe4e   : > { %v7344_v2 = vadd.f32 %v7343_v30, %v7254_v13 }
 0xe50   : > { %v7347_v4 = vpop.f32.mrf.mxu0 }
 0xe51   : > { %v7348_v47 = vadd.f32 %v7347_v4, %v7258_v56  ;;  %v7623_v4 = vrot.slane %v6957_v29, %v11090_v32  ;;  %v6960_v29 = vld [vmem:[%s16777_s24 + $0x8] sm:$0xff] }
 0xe52   : > { %v7349_v25 = vpop.f32.mrf.mxu0 }
 0xe53   : > { %v7350_v62 = vadd.f32 %v7349_v25, %v7260_v23  ;;  %v7646_v23 = vrot.slane %v6958_v63, %v11074_v57 }
 0xe74   : > { %v7507_v43 = vpop.f32.mrf.mxu0 }
 0xe75   : > { %v7418_v58 = vpop.f32.mrf.mxu1 }
 0xe76   : > { %v7509_v50 = vpop.f32.mrf.mxu0  ;;  %v7419_v31 = vadd.f32 %v7418_v58, %v7330_v27  ;;  %v7642_v58 = vrot.slane %v6958_v63, %v11090_v32  ;;  %v7940_v27 = vld [vmem:[%s16779_s26 + $0x80] sm:$0xff]  ;;  %v7933_v63 = vld [vmem:[%s16779_s26 + $0x48] sm:$0xff] }
 0xe77   : > { %v7420_v37 = vpop.f32.mrf.mxu1 }
 0xe78   : > { %v7513_v51 = vpop.f32.mrf.mxu0  ;;  %v7421_v8 = vadd.f32 %v7420_v37, %v7332_v14  ;;  %v6969_v14 = vld [vmem:[%s16778_s25 + $0x10] sm:$0xff] }
 0xe7a   : > { %v7424_v48 = vpop.f32.mrf.mxu1  ;;  %v7515_v55 = vpop.f32.mrf.mxu0  ;;  %v7510_v26 = vadd.f32 %v7509_v50, %v7421_v8  ;;  %v6971_v8 = vld [vmem:[%s16778_s25 + $0x20] sm:$0xff] }
 0xe7b   : > { %v7425_v35 = vadd.f32 %v7424_v48, %v7336_v60  ;;  %v6963_v60 = vld [vmem:[%s16777_s24 + $0x20] sm:$0xff] }
 0xe7c   : > { %v7426_v33 = vpop.f32.mrf.mxu1  ;;  %v7519_v45 = vpop.f32.mrf.mxu0 }
 0xe7d   : > { %v7427_v24 = vadd.f32 %v7426_v33, %v7338_v0  ;;  %v7514_v28 = vadd.f32 %v7513_v51, %v7425_v35  ;;  %v7939_v35 = vld [vmem:[%s16779_s26 + $0x78] sm:$0xff] }
 0xe7e   : > { %v7430_v46 = vpop.f32.mrf.mxu1  ;;  %v7521_v21 = vpop.f32.mrf.mxu0 }
 0xe7f   : > { %v7516_v10 = vadd.f32 %v7515_v55, %v7427_v24  ;;  %v7431_v44 = vadd.f32 %v7430_v46, %v7342_v53  ;;  %v7508_v46 = vadd.f32 %v7507_v43, %v7419_v31  ;;  %v6974_v53 = vld [vmem:[%s16778_s25 + $0x38] sm:$0xff]  ;;  %v7932_v31 = vld [vmem:[%s16779_s26 + $0x40] sm:$0xff] }
 0xe80   : > { %v7432_v49 = vpop.f32.mrf.mxu1  ;;  %v7525_v12 = vpop.f32.mrf.mxu0 }
 0xe81   : > { %v7433_v5 = vadd.f32 %v7432_v49, %v7344_v2  ;;  %v7520_v54 = vadd.f32 %v7519_v45, %v7431_v44  ;;  %v7944_v44 = vld [vmem:[%s16779_s26 + $0xa0] sm:$0xff] }
 0xe82   : > { %v7436_v52 = vpop.f32.mrf.mxu1  ;;  %v7527_v18 = vpop.f32.mrf.mxu0  ;;  %7979 = vmatpush1.msra.mxu1 %v7944_v44 }
 0xe83   : > { %v7522_v39 = vadd.f32 %v7521_v21, %v7433_v5  ;;  %v7437_v16 = vadd.f32 %v7436_v52, %v7348_v47 }
 0xe84   : > { %v7438_v61 = vpop.f32.mrf.mxu1 }
 0xe85   : > { %v7439_v34 = vadd.f32 %v7438_v61, %v7350_v62  ;;  %v7526_v41 = vadd.f32 %v7525_v12, %v7437_v16  ;;  %v6959_v16 = vld [vmem:[%s16777_s24] sm:$0xff] }
 0xe87   : > { %v7528_v15 = vadd.f32 %v7527_v18, %v7439_v34  ;;  %v6964_v18 = vld [vmem:[%s16777_s24 + $0x28] sm:$0xff] }
 0xe96   : > { %v7596_v7 = vpop.f32.mrf.mxu1 }
 0xe97   : > { %v7597_v61 = vadd.f32 %v7596_v7, %v7508_v46 }
 0xe98   : > { %v7598_v1 = vpop.f32.mrf.mxu1 }
 0xe99   : > { %v7599_v11 = vadd.f32 %v7598_v1, %v7510_v26  ;;  %v7630_v5 = vmul.f32 %v7623_v4, %v7597_v61  ;;  %v7943_v26 = vld [vmem:[%s16779_s26 + $0x98] sm:$0xff] }
 0xe9a   : > { %v7602_v36 = vpop.f32.mrf.mxu1  ;;  %7980 = vmatprep.subr.mxu1 %v7943_v26 }
 0xe9b   : > { %v7631_v19 = vmul.f32 %v7627_v3, %v7599_v11  ;;  %v7603_v50 = vadd.f32 %v7602_v36, %v7514_v28  ;;  %v7649_v12 = vadd.f32 %v7642_v58, %v7630_v5  ;;  %v7937_v11 = vld [vmem:[%s16779_s26 + $0x68] sm:$0xff] }
 0xe9c   : > { %v7604_v40 = vpop.f32.mrf.mxu1  ;;  %v7925_v28 = vld [vmem:[%s16779_s26 + $0x8] sm:$0xff] }
 0xe9d   : > { %v7605_v42 = vadd.f32 %v7604_v40, %v7516_v10  ;;  %v7650_v2 = vadd.f32 %v7646_v23, %v7631_v19  ;;  %v7632_v21 = vmul.f32 %v7623_v4, %v7603_v50  ;;  %v6968_v40 = vld [vmem:[%s16778_s25 + $0x8] sm:$0xff]  ;;  %v7657_v34 = vmax.f32 %v7649_v12, 0.0  ;;  %v6961_v10 = vld [vmem:[%s16777_s24 + $0x10] sm:$0xff]  ;;  %v7924_v19 = vld [vmem:[%s16779_s26] sm:$0xff] }
 0xe9e   : > { %v7608_v6 = vpop.f32.mrf.mxu1  ;;  %v7956_v12 = vld [vmem:[%s16780_s27] sm:$0x3] }
 0xe9f   : > { %v7633_v9 = vmul.f32 %v7627_v3, %v7605_v42  ;;  %v7609_v48 = vadd.f32 %v7608_v6, %v7520_v54  ;;  %v7658_v43 = vmax.f32 %v7650_v2, 0.0  ;;  %v7651_v62 = vadd.f32 %v7642_v58, %v7632_v21  ;;  %v6970_v6 = vld [vmem:[%s16778_s25 + $0x18] sm:$0xff]  ;;  %v7942_v42 = vld [vmem:[%s16779_s26 + $0x90] sm:$0xff]  ;;  %v7929_v54 = vld [vmem:[%s16779_s26 + $0x28] sm:$0xff] }
 0xea0   : > { %v7610_v17 = vpop.f32.mrf.mxu1  ;;  %7981 = vmatpush1.msra.mxu1 %v7942_v42 }
 0xea1   : > { %v7611_v38 = vadd.f32 %v7610_v17, %v7522_v39  ;;  %v7652_v55 = vadd.f32 %v7646_v23, %v7633_v9  ;;  %v7634_v1 = vmul.f32 %v7623_v4, %v7609_v48  ;;  %v7659_v47 = vmax.f32 %v7651_v62, 0.0  ;;  %v6972_v39 = vld [vmem:[%s16778_s25 + $0x28] sm:$0xff]  ;;  %v6973_v17 = vld [vmem:[%s16778_s25 + $0x30] sm:$0xff] }
 0xea2   : > { %v7614_v20 = vpop.f32.mrf.mxu1  ;;  %v7930_v9 = vld [vmem:[%s16779_s26 + $0x30] sm:$0xff] }
 0xea3   : > { %v7635_v13 = vmul.f32 %v7627_v3, %v7611_v38  ;;  %v7615_v30 = vadd.f32 %v7614_v20, %v7526_v41  ;;  %v7660_v51 = vmax.f32 %v7652_v55, 0.0  ;;  %v7653_v36 = vadd.f32 %v7642_v58, %v7634_v1  ;;  %v6962_v38 = vld [vmem:[%s16777_s24 + $0x18] sm:$0xff] }
 0xea4   : > { %v7616_v22 = vpop.f32.mrf.mxu1  ;;  %v6966_v20 = vld [vmem:[%s16777_s24 + $0x38] sm:$0xff] }
 0xea5   : > { %v7617_v56 = vadd.f32 %v7616_v22, %v7528_v15  ;;  %v7654_v33 = vadd.f32 %v7646_v23, %v7635_v13  ;;  %v7636_v49 = vmul.f32 %v7623_v4, %v7615_v30  ;;  %v7661_v24 = vmax.f32 %v7653_v36, 0.0  ;;  %v7941_v15 = vld [vmem:[%s16779_s26 + $0x88] sm:$0xff]  ;;  %v7938_v22 = vld [vmem:[%s16779_s26 + $0x70] sm:$0xff]  ;;  %v7936_v13 = vld [vmem:[%s16779_s26 + $0x60] sm:$0xff] }
 0xea6   : > { %7982 = vmatprep.subr.mxu1 %v7941_v15  ;;  %v7935_v41 = vld [vmem:[%s16779_s26 + $0x58] sm:$0xff]  ;;  %v7928_v30 = vld [vmem:[%s16779_s26 + $0x20] sm:$0xff]  ;;  %v7926_v4 = vld [vmem:[%s16779_s26 + $0x10] sm:$0xff] }
 0xea7   : > { %v7637_v37 = vmul.f32 %v7627_v3, %v7617_v56  ;;  %v7662_v45 = vmax.f32 %v7654_v33, 0.0  ;;  %v7655_v0 = vadd.f32 %v7642_v58, %v7636_v49  ;;  %v6965_v3 = vld [vmem:[%s16777_s24 + $0x30] sm:$0xff]  ;;  %7983 = vmatpush1.msra.mxu1 %v7940_v27 }
 0xea8   : > { %7984 = vmatprep.subr.mxu1 %v7939_v35  ;;  %v7934_v56 = vld [vmem:[%s16779_s26 + $0x50] sm:$0xff] }
 0xea9   : > { %v7656_v25 = vadd.f32 %v7646_v23, %v7637_v37  ;;  %v7663_v7 = vmax.f32 %v7655_v0, 0.0  ;;  %7985 = vmatpush1.msra.mxu1 %v7938_v22  ;;  %v7931_v23 = vld [vmem:[%s16779_s26 + $0x38] sm:$0xff] }
 0xeaa   : > { %7986 = vmatprep.subr.mxu1 %v7937_v11  ;;  %v7927_v37 = vld [vmem:[%s16779_s26 + $0x18] sm:$0xff] }
 0xeab   : > { %v7664_v52 = vmax.f32 %v7656_v25, 0.0  ;;  %7987 = vmatpush1.msra.mxu1 %v7936_v13 }
 0xeac   : > { %7988 = vmatprep.subr.mxu1 %v7935_v41 }
 0xead   : > { %9092 = vmatprep.subr.mxu0 %v7664_v52  ;;  %7989 = vmatpush1.msra.mxu1 %v7934_v56 }
 0xeae   : > { %9093 = vmatpush3.msra.mxu0 %v7664_v52  ;;  %7990 = vmatprep.subr.mxu1 %v7933_v63 }
 0xeaf   : > { %9094 = vmatprep.subr.mxu0 %v7662_v45  ;;  %7991 = vmatpush1.msra.mxu1 %v7932_v31 }
 0xeb0   : > { %9095 = vmatpush3.msra.mxu0 %v7662_v45  ;;  %7992 = vmatprep.subr.mxu1 %v7931_v23 }
 0xeb1   : > { %9096 = vmatprep.subr.mxu0 %v7660_v51  ;;  %7993 = vmatpush1.msra.mxu1 %v7930_v9 }
 0xeb2   : > { %9097 = vmatpush3.msra.mxu0 %v7660_v51  ;;  %7994 = vmatprep.subr.mxu1 %v7929_v54 }
 0xeb3   : > { %9098 = vmatprep.subr.mxu0 %v7658_v43  ;;  %7995 = vmatpush1.msra.mxu1 %v7928_v30 }
 0xeb4   : > { %9099 = vmatpush3.msra.mxu0 %v7658_v43  ;;  %7996 = vmatprep.subr.mxu1 %v7927_v37 }
 0xeb5   : > { %9101 = vmatmul.mubr.msk.f32.vlgmr.msra.gmra.mxu0 %vm7665_vm14, %v6968_v40  ;;  %9112 = vmatprep.subr.mxu0 %v7663_v7 }
 0xeb6   : > { %9113 = vmatpush3.msra.mxu0 %v7663_v7  ;;  %9103 = vmatprep.mubr.msk.f32.mxu0 %vm7665_vm14, %v6969_v14 }
 0xeb7   : > { %9114 = vmatprep.subr.mxu0 %v7661_v24  ;;  %7997 = vmatpush1.msra.mxu1 %v7926_v4 }
 0xeb8   : > { %9115 = vmatpush3.msra.mxu0 %v7661_v24  ;;  %7998 = vmatprep.subr.mxu1 %v7925_v28 }
 0xeb9   : > { %9104 = vmatmul.mubr.msk.f32.gmra.mxu0 %vm7665_vm14, %v6970_v6  ;;  %9116 = vmatprep.subr.mxu0 %v7659_v47  ;;  %v7961_v6 = vrot.slane %v7956_v12, %v11090_v32 }
 0xeba   : > { %9117 = vmatpush3.msra.mxu0 %v7659_v47  ;;  %9106 = vmatprep.mubr.msk.f32.mxu0 %vm7665_vm14, %v6971_v8  ;;  %v7965_v47 = vrot.slane %v7956_v12, %v11074_v57 }
 0xebb   : > { %9118 = vmatprep.subr.mxu0 %v7657_v34  ;;  %7999 = vmatpush1.msra.mxu1 %v7924_v19 }
 0xebc   : > { %9119 = vmatpush3.msra.mxu0 %v7657_v34 }
 0xebd   : > { %9107 = vmatmul.mubr.msk.f32.gmra.mxu0 %vm7665_vm14, %v6972_v39 }
 0xebe   : > { %9109 = vmatprep.mubr.msk.f32.mxu0 %vm7665_vm14, %v6973_v17 }
 0xec1   : > { %9110 = vmatmul.mubr.msk.f32.gmra.mxu0 %vm7665_vm14, %v6974_v53 }
 0xec2   : > { %9120 = vmatprep.mubr.msk.f32.mxu0 %vm7665_vm14, %v6959_v16 }
 0xec5   : > { %9121 = vmatmul.mubr.msk.f32.vlgmr.msra.gmra.mxu0 %vm7665_vm14, %v6960_v29 }
 0xec6   : > { %9123 = vmatprep.mubr.msk.f32.mxu0 %vm7665_vm14, %v6961_v10 }
 0xec9   : > { %9124 = vmatmul.mubr.msk.f32.gmra.mxu0 %vm7665_vm14, %v6962_v38 }
 0xeca   : > { %9126 = vmatprep.mubr.msk.f32.mxu0 %vm7665_vm14, %v6963_v60 }
 0xecd   : > { %9127 = vmatmul.mubr.msk.f32.gmra.mxu0 %vm7665_vm14, %v6964_v18 }
 0xece   : > { %9129 = vmatprep.mubr.msk.f32.mxu0 %vm7665_vm14, %v6965_v3 }
 0xed1   : > { %9130 = vmatmul.mubr.msk.f32.gmra.mxu0 %vm7665_vm14, %v6966_v20 }
 0xf75   : > { %v9102_v48 = vpop.f32.mrf.mxu0 }
 0xf77   : > { %v7756_v25 = vpop.f32.mrf.mxu0 }
 0xf79   : > { %v9105_v33 = vpop.f32.mrf.mxu0 }
 0xf7b   : > { %v7766_v46 = vpop.f32.mrf.mxu0 }
 0xf7d   : > { %v9108_v50 = vpop.f32.mrf.mxu0 }
 0xf7f   : > { %v7776_v49 = vpop.f32.mrf.mxu0 }
 0xf81   : > { %v9111_v52 = vpop.f32.mrf.mxu0 }
 0xf83   : > { %v7786_v55 = vpop.f32.mrf.mxu0 }
 0xf85   : > { %v9122_v58 = vpop.f32.mrf.mxu0 }
 0xf86   : > { %v7891_v2 = vadd.f32 %v9122_v58, %v9102_v48 }
 0xf87   : > { %v7885_v61 = vpop.f32.mrf.mxu0 }
 0xf88   : > { %v7886_v1 = vadd.f32 %v7885_v61, %v7756_v25 }
 0xf89   : > { %v9125_v45 = vpop.f32.mrf.mxu0 }
 0xf8a   : > { %8033 = vmatmul.mubr.f32.vlgmr.msra.gmra.mxu1 %v7886_v1  ;;  %v7901_v5 = vadd.f32 %v9125_v45, %v9105_v33 }
 0xf8b   : > { %8038 = vmatprep.mubr.f32.mxu1 %v9502_v59  ;;  %v7895_v21 = vpop.f32.mrf.mxu0 }
 0xf8c   : > { %v7896_v51 = vadd.f32 %v7895_v21, %v7766_v46 }
 0xf8d   : > { %v9128_v0 = vpop.f32.mrf.mxu0 }
 0xf8e   : > { %8039 = vmatmul.mubr.f32.gmra.mxu1 %v7891_v2  ;;  %v7911_v7 = vadd.f32 %v9128_v0, %v9108_v50 }
 0xf8f   : > { %8044 = vmatprep.mubr.f32.mxu1 %v9502_v59  ;;  %v7905_v43 = vpop.f32.mrf.mxu0 }
 0xf90   : > { %v7906_v36 = vadd.f32 %v7905_v43, %v7776_v49 }
 0xf91   : > { %v9131_v40 = vpop.f32.mrf.mxu0 }
 0xf92   : > { %8045 = vmatmul.mubr.f32.gmra.mxu1 %v7896_v51  ;;  %v7921_v24 = vadd.f32 %v9131_v40, %v9111_v52 }
 0xf93   : > { %8050 = vmatprep.mubr.f32.mxu1 %v9502_v59  ;;  %v7915_v14 = vpop.f32.mrf.mxu0 }
 0xf94   : > { %v7916_v62 = vadd.f32 %v7915_v14, %v7786_v55 }
 0xf96   : > { %8051 = vmatmul.mubr.f32.gmra.mxu1 %v7901_v5 }
 0xf97   : > { %8056 = vmatprep.mubr.f32.mxu1 %v9502_v59 }
 0xf9a   : > { %8057 = vmatmul.mubr.f32.gmra.mxu1 %v7906_v36 }
 0xf9b   : > { %8062 = vmatprep.mubr.f32.mxu1 %v9502_v59 }
 0xf9e   : > { %8063 = vmatmul.mubr.f32.gmra.mxu1 %v7911_v7 }
 0xf9f   : > { %8068 = vmatprep.mubr.f32.mxu1 %v9502_v59 }
 0xfa2   : > { %8069 = vmatmul.mubr.f32.gmra.mxu1 %v7916_v62 }
 0xfa3   : > { %8074 = vmatprep.mubr.f32.mxu1 %v9502_v59 }
 0xfa6   : > { %8075 = vmatmul.mubr.f32.gmra.mxu1 %v7921_v24 }
0x104a   : > { %v8034_v8 = vpop.f32.mrf.mxu1 }
0x104b   : > { %v8035_v34 = vadd.f32 %v8034_v8, %v7961_v6 }
0x104c   : > { %v8036_v39 = vpop.f32.mrf.mxu1 }
0x104d   : > { %8081 = vst.msk [vmem:[%s16644_s4] sm:$0xff] %vm1287_vm0, %v8035_v34  ;;  %v8037_v59 = vadd.f32 %v8036_v39, %v7965_v47  ;;  %8097 = vrot.lane.b32.xlu1 %v8035_v34, %s16835_s0 }
0x104e   : > { %v8040_v17 = vpop.f32.mrf.mxu1 }
0x104f   : > { %8275 = vst.msk [vmem:[%s16644_s4 + $0x80] sm:$0xff] %vm1287_vm0, %v8037_v59  ;;  %v8041_v57 = vadd.f32 %v8040_v17, %v7961_v6 }
0x1050   : > { %v8042_v32 = vpop.f32.mrf.mxu1 }
0x1051   : > { %8082 = vst.msk [vmem:[%s16644_s4 + $0x8] sm:$0xff] %vm1287_vm0, %v8041_v57  ;;  %v8043_v53 = vadd.f32 %v8042_v32, %v7965_v47  ;;  %8099 = vrot.lane.b32.xlu0 %v8041_v57, %s16835_s0 }
0x1052   : > { %v8046_v16 = vpop.f32.mrf.mxu1 }
0x1053   : > { %8276 = vst.msk [vmem:[%s16644_s4 + $0x88] sm:$0xff] %vm1287_vm0, %v8043_v53  ;;  %v8047_v29 = vadd.f32 %v8046_v16, %v7961_v6 }
0x1054   : > { %v8048_v10 = vpop.f32.mrf.mxu1 }
0x1055   : > { %8083 = vst.msk [vmem:[%s16644_s4 + $0x10] sm:$0xff] %vm1287_vm0, %v8047_v29  ;;  %v8049_v38 = vadd.f32 %v8048_v10, %v7965_v47  ;;  %8101 = vrot.lane.b32.xlu1 %v8047_v29, %s16835_s0 }
0x1056   : > { %v8052_v60 = vpop.f32.mrf.mxu1 }
0x1057   : > { %8277 = vst.msk [vmem:[%s16644_s4 + $0x90] sm:$0xff] %vm1287_vm0, %v8049_v38  ;;  %v8053_v18 = vadd.f32 %v8052_v60, %v7961_v6 }
0x1058   : > { %v8054_v3 = vpop.f32.mrf.mxu1 }
0x1059   : > { %8084 = vst.msk [vmem:[%s16644_s4 + $0x18] sm:$0xff] %vm1287_vm0, %v8053_v18  ;;  %v8055_v20 = vadd.f32 %v8054_v3, %v7965_v47  ;;  %8103 = vrot.lane.b32.xlu0 %v8053_v18, %s16835_s0 }
0x105a   : > { %v8058_v44 = vpop.f32.mrf.mxu1 }
0x105b   : > { %8278 = vst.msk [vmem:[%s16644_s4 + $0x98] sm:$0xff] %vm1287_vm0, %v8055_v20  ;;  %v8059_v26 = vadd.f32 %v8058_v44, %v7961_v6 }
0x105c   : > { %v8060_v42 = vpop.f32.mrf.mxu1 }
0x105d   : > { %8085 = vst.msk [vmem:[%s16644_s4 + $0x20] sm:$0xff] %vm1287_vm0, %v8059_v26  ;;  %v8061_v15 = vadd.f32 %v8060_v42, %v7965_v47  ;;  %8105 = vrot.lane.b32.xlu1 %v8059_v26, %s16835_s0 }
0x105e   : > { %v8064_v27 = vpop.f32.mrf.mxu1 }
0x105f   : > { %8279 = vst.msk [vmem:[%s16644_s4 + $0xa0] sm:$0xff] %vm1287_vm0, %v8061_v15  ;;  %v8065_v35 = vadd.f32 %v8064_v27, %v7961_v6 }
0x1060   : > { %v8066_v22 = vpop.f32.mrf.mxu1 }
0x1061   : > { %8086 = vst.msk [vmem:[%s16644_s4 + $0x28] sm:$0xff] %vm1287_vm0, %v8065_v35  ;;  %v8067_v11 = vadd.f32 %v8066_v22, %v7965_v47  ;;  %8107 = vrot.lane.b32.xlu0 %v8065_v35, %s16835_s0 }
0x1062   : > { %v8070_v13 = vpop.f32.mrf.mxu1 }
0x1063   : > { %8280 = vst.msk [vmem:[%s16644_s4 + $0xa8] sm:$0xff] %vm1287_vm0, %v8067_v11  ;;  %v8071_v41 = vadd.f32 %v8070_v13, %v7961_v6 }
0x1064   : > { %v8072_v56 = vpop.f32.mrf.mxu1 }
0x1065   : > { %8087 = vst.msk [vmem:[%s16644_s4 + $0x30] sm:$0xff] %vm1287_vm0, %v8071_v41  ;;  %v8073_v63 = vadd.f32 %v8072_v56, %v7965_v47  ;;  %8109 = vrot.lane.b32.xlu1 %v8071_v41, %s16835_s0 }
0x1066   : > { %v8076_v31 = vpop.f32.mrf.mxu1 }
0x1067   : > { %8281 = vst.msk [vmem:[%s16644_s4 + $0xb0] sm:$0xff] %vm1287_vm0, %v8073_v63  ;;  %v8077_v23 = vadd.f32 %v8076_v31, %v7961_v6 }
0x1068   : > { %v8078_v9 = vpop.f32.mrf.mxu1 }
0x1069   : > { %8088 = vst.msk [vmem:[%s16644_s4 + $0x38] sm:$0xff] %vm1287_vm0, %v8077_v23  ;;  %v8079_v54 = vadd.f32 %v8078_v9, %v7965_v47  ;;  %8111 = vrot.lane.b32.xlu0 %v8077_v23, %s16835_s0  ;;  %s9133_s0 = smul.u32 3072, %s9677_s3  ;;  %s9439_s3 = scalar_lea.vmem %s16707_s30, 3072 }
0x106a   : > { %p9440_p11 = scmp.ne.s32.totalorder %s16707_s30, %s9439_s3 }
0x106b   : > { %8282 = vst.msk [vmem:[%s16644_s4 + $0xb8] sm:$0xff] %vm1287_vm0, %v8079_v54  ;;  %s16705_s29 = scalar_lea.hbm %s16844_s2, %s9133_s0  ;;  %s9445_s0 = scalar_lea.vmem %s9444_s9, 6144 }
0x106c   : > { %p9441_p12 = pnand %p9440_p11, %p9694_p5  ;;  %p9447_p1 = scmp.lt.s32.totalorder %s9445_s0, %s9439_s3 }
0x106e   : > { %p9442_p13 = pneg %p9441_p12  ;;  %p9448_p2 = por %p9447_p1, %p9446_p0 }
0x1070   : > { %p9449_p3 = pnand %p9448_p2, %p9442_p13 }
0x10bf   : > { %v8098_v30 = vpop.permute.xlu1 %8097 }
0x10c0   : > { %8267 = vst.msk [vmem:[%s16644_s4 + $0x40] sm:$0xff] %vm1287_vm0, %v8098_v30 }
0x10c3   : > { %v8100_v37 = vpop.permute.xlu0 %8099 }
0x10c4   : > { %8268 = vst.msk [vmem:[%s16644_s4 + $0x48] sm:$0xff] %vm1287_vm0, %v8100_v37 }
0x10c7   : > { %v8102_v4 = vpop.permute.xlu1 %8101 }
0x10c8   : > { %8269 = vst.msk [vmem:[%s16644_s4 + $0x50] sm:$0xff] %vm1287_vm0, %v8102_v4 }
0x10cb   : > { %v8104_v28 = vpop.permute.xlu0 %8103 }
0x10cc   : > { %8270 = vst.msk [vmem:[%s16644_s4 + $0x58] sm:$0xff] %vm1287_vm0, %v8104_v28 }
0x10cf   : > { %v8106_v19 = vpop.permute.xlu1 %8105 }
0x10d0   : > { %8271 = vst.msk [vmem:[%s16644_s4 + $0x60] sm:$0xff] %vm1287_vm0, %v8106_v19 }
0x10d3   : > { %v8108_v48 = vpop.permute.xlu0 %8107 }
0x10d4   : > { %8272 = vst.msk [vmem:[%s16644_s4 + $0x68] sm:$0xff] %vm1287_vm0, %v8108_v48 }
0x10d7   : > { %v8110_v25 = vpop.permute.xlu1 %8109 }
0x10d8   : > { %8273 = vst.msk [vmem:[%s16644_s4 + $0x70] sm:$0xff] %vm1287_vm0, %v8110_v25 }
0x10db   : > { %v8112_v33 = vpop.permute.xlu0 %8111 }
0x10dc   : > { %8274 = vst.msk [vmem:[%s16644_s4 + $0x78] sm:$0xff] %vm1287_vm0, %v8112_v33 }
0x10dd   : > { %9452 = shalt.err (!%p9449_p3)
}
0x10de   : > { %s9453_s7 = scalar_lea.hbm %s16705_s29, 3072  ;;  %s9457_s6 = scalar_lea.hbm %s16844_s2, 6144 }
0x10df   : > { %p9454_p4 = scmp.ne.s32.totalorder %s16705_s29, %s9453_s7  ;;  %p9458_p9 = scmp.lt.s32.totalorder %s16705_s29, %s16844_s2 }
0x10e0   : > { %p9459_p10 = scmp.lt.s32.totalorder %s9457_s6, %s9453_s7 }
0x10e1   : > { %p9455_p7 = pnand %p9454_p4, %p9694_p5 }
0x10e2   : > { %p9460_p11 = por %p9459_p10, %p9458_p9 }
0x10e3   : > { %p9456_p8 = pneg %p9455_p7 }
0x10e5   : > { %p9461_p12 = pnand %p9460_p11, %p9456_p8 }
0x10e7   : > { %9464 = shalt.err (!%p9461_p12)
}
0x10e8   : > { %s9509_s3 = smov 128   ;;  %s9510_s9 = smov 8  }
0x10e9   : > { %9134 = dma.vmem_to_hbm [thread:$0]  (%p9694_p5), %s16707_s30, 3072, %s16705_s29, %s16713_s8, %s9509_s3, %s9509_s3, %s9510_s9  }
0x10ea PF: > { %s16845_s0 = sld [smem:[#allocation7_spill]] }
0x10eb   : > { %s16846_s4 = sld [smem:[#allocation5_spill]] }
0x10f0   : > { %p9140_p13 = scmp.ge.s32.totalorder %s16845_s0, 2 }
0x10f1   : > { %s8168_s12 = sand.u32 1, %s16846_s4  }
0x10f2   : > { %p9137_p0 = pnand %p9140_p13, %p9698_p6  ;;  %s8169_s10 = scalar_lea.sflag [#allocation3], %s8168_s12 }
0x10f4   : > { %p9138_p1 = pneg %p9137_p0 }
0x10f6   : > { %9482 = dma.done.wait (%p9138_p1), %s8169_s10, 3072  }
0x10f7   : > { %9484 = vsyncadd (%p9138_p1), %s8169_s10, 4294964224  ;;  %s16848_s30 = sld [smem:[#allocation8_spill]]  ;;  %s16851_s8 = smov %s9491_s5 }
0x10f8   : > { %s16849_s7 = sld [smem:[#allocation6_spill]] }
0x10f9   : > { %s16850_s9 = sld [smem:[#allocation9_spill]] }
0x10fd   : > { %p38_p2 = scmp.ge.s32.totalorder %s16848_s30, 4  }
0x10fe   : > { %s16852_s5 = smov %s16849_s7 }
0x10ff   :  { %40 = sbr.rel (!%p38_p2) target bundleno = 18 (0x12), region = 169 }
0x1104   :  { %8174 = vsyncpa [#allocation3], 1 }
0x1105   :  { %8176 = vsyncpa [#allocation3 + $0x1], 1 }

</bundles_post_ra>
